<compile_context>
chip_gen: v7x
topology: tpu7x:2x2x1
jax: 0.10.0
libtpu: 0.0.40
codegen_flags: <defaults>
</compile_context>

<pallas_src>
import jax
import jax.numpy as jnp
from jax.experimental import pallas as pl
from jax.experimental.pallas import tpu as pltpu

KSIZE = 7
PAD = KSIZE // 2


def sae_kernel(w_ref, x_ref, o_ref, avg_pad_ref, max_pad_ref):
    """One batch-tile of CBAM spatial attention.

    w_ref       : SMEM (2*K*K,) f32 conv weights; avg-channel taps pre-scaled by 1/C.
    x_ref       : VMEM (Bt, C, H, W) unpadded input tile (f32 or bf16).
    o_ref       : VMEM (Bt, 1, H*W) lane-dense output tile.
    avg_pad_ref : VMEM (Bt, H+2*PAD, W+2*PAD) scratch: zero-padded channel-sum map.
    max_pad_ref : VMEM (Bt, H+2*PAD, W+2*PAD) scratch: zero-padded channel-max map.
    """
    Bt, C, H, W = x_ref.shape

    # --- channel reduction (mean's 1/C is folded into the weights -> plain sum) ---
    x = x_ref[...]
    if x.dtype != jnp.float32:
        x = x.astype(jnp.float32)                 # bf16 inputs accumulate in f32
    ch_sum = jnp.sum(x, axis=1)                   # (Bt, H, W)
    ch_max = jnp.max(x, axis=1)                   # (Bt, H, W)

    # --- zero-padded reduced maps live only in VMEM scratch (no HBM padding).
    # Zero every grid step: scratch persists across steps / per-core, so we never
    # rely on "step 0" initialization under a parallel (megacore) grid.
    avg_pad_ref[...] = jnp.zeros_like(avg_pad_ref)
    max_pad_ref[...] = jnp.zeros_like(max_pad_ref)
    avg_pad_ref[:, PAD:PAD + H, PAD:PAD + W] = ch_sum
    max_pad_ref[:, PAD:PAD + H, PAD:PAD + W] = ch_max
    avg_p = avg_pad_ref[...]                      # (Bt, Hp, Wp)
    max_p = max_pad_ref[...]

    # --- hoist all 98 scalar weight loads out of the MAC chain ---
    w_avg = [[w_ref[kh * KSIZE + kw] for kw in range(KSIZE)] for kh in range(KSIZE)]
    w_max = [[w_ref[KSIZE * KSIZE + kh * KSIZE + kw] for kw in range(KSIZE)]
             for kh in range(KSIZE)]

    # --- 7x7 conv (cross-correlation, matches nn.Conv2d): kw-outer so each lane
    # shift is reused across all 7 kh taps; 4 accumulators for VPU ILP, first-use
    # initialized so there is no zeros + add prologue. ---
    acc = [None, None, None, None]
    for kw in range(KSIZE):
        a_kw = avg_p[:, :, kw:kw + W]             # (Bt, Hp, W) -- hoisted lane shift
        m_kw = max_p[:, :, kw:kw + W]
        for kh in range(KSIZE):
            sel = kh & 1
            ta = w_avg[kh][kw] * a_kw[:, kh:kh + H, :]
            tm = w_max[kh][kw] * m_kw[:, kh:kh + H, :]
            acc[sel] = ta if acc[sel] is None else acc[sel] + ta
            acc[2 + sel] = tm if acc[2 + sel] is None else acc[2 + sel] + tm

    y = (acc[0] + acc[1]) + (acc[2] + acc[3])     # (Bt, H, W)
    sig = jax.nn.sigmoid(y).astype(o_ref.dtype)   # sigmoid -> EUP slot

    # --- lane-dense store: pack the H rows of each image into one (1, H*W) slab
    # so the output block's last dim is a multiple of 128 (dense writeback DMA). ---
    for r in range(H):
        o_ref[:, :, r * W:(r + 1) * W] = sig[:, r:r + 1, :]


def _batch_tile(B):
    for t in (8, 4, 2):
        if B % t == 0:
            return t
    return 1


def spatial_attention_extractor(x, weight):
    """x: (B, C, H, W) float32/bfloat16; weight: (1, 2, 7, 7) -> (B, 1, H, W)."""
    B, C, H, W = x.shape
    Hp, Wp = H + 2 * PAD, W + 2 * PAD
    Bt = _batch_tile(B)

    # Fold the channel-mean's 1/C into the avg-channel taps; weights go to SMEM.
    w = weight.astype(jnp.float32).reshape(2, KSIZE * KSIZE)
    w = w * jnp.array([[1.0 / C], [1.0]], dtype=jnp.float32)
    w_flat = w.reshape(-1)                        # (98,): [avg taps | max taps]

    # NOTE: for very large C/H/W (v7x has only 64 MiB VMEM/TC) add a channel-tile
    # grid axis ("arbitrary", last) with running sum/max scratch and set
    # vmem_limit_bytes explicitly; unnecessary at these sizes.
    out_flat = pl.pallas_call(
        sae_kernel,
        out_shape=jax.ShapeDtypeStruct((B, 1, H * W), x.dtype),
        grid=(B // Bt,),
        in_specs=[
            pl.BlockSpec(memory_space=pltpu.MemorySpace.SMEM),     # conv weights
            pl.BlockSpec((Bt, C, H, W), lambda b: (b, 0, 0, 0)),   # unpadded input
        ],
        out_specs=pl.BlockSpec((Bt, 1, H * W), lambda b: (b, 0, 0)),
        scratch_shapes=[
            pltpu.VMEM((Bt, Hp, Wp), jnp.float32),   # padded channel-sum map
            pltpu.VMEM((Bt, Hp, Wp), jnp.float32),   # padded channel-max map
        ],
        compiler_params=pltpu.CompilerParams(
            dimension_semantics=("parallel",)),      # batch axis -> both TCs on v7x
    )(w_flat, x)

    # (B, 1, H*W) and (B, 1, H, W) share the same contiguous layout: free reshape.
    return out_flat.reshape(B, 1, H, W)


def reference(x, weight):
    avg = jnp.mean(x, axis=1, keepdims=True)
    mx = jnp.max(x, axis=1, keepdims=True)
    cat = jnp.concatenate([avg, mx], axis=1)
    y = jax.lax.conv_general_dilated(
        cat, weight, window_strides=(1, 1),
        padding=((PAD, PAD), (PAD, PAD)),
        dimension_numbers=("NCHW", "OIHW", "NCHW"))
    return jax.nn.sigmoid(y)


if __name__ == "__main__":
    key = jax.random.PRNGKey(0)
    kx, kw = jax.random.split(key)

    B, C, H, W = 2, 4, 16, 16
    x = jax.random.normal(kx, (B, C, H, W), dtype=jnp.float32)
    # Deterministic synthetic conv weight, matches nn.Conv2d(2, 1, 7, bias=False)
    weight = jax.random.normal(kw, (1, 2, KSIZE, KSIZE), dtype=jnp.float32) * 0.1

    out = spatial_attention_extractor(x, weight)
    out = jax.block_until_ready(out)

    ref = reference(x, weight)
    assert out.shape == (B, 1, H, W), out.shape
    assert jnp.allclose(out, ref, atol=1e-5, rtol=1e-5), \
        f"max abs err {jnp.max(jnp.abs(out - ref))}"

    print("KERNEL_OK")
</pallas_src>

<mosaic_0001>
module attributes {stable_mosaic.version = 11 : i64} {
  func.func @sae_kernel(%arg0: i32, %arg1: memref<98xf32, #tpu.memory_space<smem>>, %arg2: memref<2x4x16x16xf32, #tpu.memory_space<vmem>>, %arg3: memref<2x1x256xf32, #tpu.memory_space<vmem>>, %arg4: memref<2x22x22xf32, #tpu.memory_space<vmem>>, %arg5: memref<2x22x22xf32, #tpu.memory_space<vmem>>) attributes {dimension_semantics = [#tpu.dimension_semantics<parallel>], iteration_bounds = array<i64: 1>, scalar_prefetch = 0 : i64, scratch_operands = 2 : i64, tpu.core_type = #tpu.core_type<tc>, window_params = [{transform_indices = @transform_0, window_bounds = array<i64: 98>}, {transform_indices = @transform_1, window_bounds = array<i64: 2, 4, 16, 16>}, {transform_indices = @transform_2, window_bounds = array<i64: 2, 1, 256>}]} {
    %c0 = arith.constant 0 : index
    %c0_0 = arith.constant 0 : index
    %c0_1 = arith.constant 0 : index
    %c0_2 = arith.constant 0 : index
    %0 = vector.load %arg2[%c0, %c0_0, %c0_1, %c0_2] : memref<2x4x16x16xf32, #tpu.memory_space<vmem>>, vector<2x4x16x16xf32>
    %cst = arith.constant dense<0.000000e+00> : vector<2x16x16xf32>
    %1 = vector.multi_reduction <add>, %0, %cst [1] : vector<2x4x16x16xf32> to vector<2x16x16xf32>
    %cst_3 = arith.constant dense<0xFF800000> : vector<2x16x16xf32>
    %2 = vector.multi_reduction <maximumf>, %0, %cst_3 [1] : vector<2x4x16x16xf32> to vector<2x16x16xf32>
    %cst_4 = arith.constant 0.000000e+00 : f32
    %3 = vector.broadcast %cst_4 : f32 to vector<2x22x22xf32>
    %c0_5 = arith.constant 0 : index
    %c0_6 = arith.constant 0 : index
    %c0_7 = arith.constant 0 : index
    %4 = vector.load %arg4[%c0_5, %c0_6, %c0_7] : memref<2x22x22xf32, #tpu.memory_space<vmem>>, vector<2x22x22xf32>
    tpu.vector_store %arg4[%c0_5, %c0_6, %c0_7], %3 {strides = array<i32>} : memref<2x22x22xf32, #tpu.memory_space<vmem>>, vector<2x22x22xf32>,
    %cst_8 = arith.constant 0.000000e+00 : f32
    %5 = vector.broadcast %cst_8 : f32 to vector<2x22x22xf32>
    %c0_9 = arith.constant 0 : index
    %c0_10 = arith.constant 0 : index
    %c0_11 = arith.constant 0 : index
    %6 = vector.load %arg5[%c0_9, %c0_10, %c0_11] : memref<2x22x22xf32, #tpu.memory_space<vmem>>, vector<2x22x22xf32>
    tpu.vector_store %arg5[%c0_9, %c0_10, %c0_11], %5 {strides = array<i32>} : memref<2x22x22xf32, #tpu.memory_space<vmem>>, vector<2x22x22xf32>,
    %c0_12 = arith.constant 0 : index
    %c3 = arith.constant 3 : index
    %c3_13 = arith.constant 3 : index
    %7 = vector.load %arg4[%c0_12, %c3, %c3_13] : memref<2x22x22xf32, #tpu.memory_space<vmem>>, vector<2x16x16xf32>
    tpu.vector_store %arg4[%c0_12, %c3, %c3_13], %1 {strides = array<i32>} : memref<2x22x22xf32, #tpu.memory_space<vmem>>, vector<2x16x16xf32>,
    %c0_14 = arith.constant 0 : index
    %c3_15 = arith.constant 3 : index
    %c3_16 = arith.constant 3 : index
    %8 = vector.load %arg5[%c0_14, %c3_15, %c3_16] : memref<2x22x22xf32, #tpu.memory_space<vmem>>, vector<2x16x16xf32>
    tpu.vector_store %arg5[%c0_14, %c3_15, %c3_16], %2 {strides = array<i32>} : memref<2x22x22xf32, #tpu.memory_space<vmem>>, vector<2x16x16xf32>,
    %c0_17 = arith.constant 0 : index
    %c0_18 = arith.constant 0 : index
    %c0_19 = arith.constant 0 : index
    %9 = vector.load %arg4[%c0_17, %c0_18, %c0_19] : memref<2x22x22xf32, #tpu.memory_space<vmem>>, vector<2x22x22xf32>
    %c0_20 = arith.constant 0 : index
    %c0_21 = arith.constant 0 : index
    %c0_22 = arith.constant 0 : index
    %10 = vector.load %arg5[%c0_20, %c0_21, %c0_22] : memref<2x22x22xf32, #tpu.memory_space<vmem>>, vector<2x22x22xf32>
    %c0_23 = arith.constant 0 : index
    %11 = memref.load %arg1[%c0_23] : memref<98xf32, #tpu.memory_space<smem>>
    %c1 = arith.constant 1 : index
    %12 = memref.load %arg1[%c1] : memref<98xf32, #tpu.memory_space<smem>>
    %c2 = arith.constant 2 : index
    %13 = memref.load %arg1[%c2] : memref<98xf32, #tpu.memory_space<smem>>
    %c3_24 = arith.constant 3 : index
    %14 = memref.load %arg1[%c3_24] : memref<98xf32, #tpu.memory_space<smem>>
    %c4 = arith.constant 4 : index
    %15 = memref.load %arg1[%c4] : memref<98xf32, #tpu.memory_space<smem>>
    %c5 = arith.constant 5 : index
    %16 = memref.load %arg1[%c5] : memref<98xf32, #tpu.memory_space<smem>>
    %c6 = arith.constant 6 : index
    %17 = memref.load %arg1[%c6] : memref<98xf32, #tpu.memory_space<smem>>
    %c7 = arith.constant 7 : index
    %18 = memref.load %arg1[%c7] : memref<98xf32, #tpu.memory_space<smem>>
    %c8 = arith.constant 8 : index
    %19 = memref.load %arg1[%c8] : memref<98xf32, #tpu.memory_space<smem>>
    %c9 = arith.constant 9 : index
    %20 = memref.load %arg1[%c9] : memref<98xf32, #tpu.memory_space<smem>>
    %c10 = arith.constant 10 : index
    %21 = memref.load %arg1[%c10] : memref<98xf32, #tpu.memory_space<smem>>
    %c11 = arith.constant 11 : index
    %22 = memref.load %arg1[%c11] : memref<98xf32, #tpu.memory_space<smem>>
    %c12 = arith.constant 12 : index
    %23 = memref.load %arg1[%c12] : memref<98xf32, #tpu.memory_space<smem>>
    %c13 = arith.constant 13 : index
    %24 = memref.load %arg1[%c13] : memref<98xf32, #tpu.memory_space<smem>>
    %c14 = arith.constant 14 : index
    %25 = memref.load %arg1[%c14] : memref<98xf32, #tpu.memory_space<smem>>
    %c15 = arith.constant 15 : index
    %26 = memref.load %arg1[%c15] : memref<98xf32, #tpu.memory_space<smem>>
    %c16 = arith.constant 16 : index
    %27 = memref.load %arg1[%c16] : memref<98xf32, #tpu.memory_space<smem>>
    %c17 = arith.constant 17 : index
    %28 = memref.load %arg1[%c17] : memref<98xf32, #tpu.memory_space<smem>>
    %c18 = arith.constant 18 : index
    %29 = memref.load %arg1[%c18] : memref<98xf32, #tpu.memory_space<smem>>
    %c19 = arith.constant 19 : index
    %30 = memref.load %arg1[%c19] : memref<98xf32, #tpu.memory_space<smem>>
    %c20 = arith.constant 20 : index
    %31 = memref.load %arg1[%c20] : memref<98xf32, #tpu.memory_space<smem>>
    %c21 = arith.constant 21 : index
    %32 = memref.load %arg1[%c21] : memref<98xf32, #tpu.memory_space<smem>>
    %c22 = arith.constant 22 : index
    %33 = memref.load %arg1[%c22] : memref<98xf32, #tpu.memory_space<smem>>
    %c23 = arith.constant 23 : index
    %34 = memref.load %arg1[%c23] : memref<98xf32, #tpu.memory_space<smem>>
    %c24 = arith.constant 24 : index
    %35 = memref.load %arg1[%c24] : memref<98xf32, #tpu.memory_space<smem>>
    %c25 = arith.constant 25 : index
    %36 = memref.load %arg1[%c25] : memref<98xf32, #tpu.memory_space<smem>>
    %c26 = arith.constant 26 : index
    %37 = memref.load %arg1[%c26] : memref<98xf32, #tpu.memory_space<smem>>
    %c27 = arith.constant 27 : index
    %38 = memref.load %arg1[%c27] : memref<98xf32, #tpu.memory_space<smem>>
    %c28 = arith.constant 28 : index
    %39 = memref.load %arg1[%c28] : memref<98xf32, #tpu.memory_space<smem>>
    %c29 = arith.constant 29 : index
    %40 = memref.load %arg1[%c29] : memref<98xf32, #tpu.memory_space<smem>>
    %c30 = arith.constant 30 : index
    %41 = memref.load %arg1[%c30] : memref<98xf32, #tpu.memory_space<smem>>
    %c31 = arith.constant 31 : index
    %42 = memref.load %arg1[%c31] : memref<98xf32, #tpu.memory_space<smem>>
    %c32 = arith.constant 32 : index
    %43 = memref.load %arg1[%c32] : memref<98xf32, #tpu.memory_space<smem>>
    %c33 = arith.constant 33 : index
    %44 = memref.load %arg1[%c33] : memref<98xf32, #tpu.memory_space<smem>>
    %c34 = arith.constant 34 : index
    %45 = memref.load %arg1[%c34] : memref<98xf32, #tpu.memory_space<smem>>
    %c35 = arith.constant 35 : index
    %46 = memref.load %arg1[%c35] : memref<98xf32, #tpu.memory_space<smem>>
    %c36 = arith.constant 36 : index
    %47 = memref.load %arg1[%c36] : memref<98xf32, #tpu.memory_space<smem>>
    %c37 = arith.constant 37 : index
    %48 = memref.load %arg1[%c37] : memref<98xf32, #tpu.memory_space<smem>>
    %c38 = arith.constant 38 : index
    %49 = memref.load %arg1[%c38] : memref<98xf32, #tpu.memory_space<smem>>
    %c39 = arith.constant 39 : index
    %50 = memref.load %arg1[%c39] : memref<98xf32, #tpu.memory_space<smem>>
    %c40 = arith.constant 40 : index
    %51 = memref.load %arg1[%c40] : memref<98xf32, #tpu.memory_space<smem>>
    %c41 = arith.constant 41 : index
    %52 = memref.load %arg1[%c41] : memref<98xf32, #tpu.memory_space<smem>>
    %c42 = arith.constant 42 : index
    %53 = memref.load %arg1[%c42] : memref<98xf32, #tpu.memory_space<smem>>
    %c43 = arith.constant 43 : index
    %54 = memref.load %arg1[%c43] : memref<98xf32, #tpu.memory_space<smem>>
    %c44 = arith.constant 44 : index
    %55 = memref.load %arg1[%c44] : memref<98xf32, #tpu.memory_space<smem>>
    %c45 = arith.constant 45 : index
    %56 = memref.load %arg1[%c45] : memref<98xf32, #tpu.memory_space<smem>>
    %c46 = arith.constant 46 : index
    %57 = memref.load %arg1[%c46] : memref<98xf32, #tpu.memory_space<smem>>
    %c47 = arith.constant 47 : index
    %58 = memref.load %arg1[%c47] : memref<98xf32, #tpu.memory_space<smem>>
    %c48 = arith.constant 48 : index
    %59 = memref.load %arg1[%c48] : memref<98xf32, #tpu.memory_space<smem>>
    %c49 = arith.constant 49 : index
    %60 = memref.load %arg1[%c49] : memref<98xf32, #tpu.memory_space<smem>>
    %c50 = arith.constant 50 : index
    %61 = memref.load %arg1[%c50] : memref<98xf32, #tpu.memory_space<smem>>
    %c51 = arith.constant 51 : index
    %62 = memref.load %arg1[%c51] : memref<98xf32, #tpu.memory_space<smem>>
    %c52 = arith.constant 52 : index
    %63 = memref.load %arg1[%c52] : memref<98xf32, #tpu.memory_space<smem>>
    %c53 = arith.constant 53 : index
    %64 = memref.load %arg1[%c53] : memref<98xf32, #tpu.memory_space<smem>>
    %c54 = arith.constant 54 : index
    %65 = memref.load %arg1[%c54] : memref<98xf32, #tpu.memory_space<smem>>
    %c55 = arith.constant 55 : index
    %66 = memref.load %arg1[%c55] : memref<98xf32, #tpu.memory_space<smem>>
    %c56 = arith.constant 56 : index
    %67 = memref.load %arg1[%c56] : memref<98xf32, #tpu.memory_space<smem>>
    %c57 = arith.constant 57 : index
    %68 = memref.load %arg1[%c57] : memref<98xf32, #tpu.memory_space<smem>>
    %c58 = arith.constant 58 : index
    %69 = memref.load %arg1[%c58] : memref<98xf32, #tpu.memory_space<smem>>
    %c59 = arith.constant 59 : index
    %70 = memref.load %arg1[%c59] : memref<98xf32, #tpu.memory_space<smem>>
    %c60 = arith.constant 60 : index
    %71 = memref.load %arg1[%c60] : memref<98xf32, #tpu.memory_space<smem>>
    %c61 = arith.constant 61 : index
    %72 = memref.load %arg1[%c61] : memref<98xf32, #tpu.memory_space<smem>>
    %c62 = arith.constant 62 : index
    %73 = memref.load %arg1[%c62] : memref<98xf32, #tpu.memory_space<smem>>
    %c63 = arith.constant 63 : index
    %74 = memref.load %arg1[%c63] : memref<98xf32, #tpu.memory_space<smem>>
    %c64 = arith.constant 64 : index
    %75 = memref.load %arg1[%c64] : memref<98xf32, #tpu.memory_space<smem>>
    %c65 = arith.constant 65 : index
    %76 = memref.load %arg1[%c65] : memref<98xf32, #tpu.memory_space<smem>>
    %c66 = arith.constant 66 : index
    %77 = memref.load %arg1[%c66] : memref<98xf32, #tpu.memory_space<smem>>
    %c67 = arith.constant 67 : index
    %78 = memref.load %arg1[%c67] : memref<98xf32, #tpu.memory_space<smem>>
    %c68 = arith.constant 68 : index
    %79 = memref.load %arg1[%c68] : memref<98xf32, #tpu.memory_space<smem>>
    %c69 = arith.constant 69 : index
    %80 = memref.load %arg1[%c69] : memref<98xf32, #tpu.memory_space<smem>>
    %c70 = arith.constant 70 : index
    %81 = memref.load %arg1[%c70] : memref<98xf32, #tpu.memory_space<smem>>
    %c71 = arith.constant 71 : index
    %82 = memref.load %arg1[%c71] : memref<98xf32, #tpu.memory_space<smem>>
    %c72 = arith.constant 72 : index
    %83 = memref.load %arg1[%c72] : memref<98xf32, #tpu.memory_space<smem>>
    %c73 = arith.constant 73 : index
    %84 = memref.load %arg1[%c73] : memref<98xf32, #tpu.memory_space<smem>>
    %c74 = arith.constant 74 : index
    %85 = memref.load %arg1[%c74] : memref<98xf32, #tpu.memory_space<smem>>
    %c75 = arith.constant 75 : index
    %86 = memref.load %arg1[%c75] : memref<98xf32, #tpu.memory_space<smem>>
    %c76 = arith.constant 76 : index
    %87 = memref.load %arg1[%c76] : memref<98xf32, #tpu.memory_space<smem>>
    %c77 = arith.constant 77 : index
    %88 = memref.load %arg1[%c77] : memref<98xf32, #tpu.memory_space<smem>>
    %c78 = arith.constant 78 : index
    %89 = memref.load %arg1[%c78] : memref<98xf32, #tpu.memory_space<smem>>
    %c79 = arith.constant 79 : index
    %90 = memref.load %arg1[%c79] : memref<98xf32, #tpu.memory_space<smem>>
    %c80 = arith.constant 80 : index
    %91 = memref.load %arg1[%c80] : memref<98xf32, #tpu.memory_space<smem>>
    %c81 = arith.constant 81 : index
    %92 = memref.load %arg1[%c81] : memref<98xf32, #tpu.memory_space<smem>>
    %c82 = arith.constant 82 : index
    %93 = memref.load %arg1[%c82] : memref<98xf32, #tpu.memory_space<smem>>
    %c83 = arith.constant 83 : index
    %94 = memref.load %arg1[%c83] : memref<98xf32, #tpu.memory_space<smem>>
    %c84 = arith.constant 84 : index
    %95 = memref.load %arg1[%c84] : memref<98xf32, #tpu.memory_space<smem>>
    %c85 = arith.constant 85 : index
    %96 = memref.load %arg1[%c85] : memref<98xf32, #tpu.memory_space<smem>>
    %c86 = arith.constant 86 : index
    %97 = memref.load %arg1[%c86] : memref<98xf32, #tpu.memory_space<smem>>
    %c87 = arith.constant 87 : index
    %98 = memref.load %arg1[%c87] : memref<98xf32, #tpu.memory_space<smem>>
    %c88 = arith.constant 88 : index
    %99 = memref.load %arg1[%c88] : memref<98xf32, #tpu.memory_space<smem>>
    %c89 = arith.constant 89 : index
    %100 = memref.load %arg1[%c89] : memref<98xf32, #tpu.memory_space<smem>>
    %c90 = arith.constant 90 : index
    %101 = memref.load %arg1[%c90] : memref<98xf32, #tpu.memory_space<smem>>
    %c91 = arith.constant 91 : index
    %102 = memref.load %arg1[%c91] : memref<98xf32, #tpu.memory_space<smem>>
    %c92 = arith.constant 92 : index
    %103 = memref.load %arg1[%c92] : memref<98xf32, #tpu.memory_space<smem>>
    %c93 = arith.constant 93 : index
    %104 = memref.load %arg1[%c93] : memref<98xf32, #tpu.memory_space<smem>>
    %c94 = arith.constant 94 : index
    %105 = memref.load %arg1[%c94] : memref<98xf32, #tpu.memory_space<smem>>
    %c95 = arith.constant 95 : index
    %106 = memref.load %arg1[%c95] : memref<98xf32, #tpu.memory_space<smem>>
    %c96 = arith.constant 96 : index
    %107 = memref.load %arg1[%c96] : memref<98xf32, #tpu.memory_space<smem>>
    %c97 = arith.constant 97 : index
    %108 = memref.load %arg1[%c97] : memref<98xf32, #tpu.memory_space<smem>>
    %109 = vector.extract_strided_slice %9 {offsets = [0, 0, 0], sizes = [2, 22, 16], strides = [1, 1, 1]} : vector<2x22x22xf32> to vector<2x22x16xf32>
    %110 = vector.extract_strided_slice %10 {offsets = [0, 0, 0], sizes = [2, 22, 16], strides = [1, 1, 1]} : vector<2x22x22xf32> to vector<2x22x16xf32>
    %111 = vector.extract_strided_slice %109 {offsets = [0, 0, 0], sizes = [2, 16, 16], strides = [1, 1, 1]} : vector<2x22x16xf32> to vector<2x16x16xf32>
    %112 = vector.broadcast %11 : f32 to vector<2x16x16xf32>
    %113 = arith.mulf %112, %111 : vector<2x16x16xf32>
    %114 = vector.extract_strided_slice %110 {offsets = [0, 0, 0], sizes = [2, 16, 16], strides = [1, 1, 1]} : vector<2x22x16xf32> to vector<2x16x16xf32>
    %115 = vector.broadcast %60 : f32 to vector<2x16x16xf32>
    %116 = arith.mulf %115, %114 : vector<2x16x16xf32>
    %117 = vector.extract_strided_slice %109 {offsets = [0, 1, 0], sizes = [2, 16, 16], strides = [1, 1, 1]} : vector<2x22x16xf32> to vector<2x16x16xf32>
    %118 = vector.broadcast %18 : f32 to vector<2x16x16xf32>
    %119 = arith.mulf %118, %117 : vector<2x16x16xf32>
    %120 = vector.extract_strided_slice %110 {offsets = [0, 1, 0], sizes = [2, 16, 16], strides = [1, 1, 1]} : vector<2x22x16xf32> to vector<2x16x16xf32>
    %121 = vector.broadcast %67 : f32 to vector<2x16x16xf32>
    %122 = arith.mulf %121, %120 : vector<2x16x16xf32>
    %123 = vector.extract_strided_slice %109 {offsets = [0, 2, 0], sizes = [2, 16, 16], strides = [1, 1, 1]} : vector<2x22x16xf32> to vector<2x16x16xf32>
    %124 = vector.broadcast %25 : f32 to vector<2x16x16xf32>
    %125 = arith.mulf %124, %123 : vector<2x16x16xf32>
    %126 = vector.extract_strided_slice %110 {offsets = [0, 2, 0], sizes = [2, 16, 16], strides = [1, 1, 1]} : vector<2x22x16xf32> to vector<2x16x16xf32>
    %127 = vector.broadcast %74 : f32 to vector<2x16x16xf32>
    %128 = arith.mulf %127, %126 : vector<2x16x16xf32>
    %129 = arith.addf %113, %125 : vector<2x16x16xf32>
    %130 = arith.addf %116, %128 : vector<2x16x16xf32>
    %131 = vector.extract_strided_slice %109 {offsets = [0, 3, 0], sizes = [2, 16, 16], strides = [1, 1, 1]} : vector<2x22x16xf32> to vector<2x16x16xf32>
    %132 = vector.broadcast %32 : f32 to vector<2x16x16xf32>
    %133 = arith.mulf %132, %131 : vector<2x16x16xf32>
    %134 = vector.extract_strided_slice %110 {offsets = [0, 3, 0], sizes = [2, 16, 16], strides = [1, 1, 1]} : vector<2x22x16xf32> to vector<2x16x16xf32>
    %135 = vector.broadcast %81 : f32 to vector<2x16x16xf32>
    %136 = arith.mulf %135, %134 : vector<2x16x16xf32>
    %137 = arith.addf %119, %133 : vector<2x16x16xf32>
    %138 = arith.addf %122, %136 : vector<2x16x16xf32>
    %139 = vector.extract_strided_slice %109 {offsets = [0, 4, 0], sizes = [2, 16, 16], strides = [1, 1, 1]} : vector<2x22x16xf32> to vector<2x16x16xf32>
    %140 = vector.broadcast %39 : f32 to vector<2x16x16xf32>
    %141 = arith.mulf %140, %139 : vector<2x16x16xf32>
    %142 = vector.extract_strided_slice %110 {offsets = [0, 4, 0], sizes = [2, 16, 16], strides = [1, 1, 1]} : vector<2x22x16xf32> to vector<2x16x16xf32>
    %143 = vector.broadcast %88 : f32 to vector<2x16x16xf32>
    %144 = arith.mulf %143, %142 : vector<2x16x16xf32>
    %145 = arith.addf %129, %141 : vector<2x16x16xf32>
    %146 = arith.addf %130, %144 : vector<2x16x16xf32>
    %147 = vector.extract_strided_slice %109 {offsets = [0, 5, 0], sizes = [2, 16, 16], strides = [1, 1, 1]} : vector<2x22x16xf32> to vector<2x16x16xf32>
    %148 = vector.broadcast %46 : f32 to vector<2x16x16xf32>
    %149 = arith.mulf %148, %147 : vector<2x16x16xf32>
    %150 = vector.extract_strided_slice %110 {offsets = [0, 5, 0], sizes = [2, 16, 16], strides = [1, 1, 1]} : vector<2x22x16xf32> to vector<2x16x16xf32>
    %151 = vector.broadcast %95 : f32 to vector<2x16x16xf32>
    %152 = arith.mulf %151, %150 : vector<2x16x16xf32>
    %153 = arith.addf %137, %149 : vector<2x16x16xf32>
    %154 = arith.addf %138, %152 : vector<2x16x16xf32>
    %155 = vector.extract_strided_slice %109 {offsets = [0, 6, 0], sizes = [2, 16, 16], strides = [1, 1, 1]} : vector<2x22x16xf32> to vector<2x16x16xf32>
    %156 = vector.broadcast %53 : f32 to vector<2x16x16xf32>
    %157 = arith.mulf %156, %155 : vector<2x16x16xf32>
    %158 = vector.extract_strided_slice %110 {offsets = [0, 6, 0], sizes = [2, 16, 16], strides = [1, 1, 1]} : vector<2x22x16xf32> to vector<2x16x16xf32>
    %159 = vector.broadcast %102 : f32 to vector<2x16x16xf32>
    %160 = arith.mulf %159, %158 : vector<2x16x16xf32>
    %161 = arith.addf %145, %157 : vector<2x16x16xf32>
    %162 = arith.addf %146, %160 : vector<2x16x16xf32>
    %163 = vector.extract_strided_slice %9 {offsets = [0, 0, 1], sizes = [2, 22, 16], strides = [1, 1, 1]} : vector<2x22x22xf32> to vector<2x22x16xf32>
    %164 = vector.extract_strided_slice %10 {offsets = [0, 0, 1], sizes = [2, 22, 16], strides = [1, 1, 1]} : vector<2x22x22xf32> to vector<2x22x16xf32>
    %165 = vector.extract_strided_slice %163 {offsets = [0, 0, 0], sizes = [2, 16, 16], strides = [1, 1, 1]} : vector<2x22x16xf32> to vector<2x16x16xf32>
    %166 = vector.broadcast %12 : f32 to vector<2x16x16xf32>
    %167 = arith.mulf %166, %165 : vector<2x16x16xf32>
    %168 = vector.extract_strided_slice %164 {offsets = [0, 0, 0], sizes = [2, 16, 16], strides = [1, 1, 1]} : vector<2x22x16xf32> to vector<2x16x16xf32>
    %169 = vector.broadcast %61 : f32 to vector<2x16x16xf32>
    %170 = arith.mulf %169, %168 : vector<2x16x16xf32>
    %171 = arith.addf %161, %167 : vector<2x16x16xf32>
    %172 = arith.addf %162, %170 : vector<2x16x16xf32>
    %173 = vector.extract_strided_slice %163 {offsets = [0, 1, 0], sizes = [2, 16, 16], strides = [1, 1, 1]} : vector<2x22x16xf32> to vector<2x16x16xf32>
    %174 = vector.broadcast %19 : f32 to vector<2x16x16xf32>
    %175 = arith.mulf %174, %173 : vector<2x16x16xf32>
    %176 = vector.extract_strided_slice %164 {offsets = [0, 1, 0], sizes = [2, 16, 16], strides = [1, 1, 1]} : vector<2x22x16xf32> to vector<2x16x16xf32>
    %177 = vector.broadcast %68 : f32 to vector<2x16x16xf32>
    %178 = arith.mulf %177, %176 : vector<2x16x16xf32>
    %179 = arith.addf %153, %175 : vector<2x16x16xf32>
    %180 = arith.addf %154, %178 : vector<2x16x16xf32>
    %181 = vector.extract_strided_slice %163 {offsets = [0, 2, 0], sizes = [2, 16, 16], strides = [1, 1, 1]} : vector<2x22x16xf32> to vector<2x16x16xf32>
    %182 = vector.broadcast %26 : f32 to vector<2x16x16xf32>
    %183 = arith.mulf %182, %181 : vector<2x16x16xf32>
    %184 = vector.extract_strided_slice %164 {offsets = [0, 2, 0], sizes = [2, 16, 16], strides = [1, 1, 1]} : vector<2x22x16xf32> to vector<2x16x16xf32>
    %185 = vector.broadcast %75 : f32 to vector<2x16x16xf32>
    %186 = arith.mulf %185, %184 : vector<2x16x16xf32>
    %187 = arith.addf %171, %183 : vector<2x16x16xf32>
    %188 = arith.addf %172, %186 : vector<2x16x16xf32>
    %189 = vector.extract_strided_slice %163 {offsets = [0, 3, 0], sizes = [2, 16, 16], strides = [1, 1, 1]} : vector<2x22x16xf32> to vector<2x16x16xf32>
    %190 = vector.broadcast %33 : f32 to vector<2x16x16xf32>
    %191 = arith.mulf %190, %189 : vector<2x16x16xf32>
    %192 = vector.extract_strided_slice %164 {offsets = [0, 3, 0], sizes = [2, 16, 16], strides = [1, 1, 1]} : vector<2x22x16xf32> to vector<2x16x16xf32>
    %193 = vector.broadcast %82 : f32 to vector<2x16x16xf32>
    %194 = arith.mulf %193, %192 : vector<2x16x16xf32>
    %195 = arith.addf %179, %191 : vector<2x16x16xf32>
    %196 = arith.addf %180, %194 : vector<2x16x16xf32>
    %197 = vector.extract_strided_slice %163 {offsets = [0, 4, 0], sizes = [2, 16, 16], strides = [1, 1, 1]} : vector<2x22x16xf32> to vector<2x16x16xf32>
    %198 = vector.broadcast %40 : f32 to vector<2x16x16xf32>
    %199 = arith.mulf %198, %197 : vector<2x16x16xf32>
    %200 = vector.extract_strided_slice %164 {offsets = [0, 4, 0], sizes = [2, 16, 16], strides = [1, 1, 1]} : vector<2x22x16xf32> to vector<2x16x16xf32>
    %201 = vector.broadcast %89 : f32 to vector<2x16x16xf32>
    %202 = arith.mulf %201, %200 : vector<2x16x16xf32>
    %203 = arith.addf %187, %199 : vector<2x16x16xf32>
    %204 = arith.addf %188, %202 : vector<2x16x16xf32>
    %205 = vector.extract_strided_slice %163 {offsets = [0, 5, 0], sizes = [2, 16, 16], strides = [1, 1, 1]} : vector<2x22x16xf32> to vector<2x16x16xf32>
    %206 = vector.broadcast %47 : f32 to vector<2x16x16xf32>
    %207 = arith.mulf %206, %205 : vector<2x16x16xf32>
    %208 = vector.extract_strided_slice %164 {offsets = [0, 5, 0], sizes = [2, 16, 16], strides = [1, 1, 1]} : vector<2x22x16xf32> to vector<2x16x16xf32>
    %209 = vector.broadcast %96 : f32 to vector<2x16x16xf32>
    %210 = arith.mulf %209, %208 : vector<2x16x16xf32>
    %211 = arith.addf %195, %207 : vector<2x16x16xf32>
    %212 = arith.addf %196, %210 : vector<2x16x16xf32>
    %213 = vector.extract_strided_slice %163 {offsets = [0, 6, 0], sizes = [2, 16, 16], strides = [1, 1, 1]} : vector<2x22x16xf32> to vector<2x16x16xf32>
    %214 = vector.broadcast %54 : f32 to vector<2x16x16xf32>
    %215 = arith.mulf %214, %213 : vector<2x16x16xf32>
    %216 = vector.extract_strided_slice %164 {offsets = [0, 6, 0], sizes = [2, 16, 16], strides = [1, 1, 1]} : vector<2x22x16xf32> to vector<2x16x16xf32>
    %217 = vector.broadcast %103 : f32 to vector<2x16x16xf32>
    %218 = arith.mulf %217, %216 : vector<2x16x16xf32>
    %219 = arith.addf %203, %215 : vector<2x16x16xf32>
    %220 = arith.addf %204, %218 : vector<2x16x16xf32>
    %221 = vector.extract_strided_slice %9 {offsets = [0, 0, 2], sizes = [2, 22, 16], strides = [1, 1, 1]} : vector<2x22x22xf32> to vector<2x22x16xf32>
    %222 = vector.extract_strided_slice %10 {offsets = [0, 0, 2], sizes = [2, 22, 16], strides = [1, 1, 1]} : vector<2x22x22xf32> to vector<2x22x16xf32>
    %223 = vector.extract_strided_slice %221 {offsets = [0, 0, 0], sizes = [2, 16, 16], strides = [1, 1, 1]} : vector<2x22x16xf32> to vector<2x16x16xf32>
    %224 = vector.broadcast %13 : f32 to vector<2x16x16xf32>
    %225 = arith.mulf %224, %223 : vector<2x16x16xf32>
    %226 = vector.extract_strided_slice %222 {offsets = [0, 0, 0], sizes = [2, 16, 16], strides = [1, 1, 1]} : vector<2x22x16xf32> to vector<2x16x16xf32>
    %227 = vector.broadcast %62 : f32 to vector<2x16x16xf32>
    %228 = arith.mulf %227, %226 : vector<2x16x16xf32>
    %229 = arith.addf %219, %225 : vector<2x16x16xf32>
    %230 = arith.addf %220, %228 : vector<2x16x16xf32>
    %231 = vector.extract_strided_slice %221 {offsets = [0, 1, 0], sizes = [2, 16, 16], strides = [1, 1, 1]} : vector<2x22x16xf32> to vector<2x16x16xf32>
    %232 = vector.broadcast %20 : f32 to vector<2x16x16xf32>
    %233 = arith.mulf %232, %231 : vector<2x16x16xf32>
    %234 = vector.extract_strided_slice %222 {offsets = [0, 1, 0], sizes = [2, 16, 16], strides = [1, 1, 1]} : vector<2x22x16xf32> to vector<2x16x16xf32>
    %235 = vector.broadcast %69 : f32 to vector<2x16x16xf32>
    %236 = arith.mulf %235, %234 : vector<2x16x16xf32>
    %237 = arith.addf %211, %233 : vector<2x16x16xf32>
    %238 = arith.addf %212, %236 : vector<2x16x16xf32>
    %239 = vector.extract_strided_slice %221 {offsets = [0, 2, 0], sizes = [2, 16, 16], strides = [1, 1, 1]} : vector<2x22x16xf32> to vector<2x16x16xf32>
    %240 = vector.broadcast %27 : f32 to vector<2x16x16xf32>
    %241 = arith.mulf %240, %239 : vector<2x16x16xf32>
    %242 = vector.extract_strided_slice %222 {offsets = [0, 2, 0], sizes = [2, 16, 16], strides = [1, 1, 1]} : vector<2x22x16xf32> to vector<2x16x16xf32>
    %243 = vector.broadcast %76 : f32 to vector<2x16x16xf32>
    %244 = arith.mulf %243, %242 : vector<2x16x16xf32>
    %245 = arith.addf %229, %241 : vector<2x16x16xf32>
    %246 = arith.addf %230, %244 : vector<2x16x16xf32>
    %247 = vector.extract_strided_slice %221 {offsets = [0, 3, 0], sizes = [2, 16, 16], strides = [1, 1, 1]} : vector<2x22x16xf32> to vector<2x16x16xf32>
    %248 = vector.broadcast %34 : f32 to vector<2x16x16xf32>
    %249 = arith.mulf %248, %247 : vector<2x16x16xf32>
    %250 = vector.extract_strided_slice %222 {offsets = [0, 3, 0], sizes = [2, 16, 16], strides = [1, 1, 1]} : vector<2x22x16xf32> to vector<2x16x16xf32>
    %251 = vector.broadcast %83 : f32 to vector<2x16x16xf32>
    %252 = arith.mulf %251, %250 : vector<2x16x16xf32>
    %253 = arith.addf %237, %249 : vector<2x16x16xf32>
    %254 = arith.addf %238, %252 : vector<2x16x16xf32>
    %255 = vector.extract_strided_slice %221 {offsets = [0, 4, 0], sizes = [2, 16, 16], strides = [1, 1, 1]} : vector<2x22x16xf32> to vector<2x16x16xf32>
    %256 = vector.broadcast %41 : f32 to vector<2x16x16xf32>
    %257 = arith.mulf %256, %255 : vector<2x16x16xf32>
    %258 = vector.extract_strided_slice %222 {offsets = [0, 4, 0], sizes = [2, 16, 16], strides = [1, 1, 1]} : vector<2x22x16xf32> to vector<2x16x16xf32>
    %259 = vector.broadcast %90 : f32 to vector<2x16x16xf32>
    %260 = arith.mulf %259, %258 : vector<2x16x16xf32>
    %261 = arith.addf %245, %257 : vector<2x16x16xf32>
    %262 = arith.addf %246, %260 : vector<2x16x16xf32>
    %263 = vector.extract_strided_slice %221 {offsets = [0, 5, 0], sizes = [2, 16, 16], strides = [1, 1, 1]} : vector<2x22x16xf32> to vector<2x16x16xf32>
    %264 = vector.broadcast %48 : f32 to vector<2x16x16xf32>
    %265 = arith.mulf %264, %263 : vector<2x16x16xf32>
    %266 = vector.extract_strided_slice %222 {offsets = [0, 5, 0], sizes = [2, 16, 16], strides = [1, 1, 1]} : vector<2x22x16xf32> to vector<2x16x16xf32>
    %267 = vector.broadcast %97 : f32 to vector<2x16x16xf32>
    %268 = arith.mulf %267, %266 : vector<2x16x16xf32>
    %269 = arith.addf %253, %265 : vector<2x16x16xf32>
    %270 = arith.addf %254, %268 : vector<2x16x16xf32>
    %271 = vector.extract_strided_slice %221 {offsets = [0, 6, 0], sizes = [2, 16, 16], strides = [1, 1, 1]} : vector<2x22x16xf32> to vector<2x16x16xf32>
    %272 = vector.broadcast %55 : f32 to vector<2x16x16xf32>
    %273 = arith.mulf %272, %271 : vector<2x16x16xf32>
    %274 = vector.extract_strided_slice %222 {offsets = [0, 6, 0], sizes = [2, 16, 16], strides = [1, 1, 1]} : vector<2x22x16xf32> to vector<2x16x16xf32>
    %275 = vector.broadcast %104 : f32 to vector<2x16x16xf32>
    %276 = arith.mulf %275, %274 : vector<2x16x16xf32>
    %277 = arith.addf %261, %273 : vector<2x16x16xf32>
    %278 = arith.addf %262, %276 : vector<2x16x16xf32>
    %279 = vector.extract_strided_slice %9 {offsets = [0, 0, 3], sizes = [2, 22, 16], strides = [1, 1, 1]} : vector<2x22x22xf32> to vector<2x22x16xf32>
    %280 = vector.extract_strided_slice %10 {offsets = [0, 0, 3], sizes = [2, 22, 16], strides = [1, 1, 1]} : vector<2x22x22xf32> to vector<2x22x16xf32>
    %281 = vector.extract_strided_slice %279 {offsets = [0, 0, 0], sizes = [2, 16, 16], strides = [1, 1, 1]} : vector<2x22x16xf32> to vector<2x16x16xf32>
    %282 = vector.broadcast %14 : f32 to vector<2x16x16xf32>
    %283 = arith.mulf %282, %281 : vector<2x16x16xf32>
    %284 = vector.extract_strided_slice %280 {offsets = [0, 0, 0], sizes = [2, 16, 16], strides = [1, 1, 1]} : vector<2x22x16xf32> to vector<2x16x16xf32>
    %285 = vector.broadcast %63 : f32 to vector<2x16x16xf32>
    %286 = arith.mulf %285, %284 : vector<2x16x16xf32>
    %287 = arith.addf %277, %283 : vector<2x16x16xf32>
    %288 = arith.addf %278, %286 : vector<2x16x16xf32>
    %289 = vector.extract_strided_slice %279 {offsets = [0, 1, 0], sizes = [2, 16, 16], strides = [1, 1, 1]} : vector<2x22x16xf32> to vector<2x16x16xf32>
    %290 = vector.broadcast %21 : f32 to vector<2x16x16xf32>
    %291 = arith.mulf %290, %289 : vector<2x16x16xf32>
    %292 = vector.extract_strided_slice %280 {offsets = [0, 1, 0], sizes = [2, 16, 16], strides = [1, 1, 1]} : vector<2x22x16xf32> to vector<2x16x16xf32>
    %293 = vector.broadcast %70 : f32 to vector<2x16x16xf32>
    %294 = arith.mulf %293, %292 : vector<2x16x16xf32>
    %295 = arith.addf %269, %291 : vector<2x16x16xf32>
    %296 = arith.addf %270, %294 : vector<2x16x16xf32>
    %297 = vector.extract_strided_slice %279 {offsets = [0, 2, 0], sizes = [2, 16, 16], strides = [1, 1, 1]} : vector<2x22x16xf32> to vector<2x16x16xf32>
    %298 = vector.broadcast %28 : f32 to vector<2x16x16xf32>
    %299 = arith.mulf %298, %297 : vector<2x16x16xf32>
    %300 = vector.extract_strided_slice %280 {offsets = [0, 2, 0], sizes = [2, 16, 16], strides = [1, 1, 1]} : vector<2x22x16xf32> to vector<2x16x16xf32>
    %301 = vector.broadcast %77 : f32 to vector<2x16x16xf32>
    %302 = arith.mulf %301, %300 : vector<2x16x16xf32>
    %303 = arith.addf %287, %299 : vector<2x16x16xf32>
    %304 = arith.addf %288, %302 : vector<2x16x16xf32>
    %305 = vector.extract_strided_slice %279 {offsets = [0, 3, 0], sizes = [2, 16, 16], strides = [1, 1, 1]} : vector<2x22x16xf32> to vector<2x16x16xf32>
    %306 = vector.broadcast %35 : f32 to vector<2x16x16xf32>
    %307 = arith.mulf %306, %305 : vector<2x16x16xf32>
    %308 = vector.extract_strided_slice %280 {offsets = [0, 3, 0], sizes = [2, 16, 16], strides = [1, 1, 1]} : vector<2x22x16xf32> to vector<2x16x16xf32>
    %309 = vector.broadcast %84 : f32 to vector<2x16x16xf32>
    %310 = arith.mulf %309, %308 : vector<2x16x16xf32>
    %311 = arith.addf %295, %307 : vector<2x16x16xf32>
    %312 = arith.addf %296, %310 : vector<2x16x16xf32>
    %313 = vector.extract_strided_slice %279 {offsets = [0, 4, 0], sizes = [2, 16, 16], strides = [1, 1, 1]} : vector<2x22x16xf32> to vector<2x16x16xf32>
    %314 = vector.broadcast %42 : f32 to vector<2x16x16xf32>
    %315 = arith.mulf %314, %313 : vector<2x16x16xf32>
    %316 = vector.extract_strided_slice %280 {offsets = [0, 4, 0], sizes = [2, 16, 16], strides = [1, 1, 1]} : vector<2x22x16xf32> to vector<2x16x16xf32>
    %317 = vector.broadcast %91 : f32 to vector<2x16x16xf32>
    %318 = arith.mulf %317, %316 : vector<2x16x16xf32>
    %319 = arith.addf %303, %315 : vector<2x16x16xf32>
    %320 = arith.addf %304, %318 : vector<2x16x16xf32>
    %321 = vector.extract_strided_slice %279 {offsets = [0, 5, 0], sizes = [2, 16, 16], strides = [1, 1, 1]} : vector<2x22x16xf32> to vector<2x16x16xf32>
    %322 = vector.broadcast %49 : f32 to vector<2x16x16xf32>
    %323 = arith.mulf %322, %321 : vector<2x16x16xf32>
    %324 = vector.extract_strided_slice %280 {offsets = [0, 5, 0], sizes = [2, 16, 16], strides = [1, 1, 1]} : vector<2x22x16xf32> to vector<2x16x16xf32>
    %325 = vector.broadcast %98 : f32 to vector<2x16x16xf32>
    %326 = arith.mulf %325, %324 : vector<2x16x16xf32>
    %327 = arith.addf %311, %323 : vector<2x16x16xf32>
    %328 = arith.addf %312, %326 : vector<2x16x16xf32>
    %329 = vector.extract_strided_slice %279 {offsets = [0, 6, 0], sizes = [2, 16, 16], strides = [1, 1, 1]} : vector<2x22x16xf32> to vector<2x16x16xf32>
    %330 = vector.broadcast %56 : f32 to vector<2x16x16xf32>
    %331 = arith.mulf %330, %329 : vector<2x16x16xf32>
    %332 = vector.extract_strided_slice %280 {offsets = [0, 6, 0], sizes = [2, 16, 16], strides = [1, 1, 1]} : vector<2x22x16xf32> to vector<2x16x16xf32>
    %333 = vector.broadcast %105 : f32 to vector<2x16x16xf32>
    %334 = arith.mulf %333, %332 : vector<2x16x16xf32>
    %335 = arith.addf %319, %331 : vector<2x16x16xf32>
    %336 = arith.addf %320, %334 : vector<2x16x16xf32>
    %337 = vector.extract_strided_slice %9 {offsets = [0, 0, 4], sizes = [2, 22, 16], strides = [1, 1, 1]} : vector<2x22x22xf32> to vector<2x22x16xf32>
    %338 = vector.extract_strided_slice %10 {offsets = [0, 0, 4], sizes = [2, 22, 16], strides = [1, 1, 1]} : vector<2x22x22xf32> to vector<2x22x16xf32>
    %339 = vector.extract_strided_slice %337 {offsets = [0, 0, 0], sizes = [2, 16, 16], strides = [1, 1, 1]} : vector<2x22x16xf32> to vector<2x16x16xf32>
    %340 = vector.broadcast %15 : f32 to vector<2x16x16xf32>
    %341 = arith.mulf %340, %339 : vector<2x16x16xf32>
    %342 = vector.extract_strided_slice %338 {offsets = [0, 0, 0], sizes = [2, 16, 16], strides = [1, 1, 1]} : vector<2x22x16xf32> to vector<2x16x16xf32>
    %343 = vector.broadcast %64 : f32 to vector<2x16x16xf32>
    %344 = arith.mulf %343, %342 : vector<2x16x16xf32>
    %345 = arith.addf %335, %341 : vector<2x16x16xf32>
    %346 = arith.addf %336, %344 : vector<2x16x16xf32>
    %347 = vector.extract_strided_slice %337 {offsets = [0, 1, 0], sizes = [2, 16, 16], strides = [1, 1, 1]} : vector<2x22x16xf32> to vector<2x16x16xf32>
    %348 = vector.broadcast %22 : f32 to vector<2x16x16xf32>
    %349 = arith.mulf %348, %347 : vector<2x16x16xf32>
    %350 = vector.extract_strided_slice %338 {offsets = [0, 1, 0], sizes = [2, 16, 16], strides = [1, 1, 1]} : vector<2x22x16xf32> to vector<2x16x16xf32>
    %351 = vector.broadcast %71 : f32 to vector<2x16x16xf32>
    %352 = arith.mulf %351, %350 : vector<2x16x16xf32>
    %353 = arith.addf %327, %349 : vector<2x16x16xf32>
    %354 = arith.addf %328, %352 : vector<2x16x16xf32>
    %355 = vector.extract_strided_slice %337 {offsets = [0, 2, 0], sizes = [2, 16, 16], strides = [1, 1, 1]} : vector<2x22x16xf32> to vector<2x16x16xf32>
    %356 = vector.broadcast %29 : f32 to vector<2x16x16xf32>
    %357 = arith.mulf %356, %355 : vector<2x16x16xf32>
    %358 = vector.extract_strided_slice %338 {offsets = [0, 2, 0], sizes = [2, 16, 16], strides = [1, 1, 1]} : vector<2x22x16xf32> to vector<2x16x16xf32>
    %359 = vector.broadcast %78 : f32 to vector<2x16x16xf32>
    %360 = arith.mulf %359, %358 : vector<2x16x16xf32>
    %361 = arith.addf %345, %357 : vector<2x16x16xf32>
    %362 = arith.addf %346, %360 : vector<2x16x16xf32>
    %363 = vector.extract_strided_slice %337 {offsets = [0, 3, 0], sizes = [2, 16, 16], strides = [1, 1, 1]} : vector<2x22x16xf32> to vector<2x16x16xf32>
    %364 = vector.broadcast %36 : f32 to vector<2x16x16xf32>
    %365 = arith.mulf %364, %363 : vector<2x16x16xf32>
    %366 = vector.extract_strided_slice %338 {offsets = [0, 3, 0], sizes = [2, 16, 16], strides = [1, 1, 1]} : vector<2x22x16xf32> to vector<2x16x16xf32>
    %367 = vector.broadcast %85 : f32 to vector<2x16x16xf32>
    %368 = arith.mulf %367, %366 : vector<2x16x16xf32>
    %369 = arith.addf %353, %365 : vector<2x16x16xf32>
    %370 = arith.addf %354, %368 : vector<2x16x16xf32>
    %371 = vector.extract_strided_slice %337 {offsets = [0, 4, 0], sizes = [2, 16, 16], strides = [1, 1, 1]} : vector<2x22x16xf32> to vector<2x16x16xf32>
    %372 = vector.broadcast %43 : f32 to vector<2x16x16xf32>
    %373 = arith.mulf %372, %371 : vector<2x16x16xf32>
    %374 = vector.extract_strided_slice %338 {offsets = [0, 4, 0], sizes = [2, 16, 16], strides = [1, 1, 1]} : vector<2x22x16xf32> to vector<2x16x16xf32>
    %375 = vector.broadcast %92 : f32 to vector<2x16x16xf32>
    %376 = arith.mulf %375, %374 : vector<2x16x16xf32>
    %377 = arith.addf %361, %373 : vector<2x16x16xf32>
    %378 = arith.addf %362, %376 : vector<2x16x16xf32>
    %379 = vector.extract_strided_slice %337 {offsets = [0, 5, 0], sizes = [2, 16, 16], strides = [1, 1, 1]} : vector<2x22x16xf32> to vector<2x16x16xf32>
    %380 = vector.broadcast %50 : f32 to vector<2x16x16xf32>
    %381 = arith.mulf %380, %379 : vector<2x16x16xf32>
    %382 = vector.extract_strided_slice %338 {offsets = [0, 5, 0], sizes = [2, 16, 16], strides = [1, 1, 1]} : vector<2x22x16xf32> to vector<2x16x16xf32>
    %383 = vector.broadcast %99 : f32 to vector<2x16x16xf32>
    %384 = arith.mulf %383, %382 : vector<2x16x16xf32>
    %385 = arith.addf %369, %381 : vector<2x16x16xf32>
    %386 = arith.addf %370, %384 : vector<2x16x16xf32>
    %387 = vector.extract_strided_slice %337 {offsets = [0, 6, 0], sizes = [2, 16, 16], strides = [1, 1, 1]} : vector<2x22x16xf32> to vector<2x16x16xf32>
    %388 = vector.broadcast %57 : f32 to vector<2x16x16xf32>
    %389 = arith.mulf %388, %387 : vector<2x16x16xf32>
    %390 = vector.extract_strided_slice %338 {offsets = [0, 6, 0], sizes = [2, 16, 16], strides = [1, 1, 1]} : vector<2x22x16xf32> to vector<2x16x16xf32>
    %391 = vector.broadcast %106 : f32 to vector<2x16x16xf32>
    %392 = arith.mulf %391, %390 : vector<2x16x16xf32>
    %393 = arith.addf %377, %389 : vector<2x16x16xf32>
    %394 = arith.addf %378, %392 : vector<2x16x16xf32>
    %395 = vector.extract_strided_slice %9 {offsets = [0, 0, 5], sizes = [2, 22, 16], strides = [1, 1, 1]} : vector<2x22x22xf32> to vector<2x22x16xf32>
    %396 = vector.extract_strided_slice %10 {offsets = [0, 0, 5], sizes = [2, 22, 16], strides = [1, 1, 1]} : vector<2x22x22xf32> to vector<2x22x16xf32>
    %397 = vector.extract_strided_slice %395 {offsets = [0, 0, 0], sizes = [2, 16, 16], strides = [1, 1, 1]} : vector<2x22x16xf32> to vector<2x16x16xf32>
    %398 = vector.broadcast %16 : f32 to vector<2x16x16xf32>
    %399 = arith.mulf %398, %397 : vector<2x16x16xf32>
    %400 = vector.extract_strided_slice %396 {offsets = [0, 0, 0], sizes = [2, 16, 16], strides = [1, 1, 1]} : vector<2x22x16xf32> to vector<2x16x16xf32>
    %401 = vector.broadcast %65 : f32 to vector<2x16x16xf32>
    %402 = arith.mulf %401, %400 : vector<2x16x16xf32>
    %403 = arith.addf %393, %399 : vector<2x16x16xf32>
    %404 = arith.addf %394, %402 : vector<2x16x16xf32>
    %405 = vector.extract_strided_slice %395 {offsets = [0, 1, 0], sizes = [2, 16, 16], strides = [1, 1, 1]} : vector<2x22x16xf32> to vector<2x16x16xf32>
    %406 = vector.broadcast %23 : f32 to vector<2x16x16xf32>
    %407 = arith.mulf %406, %405 : vector<2x16x16xf32>
    %408 = vector.extract_strided_slice %396 {offsets = [0, 1, 0], sizes = [2, 16, 16], strides = [1, 1, 1]} : vector<2x22x16xf32> to vector<2x16x16xf32>
    %409 = vector.broadcast %72 : f32 to vector<2x16x16xf32>
    %410 = arith.mulf %409, %408 : vector<2x16x16xf32>
    %411 = arith.addf %385, %407 : vector<2x16x16xf32>
    %412 = arith.addf %386, %410 : vector<2x16x16xf32>
    %413 = vector.extract_strided_slice %395 {offsets = [0, 2, 0], sizes = [2, 16, 16], strides = [1, 1, 1]} : vector<2x22x16xf32> to vector<2x16x16xf32>
    %414 = vector.broadcast %30 : f32 to vector<2x16x16xf32>
    %415 = arith.mulf %414, %413 : vector<2x16x16xf32>
    %416 = vector.extract_strided_slice %396 {offsets = [0, 2, 0], sizes = [2, 16, 16], strides = [1, 1, 1]} : vector<2x22x16xf32> to vector<2x16x16xf32>
    %417 = vector.broadcast %79 : f32 to vector<2x16x16xf32>
    %418 = arith.mulf %417, %416 : vector<2x16x16xf32>
    %419 = arith.addf %403, %415 : vector<2x16x16xf32>
    %420 = arith.addf %404, %418 : vector<2x16x16xf32>
    %421 = vector.extract_strided_slice %395 {offsets = [0, 3, 0], sizes = [2, 16, 16], strides = [1, 1, 1]} : vector<2x22x16xf32> to vector<2x16x16xf32>
    %422 = vector.broadcast %37 : f32 to vector<2x16x16xf32>
    %423 = arith.mulf %422, %421 : vector<2x16x16xf32>
    %424 = vector.extract_strided_slice %396 {offsets = [0, 3, 0], sizes = [2, 16, 16], strides = [1, 1, 1]} : vector<2x22x16xf32> to vector<2x16x16xf32>
    %425 = vector.broadcast %86 : f32 to vector<2x16x16xf32>
    %426 = arith.mulf %425, %424 : vector<2x16x16xf32>
    %427 = arith.addf %411, %423 : vector<2x16x16xf32>
    %428 = arith.addf %412, %426 : vector<2x16x16xf32>
    %429 = vector.extract_strided_slice %395 {offsets = [0, 4, 0], sizes = [2, 16, 16], strides = [1, 1, 1]} : vector<2x22x16xf32> to vector<2x16x16xf32>
    %430 = vector.broadcast %44 : f32 to vector<2x16x16xf32>
    %431 = arith.mulf %430, %429 : vector<2x16x16xf32>
    %432 = vector.extract_strided_slice %396 {offsets = [0, 4, 0], sizes = [2, 16, 16], strides = [1, 1, 1]} : vector<2x22x16xf32> to vector<2x16x16xf32>
    %433 = vector.broadcast %93 : f32 to vector<2x16x16xf32>
    %434 = arith.mulf %433, %432 : vector<2x16x16xf32>
    %435 = arith.addf %419, %431 : vector<2x16x16xf32>
    %436 = arith.addf %420, %434 : vector<2x16x16xf32>
    %437 = vector.extract_strided_slice %395 {offsets = [0, 5, 0], sizes = [2, 16, 16], strides = [1, 1, 1]} : vector<2x22x16xf32> to vector<2x16x16xf32>
    %438 = vector.broadcast %51 : f32 to vector<2x16x16xf32>
    %439 = arith.mulf %438, %437 : vector<2x16x16xf32>
    %440 = vector.extract_strided_slice %396 {offsets = [0, 5, 0], sizes = [2, 16, 16], strides = [1, 1, 1]} : vector<2x22x16xf32> to vector<2x16x16xf32>
    %441 = vector.broadcast %100 : f32 to vector<2x16x16xf32>
    %442 = arith.mulf %441, %440 : vector<2x16x16xf32>
    %443 = arith.addf %427, %439 : vector<2x16x16xf32>
    %444 = arith.addf %428, %442 : vector<2x16x16xf32>
    %445 = vector.extract_strided_slice %395 {offsets = [0, 6, 0], sizes = [2, 16, 16], strides = [1, 1, 1]} : vector<2x22x16xf32> to vector<2x16x16xf32>
    %446 = vector.broadcast %58 : f32 to vector<2x16x16xf32>
    %447 = arith.mulf %446, %445 : vector<2x16x16xf32>
    %448 = vector.extract_strided_slice %396 {offsets = [0, 6, 0], sizes = [2, 16, 16], strides = [1, 1, 1]} : vector<2x22x16xf32> to vector<2x16x16xf32>
    %449 = vector.broadcast %107 : f32 to vector<2x16x16xf32>
    %450 = arith.mulf %449, %448 : vector<2x16x16xf32>
    %451 = arith.addf %435, %447 : vector<2x16x16xf32>
    %452 = arith.addf %436, %450 : vector<2x16x16xf32>
    %453 = vector.extract_strided_slice %9 {offsets = [0, 0, 6], sizes = [2, 22, 16], strides = [1, 1, 1]} : vector<2x22x22xf32> to vector<2x22x16xf32>
    %454 = vector.extract_strided_slice %10 {offsets = [0, 0, 6], sizes = [2, 22, 16], strides = [1, 1, 1]} : vector<2x22x22xf32> to vector<2x22x16xf32>
    %455 = vector.extract_strided_slice %453 {offsets = [0, 0, 0], sizes = [2, 16, 16], strides = [1, 1, 1]} : vector<2x22x16xf32> to vector<2x16x16xf32>
    %456 = vector.broadcast %17 : f32 to vector<2x16x16xf32>
    %457 = arith.mulf %456, %455 : vector<2x16x16xf32>
    %458 = vector.extract_strided_slice %454 {offsets = [0, 0, 0], sizes = [2, 16, 16], strides = [1, 1, 1]} : vector<2x22x16xf32> to vector<2x16x16xf32>
    %459 = vector.broadcast %66 : f32 to vector<2x16x16xf32>
    %460 = arith.mulf %459, %458 : vector<2x16x16xf32>
    %461 = arith.addf %451, %457 : vector<2x16x16xf32>
    %462 = arith.addf %452, %460 : vector<2x16x16xf32>
    %463 = vector.extract_strided_slice %453 {offsets = [0, 1, 0], sizes = [2, 16, 16], strides = [1, 1, 1]} : vector<2x22x16xf32> to vector<2x16x16xf32>
    %464 = vector.broadcast %24 : f32 to vector<2x16x16xf32>
    %465 = arith.mulf %464, %463 : vector<2x16x16xf32>
    %466 = vector.extract_strided_slice %454 {offsets = [0, 1, 0], sizes = [2, 16, 16], strides = [1, 1, 1]} : vector<2x22x16xf32> to vector<2x16x16xf32>
    %467 = vector.broadcast %73 : f32 to vector<2x16x16xf32>
    %468 = arith.mulf %467, %466 : vector<2x16x16xf32>
    %469 = arith.addf %443, %465 : vector<2x16x16xf32>
    %470 = arith.addf %444, %468 : vector<2x16x16xf32>
    %471 = vector.extract_strided_slice %453 {offsets = [0, 2, 0], sizes = [2, 16, 16], strides = [1, 1, 1]} : vector<2x22x16xf32> to vector<2x16x16xf32>
    %472 = vector.broadcast %31 : f32 to vector<2x16x16xf32>
    %473 = arith.mulf %472, %471 : vector<2x16x16xf32>
    %474 = vector.extract_strided_slice %454 {offsets = [0, 2, 0], sizes = [2, 16, 16], strides = [1, 1, 1]} : vector<2x22x16xf32> to vector<2x16x16xf32>
    %475 = vector.broadcast %80 : f32 to vector<2x16x16xf32>
    %476 = arith.mulf %475, %474 : vector<2x16x16xf32>
    %477 = arith.addf %461, %473 : vector<2x16x16xf32>
    %478 = arith.addf %462, %476 : vector<2x16x16xf32>
    %479 = vector.extract_strided_slice %453 {offsets = [0, 3, 0], sizes = [2, 16, 16], strides = [1, 1, 1]} : vector<2x22x16xf32> to vector<2x16x16xf32>
    %480 = vector.broadcast %38 : f32 to vector<2x16x16xf32>
    %481 = arith.mulf %480, %479 : vector<2x16x16xf32>
    %482 = vector.extract_strided_slice %454 {offsets = [0, 3, 0], sizes = [2, 16, 16], strides = [1, 1, 1]} : vector<2x22x16xf32> to vector<2x16x16xf32>
    %483 = vector.broadcast %87 : f32 to vector<2x16x16xf32>
    %484 = arith.mulf %483, %482 : vector<2x16x16xf32>
    %485 = arith.addf %469, %481 : vector<2x16x16xf32>
    %486 = arith.addf %470, %484 : vector<2x16x16xf32>
    %487 = vector.extract_strided_slice %453 {offsets = [0, 4, 0], sizes = [2, 16, 16], strides = [1, 1, 1]} : vector<2x22x16xf32> to vector<2x16x16xf32>
    %488 = vector.broadcast %45 : f32 to vector<2x16x16xf32>
    %489 = arith.mulf %488, %487 : vector<2x16x16xf32>
    %490 = vector.extract_strided_slice %454 {offsets = [0, 4, 0], sizes = [2, 16, 16], strides = [1, 1, 1]} : vector<2x22x16xf32> to vector<2x16x16xf32>
    %491 = vector.broadcast %94 : f32 to vector<2x16x16xf32>
    %492 = arith.mulf %491, %490 : vector<2x16x16xf32>
    %493 = arith.addf %477, %489 : vector<2x16x16xf32>
    %494 = arith.addf %478, %492 : vector<2x16x16xf32>
    %495 = vector.extract_strided_slice %453 {offsets = [0, 5, 0], sizes = [2, 16, 16], strides = [1, 1, 1]} : vector<2x22x16xf32> to vector<2x16x16xf32>
    %496 = vector.broadcast %52 : f32 to vector<2x16x16xf32>
    %497 = arith.mulf %496, %495 : vector<2x16x16xf32>
    %498 = vector.extract_strided_slice %454 {offsets = [0, 5, 0], sizes = [2, 16, 16], strides = [1, 1, 1]} : vector<2x22x16xf32> to vector<2x16x16xf32>
    %499 = vector.broadcast %101 : f32 to vector<2x16x16xf32>
    %500 = arith.mulf %499, %498 : vector<2x16x16xf32>
    %501 = arith.addf %485, %497 : vector<2x16x16xf32>
    %502 = arith.addf %486, %500 : vector<2x16x16xf32>
    %503 = vector.extract_strided_slice %453 {offsets = [0, 6, 0], sizes = [2, 16, 16], strides = [1, 1, 1]} : vector<2x22x16xf32> to vector<2x16x16xf32>
    %504 = vector.broadcast %59 : f32 to vector<2x16x16xf32>
    %505 = arith.mulf %504, %503 : vector<2x16x16xf32>
    %506 = vector.extract_strided_slice %454 {offsets = [0, 6, 0], sizes = [2, 16, 16], strides = [1, 1, 1]} : vector<2x22x16xf32> to vector<2x16x16xf32>
    %507 = vector.broadcast %108 : f32 to vector<2x16x16xf32>
    %508 = arith.mulf %507, %506 : vector<2x16x16xf32>
    %509 = arith.addf %493, %505 : vector<2x16x16xf32>
    %510 = arith.addf %494, %508 : vector<2x16x16xf32>
    %511 = arith.addf %509, %501 : vector<2x16x16xf32>
    %512 = arith.addf %510, %502 : vector<2x16x16xf32>
    %513 = arith.addf %511, %512 : vector<2x16x16xf32>
    %514 = arith.negf %513 : vector<2x16x16xf32>
    %515 = math.exp %514 : vector<2x16x16xf32>
    %cst_25 = arith.constant 1.000000e+00 : f32
    %516 = vector.broadcast %cst_25 : f32 to vector<2x16x16xf32>
    %517 = arith.addf %516, %515 : vector<2x16x16xf32>
    %518 = arith.divf %516, %517 : vector<2x16x16xf32>
    %519 = vector.extract_strided_slice %518 {offsets = [0, 0, 0], sizes = [2, 1, 16], strides = [1, 1, 1]} : vector<2x16x16xf32> to vector<2x1x16xf32>
    %c0_26 = arith.constant 0 : index
    %c0_27 = arith.constant 0 : index
    %c0_28 = arith.constant 0 : index
    %520 = vector.load %arg3[%c0_26, %c0_27, %c0_28] : memref<2x1x256xf32, #tpu.memory_space<vmem>>, vector<2x1x16xf32>
    tpu.vector_store %arg3[%c0_26, %c0_27, %c0_28], %519 {strides = array<i32>} : memref<2x1x256xf32, #tpu.memory_space<vmem>>, vector<2x1x16xf32>,
    %521 = vector.extract_strided_slice %518 {offsets = [0, 1, 0], sizes = [2, 1, 16], strides = [1, 1, 1]} : vector<2x16x16xf32> to vector<2x1x16xf32>
    %c0_29 = arith.constant 0 : index
    %c0_30 = arith.constant 0 : index
    %c16_31 = arith.constant 16 : index
    %522 = vector.load %arg3[%c0_29, %c0_30, %c16_31] : memref<2x1x256xf32, #tpu.memory_space<vmem>>, vector<2x1x16xf32>
    tpu.vector_store %arg3[%c0_29, %c0_30, %c16_31], %521 {strides = array<i32>} : memref<2x1x256xf32, #tpu.memory_space<vmem>>, vector<2x1x16xf32>,
    %523 = vector.extract_strided_slice %518 {offsets = [0, 2, 0], sizes = [2, 1, 16], strides = [1, 1, 1]} : vector<2x16x16xf32> to vector<2x1x16xf32>
    %c0_32 = arith.constant 0 : index
    %c0_33 = arith.constant 0 : index
    %c32_34 = arith.constant 32 : index
    %524 = vector.load %arg3[%c0_32, %c0_33, %c32_34] : memref<2x1x256xf32, #tpu.memory_space<vmem>>, vector<2x1x16xf32>
    tpu.vector_store %arg3[%c0_32, %c0_33, %c32_34], %523 {strides = array<i32>} : memref<2x1x256xf32, #tpu.memory_space<vmem>>, vector<2x1x16xf32>,
    %525 = vector.extract_strided_slice %518 {offsets = [0, 3, 0], sizes = [2, 1, 16], strides = [1, 1, 1]} : vector<2x16x16xf32> to vector<2x1x16xf32>
    %c0_35 = arith.constant 0 : index
    %c0_36 = arith.constant 0 : index
    %c48_37 = arith.constant 48 : index
    %526 = vector.load %arg3[%c0_35, %c0_36, %c48_37] : memref<2x1x256xf32, #tpu.memory_space<vmem>>, vector<2x1x16xf32>
    tpu.vector_store %arg3[%c0_35, %c0_36, %c48_37], %525 {strides = array<i32>} : memref<2x1x256xf32, #tpu.memory_space<vmem>>, vector<2x1x16xf32>,
    %527 = vector.extract_strided_slice %518 {offsets = [0, 4, 0], sizes = [2, 1, 16], strides = [1, 1, 1]} : vector<2x16x16xf32> to vector<2x1x16xf32>
    %c0_38 = arith.constant 0 : index
    %c0_39 = arith.constant 0 : index
    %c64_40 = arith.constant 64 : index
    %528 = vector.load %arg3[%c0_38, %c0_39, %c64_40] : memref<2x1x256xf32, #tpu.memory_space<vmem>>, vector<2x1x16xf32>
    tpu.vector_store %arg3[%c0_38, %c0_39, %c64_40], %527 {strides = array<i32>} : memref<2x1x256xf32, #tpu.memory_space<vmem>>, vector<2x1x16xf32>,
    %529 = vector.extract_strided_slice %518 {offsets = [0, 5, 0], sizes = [2, 1, 16], strides = [1, 1, 1]} : vector<2x16x16xf32> to vector<2x1x16xf32>
    %c0_41 = arith.constant 0 : index
    %c0_42 = arith.constant 0 : index
    %c80_43 = arith.constant 80 : index
    %530 = vector.load %arg3[%c0_41, %c0_42, %c80_43] : memref<2x1x256xf32, #tpu.memory_space<vmem>>, vector<2x1x16xf32>
    tpu.vector_store %arg3[%c0_41, %c0_42, %c80_43], %529 {strides = array<i32>} : memref<2x1x256xf32, #tpu.memory_space<vmem>>, vector<2x1x16xf32>,
    %531 = vector.extract_strided_slice %518 {offsets = [0, 6, 0], sizes = [2, 1, 16], strides = [1, 1, 1]} : vector<2x16x16xf32> to vector<2x1x16xf32>
    %c0_44 = arith.constant 0 : index
    %c0_45 = arith.constant 0 : index
    %c96_46 = arith.constant 96 : index
    %532 = vector.load %arg3[%c0_44, %c0_45, %c96_46] : memref<2x1x256xf32, #tpu.memory_space<vmem>>, vector<2x1x16xf32>
    tpu.vector_store %arg3[%c0_44, %c0_45, %c96_46], %531 {strides = array<i32>} : memref<2x1x256xf32, #tpu.memory_space<vmem>>, vector<2x1x16xf32>,
    %533 = vector.extract_strided_slice %518 {offsets = [0, 7, 0], sizes = [2, 1, 16], strides = [1, 1, 1]} : vector<2x16x16xf32> to vector<2x1x16xf32>
    %c0_47 = arith.constant 0 : index
    %c0_48 = arith.constant 0 : index
    %c112 = arith.constant 112 : index
    %534 = vector.load %arg3[%c0_47, %c0_48, %c112] : memref<2x1x256xf32, #tpu.memory_space<vmem>>, vector<2x1x16xf32>
    tpu.vector_store %arg3[%c0_47, %c0_48, %c112], %533 {strides = array<i32>} : memref<2x1x256xf32, #tpu.memory_space<vmem>>, vector<2x1x16xf32>,
    %535 = vector.extract_strided_slice %518 {offsets = [0, 8, 0], sizes = [2, 1, 16], strides = [1, 1, 1]} : vector<2x16x16xf32> to vector<2x1x16xf32>
    %c0_49 = arith.constant 0 : index
    %c0_50 = arith.constant 0 : index
    %c128 = arith.constant 128 : index
    %536 = vector.load %arg3[%c0_49, %c0_50, %c128] : memref<2x1x256xf32, #tpu.memory_space<vmem>>, vector<2x1x16xf32>
    tpu.vector_store %arg3[%c0_49, %c0_50, %c128], %535 {strides = array<i32>} : memref<2x1x256xf32, #tpu.memory_space<vmem>>, vector<2x1x16xf32>,
    %537 = vector.extract_strided_slice %518 {offsets = [0, 9, 0], sizes = [2, 1, 16], strides = [1, 1, 1]} : vector<2x16x16xf32> to vector<2x1x16xf32>
    %c0_51 = arith.constant 0 : index
    %c0_52 = arith.constant 0 : index
    %c144 = arith.constant 144 : index
    %538 = vector.load %arg3[%c0_51, %c0_52, %c144] : memref<2x1x256xf32, #tpu.memory_space<vmem>>, vector<2x1x16xf32>
    tpu.vector_store %arg3[%c0_51, %c0_52, %c144], %537 {strides = array<i32>} : memref<2x1x256xf32, #tpu.memory_space<vmem>>, vector<2x1x16xf32>,
    %539 = vector.extract_strided_slice %518 {offsets = [0, 10, 0], sizes = [2, 1, 16], strides = [1, 1, 1]} : vector<2x16x16xf32> to vector<2x1x16xf32>
    %c0_53 = arith.constant 0 : index
    %c0_54 = arith.constant 0 : index
    %c160 = arith.constant 160 : index
    %540 = vector.load %arg3[%c0_53, %c0_54, %c160] : memref<2x1x256xf32, #tpu.memory_space<vmem>>, vector<2x1x16xf32>
    tpu.vector_store %arg3[%c0_53, %c0_54, %c160], %539 {strides = array<i32>} : memref<2x1x256xf32, #tpu.memory_space<vmem>>, vector<2x1x16xf32>,
    %541 = vector.extract_strided_slice %518 {offsets = [0, 11, 0], sizes = [2, 1, 16], strides = [1, 1, 1]} : vector<2x16x16xf32> to vector<2x1x16xf32>
    %c0_55 = arith.constant 0 : index
    %c0_56 = arith.constant 0 : index
    %c176 = arith.constant 176 : index
    %542 = vector.load %arg3[%c0_55, %c0_56, %c176] : memref<2x1x256xf32, #tpu.memory_space<vmem>>, vector<2x1x16xf32>
    tpu.vector_store %arg3[%c0_55, %c0_56, %c176], %541 {strides = array<i32>} : memref<2x1x256xf32, #tpu.memory_space<vmem>>, vector<2x1x16xf32>,
    %543 = vector.extract_strided_slice %518 {offsets = [0, 12, 0], sizes = [2, 1, 16], strides = [1, 1, 1]} : vector<2x16x16xf32> to vector<2x1x16xf32>
    %c0_57 = arith.constant 0 : index
    %c0_58 = arith.constant 0 : index
    %c192 = arith.constant 192 : index
    %544 = vector.load %arg3[%c0_57, %c0_58, %c192] : memref<2x1x256xf32, #tpu.memory_space<vmem>>, vector<2x1x16xf32>
    tpu.vector_store %arg3[%c0_57, %c0_58, %c192], %543 {strides = array<i32>} : memref<2x1x256xf32, #tpu.memory_space<vmem>>, vector<2x1x16xf32>,
    %545 = vector.extract_strided_slice %518 {offsets = [0, 13, 0], sizes = [2, 1, 16], strides = [1, 1, 1]} : vector<2x16x16xf32> to vector<2x1x16xf32>
    %c0_59 = arith.constant 0 : index
    %c0_60 = arith.constant 0 : index
    %c208 = arith.constant 208 : index
    %546 = vector.load %arg3[%c0_59, %c0_60, %c208] : memref<2x1x256xf32, #tpu.memory_space<vmem>>, vector<2x1x16xf32>
    tpu.vector_store %arg3[%c0_59, %c0_60, %c208], %545 {strides = array<i32>} : memref<2x1x256xf32, #tpu.memory_space<vmem>>, vector<2x1x16xf32>,
    %547 = vector.extract_strided_slice %518 {offsets = [0, 14, 0], sizes = [2, 1, 16], strides = [1, 1, 1]} : vector<2x16x16xf32> to vector<2x1x16xf32>
    %c0_61 = arith.constant 0 : index
    %c0_62 = arith.constant 0 : index
    %c224 = arith.constant 224 : index
    %548 = vector.load %arg3[%c0_61, %c0_62, %c224] : memref<2x1x256xf32, #tpu.memory_space<vmem>>, vector<2x1x16xf32>
    tpu.vector_store %arg3[%c0_61, %c0_62, %c224], %547 {strides = array<i32>} : memref<2x1x256xf32, #tpu.memory_space<vmem>>, vector<2x1x16xf32>,
    %549 = vector.extract_strided_slice %518 {offsets = [0, 15, 0], sizes = [2, 1, 16], strides = [1, 1, 1]} : vector<2x16x16xf32> to vector<2x1x16xf32>
    %c0_63 = arith.constant 0 : index
    %c0_64 = arith.constant 0 : index
    %c240 = arith.constant 240 : index
    %550 = vector.load %arg3[%c0_63, %c0_64, %c240] : memref<2x1x256xf32, #tpu.memory_space<vmem>>, vector<2x1x16xf32>
    tpu.vector_store %arg3[%c0_63, %c0_64, %c240], %549 {strides = array<i32>} : memref<2x1x256xf32, #tpu.memory_space<vmem>>, vector<2x1x16xf32>,
    return
  }
  func.func @transform_0(%arg0: i32) -> i32 {
    %c0_i32 = arith.constant 0 : i32
    %c0_i32_0 = arith.constant 0 : i32
    return %c0_i32 : i32
  }
  func.func @transform_1(%arg0: i32) -> (i32, i32, i32, i32) {
    %c0_i32 = arith.constant 0 : i32
    %c0_i32_0 = arith.constant 0 : i32
    %c0_i32_1 = arith.constant 0 : i32
    %c0_i32_2 = arith.constant 0 : i32
    return %arg0, %c0_i32, %c0_i32_0, %c0_i32_1 : i32, i32, i32, i32
  }
  func.func @transform_2(%arg0: i32) -> (i32, i32, i32) {
    %c0_i32 = arith.constant 0 : i32
    %c0_i32_0 = arith.constant 0 : i32
    %c0_i32_1 = arith.constant 0 : i32
    return %arg0, %c0_i32, %c0_i32_0 : i32, i32, i32
  }
}

</mosaic_0001>

<bundles_post_ra>
// kernel: tpu_custom_call.1
= control target key start
LH: loop header
LB: loop body
LE: loop exit
PB: predicated region body
PF: predicated region fallthrough
CT: control target
= control target key end

     0   :  { %7 = vsyncpa [#allocation7], 0  ;;  %s7770_s0 = inlined_call_operand.hbm [shape: f32[98], index: 0, kind: input, shape index: {}]   ;;  %s7771_s1 = inlined_call_operand.hbm [shape: f32[2,4,16,16], index: 1, kind: input, shape index: {}]   ;;  %s7772_s2 = inlined_call_operand.hbm [shape: f32[2,1,256], index: 2, kind: output, shape index: {}]  }
   0x1   :  { %8 = vsyncpa [#allocation5], 0 }
   0x2   :  { %9 = vsyncpa [#allocation6], 0  ;;  %s4527_s11 = scalar_lea.hbm %s7770_s0, 16 }
   0x3   :  { %p4528_p0 = scmp.ne.s32.totalorder %s7770_s0, %s4527_s11  ;;  %p4531_p1 = scmp.lt.u32.totalorder %s4527_s11, %s7770_s0 }
   0x5   :  { %p4533_p2 = pnand %p4531_p1, %p4528_p0 }
   0x7   :  { %4536 = shalt.err (!%p4533_p2)
}
   0x8   :  { %s4587_s16 = smov [#allocation4]   ;;  %s4588_s19 = smov [#allocation8]  }
   0x9   :  { %17 = dma.hbm_to_smem %s7770_s0, 16, %s4587_s16, [#allocation7]  }
   0xa   :  { %s23_s20 = sshll.u32 %s4588_s19, 4  ;;  %s4537_s23 = scalar_lea.hbm %s7771_s1, 2048  ;;  %s24_s20 = int_to_ptr.vmem [resolvable:$true] %s23_s20 }
   0xb   :  { %p4538_p3 = scmp.ne.s32.totalorder %s7771_s1, %s4537_s23  ;;  %p4541_p4 = scmp.lt.u32.totalorder %s4537_s23, %s7771_s1 }
   0xd   :  { %p4543_p5 = pnand %p4541_p4, %p4538_p3 }
   0xf   :  { %4546 = shalt.err (!%p4543_p5)
}
  0x10   :  { %s4547_s28 = scalar_lea.vmem %s24_s20, 2048  ;;  %p4552_p7 = scmp.lt.s32.totalorder %s24_s20, %s24_s20 }
  0x11   :  { %p4548_p6 = scmp.ne.s32.totalorder %s24_s20, %s4547_s28  ;;  %p4553_p8 = scmp.lt.s32.totalorder %s4547_s28, %s4547_s28 }
  0x13   :  { %p4554_p9 = por %p4553_p8, %p4552_p7 }
  0x15   :  { %p4555_p10 = pnand %p4554_p9, %p4548_p6 }
  0x17   :  { %4558 = shalt.err (!%p4555_p10)
}
  0x18   :  { %s4589_s0 = smov 128   ;;  %s4590_s29 = smov 8  }
  0x19   :  { %29 = dma.hbm_to_vmem [thread:$0]  %s7771_s1, 2048, %s24_s20, [#allocation5], %s4589_s0, %s4589_s0, %s4590_s29  }
  0x1a   :  { %4581 = dma.done.wait [#allocation7], 16  }
  0x1b   :  { %4582 = vsyncadd [#allocation7], 4294967280 }
  0x1c   :  { %4583 = dma.done.wait [#allocation5], 2048  }
  0x1d   :  { %4584 = vsyncadd [#allocation5], 4294965248 }
  0x1e   :  { %36 = sfence }
  0x1f   :  { %v45_v0 = vld [vmem:[#allocation8 + $0x40] sm:$0xff]  ;;  %v47_v1 = vld [vmem:[#allocation8 + $0x50] sm:$0xff]  ;;  %vm53_vm0 = vcmask 130048   ;;  %v46_v19 = vld [vmem:[#allocation8 + $0x48] sm:$0xff]  ;;  %vm110_vm1 = vcmask 179200   ;;  %s4591_s1 = smov 3  }
  0x20   :  { %v49_v2 = vld [vmem:[#allocation8 + $0x60] sm:$0xff]  ;;  %v4648_v3 = vld [vmem:[#allocation8 + $0x70] sm:$0xff]  ;;  %v68_v4 = vsel %vm53_vm0, %v45_v0, 0.0  ;;  %v69_v5 = vsel %vm53_vm0, %v47_v1, 0.0  ;;  %v4656_v10 = vsel %vm53_vm0, %v45_v0, -inf  ;;  %v4659_v11 = vsel %vm53_vm0, %v47_v1, -inf }
  0x21   :  { %v71_v6 = vsel %vm53_vm0, %v49_v2, 0.0  ;;  %v37_v7 = vld [vmem:[#allocation8] sm:$0xff]  ;;  %v70_v8 = vadd.f32 %v69_v5, %v68_v4  ;;  %v73_v9 = vsel %vm53_vm0, %v4648_v3, 0.0  ;;  %v39_v12 = vld [vmem:[#allocation8 + $0x10] sm:$0xff]  ;;  %v4662_v15 = vsel %vm53_vm0, %v49_v2, -inf  ;;  %v48_v20 = vld [vmem:[#allocation8 + $0x58] sm:$0xff] }
  0x22   :  { %v41_v13 = vld [vmem:[#allocation8 + $0x20] sm:$0xff]  ;;  %v43_v14 = vld [vmem:[#allocation8 + $0x30] sm:$0xff]  ;;  %v54_v16 = vsel %vm53_vm0, %v37_v7, 0.0  ;;  %v55_v17 = vsel %vm53_vm0, %v39_v12, 0.0  ;;  %v82_v24 = vsel %vm53_vm0, %v37_v7, -inf  ;;  %v50_v25 = vld [vmem:[#allocation8 + $0x68] sm:$0xff]  ;;  %v98_v0 = vmax.f32 %v4656_v10, %v4659_v11 }
  0x23   :  { %v57_v18 = vsel %vm53_vm0, %v41_v13, 0.0  ;;  %v72_v21 = vadd.f32 %v71_v6, %v70_v8  ;;  %v56_v22 = vadd.f32 %v55_v17, %v54_v16  ;;  %v59_v23 = vsel %vm53_vm0, %v43_v14, 0.0  ;;  %v52_v26 = vld [vmem:[#allocation8 + $0x78] sm:$0xff]  ;;  %v38_v27 = vld [vmem:[#allocation8 + $0x8] sm:$0xff]  ;;  %s4340_s4 = sld [smem:[#allocation4 + $0x1]]  ;;  %s4389_s5 = sld [smem:[#allocation4 + $0x32]] }
  0x24   :  { %v83_v28 = vsel %vm53_vm0, %v39_v12, -inf  ;;  %v85_v29 = vsel %vm53_vm0, %v41_v13, -inf  ;;  %v87_v30 = vsel %vm53_vm0, %v43_v14, -inf  ;;  %v75_v31 = vsel %vm53_vm0, %v46_v19, 0.0  ;;  %v40_v32 = vld [vmem:[#allocation8 + $0x18] sm:$0xff]  ;;  %v42_v33 = vld [vmem:[#allocation8 + $0x28] sm:$0xff] }
  0x25   :  { %v74_v34 = vadd.f32 %v73_v9, %v72_v21  ;;  %v58_v35 = vadd.f32 %v57_v18, %v56_v22  ;;  %v76_v36 = vsel %vm53_vm0, %v48_v20, 0.0  ;;  %v78_v37 = vsel %vm53_vm0, %v50_v25, 0.0  ;;  %v44_v38 = vld [vmem:[#allocation8 + $0x38] sm:$0xff]  ;;  %s4593_s6 = smov 127   ;;  %s4347_s7 = sld [smem:[#allocation4 + $0x8]] }
  0x26   :  { %v77_v39 = vadd.f32 %v76_v36, %v75_v31  ;;  %v80_v40 = vsel %vm53_vm0, %v52_v26, 0.0  ;;  %v61_v41 = vsel %vm53_vm0, %v38_v27, 0.0  ;;  %v62_v42 = vsel %vm53_vm0, %v40_v32, 0.0  ;;  %s4396_s8 = sld [smem:[#allocation4 + $0x39]]  ;;  %s4361_s9 = sld [smem:[#allocation4 + $0x16]] }
  0x27   :  { %132 = vrot.lane.b32.xlu1 %v74_v34, %s4591_s1  ;;  %v60_v43 = vadd.f32 %v59_v23, %v58_v35  ;;  %v63_v44 = vadd.f32 %v62_v42, %v61_v41  ;;  %v64_v45 = vsel %vm53_vm0, %v42_v33, 0.0  ;;  %v66_v46 = vsel %vm53_vm0, %v44_v38, 0.0  ;;  %s4410_s10 = sld [smem:[#allocation4 + $0x47]]  ;;  %s4375_s11 = sld [smem:[#allocation4 + $0x24]] }
  0x28   :  { %v79_v47 = vadd.f32 %v78_v37, %v77_v39  ;;  %v89_v48 = vsel %vm53_vm0, %v38_v27, -inf  ;;  %v90_v49 = vsel %vm53_vm0, %v40_v32, -inf  ;;  %v92_v50 = vsel %vm53_vm0, %v42_v33, -inf  ;;  %s4424_s12 = sld [smem:[#allocation4 + $0x55]]  ;;  %s4354_s13 = sld [smem:[#allocation4 + $0xf]] }
  0x29   :  { %128 = vrot.lane.b32.xlu0 %v60_v43, %s4591_s1  ;;  %v65_v51 = vadd.f32 %v64_v45, %v63_v44  ;;  %v91_v52 = vmax.f32 %v89_v48, %v90_v49  ;;  %v94_v53 = vsel %vm53_vm0, %v44_v38, -inf  ;;  %v84_v54 = vmax.f32 %v82_v24, %v83_v28  ;;  %s4403_s14 = sld [smem:[#allocation4 + $0x40]]  ;;  %s4368_s15 = sld [smem:[#allocation4 + $0x1d]] }
  0x2a   :  { %v81_v55 = vadd.f32 %v80_v40, %v79_v47  ;;  %v103_v56 = vsel %vm53_vm0, %v46_v19, -inf  ;;  %v104_v57 = vsel %vm53_vm0, %v48_v20, -inf  ;;  %v106_v58 = vsel %vm53_vm0, %v50_v25, -inf  ;;  %s4417_s16 = sld [smem:[#allocation4 + $0x4e]]  ;;  %s4382_s17 = sld [smem:[#allocation4 + $0x2b]] }
  0x2b   :  { %v67_v59 = vadd.f32 %v66_v46, %v65_v51  ;;  %v93_v60 = vmax.f32 %v91_v52, %v92_v50  ;;  %v86_v61 = vmax.f32 %v84_v54, %v85_v29  ;;  %v105_v62 = vmax.f32 %v103_v56, %v104_v57  ;;  %s4431_s18 = sld [smem:[#allocation4 + $0x5c]]  ;;  %s4341_s19 = sld [smem:[#allocation4 + $0x2]] }
  0x2c   :  { %134 = vrot.lane.b32.xlu1 %v81_v55, %s4591_s1  ;;  %v108_v63 = vsel %vm53_vm0, %v52_v26, -inf  ;;  %v4592_v5 = vmov 0.0   ;;  %vm113_vm2 = vcmask 177152   ;;  %v101_v6 = vsel %vm53_vm0, %v4648_v3, -inf  ;;  %s4390_s20 = sld [smem:[#allocation4 + $0x33]]  ;;  %s4594_s21 = smov 126  }
  0x2d   :  { %130 = vrot.lane.b32.xlu0 %v67_v59, %s4591_s1  ;;  %v95_v1 = vmax.f32 %v93_v60, %v94_v53  ;;  %v88_v2 = vmax.f32 %v86_v61, %v87_v30  ;;  %v107_v4 = vmax.f32 %v105_v62, %v106_v58  ;;  %115 = vst.msk [vmem:[#allocation2 + $0x18] sm:$0xff] %vm110_vm1, %v4592_v5  ;;  %116 = vst.msk [vmem:[#allocation2 + $0x20] sm:$0xff] %vm110_vm1, %v4592_v5  ;;  %vm140_vm3 = vcmask 154648   ;;  %s4348_s22 = sld [smem:[#allocation4 + $0x9]]  ;;  %s4397_s23 = sld [smem:[#allocation4 + $0x3a]] }
  0x2e   :  { %111 = vst.msk [vmem:[#allocation2] sm:$0xff] %vm110_vm1, %v4592_v5  ;;  %112 = vst.msk [vmem:[#allocation2 + $0x8] sm:$0xff] %vm110_vm1, %v4592_v5  ;;  %v100_v7 = vmax.f32 %v98_v0, %v4662_v15  ;;  %v628_v13 = vstv %s4340_s4  ;;  %v633_v25 = vstv %s4389_s5  ;;  %v678_v34 = vstv %s4347_s7  ;;  %s4355_s24 = sld [smem:[#allocation4 + $0x10]]  ;;  %s4404_s25 = sld [smem:[#allocation4 + $0x41]] }
  0x2f   :  { %118 = vst.msk [vmem:[#allocation3] sm:$0xff] %vm110_vm1, %v4592_v5  ;;  %119 = vst.msk [vmem:[#allocation3 + $0x8] sm:$0xff] %vm110_vm1, %v4592_v5  ;;  %v109_v8 = vmax.f32 %v107_v4, %v108_v63  ;;  %v685_v42 = vstv %s4396_s8  ;;  %v4773_v49 = vstv %s4361_s9  ;;  %v4781_v53 = vstv %s4410_s10  ;;  %s4362_s26 = sld [smem:[#allocation4 + $0x17]]  ;;  %s4411_s27 = sld [smem:[#allocation4 + $0x48]] }
  0x30   :  { %121 = vst.msk [vmem:[#allocation3 + $0x18] sm:$0xff] %vm110_vm1, %v4592_v5  ;;  %122 = vst.msk [vmem:[#allocation3 + $0x20] sm:$0xff] %vm110_vm1, %v4592_v5  ;;  %151 = vrot.lane.b32.xlu1 %v95_v1, %s4591_s1  ;;  %v102_v9 = vmax.f32 %v100_v7, %v101_v6  ;;  %v4801_v59 = vstv %s4375_s11  ;;  %v4813_v0 = vstv %s4424_s12  ;;  %v752_v1 = vstv %s4354_s13  ;;  %s4369_s28 = sld [smem:[#allocation4 + $0x1e]]  ;;  %s4418_s0 = sld [smem:[#allocation4 + $0x4f]] }
  0x31   :  { %117 = vst.msk [vmem:[#allocation2 + $0x28] sm:$0x3f] %vm113_vm2, %v4592_v5  ;;  %114 = vst.msk [vmem:[#allocation2 + $0x10] sm:$0x3f] %vm113_vm2, %v4592_v5  ;;  %149 = vrot.lane.b32.xlu0 %v88_v2, %s4591_s1  ;;  %vm319_vm4 = vcmask 1045504   ;;  %vm452_vm5 = vcmask 1043456  }
  0x32   :  { %120 = vst.msk [vmem:[#allocation3 + $0x10] sm:$0x3f] %vm113_vm2, %v4592_v5  ;;  %123 = vst.msk [vmem:[#allocation3 + $0x28] sm:$0x3f] %vm113_vm2, %v4592_v5  ;;  %vm585_vm6 = vcmask 1041408   ;;  %s4376_s29 = sld [smem:[#allocation4 + $0x25]] }
  0x33   :  { %s4425_s30 = sld [smem:[#allocation4 + $0x56]]  ;;  %s4383_s3 = sld [smem:[#allocation4 + $0x2c]]  ;;  %vm3910_vm7 = vcmask 1046528  }
  0x34   :  { %155 = vrot.lane.b32.xlu1 %v109_v8, %s4591_s1  ;;  %s4342_s4 = sld [smem:[#allocation4 + $0x3]]  ;;  %s4391_s5 = sld [smem:[#allocation4 + $0x34]] }
  0x35   :  { %153 = vrot.lane.b32.xlu0 %v102_v9, %s4591_s1  ;;  %s4432_s1 = sld [smem:[#allocation4 + $0x5d]]  ;;  %s4349_s7 = sld [smem:[#allocation4 + $0xa]] }
  0x36   :  { %s4398_s8 = sld [smem:[#allocation4 + $0x3b]]  ;;  %s4356_s9 = sld [smem:[#allocation4 + $0x11]] }
  0x37   :  { %s4405_s10 = sld [smem:[#allocation4 + $0x42]]  ;;  %s4363_s11 = sld [smem:[#allocation4 + $0x18]] }
  0x38   :  { %s4412_s12 = sld [smem:[#allocation4 + $0x49]]  ;;  %s4370_s13 = sld [smem:[#allocation4 + $0x1f]] }
  0x99   :  { %v133_v10 = vpop.permute.xlu1 %132 }
  0x9a   :  { %143 = vst.msk [vmem:[#allocation2 + $0x1b] sm:$0xff] %vm140_vm3, %v133_v10 }
  0x9b   :  { %v129_v3 = vpop.permute.xlu0 %128 }
  0x9c   :  { %141 = vst.msk [vmem:[#allocation2 + $0x3] sm:$0xff] %vm140_vm3, %v129_v3 }
  0x9e   :  { %v135_v11 = vpop.permute.xlu1 %134 }
  0x9f   :  { %144 = vst.msk [vmem:[#allocation2 + $0x23] sm:$0xff] %vm140_vm3, %v135_v11  ;;  %v131_v12 = vpop.permute.xlu0 %130 }
  0xa0   :  { %142 = vst.msk [vmem:[#allocation2 + $0xb] sm:$0xff] %vm140_vm3, %v131_v12 }
  0xa1   :  { %v4713_v15 = vld [vmem:[#allocation2 + $0x18] sm:$0xff] }
  0xa2   :  { %v152_v14 = vpop.permute.xlu1 %151  ;;  %v631_v20 = vmul.f32 %v628_v13, %v4713_v15  ;;  %v682_v40 = vmul.f32 %v678_v34, %v4713_v15 }
  0xa3   :  { %v4715_v16 = vld [vmem:[#allocation2] sm:$0xff]  ;;  %162 = vst.msk [vmem:[#allocation3 + $0xb] sm:$0xff] %vm140_vm3, %v152_v14  ;;  %v150_v17 = vpop.permute.xlu0 %149 }
  0xa4   :  { %161 = vst.msk [vmem:[#allocation3 + $0x3] sm:$0xff] %vm140_vm3, %v150_v17  ;;  %v629_v18 = vmul.f32 %v628_v13, %v4715_v16  ;;  %v679_v36 = vmul.f32 %v678_v34, %v4715_v16  ;;  %v753_v8 = vmul.f32 %v752_v1, %v4715_v16  ;;  %v759_v17 = vstv %s4403_s14  ;;  %s4419_s14 = sld [smem:[#allocation4 + $0x50]] }
  0xa6   :  { %642 = vrot.lane.b32.xlu0 %v629_v18, %s4593_s6  ;;  %v156_v19 = vpop.permute.xlu1 %155  ;;  %v4727_v24 = vld [vmem:[#allocation2 + $0x20] sm:$0xff]  ;;  %v4761_v43 = vld [vmem:[#allocation2 + $0x28] sm:$0x3f]  ;;  %v772_v18 = vrot.slane %v753_v8, 2 }
  0xa7   :  { %v4722_v21 = vld [vmem:[#allocation2 + $0x8] sm:$0xff]  ;;  %164 = vst.msk [vmem:[#allocation3 + $0x23] sm:$0xff] %vm140_vm3, %v156_v19  ;;  %v154_v22 = vpop.permute.xlu0 %153  ;;  %v632_v27 = vmul.f32 %v628_v13, %v4727_v24  ;;  %v4749_v37 = vld [vmem:[#allocation2 + $0x10] sm:$0x3f]  ;;  %v683_v41 = vmul.f32 %v678_v34, %v4727_v24  ;;  %v684_v44 = vmul.f32 %v678_v34, %v4761_v43  ;;  %v4791_v57 = vmul.f32 %v4773_v49, %v4761_v43 }
  0xa8   :  { %163 = vst.msk [vmem:[#allocation3 + $0x1b] sm:$0xff] %vm140_vm3, %v154_v22  ;;  %v630_v23 = vmul.f32 %v628_v13, %v4722_v21  ;;  %v680_v38 = vmul.f32 %v678_v34, %v4722_v21  ;;  %v681_v39 = vmul.f32 %v678_v34, %v4749_v37  ;;  %v4779_v52 = vmul.f32 %v4773_v49, %v4749_v37 }
  0xa9   :  { %v858_v60 = vrot.slane %v4791_v57, 2  ;;  %v4811_v63 = vmul.f32 %v4801_v59, %v4749_v37  ;;  %v4825_v5 = vmul.f32 %v4801_v59, %v4761_v43  ;;  %v754_v7 = vmul.f32 %v752_v1, %v4722_v21 }
  0xaa   :  { %646 = vrot.lane.b32.xlu0 %v631_v20, %s4593_s6  ;;  %644 = vrot.lane.b32.xlu1 %v630_v23, %s4593_s6  ;;  %v4767_v46 = vld [vmem:[#allocation3 + $0x10] sm:$0x3f]  ;;  %v853_v56 = vrot.slane %v4779_v52, 2  ;;  %v755_v11 = vmul.f32 %v752_v1, %v4749_v37  ;;  %v756_v13 = vmul.f32 %v752_v1, %v4713_v15  ;;  %v757_v14 = vmul.f32 %v752_v1, %v4727_v24 }
  0xab   :  { %v4731_v26 = vld [vmem:[#allocation3] sm:$0xff]  ;;  %v4735_v29 = vld [vmem:[#allocation3 + $0x8] sm:$0xff]  ;;  %v688_v48 = vmul.f32 %v685_v42, %v4767_v46  ;;  %v4795_v58 = vmul.f32 %v4781_v53, %v4767_v46  ;;  %v1025_v4 = vrot.slane %v4811_v63, 4  ;;  %v4829_v6 = vmul.f32 %v4813_v0, %v4767_v46 }
  0xac   :  { %v634_v28 = vmul.f32 %v633_v25, %v4731_v26  ;;  %v635_v31 = vmul.f32 %v633_v25, %v4735_v29  ;;  %v686_v45 = vmul.f32 %v685_v42, %v4731_v26  ;;  %v687_v47 = vmul.f32 %v685_v42, %v4735_v29 }
  0xad   :  { %v893_v61 = vrot.slane %v4795_v58, 2  ;;  %v1030_v9 = vrot.slane %v4825_v5, 4  ;;  %v1065_v10 = vrot.slane %v4829_v6, 4  ;;  %v773_v12 = vrot.slane %v754_v7, 2 }
  0xae   :  { %648 = vrot.lane.b32.xlu1 %v632_v27, %s4593_s6  ;;  %662 = vrot.lane.b32.xlu0 %v634_v28, %s4593_s6  ;;  %v4785_v54 = vld [vmem:[#allocation3 + $0x28] sm:$0x3f]  ;;  %v758_v19 = vmul.f32 %v752_v1, %v4761_v43  ;;  %v775_v22 = vrot.slane %v755_v11, 2  ;;  %v760_v23 = vmul.f32 %v759_v17, %v4731_v26  ;;  %v777_v28 = vrot.slane %v756_v13, 2 }
  0xaf   :  { %v4739_v30 = vld [vmem:[#allocation3 + $0x18] sm:$0xff]  ;;  %v4743_v33 = vld [vmem:[#allocation3 + $0x20] sm:$0xff]  ;;  %v691_v55 = vmul.f32 %v685_v42, %v4785_v54  ;;  %v4807_v62 = vmul.f32 %v4781_v53, %v4785_v54  ;;  %v4843_v3 = vmul.f32 %v4813_v0, %v4785_v54  ;;  %v774_v27 = vsel %vm319_vm4, %v772_v18, %v773_v12 }
  0xb0   :  { %v636_v32 = vmul.f32 %v633_v25, %v4739_v30  ;;  %v637_v35 = vmul.f32 %v633_v25, %v4743_v33  ;;  %v689_v50 = vmul.f32 %v685_v42, %v4739_v30  ;;  %v690_v51 = vmul.f32 %v685_v42, %v4743_v33 }
  0xb1   :  { %v898_v2 = vrot.slane %v4807_v62, 2  ;;  %v1070_v20 = vrot.slane %v4843_v3, 4  ;;  %v761_v25 = vmul.f32 %v759_v17, %v4735_v29  ;;  %v780_v34 = vrot.slane %v758_v19, 2 }
  0xb2   :  { %664 = vrot.lane.b32.xlu1 %v635_v31, %s4593_s6  ;;  %666 = vrot.lane.b32.xlu0 %v636_v32, %s4593_s6  ;;  %v778_v31 = vrot.slane %v757_v14, 2  ;;  %v776_v32 = vsel %vm319_vm4, %v773_v12, %v775_v22  ;;  %v835_v1 = vmul.f32 %v4773_v49, %v4727_v24  ;;  %v838_v22 = vmul.f32 %v4781_v53, %v4731_v26 }
  0xb3   :  { %v841_v52 = vmul.f32 %v4781_v53, %v4739_v30  ;;  %v1013_v63 = vmul.f32 %v4813_v0, %v4739_v30 }
  0xb4   :  { %v781_v42 = vsel %vm319_vm4, %v778_v31, %v780_v34  ;;  %v856_v14 = vrot.slane %v835_v1, 2 }
  0xb6   :  { %668 = vrot.lane.b32.xlu1 %v637_v35, %s4593_s6  ;;  %698 = vrot.lane.b32.xlu0 %v679_v36, %s4593_s6  ;;  %v804_v35 = vrot.slane %v760_v23, 2  ;;  %v805_v36 = vrot.slane %v761_v25, 2  ;;  %v839_v23 = vmul.f32 %v4781_v53, %v4735_v29 }
  0xba   :  { %700 = vrot.lane.b32.xlu1 %v680_v38, %s4593_s6  ;;  %702 = vrot.lane.b32.xlu0 %v681_v39, %s4593_s6  ;;  %v779_v38 = vsel %vm319_vm4, %v777_v28, %v778_v31  ;;  %v762_v39 = vmul.f32 %v759_v17, %v4767_v46  ;;  %v859_v28 = vsel %vm319_vm4, %v856_v14, %v858_v60  ;;  %v890_v31 = vrot.slane %v838_v22, 2 }
  0xbe   :  { %704 = vrot.lane.b32.xlu1 %v682_v40, %s4593_s6  ;;  %706 = vrot.lane.b32.xlu0 %v683_v41, %s4593_s6  ;;  %v763_v40 = vmul.f32 %v759_v17, %v4739_v30  ;;  %v764_v41 = vmul.f32 %v759_v17, %v4743_v33 }
  0xc2   :  { %708 = vrot.lane.b32.xlu1 %v684_v44, %s4593_s6  ;;  %728 = vrot.lane.b32.xlu0 %v686_v45, %s4593_s6  ;;  %v806_v44 = vsel %vm319_vm4, %v804_v35, %v805_v36  ;;  %v765_v45 = vmul.f32 %v759_v17, %v4785_v54  ;;  %v834_v17 = vmul.f32 %v4773_v49, %v4713_v15  ;;  %v924_v35 = vstv %s4368_s15  ;;  %s4377_s15 = sld [smem:[#allocation4 + $0x26]] }
  0xc3   :  { %v925_v57 = vmul.f32 %v924_v35, %v4715_v16  ;;  %v930_v58 = vmul.f32 %v924_v35, %v4761_v43 }
  0xc4   :  { %v812_v11 = vrot.slane %v765_v45, 2  ;;  %v855_v25 = vrot.slane %v834_v17, 2  ;;  %v931_v45 = vstv %s4417_s16  ;;  %s4426_s16 = sld [smem:[#allocation4 + $0x57]] }
  0xc5   :  { %v936_v17 = vmul.f32 %v931_v45, %v4743_v33  ;;  %v937_v22 = vmul.f32 %v931_v45, %v4785_v54 }
  0xc6   :  { %730 = vrot.lane.b32.xlu1 %v687_v47, %s4593_s6  ;;  %732 = vrot.lane.b32.xlu0 %v688_v48, %s4593_s6  ;;  %v807_v47 = vrot.slane %v762_v39, 2  ;;  %v809_v48 = vrot.slane %v763_v40, 2  ;;  %v857_v34 = vsel %vm319_vm4, %v855_v25, %v856_v14  ;;  %v928_v39 = vmul.f32 %v924_v35, %v4713_v15 }
  0xc7   :  { %v929_v40 = vmul.f32 %v924_v35, %v4727_v24  ;;  %v935_v14 = vmul.f32 %v931_v45, %v4739_v30 }
  0xc8   :  { %v808_v7 = vsel %vm319_vm4, %v805_v36, %v807_v47  ;;  %v944_v47 = vrot.slane %v925_v57, 4 }
  0xc9   :  { %v981_v25 = vrot.slane %v935_v14, 4 }
  0xca   :  { %734 = vrot.lane.b32.xlu1 %v689_v50, %s4593_s6  ;;  %736 = vrot.lane.b32.xlu0 %v690_v51, %s4593_s6  ;;  %v810_v50 = vrot.slane %v764_v41, 2  ;;  %v832_v51 = vmul.f32 %v4773_v49, %v4722_v21 }
  0xcc   :  { %v811_v8 = vsel %vm319_vm4, %v809_v48, %v810_v50  ;;  %v851_v12 = vrot.slane %v832_v51, 2  ;;  %v813_v18 = vsel %vm319_vm4, %v810_v50, %v812_v11  ;;  %v949_v50 = vrot.slane %v928_v39, 4 }
  0xcd   :  { %v950_v51 = vrot.slane %v929_v40, 4  ;;  %v934_v11 = vmul.f32 %v931_v45, %v4767_v46  ;;  %v1011_v40 = vmul.f32 %v4813_v0, %v4735_v29 }
  0xce   :  { %738 = vrot.lane.b32.xlu1 %v691_v55, %s4593_s6  ;;  %864 = vrot.lane.b32.xlu0 %v853_v56, %s4593_s6  ;;  %v831_v55 = vmul.f32 %v4773_v49, %v4715_v16  ;;  %v854_v49 = vsel %vm319_vm4, %v851_v12, %v853_v56  ;;  %v926_v56 = vmul.f32 %v924_v35, %v4722_v21 }
  0xd0   :  { %v850_v13 = vrot.slane %v831_v55, 2  ;;  %v933_v55 = vmul.f32 %v931_v45, %v4735_v29 }
  0xd2   :  { %870 = vrot.lane.b32.xlu1 %v858_v60, %s4593_s6  ;;  %904 = vrot.lane.b32.xlu0 %v893_v61, %s4593_s6  ;;  %v852_v19 = vsel %vm319_vm4, %v850_v13, %v851_v12  ;;  %v927_v60 = vmul.f32 %v924_v35, %v4749_v37  ;;  %v977_v13 = vrot.slane %v933_v55, 4 }
  0xd4   :  { %v947_v48 = vrot.slane %v927_v60, 4 }
  0xd6   :  { %910 = vrot.lane.b32.xlu1 %v898_v2, %s4593_s6  ;;  %1036 = vrot.lane.b32.xlu0 %v1025_v4, %s4593_s6 }
  0xda   :  { %1042 = vrot.lane.b32.xlu1 %v1030_v9, %s4593_s6  ;;  %1076 = vrot.lane.b32.xlu0 %v1065_v10, %s4593_s6 }
  0xde   :  { %1082 = vrot.lane.b32.xlu1 %v1070_v20, %s4593_s6  ;;  %782 = vrot.lane.b32.xlu0 %v774_v27, %s4593_s6  ;;  %v842_v27 = vmul.f32 %v4781_v53, %v4743_v33 }
  0xe2   :  { %784 = vrot.lane.b32.xlu1 %v776_v32, %s4593_s6  ;;  %786 = vrot.lane.b32.xlu0 %v779_v38, %s4593_s6  ;;  %v891_v32 = vrot.slane %v839_v23, 2  ;;  %v896_v38 = vrot.slane %v842_v27, 2  ;;  %v982_v27 = vrot.slane %v936_v17, 4 }
  0xe4   :  { %v892_v36 = vsel %vm319_vm4, %v890_v31, %v891_v32  ;;  %v894_v41 = vsel %vm319_vm4, %v891_v32, %v893_v61  ;;  %v899_v53 = vsel %vm319_vm4, %v896_v38, %v898_v2  ;;  %v932_v2 = vmul.f32 %v931_v45, %v4731_v26 }
  0xe5   :  { %v983_v32 = vsel %vm452_vm5, %v981_v25, %v982_v27  ;;  %v1063_v45 = vrot.slane %v1011_v40, 4 }
  0xe6   :  { %788 = vrot.lane.b32.xlu1 %v781_v42, %s4593_s6  ;;  %814 = vrot.lane.b32.xlu0 %v806_v44, %s4593_s6  ;;  %v895_v42 = vrot.slane %v841_v52, 2  ;;  %v945_v44 = vrot.slane %v926_v56, 4  ;;  %v976_v12 = vrot.slane %v932_v2, 4  ;;  %v1006_v52 = vmul.f32 %v4801_v59, %v4713_v15 }
  0xe7   :  { %v1010_v56 = vmul.f32 %v4813_v0, %v4731_v26  ;;  %v1067_v2 = vrot.slane %v1013_v63, 4 }
  0xe8   :  { %v897_v61 = vsel %vm319_vm4, %v895_v42, %v896_v38  ;;  %v946_v62 = vsel %vm452_vm5, %v944_v47, %v945_v44  ;;  %v948_v1 = vsel %vm452_vm5, %v945_v44, %v947_v48  ;;  %v978_v23 = vsel %vm452_vm5, %v976_v12, %v977_v13 }
  0xe9   :  { %v1062_v44 = vrot.slane %v1010_v56, 4  ;;  %v1096_v48 = vstv %s4382_s17  ;;  %s4384_s17 = sld [smem:[#allocation4 + $0x2d]] }
  0xea   :  { %816 = vrot.lane.b32.xlu1 %v808_v7, %s4593_s6  ;;  %818 = vrot.lane.b32.xlu0 %v811_v8, %s4593_s6  ;;  %v951_v7 = vsel %vm452_vm5, %v949_v50, %v950_v51  ;;  %v952_v8 = vrot.slane %v930_v58, 4  ;;  %v1097_v5 = vmul.f32 %v1096_v48, %v4715_v16  ;;  %v1066_v58 = vsel %vm452_vm5, %v1063_v45, %v1065_v10 }
  0xec   :  { %v1116_v6 = vrot.slane %v1097_v5, 6 }
  0xee   :  { %820 = vrot.lane.b32.xlu1 %v813_v18, %s4593_s6  ;;  %860 = vrot.lane.b32.xlu0 %v852_v19, %s4593_s6  ;;  %v953_v18 = vsel %vm452_vm5, %v950_v51, %v952_v8  ;;  %v979_v19 = vrot.slane %v934_v11, 4  ;;  %v1064_v51 = vsel %vm452_vm5, %v1062_v44, %v1063_v45  ;;  %v1102_v8 = vmul.f32 %v1096_v48, %v4761_v43 }
  0xef   :  { %v1174_v44 = vstv %s4341_s19  ;;  %s4343_s19 = sld [smem:[#allocation4 + $0x4]] }
  0xf0   :  { %v980_v31 = vsel %vm452_vm5, %v977_v13, %v979_v19  ;;  %v1124_v25 = vrot.slane %v1102_v8, 6  ;;  %v1177_v5 = vmul.f32 %v1174_v44, %v4713_v15 }
  0xf2   :  { %862 = vrot.lane.b32.xlu1 %v854_v49, %s4593_s6  ;;  %868 = vrot.lane.b32.xlu0 %v859_v28, %s4593_s6  ;;  %v1004_v49 = vmul.f32 %v4801_v59, %v4722_v21  ;;  %v1003_v28 = vmul.f32 %v4801_v59, %v4715_v16 }
  0xf4   :  { %v1023_v35 = vrot.slane %v1004_v49, 4  ;;  %v1022_v38 = vrot.slane %v1003_v28, 4 }
  0xf6   :  { %866 = vrot.lane.b32.xlu1 %v857_v34, %s4593_s6  ;;  %900 = vrot.lane.b32.xlu0 %v892_v36, %s4593_s6  ;;  %v984_v34 = vrot.slane %v937_v22, 4  ;;  %v1007_v36 = vmul.f32 %v4801_v59, %v4727_v24  ;;  %v1024_v60 = vsel %vm452_vm5, %v1022_v38, %v1023_v35  ;;  %v1014_v59 = vmul.f32 %v4813_v0, %v4743_v33 }
  0xf7   :  { %v1099_v0 = vmul.f32 %v1096_v48, %v4749_v37 }
  0xf8   :  { %v985_v57 = vsel %vm452_vm5, %v982_v27, %v984_v34  ;;  %v1028_v39 = vrot.slane %v1007_v36, 4  ;;  %v1068_v47 = vrot.slane %v1014_v59, 4 }
  0xfa   :  { %902 = vrot.lane.b32.xlu1 %v894_v41, %s4593_s6  ;;  %908 = vrot.lane.b32.xlu0 %v899_v53, %s4593_s6  ;;  %v1027_v41 = vrot.slane %v1006_v52, 4  ;;  %v1026_v53 = vsel %vm452_vm5, %v1023_v35, %v1025_v4  ;;  %v1031_v42 = vsel %vm452_vm5, %v1028_v39, %v1030_v9  ;;  %v1098_v4 = vmul.f32 %v1096_v48, %v4722_v21 }
  0xfb   :  { %v1069_v13 = vsel %vm452_vm5, %v1067_v2, %v1068_v47 }
  0xfc   :  { %v1029_v50 = vsel %vm452_vm5, %v1027_v41, %v1028_v39  ;;  %v1117_v55 = vrot.slane %v1098_v4, 6  ;;  %v1176_v4 = vmul.f32 %v1174_v44, %v4722_v21 }
  0xfe   :  { %906 = vrot.lane.b32.xlu1 %v897_v61, %s4593_s6  ;;  %954 = vrot.lane.b32.xlu0 %v946_v62, %s4593_s6  ;;  %v1071_v61 = vsel %vm452_vm5, %v1068_v47, %v1070_v20  ;;  %v1103_v62 = vstv %s4431_s18  ;;  %v1119_v20 = vrot.slane %v1099_v0, 6  ;;  %v1118_v14 = vsel %vm585_vm6, %v1116_v6, %v1117_v55  ;;  %s4433_s18 = sld [smem:[#allocation4 + $0x5e]] }
  0xff   :  { %v1104_v11 = vmul.f32 %v1103_v62, %v4731_v26  ;;  %v1105_v12 = vmul.f32 %v1103_v62, %v4735_v29  ;;  %v1108_v34 = vmul.f32 %v1103_v62, %v4743_v33  ;;  %v1109_v39 = vmul.f32 %v1103_v62, %v4785_v54 }
 0x101   :  { %v1148_v27 = vrot.slane %v1104_v11, 6  ;;  %v1149_v49 = vrot.slane %v1105_v12, 6 }
 0x102   :  { %956 = vrot.lane.b32.xlu1 %v948_v1, %s4593_s6  ;;  %958 = vrot.lane.b32.xlu0 %v951_v7, %s4593_s6  ;;  %v1100_v1 = vmul.f32 %v1096_v48, %v4713_v15  ;;  %v1101_v7 = vmul.f32 %v1096_v48, %v4727_v24  ;;  %v1175_v48 = vmul.f32 %v1174_v44, %v4715_v16 }
 0x103   :  { %v1150_v52 = vsel %vm585_vm6, %v1148_v27, %v1149_v49 }
 0x104   :  { %v1121_v17 = vrot.slane %v1100_v1, 6 }
 0x106   :  { %960 = vrot.lane.b32.xlu1 %v953_v18, %s4593_s6  ;;  %986 = vrot.lane.b32.xlu0 %v978_v23, %s4593_s6  ;;  %v1122_v18 = vrot.slane %v1101_v7, 6  ;;  %v1120_v23 = vsel %vm585_vm6, %v1117_v55, %v1119_v20  ;;  %v1224_v20 = vstv %s4348_s22  ;;  %s4350_s22 = sld [smem:[#allocation4 + $0xb]] }
 0x108   :  { %v1123_v28 = vsel %vm585_vm6, %v1121_v17, %v1122_v18  ;;  %v1125_v38 = vsel %vm585_vm6, %v1122_v18, %v1124_v25  ;;  %v1226_v18 = vmul.f32 %v1224_v20, %v4722_v21 }
 0x10a   :  { %988 = vrot.lane.b32.xlu1 %v980_v31, %s4593_s6  ;;  %990 = vrot.lane.b32.xlu0 %v983_v32, %s4593_s6  ;;  %v1106_v31 = vmul.f32 %v1103_v62, %v4767_v46  ;;  %v1107_v32 = vmul.f32 %v1103_v62, %v4739_v30  ;;  %v1178_v62 = vmul.f32 %v1174_v44, %v4727_v24 }
 0x10c   :  { %v1151_v56 = vrot.slane %v1106_v31, 6  ;;  %v1231_v31 = vstv %s4397_s23  ;;  %s4399_s23 = sld [smem:[#allocation4 + $0x3c]] }
 0x10e   :  { %992 = vrot.lane.b32.xlu1 %v985_v57, %s4593_s6  ;;  %1032 = vrot.lane.b32.xlu0 %v1024_v60, %s4593_s6  ;;  %v1153_v57 = vrot.slane %v1107_v32, 6  ;;  %v1154_v60 = vrot.slane %v1108_v34, 6  ;;  %v1152_v59 = vsel %vm585_vm6, %v1149_v49, %v1151_v56  ;;  %v1228_v49 = vmul.f32 %v1224_v20, %v4713_v15 }
 0x112   :  { %1034 = vrot.lane.b32.xlu1 %v1026_v53, %s4593_s6  ;;  %1040 = vrot.lane.b32.xlu0 %v1031_v42, %s4593_s6  ;;  %v1155_v53 = vsel %vm585_vm6, %v1153_v57, %v1154_v60  ;;  %v1156_v42 = vrot.slane %v1109_v39, 6  ;;  %v1234_v39 = vmul.f32 %v1231_v31, %v4767_v46 }
 0x116   :  { %1038 = vrot.lane.b32.xlu1 %v1029_v50, %s4593_s6  ;;  %1072 = vrot.lane.b32.xlu0 %v1064_v51, %s4593_s6  ;;  %v1157_v50 = vsel %vm585_vm6, %v1154_v60, %v1156_v42  ;;  %v1233_v60 = vmul.f32 %v1231_v31, %v4735_v29 }
 0x118   :  { %v4981_v9 = vpop.permute.xlu0 %642 }
 0x119   :  { %7794 = vst [vmem:[#allocation13_spill] sm:$0xff] %v4981_v9  ;;  %v5287_v9 = vld [vmem:[#allocation3 + $0x8] sm:$0xff] }
 0x11a   :  { %1074 = vrot.lane.b32.xlu1 %v1066_v58, %s4593_s6  ;;  %1080 = vrot.lane.b32.xlu0 %v1071_v61, %s4593_s6  ;;  %v1179_v58 = vstv %s4390_s20  ;;  %s4392_s20 = sld [smem:[#allocation4 + $0x35]] }
 0x11b   :  { %v1180_v2 = vmul.f32 %v1179_v58, %v4731_v26  ;;  %v1181_v7 = vmul.f32 %v1179_v58, %v4735_v29  ;;  %v1182_v6 = vmul.f32 %v1179_v58, %v4739_v30  ;;  %v1183_v12 = vmul.f32 %v1179_v58, %v4743_v33 }
 0x11c   :  { %v4994_v10 = vpop.permute.xlu1 %644  ;;  %v4996_v3 = vpop.permute.xlu0 %646 }
 0x11d   :  { %7795 = vst [vmem:[#allocation14_spill] sm:$0xff] %v4994_v10  ;;  %7796 = vst [vmem:[#allocation15_spill] sm:$0xff] %v4996_v3  ;;  %v5268_v3 = vld [vmem:[#allocation2 + $0x18] sm:$0xff]  ;;  %v5284_v10 = vld [vmem:[#allocation3] sm:$0xff] }
 0x11e   :  { %1078 = vrot.lane.b32.xlu1 %v1069_v13, %s4593_s6  ;;  %1126 = vrot.lane.b32.xlu0 %v1118_v14, %s4593_s6  ;;  %v1225_v13 = vmul.f32 %v1224_v20, %v4715_v16 }
 0x120   :  { %v5005_v19 = vpop.permute.xlu1 %648  ;;  %v5007_v22 = vpop.permute.xlu0 %662 }
 0x121   :  { %7797 = vst [vmem:[#allocation16_spill] sm:$0xff] %v5005_v19  ;;  %7798 = vst [vmem:[#allocation17_spill] sm:$0xff] %v5007_v22  ;;  %v1470_v22 = vstv %s4369_s28  ;;  %s4371_s28 = sld [smem:[#allocation4 + $0x20]] }
 0x122   :  { %1128 = vrot.lane.b32.xlu1 %v1120_v23, %s4593_s6  ;;  %1130 = vrot.lane.b32.xlu0 %v1123_v28, %s4593_s6  ;;  %v1227_v23 = vmul.f32 %v1224_v20, %v4749_v37  ;;  %v1229_v28 = vmul.f32 %v1224_v20, %v4727_v24 }
 0x124   :  { %v5016_v35 = vpop.permute.xlu1 %664  ;;  %v5018_v36 = vpop.permute.xlu0 %666 }
 0x125   :  { %7799 = vst [vmem:[#allocation18_spill] sm:$0xff] %v5016_v35 }
 0x126   :  { %1132 = vrot.lane.b32.xlu1 %v1125_v38, %s4593_s6  ;;  %1158 = vrot.lane.b32.xlu0 %v1150_v52, %s4593_s6  ;;  %v1230_v38 = vmul.f32 %v1224_v20, %v4761_v43  ;;  %v1232_v52 = vmul.f32 %v1231_v31, %v4731_v26 }
 0x128   :  { %v5025_v40 = vpop.permute.xlu1 %668  ;;  %v5027_v41 = vpop.permute.xlu0 %698 }
 0x12a   :  { %1160 = vrot.lane.b32.xlu1 %v1152_v59, %s4593_s6  ;;  %1162 = vrot.lane.b32.xlu0 %v1155_v53, %s4593_s6  ;;  %v1298_v59 = vstv %s4355_s24  ;;  %s4357_s24 = sld [smem:[#allocation4 + $0x12]] }
 0x12b   :  { %v1300_v53 = vmul.f32 %v1298_v59, %v4722_v21  ;;  %v1299_v42 = vmul.f32 %v1298_v59, %v4715_v16 }
 0x12c   :  { %v5033_v45 = vpop.permute.xlu1 %700  ;;  %v5035_v47 = vpop.permute.xlu0 %702 }
 0x12d   :  { %v1319_v58 = vrot.slane %v1300_v53, 2 }
 0x12e   :  { %1164 = vrot.lane.b32.xlu1 %v1157_v50, %s4593_s6  ;;  %1188 = vrot.lane.b32.xlu0 %v1175_v48, %s4594_s21  ;;  %v1235_v50 = vmul.f32 %v1231_v31, %v4739_v30  ;;  %s4595_s6 = smov 125  }
 0x130   :  { %v5041_v51 = vpop.permute.xlu1 %704  ;;  %v5043_v63 = vpop.permute.xlu0 %706 }
 0x132   :  { %1190 = vrot.lane.b32.xlu1 %v1176_v4, %s4594_s21  ;;  %1192 = vrot.lane.b32.xlu0 %v1177_v5, %s4594_s21  ;;  %v1236_v4 = vmul.f32 %v1231_v31, %v4743_v33  ;;  %v1305_v5 = vstv %s4404_s25  ;;  %s4406_s25 = sld [smem:[#allocation4 + $0x43]] }
 0x134   :  { %v5049_v61 = vpop.permute.xlu1 %708  ;;  %v5051_v0 = vpop.permute.xlu0 %728 }
 0x135   :  { %7800 = vst [vmem:[#allocation19_spill] sm:$0xff] %v5051_v0 }
 0x136   :  { %1194 = vrot.lane.b32.xlu1 %v1178_v62, %s4594_s21  ;;  %1208 = vrot.lane.b32.xlu0 %v1180_v2, %s4594_s21  ;;  %v1301_v62 = vmul.f32 %v1298_v59, %v4749_v37  ;;  %v1302_v2 = vmul.f32 %v1298_v59, %v4713_v15 }
 0x138   :  { %v5057_v55 = vpop.permute.xlu1 %730  ;;  %v5059_v1 = vpop.permute.xlu0 %732 }
 0x139   :  { %7801 = vst [vmem:[#allocation20_spill] sm:$0xff] %v5057_v55  ;;  %7802 = vst [vmem:[#allocation21_spill] sm:$0xff] %v5059_v1 }
 0x13a   :  { %1210 = vrot.lane.b32.xlu1 %v1181_v7, %s4594_s21  ;;  %1212 = vrot.lane.b32.xlu0 %v1182_v6, %s4594_s21  ;;  %v1303_v7 = vmul.f32 %v1298_v59, %v4727_v24  ;;  %v1318_v6 = vrot.slane %v1299_v42, 2 }
 0x13c   :  { %v5065_v8 = vpop.permute.xlu1 %734  ;;  %v5067_v11 = vpop.permute.xlu0 %736 }
 0x13d   :  { %7803 = vst [vmem:[#allocation22_spill] sm:$0xff] %v5065_v8  ;;  %7804 = vst [vmem:[#allocation23_spill] sm:$0xff] %v5067_v11 }
 0x13e   :  { %1214 = vrot.lane.b32.xlu1 %v1183_v12, %s4594_s21  ;;  %1244 = vrot.lane.b32.xlu0 %v1225_v13, %s4594_s21  ;;  %v1237_v13 = vmul.f32 %v1231_v31, %v4785_v54 }
 0x140   :  { %v5073_v14 = vpop.permute.xlu1 %738  ;;  %v5075_v17 = vpop.permute.xlu0 %864 }
 0x141   :  { %7805 = vst [vmem:[#allocation24_spill] sm:$0xff] %v5073_v14  ;;  %7806 = vst [vmem:[#allocation25_spill] sm:$0xff] %v5075_v17 }
 0x142   :  { %1246 = vrot.lane.b32.xlu1 %v1226_v18, %s4594_s21  ;;  %1248 = vrot.lane.b32.xlu0 %v1227_v23, %s4594_s21  ;;  %v1304_v18 = vmul.f32 %v1298_v59, %v4761_v43  ;;  %v1306_v23 = vmul.f32 %v1305_v5, %v4731_v26 }
 0x144   :  { %v5081_v25 = vpop.permute.xlu1 %870  ;;  %v5083_v27 = vpop.permute.xlu0 %904  ;;  %v1326_v31 = vrot.slane %v1304_v18, 2  ;;  %v1350_v59 = vrot.slane %v1306_v23, 2 }
 0x145   :  { %7807 = vst [vmem:[#allocation26_spill] sm:$0xff] %v5081_v25  ;;  %7808 = vst [vmem:[#allocation27_spill] sm:$0xff] %v5083_v27 }
 0x146   :  { %1250 = vrot.lane.b32.xlu1 %v1228_v49, %s4594_s21  ;;  %1252 = vrot.lane.b32.xlu0 %v1229_v28, %s4594_s21  ;;  %v1307_v49 = vmul.f32 %v1305_v5, %v4735_v29  ;;  %v1320_v28 = vsel %vm319_vm4, %v1318_v6, %v1319_v58 }
 0x148   :  { %v5089_v32 = vpop.permute.xlu1 %910  ;;  %v5091_v34 = vpop.permute.xlu0 %1036  ;;  %v1351_v42 = vrot.slane %v1307_v49, 2 }
 0x149   :  { %7809 = vst [vmem:[#allocation28_spill] sm:$0xff] %v5089_v32  ;;  %7810 = vst [vmem:[#allocation29_spill] sm:$0xff] %v5091_v34 }
 0x14a   :  { %1254 = vrot.lane.b32.xlu1 %v1230_v38, %s4594_s21  ;;  %1274 = vrot.lane.b32.xlu0 %v1232_v52, %s4594_s21  ;;  %v1321_v38 = vrot.slane %v1301_v62, 2  ;;  %v1323_v52 = vrot.slane %v1302_v2, 2  ;;  %v1309_v62 = vmul.f32 %v1305_v5, %v4739_v30  ;;  %v1310_v2 = vmul.f32 %v1305_v5, %v4743_v33 }
 0x14b   :  { %v1352_v23 = vsel %vm319_vm4, %v1350_v59, %v1351_v42 }
 0x14c   :  { %v5097_v56 = vpop.permute.xlu1 %1042  ;;  %v5099_v57 = vpop.permute.xlu0 %1076 }
 0x14d   :  { %7811 = vst [vmem:[#allocation30_spill] sm:$0xff] %v5097_v56  ;;  %7812 = vst [vmem:[#allocation31_spill] sm:$0xff] %v5099_v57 }
 0x14e   :  { %1276 = vrot.lane.b32.xlu1 %v1233_v60, %s4594_s21  ;;  %1278 = vrot.lane.b32.xlu0 %v1234_v39, %s4594_s21  ;;  %v1324_v60 = vrot.slane %v1303_v7, 2 }
 0x150   :  { %v5107_v44 = vpop.permute.xlu1 %1082  ;;  %v5109_v48 = vpop.permute.xlu0 %782  ;;  %v1325_v6 = vsel %vm319_vm4, %v1323_v52, %v1324_v60  ;;  %v1327_v18 = vsel %vm319_vm4, %v1324_v60, %v1326_v31  ;;  %v1311_v52 = vmul.f32 %v1305_v5, %v4785_v54 }
 0x151   :  { %7813 = vst [vmem:[#allocation32_spill] sm:$0xff] %v5107_v44  ;;  %7814 = vst [vmem:[#allocation33_spill] sm:$0xff] %v5109_v48 }
 0x152   :  { %1280 = vrot.lane.b32.xlu1 %v1235_v50, %s4594_s21  ;;  %1282 = vrot.lane.b32.xlu0 %v1236_v4, %s4594_s21  ;;  %v1308_v50 = vmul.f32 %v1305_v5, %v4767_v46  ;;  %v1322_v4 = vsel %vm319_vm4, %v1319_v58, %v1321_v38  ;;  %v1376_v58 = vstv %s4362_s26  ;;  %v1356_v38 = vrot.slane %v1310_v2, 2  ;;  %s4364_s26 = sld [smem:[#allocation4 + $0x19]] }
 0x153   :  { %v1379_v31 = vmul.f32 %v1376_v58, %v4749_v37 }
 0x154   :  { %v5118_v20 = vpop.permute.xlu1 %784  ;;  %v5120_v12 = vpop.permute.xlu0 %786  ;;  %v1353_v49 = vrot.slane %v1308_v50, 2 }
 0x155   :  { %7815 = vst [vmem:[#allocation34_spill] sm:$0xff] %v5118_v20  ;;  %7816 = vst [vmem:[#allocation35_spill] sm:$0xff] %v5120_v12  ;;  %v1383_v12 = vstv %s4411_s27  ;;  %s4413_s27 = sld [smem:[#allocation4 + $0x4a]] }
 0x156   :  { %1284 = vrot.lane.b32.xlu1 %v1237_v13, %s4594_s21  ;;  %1328 = vrot.lane.b32.xlu0 %v1320_v28, %s4594_s21  ;;  %v1355_v28 = vrot.slane %v1309_v62, 2  ;;  %v1354_v59 = vsel %vm319_vm4, %v1351_v42, %v1353_v49  ;;  %v1358_v62 = vrot.slane %v1311_v52, 2  ;;  %v1381_v49 = vmul.f32 %v1376_v58, %v4727_v24 }
 0x158   :  { %v5129_v39 = vpop.permute.xlu1 %788  ;;  %v5131_v53 = vpop.permute.xlu0 %814  ;;  %v1357_v50 = vsel %vm319_vm4, %v1355_v28, %v1356_v38  ;;  %v1359_v20 = vsel %vm319_vm4, %v1356_v38, %v1358_v62  ;;  %v1402_v38 = vrot.slane %v1381_v49, 2  ;;  %v1385_v62 = vmul.f32 %v1383_v12, %v4735_v29 }
 0x159   :  { %7817 = vst [vmem:[#allocation36_spill] sm:$0xff] %v5129_v39  ;;  %7818 = vst [vmem:[#allocation37_spill] sm:$0xff] %v5131_v53  ;;  %v1378_v53 = vmul.f32 %v1376_v58, %v4722_v21  ;;  %v1380_v39 = vmul.f32 %v1376_v58, %v4713_v15 }
 0x15a   :  { %1330 = vrot.lane.b32.xlu1 %v1322_v4, %s4594_s21  ;;  %1332 = vrot.lane.b32.xlu0 %v1325_v6, %s4594_s21  ;;  %v1377_v4 = vmul.f32 %v1376_v58, %v4715_v16  ;;  %v1437_v35 = vrot.slane %v1385_v62, 2 }
 0x15b   :  { %v1397_v5 = vrot.slane %v1378_v53, 2  ;;  %v1382_v53 = vmul.f32 %v1376_v58, %v4761_v43 }
 0x15c   :  { %v5140_v7 = vpop.permute.xlu1 %816  ;;  %v5142_v13 = vpop.permute.xlu0 %818  ;;  %v1396_v2 = vrot.slane %v1377_v4, 2  ;;  %v1401_v4 = vrot.slane %v1380_v39, 2 }
 0x15d   :  { %7819 = vst [vmem:[#allocation38_spill] sm:$0xff] %v5140_v7  ;;  %v1399_v7 = vrot.slane %v1379_v31, 2  ;;  %v1384_v31 = vmul.f32 %v1383_v12, %v4731_v26 }
 0x15e   :  { %1334 = vrot.lane.b32.xlu1 %v1327_v18, %s4594_s21  ;;  %1360 = vrot.lane.b32.xlu0 %v1352_v23, %s4594_s21  ;;  %v1398_v42 = vsel %vm319_vm4, %v1396_v2, %v1397_v5  ;;  %v1403_v39 = vsel %vm319_vm4, %v1401_v4, %v1402_v38  ;;  %v1388_v4 = vmul.f32 %v1383_v12, %v4743_v33 }
 0x15f   :  { %v1436_v2 = vrot.slane %v1384_v31, 2 }
 0x160   :  { %v5151_v6 = vpop.permute.xlu1 %820  ;;  %v5153_v60 = vpop.permute.xlu0 %860  ;;  %v1442_v19 = vrot.slane %v1388_v4, 2 }
 0x161   :  { %7820 = vst [vmem:[#allocation39_spill] sm:$0xff] %v5153_v60  ;;  %v1438_v31 = vsel %vm319_vm4, %v1436_v2, %v1437_v35 }
 0x162   :  { %1362 = vrot.lane.b32.xlu1 %v1354_v59, %s4594_s21  ;;  %1364 = vrot.lane.b32.xlu0 %v1357_v50, %s4594_s21  ;;  %v1400_v59 = vsel %vm319_vm4, %v1397_v5, %v1399_v7  ;;  %v1404_v50 = vrot.slane %v1382_v53, 2  ;;  %v1386_v5 = vmul.f32 %v1383_v12, %v4767_v46  ;;  %v1387_v53 = vmul.f32 %v1383_v12, %v4739_v30 }
 0x164   :  { %v5160_v18 = vpop.permute.xlu1 %862  ;;  %v5162_v23 = vpop.permute.xlu0 %868 }
 0x165   :  { %7821 = vst [vmem:[#allocation40_spill] sm:$0xff] %v5160_v18  ;;  %7822 = vst [vmem:[#allocation41_spill] sm:$0xff] %v5162_v23 }
 0x166   :  { %1366 = vrot.lane.b32.xlu1 %v1359_v20, %s4594_s21  ;;  %1406 = vrot.lane.b32.xlu0 %v1398_v42, %s4594_s21  ;;  %v1405_v42 = vsel %vm319_vm4, %v1402_v38, %v1404_v50  ;;  %v1389_v38 = vmul.f32 %v1383_v12, %v4785_v54  ;;  %v1471_v12 = vmul.f32 %v1470_v22, %v4715_v16  ;;  %v1477_v16 = vstv %s4418_s0  ;;  %s4420_s0 = sld [smem:[#allocation4 + $0x51]] }
 0x168   :  { %v5171_v28 = vpop.permute.xlu1 %866  ;;  %v5173_v52 = vpop.permute.xlu0 %900  ;;  %v1444_v2 = vrot.slane %v1389_v38, 2 }
 0x169   :  { %7823 = vst [vmem:[#allocation42_spill] sm:$0xff] %v5171_v28  ;;  %7824 = vst [vmem:[#allocation43_spill] sm:$0xff] %v5173_v52 }
 0x16a   :  { %1408 = vrot.lane.b32.xlu1 %v1400_v59, %s4594_s21  ;;  %1410 = vrot.lane.b32.xlu0 %v1399_v7, %s4594_s21  ;;  %v1439_v59 = vrot.slane %v1386_v5, 2  ;;  %v1472_v5 = vmul.f32 %v1470_v22, %v4722_v21  ;;  %v1445_v4 = vsel %vm319_vm4, %v1442_v19, %v1444_v2  ;;  %v1475_v21 = vmul.f32 %v1470_v22, %v4727_v24 }
 0x16b   :  { %v1478_v24 = vmul.f32 %v1477_v16, %v4731_v26 }
 0x16c   :  { %v5180_v20 = vpop.permute.xlu1 %902  ;;  %v5182_v58 = vpop.permute.xlu0 %908  ;;  %v1491_v38 = vrot.slane %v1472_v5, 4  ;;  %v1479_v5 = vmul.f32 %v1477_v16, %v4735_v29  ;;  %v1482_v29 = vmul.f32 %v1477_v16, %v4743_v33 }
 0x16d   :  { %7825 = vst [vmem:[#allocation44_spill] sm:$0xff] %v5180_v20  ;;  %7826 = vst [vmem:[#allocation45_spill] sm:$0xff] %v5182_v58  ;;  %v1522_v26 = vrot.slane %v1478_v24, 4  ;;  %v1483_v24 = vmul.f32 %v1477_v16, %v4785_v54 }
 0x16e   :  { %1412 = vrot.lane.b32.xlu1 %v1403_v39, %s4594_s21  ;;  %1414 = vrot.lane.b32.xlu0 %v1405_v42, %s4594_s21  ;;  %v1441_v42 = vrot.slane %v1387_v53, 2  ;;  %v1474_v53 = vmul.f32 %v1470_v22, %v4713_v15  ;;  %v1476_v15 = vmul.f32 %v1470_v22, %v4761_v43 }
 0x170   :  { %v5189_v49 = vpop.permute.xlu1 %906  ;;  %v5191_v7 = vpop.permute.xlu0 %954 }
 0x171   :  { %7827 = vst [vmem:[#allocation46_spill] sm:$0xff] %v5189_v49  ;;  %7828 = vst [vmem:[#allocation47_spill] sm:$0xff] %v5191_v7  ;;  %v1440_v7 = vsel %vm319_vm4, %v1437_v35, %v1439_v59  ;;  %v1443_v35 = vsel %vm319_vm4, %v1441_v42, %v1442_v19  ;;  %v1496_v42 = vrot.slane %v1475_v21, 4 }
 0x172   :  { %1416 = vrot.lane.b32.xlu1 %v1404_v50, %s4594_s21  ;;  %1446 = vrot.lane.b32.xlu0 %v1438_v31, %s4594_s21 }
 0x174   :  { %v5199_v62 = vpop.permute.xlu1 %956  ;;  %v5201_v39 = vpop.permute.xlu0 %958 }
 0x175   :  { %7829 = vst [vmem:[#allocation48_spill] sm:$0xff] %v5199_v62  ;;  %7830 = vst [vmem:[#allocation49_spill] sm:$0xff] %v5201_v39  ;;  %v1473_v39 = vmul.f32 %v1470_v22, %v4749_v37  ;;  %v1495_v62 = vrot.slane %v1474_v53, 4  ;;  %v1498_v53 = vrot.slane %v1476_v15, 4  ;;  %v1480_v22 = vmul.f32 %v1477_v16, %v4767_v46 }
 0x176   :  { %1448 = vrot.lane.b32.xlu1 %v1440_v7, %s4594_s21  ;;  %1450 = vrot.lane.b32.xlu0 %v1439_v59, %s4594_s21  ;;  %v1490_v7 = vrot.slane %v1471_v12, 4  ;;  %v1548_v15 = vstv %s4376_s29  ;;  %s4378_s29 = sld [smem:[#allocation4 + $0x27]] }
 0x177   :  { %v1497_v21 = vsel %vm452_vm5, %v1495_v62, %v1496_v42  ;;  %v1528_v62 = vrot.slane %v1482_v29, 4 }
 0x178   :  { %v5208_v50 = vpop.permute.xlu1 %960  ;;  %v5210_v31 = vpop.permute.xlu0 %986  ;;  %v1492_v19 = vsel %vm452_vm5, %v1490_v7, %v1491_v38  ;;  %v1523_v7 = vrot.slane %v1479_v5, 4  ;;  %v5247_v5 = vld [vmem:[#allocation2 + $0x8] sm:$0xff] }
 0x179   :  { %7831 = vst [vmem:[#allocation50_spill] sm:$0xff] %v5208_v50  ;;  %7832 = vst [vmem:[#allocation51_spill] sm:$0xff] %v5210_v31  ;;  %v1493_v50 = vrot.slane %v1473_v39, 4  ;;  %v1550_v33 = vmul.f32 %v5247_v5, %v1548_v15 }
 0x17a   :  { %1452 = vrot.lane.b32.xlu1 %v1443_v35, %s4594_s21  ;;  %1454 = vrot.lane.b32.xlu0 %v1445_v4, %s4594_s21  ;;  %v1481_v4 = vmul.f32 %v1477_v16, %v4739_v30  ;;  %v1524_v30 = vsel %vm452_vm5, %v1522_v26, %v1523_v7 }
 0x17b   :  { %v1494_v39 = vsel %vm452_vm5, %v1491_v38, %v1493_v50  ;;  %v1499_v50 = vsel %vm452_vm5, %v1496_v42, %v1498_v53  ;;  %v1525_v38 = vrot.slane %v1480_v22, 4  ;;  %v1569_v26 = vrot.slane %v1550_v33, 4 }
 0x17c   :  { %v5219_v59 = vpop.permute.xlu1 %988  ;;  %v5221_v31 = vpop.permute.xlu0 %990  ;;  %v1527_v46 = vrot.slane %v1481_v4, 4  ;;  %v1551_v4 = vmul.f32 %v1548_v15, %v4749_v37  ;;  %v1552_v37 = vmul.f32 %v5268_v3, %v1548_v15  ;;  %v1554_v33 = vmul.f32 %v1548_v15, %v4761_v43 }
 0x17d   :  { %7833 = vst [vmem:[#allocation52_spill] sm:$0xff] %v5219_v59  ;;  %v1526_v54 = vsel %vm452_vm5, %v1523_v7, %v1525_v38 }
 0x17e   :  { %1456 = vrot.lane.b32.xlu1 %v1444_v2, %s4594_s21  ;;  %1500 = vrot.lane.b32.xlu0 %v1492_v19, %s4594_s21  ;;  %v1529_v16 = vsel %vm452_vm5, %v1527_v46, %v1528_v62  ;;  %v1571_v59 = vrot.slane %v1551_v4, 4  ;;  %v5273_v46 = vld [vmem:[#allocation2 + $0x20] sm:$0xff] }
 0x180   :  { %v5229_v12 = vpop.permute.xlu1 %992  ;;  %v5231_v35 = vpop.permute.xlu0 %1032 }
 0x181   :  { %7834 = vst [vmem:[#allocation53_spill] sm:$0xff] %v5229_v12  ;;  %7835 = vst [vmem:[#allocation54_spill] sm:$0xff] %v5231_v35  ;;  %v5345_v35 = vld [vmem:[#allocation2 + $0x28] sm:$0x3f] }
 0x182   :  { %1502 = vrot.lane.b32.xlu1 %v1494_v39, %s4594_s21  ;;  %1504 = vrot.lane.b32.xlu0 %v1497_v21, %s4594_s21  ;;  %v5252_v39 = vld [vmem:[#allocation2] sm:$0xff]  ;;  %v1530_v21 = vrot.slane %v1483_v24, 4  ;;  %v1553_v24 = vmul.f32 %v5273_v46, %v1548_v15 }
 0x183   :  { %v1549_v42 = vmul.f32 %v5252_v39, %v1548_v15 }
 0x184   :  { %v5240_v2 = vpop.permute.xlu1 %1034  ;;  %v5242_v19 = vpop.permute.xlu0 %1040  ;;  %v1531_v7 = vsel %vm452_vm5, %v1528_v62, %v1530_v21  ;;  %v1573_v62 = vrot.slane %v1552_v37, 4  ;;  %v1574_v21 = vrot.slane %v1553_v24, 4 }
 0x185   :  { %7836 = vst [vmem:[#allocation55_spill] sm:$0xff] %v5240_v2  ;;  %7837 = vst [vmem:[#allocation56_spill] sm:$0xff] %v5242_v19  ;;  %v1568_v29 = vrot.slane %v1549_v42, 4  ;;  %v1555_v42 = vstv %s4425_s30  ;;  %s4427_s30 = sld [smem:[#allocation4 + $0x58]] }
 0x186   :  { %1506 = vrot.lane.b32.xlu1 %v1499_v50, %s4594_s21  ;;  %1532 = vrot.lane.b32.xlu0 %v1524_v30, %s4594_s21  ;;  %v1556_v48 = vmul.f32 %v5284_v10, %v1555_v42  ;;  %v1557_v43 = vmul.f32 %v5287_v9, %v1555_v42 }
 0x187   :  { %v1570_v38 = vsel %vm452_vm5, %v1568_v29, %v1569_v26  ;;  %v1576_v29 = vrot.slane %v1554_v33, 4 }
 0x188   :  { %v5255_v53 = vpop.permute.xlu1 %1038  ;;  %v5257_v22 = vpop.permute.xlu0 %1072  ;;  %v1608_v33 = vrot.slane %v1556_v48, 4 }
 0x189   :  { %7838 = vst [vmem:[#allocation57_spill] sm:$0xff] %v5255_v53  ;;  %7839 = vst [vmem:[#allocation58_spill] sm:$0xff] %v5257_v22  ;;  %v1577_v24 = vsel %vm452_vm5, %v1574_v21, %v1576_v29 }
 0x18a   :  { %1534 = vrot.lane.b32.xlu1 %v1526_v54, %s4594_s21  ;;  %1536 = vrot.lane.b32.xlu0 %v1529_v16, %s4594_s21  ;;  %v1572_v16 = vsel %vm452_vm5, %v1569_v26, %v1571_v59  ;;  %v5296_v26 = vld [vmem:[#allocation3 + $0x10] sm:$0x3f] }
 0x18b   :  { %v1558_v37 = vmul.f32 %v5296_v26, %v1555_v42 }
 0x18c   :  { %v5264_v50 = vpop.permute.xlu1 %1074  ;;  %v5266_v30 = vpop.permute.xlu0 %1080 }
 0x18d   :  { %7840 = vst [vmem:[#allocation59_spill] sm:$0xff] %v5264_v50  ;;  %7841 = vst [vmem:[#allocation60_spill] sm:$0xff] %v5266_v30  ;;  %v1642_v50 = vstv %s4383_s3  ;;  %s4385_s3 = sld [smem:[#allocation4 + $0x2e]] }
 0x18e   :  { %1538 = vrot.lane.b32.xlu1 %v1531_v7, %s4594_s21  ;;  %1578 = vrot.lane.b32.xlu0 %v1570_v38, %s4594_s21  ;;  %v1575_v38 = vsel %vm452_vm5, %v1573_v62, %v1574_v21  ;;  %v1611_v21 = vrot.slane %v1558_v37, 4  ;;  %v1644_v37 = vmul.f32 %v5247_v5, %v1642_v50  ;;  %v1648_v49 = vmul.f32 %v5345_v35, %v1642_v50 }
 0x190   :  { %v5279_v4 = vpop.permute.xlu1 %1078  ;;  %v5281_v54 = vpop.permute.xlu0 %1126 }
 0x191   :  { %7842 = vst [vmem:[#allocation61_spill] sm:$0xff] %v5279_v4  ;;  %7843 = vst [vmem:[#allocation62_spill] sm:$0xff] %v5281_v54  ;;  %v1609_v54 = vrot.slane %v1557_v43, 4  ;;  %v5310_v4 = vld [vmem:[#allocation3 + $0x20] sm:$0xff]  ;;  %v5314_v43 = vld [vmem:[#allocation3 + $0x28] sm:$0x3f] }
 0x192   :  { %1580 = vrot.lane.b32.xlu1 %v1572_v16, %s4594_s21  ;;  %1582 = vrot.lane.b32.xlu0 %v1571_v59, %s4594_s21  ;;  %v1560_v62 = vmul.f32 %v5310_v4, %v1555_v42 }
 0x193   :  { %v1610_v48 = vsel %vm452_vm5, %v1608_v33, %v1609_v54  ;;  %v1612_v22 = vsel %vm452_vm5, %v1609_v54, %v1611_v21  ;;  %v1649_v54 = vstv %s4432_s1  ;;  %s4434_s1 = sld [smem:[#allocation4 + $0x5f]] }
 0x194   :  { %v5292_v15 = vpop.permute.xlu1 %1128  ;;  %v5294_v7 = vpop.permute.xlu0 %1130  ;;  %v1614_v30 = vrot.slane %v1560_v62, 4  ;;  %v1652_v28 = vmul.f32 %v5296_v26, %v1649_v54 }
 0x195   :  { %7844 = vst [vmem:[#allocation63_spill] sm:$0xff] %v5292_v15  ;;  %7845 = vst [vmem:[#allocation64_spill] sm:$0xff] %v5294_v7  ;;  %v5307_v7 = vld [vmem:[#allocation3 + $0x18] sm:$0xff] }
 0x196   :  { %1584 = vrot.lane.b32.xlu1 %v1575_v38, %s4594_s21  ;;  %1586 = vrot.lane.b32.xlu0 %v1577_v24, %s4594_s21  ;;  %v1559_v15 = vmul.f32 %v5307_v7, %v1555_v42  ;;  %v1561_v38 = vmul.f32 %v5314_v43, %v1555_v42  ;;  %v1643_v42 = vmul.f32 %v5252_v39, %v1642_v50 }
 0x198   :  { %v5303_v59 = vpop.permute.xlu1 %1132  ;;  %v5305_v16 = vpop.permute.xlu0 %1158  ;;  %v1616_v53 = vrot.slane %v1561_v38, 4  ;;  %v1662_v19 = vrot.slane %v1643_v42, 6 }
 0x199   :  { %7846 = vst [vmem:[#allocation65_spill] sm:$0xff] %v5303_v59  ;;  %7847 = vst [vmem:[#allocation66_spill] sm:$0xff] %v5305_v16  ;;  %v1613_v59 = vrot.slane %v1559_v15, 4  ;;  %v5333_v15 = vld [vmem:[#allocation2 + $0x10] sm:$0x3f] }
 0x19a   :  { %1588 = vrot.lane.b32.xlu1 %v1576_v29, %s4594_s21  ;;  %1618 = vrot.lane.b32.xlu0 %v1610_v48, %s4594_s21  ;;  %v1645_v62 = vmul.f32 %v5333_v15, %v1642_v50  ;;  %v1617_v38 = vsel %vm452_vm5, %v1614_v30, %v1616_v53 }
 0x19b   :  { %v1615_v48 = vsel %vm452_vm5, %v1613_v59, %v1614_v30  ;;  %v1650_v30 = vmul.f32 %v5284_v10, %v1649_v54 }
 0x19c   :  { %v5319_v24 = vpop.permute.xlu1 %1160  ;;  %v5321_v16 = vpop.permute.xlu0 %1162  ;;  %v1665_v2 = vrot.slane %v1645_v62, 6 }
 0x19d   :  { %7848 = vst [vmem:[#allocation67_spill] sm:$0xff] %v5319_v24  ;;  %v1663_v24 = vrot.slane %v1644_v37, 6  ;;  %v1651_v37 = vmul.f32 %v5287_v9, %v1649_v54 }
 0x19e   :  { %1620 = vrot.lane.b32.xlu1 %v1612_v22, %s4594_s21  ;;  %1622 = vrot.lane.b32.xlu0 %v1611_v21, %s4594_s21  ;;  %v1646_v22 = vmul.f32 %v5268_v3, %v1642_v50  ;;  %v1647_v21 = vmul.f32 %v5273_v46, %v1642_v50  ;;  %v1694_v50 = vrot.slane %v1650_v30, 6 }
 0x19f   :  { %v1664_v58 = vsel %vm585_vm6, %v1662_v19, %v1663_v24  ;;  %v1666_v62 = vsel %vm585_vm6, %v1663_v24, %v1665_v2  ;;  %v1653_v19 = vmul.f32 %v5307_v7, %v1649_v54  ;;  %v1655_v2 = vmul.f32 %v5314_v43, %v1649_v54 }
 0x1a0   :  { %v5328_v29 = vpop.permute.xlu1 %1164  ;;  %v5330_v33 = vpop.permute.xlu0 %1188  ;;  %v1667_v20 = vrot.slane %v1646_v22, 6  ;;  %v1654_v22 = vmul.f32 %v5310_v4, %v1649_v54  ;;  %v1697_v24 = vrot.slane %v1652_v28, 6 }
 0x1a1   :  { %7849 = vst [vmem:[#allocation68_spill] sm:$0xff] %v5328_v29  ;;  %7850 = vst [vmem:[#allocation69_spill] sm:$0xff] %v5330_v33 }
 0x1a2   :  { %1624 = vrot.lane.b32.xlu1 %v1615_v48, %s4594_s21  ;;  %1626 = vrot.lane.b32.xlu0 %v1617_v38, %s4594_s21  ;;  %v1668_v48 = vrot.slane %v1647_v21, 6  ;;  %v1699_v21 = vrot.slane %v1653_v19, 6  ;;  %v1700_v30 = vrot.slane %v1654_v22, 6 }
 0x1a4   :  { %v5341_v33 = vpop.permute.xlu1 %1190  ;;  %v5343_v59 = vpop.permute.xlu0 %1192  ;;  %v1669_v52 = vsel %vm585_vm6, %v1667_v20, %v1668_v48 }
 0x1a5   :  { %7851 = vst [vmem:[#allocation70_spill] sm:$0xff] %v5341_v33  ;;  %7852 = vst [vmem:[#allocation71_spill] sm:$0xff] %v5343_v59  ;;  %v1670_v59 = vrot.slane %v1648_v49, 6  ;;  %v1695_v33 = vrot.slane %v1651_v37, 6 }
 0x1a6   :  { %1628 = vrot.lane.b32.xlu1 %v1616_v53, %s4594_s21  ;;  %1672 = vrot.lane.b32.xlu0 %v1664_v58, %s4594_s21 }
 0x1a7   :  { %v1671_v49 = vsel %vm585_vm6, %v1668_v48, %v1670_v59  ;;  %v1696_v20 = vsel %vm585_vm6, %v1694_v50, %v1695_v33  ;;  %v1702_v59 = vrot.slane %v1655_v2, 6  ;;  %v1720_v48 = vstv %s4342_s4  ;;  %s4344_s4 = sld [smem:[#allocation4 + $0x5]] }
 0x1a8   :  { %v5353_v42 = vpop.permute.xlu1 %1194  ;;  %v5355_v38 = vpop.permute.xlu0 %1208  ;;  %v1721_v50 = vmul.f32 %v5252_v39, %v1720_v48  ;;  %v1725_v2 = vstv %s4391_s5  ;;  %s4393_s5 = sld [smem:[#allocation4 + $0x36]] }
 0x1a9   :  { %7853 = vst [vmem:[#allocation72_spill] sm:$0xff] %v5353_v42  ;;  %7854 = vst [vmem:[#allocation73_spill] sm:$0xff] %v5355_v38  ;;  %v1703_v19 = vsel %vm585_vm6, %v1700_v30, %v1702_v59 }
 0x1aa   :  { %1674 = vrot.lane.b32.xlu1 %v1666_v62, %s4594_s21  ;;  %1676 = vrot.lane.b32.xlu0 %v1669_v52, %s4594_s21  ;;  %v1698_v62 = vsel %vm585_vm6, %v1695_v33, %v1697_v24 }
 0x1ac   :  { %v5364_v58 = vpop.permute.xlu1 %1210  ;;  %v5366_v53 = vpop.permute.xlu0 %1212 }
 0x1ad   :  { %7855 = vst [vmem:[#allocation74_spill] sm:$0xff] %v5364_v58  ;;  %7856 = vst [vmem:[#allocation75_spill] sm:$0xff] %v5366_v53  ;;  %v1701_v58 = vsel %vm585_vm6, %v1699_v21, %v1700_v30  ;;  %v1724_v21 = vmul.f32 %v5273_v46, %v1720_v48  ;;  %v1726_v30 = vmul.f32 %v5284_v10, %v1725_v2 }
 0x1ae   :  { %1678 = vrot.lane.b32.xlu1 %v1671_v49, %s4594_s21  ;;  %1704 = vrot.lane.b32.xlu0 %v1696_v20, %s4594_s21  ;;  %v1722_v49 = vmul.f32 %v5247_v5, %v1720_v48 }
 0x1b0   :  { %v5373_v37 = vpop.permute.xlu1 %1214  ;;  %v5375_v52 = vpop.permute.xlu0 %1244 }
 0x1b1   :  { %7857 = vst [vmem:[#allocation76_spill] sm:$0xff] %v5373_v37  ;;  %7858 = vst [vmem:[#allocation77_spill] sm:$0xff] %v5375_v52 }
 0x1b2   :  { %1706 = vrot.lane.b32.xlu1 %v1698_v62, %s4594_s21  ;;  %1708 = vrot.lane.b32.xlu0 %v1701_v58, %s4594_s21  ;;  %v1723_v58 = vmul.f32 %v5268_v3, %v1720_v48 }
 0x1b4   :  { %v5381_v28 = vpop.permute.xlu1 %1246  ;;  %v5383_v54 = vpop.permute.xlu0 %1248 }
 0x1b5   :  { %7859 = vst [vmem:[#allocation78_spill] sm:$0xff] %v5381_v28  ;;  %7860 = vst [vmem:[#allocation79_spill] sm:$0xff] %v5383_v54 }
 0x1b6   :  { %1710 = vrot.lane.b32.xlu1 %v1703_v19, %s4594_s21  ;;  %1734 = vrot.lane.b32.xlu0 %v1721_v50, %s4595_s6  ;;  %v1727_v50 = vmul.f32 %v5287_v9, %v1725_v2  ;;  %v1728_v19 = vmul.f32 %v5307_v7, %v1725_v2  ;;  %s4596_s21 = smov 124  }
 0x1b8   :  { %v5389_v33 = vpop.permute.xlu1 %1250  ;;  %v5391_v22 = vpop.permute.xlu0 %1252 }
 0x1b9   :  { %7861 = vst [vmem:[#allocation80_spill] sm:$0xff] %v5389_v33  ;;  %7862 = vst [vmem:[#allocation81_spill] sm:$0xff] %v5391_v22 }
 0x1ba   :  { %1736 = vrot.lane.b32.xlu1 %v1722_v49, %s4595_s6  ;;  %1738 = vrot.lane.b32.xlu0 %v1723_v58, %s4595_s6  ;;  %v1770_v49 = vstv %s4349_s7  ;;  %s4351_s7 = sld [smem:[#allocation4 + $0xc]] }
 0x1bc   :  { %v5397_v20 = vpop.permute.xlu1 %1254  ;;  %v5399_v24 = vpop.permute.xlu0 %1274 }
 0x1bd   :  { %7863 = vst [vmem:[#allocation82_spill] sm:$0xff] %v5397_v20  ;;  %7864 = vst [vmem:[#allocation83_spill] sm:$0xff] %v5399_v24 }
 0x1be   :  { %1740 = vrot.lane.b32.xlu1 %v1724_v21, %s4595_s6  ;;  %1754 = vrot.lane.b32.xlu0 %v1726_v30, %s4595_s6  ;;  %v1729_v21 = vmul.f32 %v5310_v4, %v1725_v2  ;;  %v1771_v30 = vmul.f32 %v5252_v39, %v1770_v49 }
 0x1c0   :  { %v5405_v62 = vpop.permute.xlu1 %1276  ;;  %v5407_v59 = vpop.permute.xlu0 %1278 }
 0x1c1   :  { %7865 = vst [vmem:[#allocation84_spill] sm:$0xff] %v5405_v62  ;;  %7866 = vst [vmem:[#allocation85_spill] sm:$0xff] %v5407_v59 }
 0x1c2   :  { %1756 = vrot.lane.b32.xlu1 %v1727_v50, %s4595_s6  ;;  %1758 = vrot.lane.b32.xlu0 %v1728_v19, %s4595_s6  ;;  %v1772_v50 = vmul.f32 %v5247_v5, %v1770_v49  ;;  %v1773_v19 = vmul.f32 %v5333_v15, %v1770_v49 }
 0x1c4   :  { %v5413_v48 = vpop.permute.xlu1 %1280  ;;  %v5415_v58 = vpop.permute.xlu0 %1282 }
 0x1c5   :  { %7867 = vst [vmem:[#allocation86_spill] sm:$0xff] %v5413_v48  ;;  %7868 = vst [vmem:[#allocation87_spill] sm:$0xff] %v5415_v58 }
 0x1c6   :  { %1760 = vrot.lane.b32.xlu1 %v1729_v21, %s4595_s6  ;;  %1790 = vrot.lane.b32.xlu0 %v1771_v30, %s4595_s6  ;;  %v1774_v21 = vmul.f32 %v5268_v3, %v1770_v49  ;;  %v1775_v30 = vmul.f32 %v5273_v46, %v1770_v49 }
 0x1c8   :  { %v5421_v38 = vpop.permute.xlu1 %1284  ;;  %v5423_v42 = vpop.permute.xlu0 %1328 }
 0x1c9   :  { %7869 = vst [vmem:[#allocation88_spill] sm:$0xff] %v5421_v38  ;;  %7870 = vst [vmem:[#allocation89_spill] sm:$0xff] %v5423_v42  ;;  %v1777_v38 = vstv %s4398_s8  ;;  %s4400_s8 = sld [smem:[#allocation4 + $0x3d]] }
 0x1ca   :  { %1792 = vrot.lane.b32.xlu1 %v1772_v50, %s4595_s6  ;;  %1794 = vrot.lane.b32.xlu0 %v1773_v19, %s4595_s6  ;;  %v1776_v50 = vmul.f32 %v5345_v35, %v1770_v49  ;;  %v1778_v19 = vmul.f32 %v5284_v10, %v1777_v38  ;;  %v1782_v59 = vmul.f32 %v5310_v4, %v1777_v38 }
 0x1cc   :  { %v5429_v2 = vpop.permute.xlu1 %1330  ;;  %v5431_v58 = vpop.permute.xlu0 %1332 }
 0x1cd   :  { %7871 = vst [vmem:[#allocation90_spill] sm:$0xff] %v5429_v2  ;;  %7872 = vst [vmem:[#allocation91_spill] sm:$0xff] %v5431_v58 }
 0x1ce   :  { %1796 = vrot.lane.b32.xlu1 %v1774_v21, %s4595_s6  ;;  %1798 = vrot.lane.b32.xlu0 %v1775_v30, %s4595_s6  ;;  %v1779_v21 = vmul.f32 %v5287_v9, %v1777_v38  ;;  %v1780_v30 = vmul.f32 %v5296_v26, %v1777_v38 }
 0x1d0   :  { %v5437_v42 = vpop.permute.xlu1 %1334  ;;  %v5439_v48 = vpop.permute.xlu0 %1360 }
 0x1d1   :  { %7873 = vst [vmem:[#allocation92_spill] sm:$0xff] %v5437_v42  ;;  %7874 = vst [vmem:[#allocation93_spill] sm:$0xff] %v5439_v48  ;;  %v1844_v42 = vstv %s4356_s9  ;;  %s4358_s9 = sld [smem:[#allocation4 + $0x13]] }
 0x1d2   :  { %1800 = vrot.lane.b32.xlu1 %v1776_v50, %s4595_s6  ;;  %1820 = vrot.lane.b32.xlu0 %v1778_v19, %s4595_s6  ;;  %v1846_v48 = vmul.f32 %v5247_v5, %v1844_v42  ;;  %v1845_v49 = vmul.f32 %v5252_v39, %v1844_v42  ;;  %v1847_v62 = vmul.f32 %v5333_v15, %v1844_v42 }
 0x1d3   :  { %v1848_v20 = vmul.f32 %v5268_v3, %v1844_v42  ;;  %v1849_v22 = vmul.f32 %v5273_v46, %v1844_v42  ;;  %v1850_v52 = vmul.f32 %v5345_v35, %v1844_v42 }
 0x1d4   :  { %v5445_v58 = vpop.permute.xlu1 %1362  ;;  %v5447_v2 = vpop.permute.xlu0 %1364  ;;  %v1865_v24 = vrot.slane %v1846_v48, 2  ;;  %v1864_v33 = vrot.slane %v1845_v49, 2  ;;  %v1867_v28 = vrot.slane %v1847_v62, 2 }
 0x1d5   :  { %7875 = vst [vmem:[#allocation94_spill] sm:$0xff] %v5445_v58  ;;  %7876 = vst [vmem:[#allocation95_spill] sm:$0xff] %v5447_v2  ;;  %v1781_v58 = vmul.f32 %v5307_v7, %v1777_v38  ;;  %v1870_v60 = vrot.slane %v1849_v22, 2  ;;  %v1872_v42 = vrot.slane %v1850_v52, 2 }
 0x1d6   :  { %1822 = vrot.lane.b32.xlu1 %v1779_v21, %s4595_s6  ;;  %1824 = vrot.lane.b32.xlu0 %v1780_v30, %s4595_s6  ;;  %v1851_v21 = vstv %s4405_s10  ;;  %v1783_v30 = vmul.f32 %v5314_v43, %v1777_v38  ;;  %v1866_v18 = vsel %vm319_vm4, %v1864_v33, %v1865_v24  ;;  %v1868_v62 = vsel %vm319_vm4, %v1865_v24, %v1867_v28  ;;  %s4407_s10 = sld [smem:[#allocation4 + $0x44]] }
 0x1d7   :  { %v1852_v48 = vmul.f32 %v5284_v10, %v1851_v21  ;;  %v1853_v23 = vmul.f32 %v5287_v9, %v1851_v21  ;;  %v1854_v44 = vmul.f32 %v5296_v26, %v1851_v21  ;;  %v1855_v33 = vmul.f32 %v5307_v7, %v1851_v21 }
 0x1d8   :  { %v5455_v50 = vpop.permute.xlu1 %1366  ;;  %v5457_v19 = vpop.permute.xlu0 %1406  ;;  %v1856_v22 = vmul.f32 %v5310_v4, %v1851_v21  ;;  %v1873_v52 = vsel %vm319_vm4, %v1870_v60, %v1872_v42  ;;  %v1857_v28 = vmul.f32 %v5314_v43, %v1851_v21  ;;  %v1922_v24 = vstv %s4363_s11  ;;  %s4365_s11 = sld [smem:[#allocation4 + $0x1a]] }
 0x1d9   :  { %7877 = vst [vmem:[#allocation96_spill] sm:$0xff] %v5455_v50  ;;  %7878 = vst [vmem:[#allocation97_spill] sm:$0xff] %v5457_v19  ;;  %v1896_v49 = vrot.slane %v1852_v48, 2  ;;  %v1901_v48 = vrot.slane %v1855_v33, 2  ;;  %v1925_v33 = vmul.f32 %v5333_v15, %v1922_v24 }
 0x1da   :  { %1826 = vrot.lane.b32.xlu1 %v1781_v58, %s4595_s6  ;;  %1828 = vrot.lane.b32.xlu0 %v1782_v59, %s4595_s6  ;;  %v1869_v58 = vrot.slane %v1848_v20, 2  ;;  %v1904_v42 = vrot.slane %v1857_v28, 2  ;;  %v1927_v28 = vmul.f32 %v5273_v46, %v1922_v24 }
 0x1dc   :  { %v5467_v19 = vpop.permute.xlu1 %1408  ;;  %v5469_v54 = vpop.permute.xlu0 %1410 }
 0x1dd   :  { %7879 = vst [vmem:[#allocation98_spill] sm:$0xff] %v5467_v19  ;;  %7880 = vst [vmem:[#allocation99_spill] sm:$0xff] %v5469_v54  ;;  %v1897_v54 = vrot.slane %v1853_v23, 2  ;;  %v1871_v19 = vsel %vm319_vm4, %v1869_v58, %v1870_v60  ;;  %v1902_v58 = vrot.slane %v1856_v22, 2 }
 0x1de   :  { %1830 = vrot.lane.b32.xlu1 %v1783_v30, %s4595_s6  ;;  %1874 = vrot.lane.b32.xlu0 %v1866_v18, %s4595_s6  ;;  %v1899_v30 = vrot.slane %v1854_v44, 2 }
 0x1df   :  { %v1898_v23 = vsel %vm319_vm4, %v1896_v49, %v1897_v54  ;;  %v1903_v44 = vsel %vm319_vm4, %v1901_v48, %v1902_v58  ;;  %v1928_v48 = vmul.f32 %v5345_v35, %v1922_v24 }
 0x1e0   :  { %v5477_v38 = vpop.permute.xlu1 %1412  ;;  %v5479_v59 = vpop.permute.xlu0 %1414  ;;  %v1900_v21 = vsel %vm319_vm4, %v1897_v54, %v1899_v30  ;;  %v1905_v54 = vsel %vm319_vm4, %v1902_v58, %v1904_v42 }
 0x1e1   :  { %7881 = vst [vmem:[#allocation100_spill] sm:$0xff] %v5477_v38  ;;  %7882 = vst [vmem:[#allocation101_spill] sm:$0xff] %v5479_v59  ;;  %v1924_v59 = vmul.f32 %v5247_v5, %v1922_v24 }
 0x1e2   :  { %1876 = vrot.lane.b32.xlu1 %v1868_v62, %s4595_s6  ;;  %1878 = vrot.lane.b32.xlu0 %v1871_v19, %s4595_s6  ;;  %v1923_v19 = vmul.f32 %v5252_v39, %v1922_v24 }
 0x1e3   :  { %v1943_v49 = vrot.slane %v1924_v59, 2  ;;  %v1945_v59 = vrot.slane %v1925_v33, 2 }
 0x1e4   :  { %v5488_v18 = vpop.permute.xlu1 %1416  ;;  %v5490_v20 = vpop.permute.xlu0 %1446  ;;  %v1942_v22 = vrot.slane %v1923_v19, 2  ;;  %v1929_v19 = vstv %s4412_s12  ;;  %s4414_s12 = sld [smem:[#allocation4 + $0x4b]] }
 0x1e5   :  { %7883 = vst [vmem:[#allocation102_spill] sm:$0xff] %v5488_v18  ;;  %7884 = vst [vmem:[#allocation103_spill] sm:$0xff] %v5490_v20  ;;  %v1950_v20 = vrot.slane %v1928_v48, 2  ;;  %v1930_v58 = vmul.f32 %v5284_v10, %v1929_v19  ;;  %v1931_v42 = vmul.f32 %v5287_v9, %v1929_v19 }
 0x1e6   :  { %1880 = vrot.lane.b32.xlu1 %v1873_v52, %s4595_s6  ;;  %1906 = vrot.lane.b32.xlu0 %v1898_v23, %s4595_s6  ;;  %v1944_v30 = vsel %vm319_vm4, %v1942_v22, %v1943_v49  ;;  %v1932_v22 = vmul.f32 %v5296_v26, %v1929_v19 }
 0x1e8   :  { %v5499_v62 = vpop.permute.xlu1 %1448  ;;  %v5501_v60 = vpop.permute.xlu0 %1450 }
 0x1e9   :  { %7885 = vst [vmem:[#allocation104_spill] sm:$0xff] %v5499_v62  ;;  %7886 = vst [vmem:[#allocation105_spill] sm:$0xff] %v5501_v60  ;;  %v1926_v62 = vmul.f32 %v5268_v3, %v1922_v24  ;;  %v1946_v60 = vsel %vm319_vm4, %v1943_v49, %v1945_v59 }
 0x1ea   :  { %1908 = vrot.lane.b32.xlu1 %v1900_v21, %s4595_s6  ;;  %1910 = vrot.lane.b32.xlu0 %v1903_v44, %s4595_s6 }
 0x1ec   :  { %v5508_v52 = vpop.permute.xlu1 %1452  ;;  %v5510_v23 = vpop.permute.xlu0 %1454 }
 0x1ed   :  { %7887 = vst [vmem:[#allocation106_spill] sm:$0xff] %v5508_v52  ;;  %7888 = vst [vmem:[#allocation107_spill] sm:$0xff] %v5510_v23  ;;  %v1947_v23 = vrot.slane %v1926_v62, 2  ;;  %v1948_v52 = vrot.slane %v1927_v28, 2  ;;  %v1982_v28 = vrot.slane %v1930_v58, 2 }
 0x1ee   :  { %1912 = vrot.lane.b32.xlu1 %v1905_v54, %s4595_s6  ;;  %1952 = vrot.lane.b32.xlu0 %v1944_v30, %s4595_s6  ;;  %v1983_v54 = vrot.slane %v1931_v42, 2 }
 0x1ef   :  { %v1949_v62 = vsel %vm319_vm4, %v1947_v23, %v1948_v52  ;;  %v1951_v49 = vsel %vm319_vm4, %v1948_v52, %v1950_v20  ;;  %v1935_v23 = vmul.f32 %v5314_v43, %v1929_v19 }
 0x1f0   :  { %v5519_v21 = vpop.permute.xlu1 %1456  ;;  %v5521_v44 = vpop.permute.xlu0 %1500  ;;  %v1984_v48 = vsel %vm319_vm4, %v1982_v28, %v1983_v54 }
 0x1f1   :  { %7889 = vst [vmem:[#allocation108_spill] sm:$0xff] %v5519_v21  ;;  %7890 = vst [vmem:[#allocation109_spill] sm:$0xff] %v5521_v44  ;;  %v1990_v28 = vrot.slane %v1935_v23, 2 }
 0x1f2   :  { %1954 = vrot.lane.b32.xlu1 %v1946_v60, %s4595_s6  ;;  %1956 = vrot.lane.b32.xlu0 %v1945_v59, %s4595_s6  ;;  %v1933_v59 = vmul.f32 %v5307_v7, %v1929_v19 }
 0x1f4   :  { %v5528_v24 = vpop.permute.xlu1 %1502  ;;  %v5530_v33 = vpop.permute.xlu0 %1504  ;;  %v1987_v42 = vrot.slane %v1933_v59, 2 }
 0x1f5   :  { %7891 = vst [vmem:[#allocation110_spill] sm:$0xff] %v5528_v24  ;;  %7892 = vst [vmem:[#allocation111_spill] sm:$0xff] %v5530_v33  ;;  %v1985_v33 = vrot.slane %v1932_v22, 2  ;;  %v1934_v24 = vmul.f32 %v5310_v4, %v1929_v19 }
 0x1f6   :  { %1958 = vrot.lane.b32.xlu1 %v1949_v62, %s4595_s6  ;;  %1960 = vrot.lane.b32.xlu0 %v1951_v49, %s4595_s6  ;;  %v2016_v62 = vstv %s4370_s13  ;;  %s4372_s13 = sld [smem:[#allocation4 + $0x21]] }
 0x1f7   :  { %v1986_v49 = vsel %vm319_vm4, %v1983_v54, %v1985_v33  ;;  %v2018_v22 = vmul.f32 %v5247_v5, %v2016_v62  ;;  %v2020_v59 = vmul.f32 %v5268_v3, %v2016_v62  ;;  %v2021_v54 = vmul.f32 %v5273_v46, %v2016_v62 }
 0x1f8   :  { %v5537_v60 = vpop.permute.xlu1 %1506  ;;  %v5539_v30 = vpop.permute.xlu0 %1532  ;;  %v2022_v57 = vmul.f32 %v5345_v35, %v2016_v62 }
 0x1f9   :  { %7893 = vst [vmem:[#allocation112_spill] sm:$0xff] %v5537_v60  ;;  %7894 = vst [vmem:[#allocation113_spill] sm:$0xff] %v5539_v30  ;;  %v1988_v30 = vrot.slane %v1934_v24, 2  ;;  %v2037_v60 = vrot.slane %v2018_v22, 4  ;;  %v2042_v38 = vrot.slane %v2021_v54, 4 }
 0x1fa   :  { %1962 = vrot.lane.b32.xlu1 %v1950_v20, %s4595_s6  ;;  %1992 = vrot.lane.b32.xlu0 %v1984_v48, %s4595_s6  ;;  %v2017_v20 = vmul.f32 %v5252_v39, %v2016_v62 }
 0x1fb   :  { %v1989_v24 = vsel %vm319_vm4, %v1987_v42, %v1988_v30  ;;  %v1991_v23 = vsel %vm319_vm4, %v1988_v30, %v1990_v28 }
 0x1fc   :  { %v5547_v52 = vpop.permute.xlu1 %1534  ;;  %v5549_v58 = vpop.permute.xlu0 %1536 }
 0x1fd   :  { %7895 = vst [vmem:[#allocation114_spill] sm:$0xff] %v5547_v52  ;;  %7896 = vst [vmem:[#allocation115_spill] sm:$0xff] %v5549_v58  ;;  %v2019_v52 = vmul.f32 %v5333_v15, %v2016_v62  ;;  %v2044_v62 = vrot.slane %v2022_v57, 4 }
 0x1fe   :  { %1994 = vrot.lane.b32.xlu1 %v1986_v49, %s4595_s6  ;;  %1996 = vrot.lane.b32.xlu0 %v1985_v33, %s4595_s6  ;;  %v2023_v33 = vstv %s4419_s14  ;;  %v2036_v49 = vrot.slane %v2017_v20, 4  ;;  %s4421_s14 = sld [smem:[#allocation4 + $0x52]] }
 0x1ff   :  { %v2039_v18 = vrot.slane %v2019_v52, 4  ;;  %v2024_v30 = vmul.f32 %v5284_v10, %v2023_v33  ;;  %v2025_v22 = vmul.f32 %v5287_v9, %v2023_v33  ;;  %v2026_v54 = vmul.f32 %v5296_v26, %v2023_v33 }
 0x200   :  { %v5556_v19 = vpop.permute.xlu1 %1538  ;;  %v5558_v48 = vpop.permute.xlu0 %1578  ;;  %v2038_v42 = vsel %vm452_vm5, %v2036_v49, %v2037_v60  ;;  %v2029_v57 = vmul.f32 %v5314_v43, %v2023_v33 }
 0x201   :  { %7897 = vst [vmem:[#allocation116_spill] sm:$0xff] %v5556_v19  ;;  %7898 = vst [vmem:[#allocation117_spill] sm:$0xff] %v5558_v48  ;;  %v2041_v48 = vrot.slane %v2020_v59, 4  ;;  %v2040_v52 = vsel %vm452_vm5, %v2037_v60, %v2039_v18  ;;  %v2069_v49 = vrot.slane %v2025_v22, 4  ;;  %v2045_v18 = vsel %vm452_vm5, %v2042_v38, %v2044_v62 }
 0x202   :  { %1998 = vrot.lane.b32.xlu1 %v1989_v24, %s4595_s6  ;;  %2000 = vrot.lane.b32.xlu0 %v1991_v23, %s4595_s6  ;;  %v2068_v23 = vrot.slane %v2024_v30, 4  ;;  %v2071_v60 = vrot.slane %v2026_v54, 4  ;;  %v2076_v54 = vrot.slane %v2029_v57, 4 }
 0x203   :  { %v2043_v59 = vsel %vm452_vm5, %v2041_v48, %v2042_v38  ;;  %v2094_v48 = vstv %s4377_s15  ;;  %s4379_s15 = sld [smem:[#allocation4 + $0x28]] }
 0x204   :  { %v5567_v44 = vpop.permute.xlu1 %1580  ;;  %v5569_v21 = vpop.permute.xlu0 %1582  ;;  %v2070_v30 = vsel %vm452_vm5, %v2068_v23, %v2069_v49  ;;  %v2100_v57 = vmul.f32 %v5345_v35, %v2094_v48 }
 0x205   :  { %7899 = vst [vmem:[#allocation118_spill] sm:$0xff] %v5567_v44  ;;  %7900 = vst [vmem:[#allocation119_spill] sm:$0xff] %v5569_v21  ;;  %v2027_v21 = vmul.f32 %v5307_v7, %v2023_v33  ;;  %v2028_v44 = vmul.f32 %v5310_v4, %v2023_v33  ;;  %v2072_v33 = vsel %vm452_vm5, %v2069_v49, %v2071_v60 }
 0x206   :  { %2002 = vrot.lane.b32.xlu1 %v1990_v28, %s4595_s6  ;;  %2046 = vrot.lane.b32.xlu0 %v2038_v42, %s4595_s6 }
 0x207   :  { %v2073_v22 = vrot.slane %v2027_v21, 4 }
 0x208   :  { %v5577_v20 = vpop.permute.xlu1 %1584  ;;  %v5579_v24 = vpop.permute.xlu0 %1586 }
 0x209   :  { %7901 = vst [vmem:[#allocation120_spill] sm:$0xff] %v5577_v20  ;;  %7902 = vst [vmem:[#allocation121_spill] sm:$0xff] %v5579_v24  ;;  %v2074_v24 = vrot.slane %v2028_v44, 4  ;;  %v2096_v20 = vmul.f32 %v5247_v5, %v2094_v48  ;;  %v2097_v44 = vmul.f32 %v5333_v15, %v2094_v48 }
 0x20a   :  { %2048 = vrot.lane.b32.xlu1 %v2040_v52, %s4595_s6  ;;  %2050 = vrot.lane.b32.xlu0 %v2043_v59, %s4595_s6  ;;  %v2095_v52 = vmul.f32 %v5252_v39, %v2094_v48 }
 0x20b   :  { %v2075_v62 = vsel %vm452_vm5, %v2073_v22, %v2074_v24  ;;  %v2115_v21 = vrot.slane %v2096_v20, 4  ;;  %v2077_v49 = vsel %vm452_vm5, %v2074_v24, %v2076_v54  ;;  %v2117_v20 = vrot.slane %v2097_v44, 4 }
 0x20c   :  { %v5588_v28 = vpop.permute.xlu1 %1588  ;;  %v5590_v42 = vpop.permute.xlu0 %1618  ;;  %v2114_v23 = vrot.slane %v2095_v52, 4  ;;  %v2101_v22 = vstv %s4426_s16  ;;  %s4428_s16 = sld [smem:[#allocation4 + $0x59]] }
 0x20d   :  { %7903 = vst [vmem:[#allocation122_spill] sm:$0xff] %v5588_v28  ;;  %7904 = vst [vmem:[#allocation123_spill] sm:$0xff] %v5590_v42  ;;  %v2122_v42 = vrot.slane %v2100_v57, 4  ;;  %v2102_v24 = vmul.f32 %v5284_v10, %v2101_v22  ;;  %v2103_v54 = vmul.f32 %v5287_v9, %v2101_v22 }
 0x20e   :  { %2052 = vrot.lane.b32.xlu1 %v2045_v18, %s4595_s6  ;;  %2078 = vrot.lane.b32.xlu0 %v2070_v30, %s4595_s6  ;;  %v2116_v60 = vsel %vm452_vm5, %v2114_v23, %v2115_v21 }
 0x210   :  { %v5599_v59 = vpop.permute.xlu1 %1620  ;;  %v5601_v38 = vpop.permute.xlu0 %1622 }
 0x211   :  { %7905 = vst [vmem:[#allocation124_spill] sm:$0xff] %v5599_v59  ;;  %7906 = vst [vmem:[#allocation125_spill] sm:$0xff] %v5601_v38  ;;  %v2098_v59 = vmul.f32 %v5268_v3, %v2094_v48  ;;  %v2099_v38 = vmul.f32 %v5273_v46, %v2094_v48 }
 0x212   :  { %2080 = vrot.lane.b32.xlu1 %v2072_v33, %s4595_s6  ;;  %2082 = vrot.lane.b32.xlu0 %v2075_v62, %s4595_s6 }
 0x213   :  { %v2119_v62 = vrot.slane %v2098_v59, 4 }
 0x214   :  { %v5608_v18 = vpop.permute.xlu1 %1624  ;;  %v5610_v30 = vpop.permute.xlu0 %1626 }
 0x215   :  { %7907 = vst [vmem:[#allocation126_spill] sm:$0xff] %v5608_v18  ;;  %7908 = vst [vmem:[#allocation127_spill] sm:$0xff] %v5610_v30  ;;  %v2120_v30 = vrot.slane %v2099_v38, 4  ;;  %v2118_v18 = vsel %vm452_vm5, %v2115_v21, %v2117_v20  ;;  %v2154_v38 = vrot.slane %v2102_v24, 4  ;;  %v2155_v21 = vrot.slane %v2103_v54, 4 }
 0x216   :  { %2084 = vrot.lane.b32.xlu1 %v2077_v49, %s4595_s6  ;;  %2124 = vrot.lane.b32.xlu0 %v2116_v60, %s4595_s6  ;;  %v2104_v49 = vmul.f32 %v5296_v26, %v2101_v22 }
 0x217   :  { %v2121_v23 = vsel %vm452_vm5, %v2119_v62, %v2120_v30  ;;  %v2123_v59 = vsel %vm452_vm5, %v2120_v30, %v2122_v42  ;;  %v2156_v57 = vsel %vm452_vm5, %v2154_v38, %v2155_v21  ;;  %v2107_v30 = vmul.f32 %v5314_v43, %v2101_v22 }
 0x218   :  { %v5619_v52 = vpop.permute.xlu1 %1628  ;;  %v5621_v33 = vpop.permute.xlu0 %1672  ;;  %v2157_v62 = vrot.slane %v2104_v49, 4 }
 0x219   :  { %7909 = vst [vmem:[#allocation128_spill] sm:$0xff] %v5619_v52  ;;  %7910 = vst [vmem:[#allocation129_spill] sm:$0xff] %v5621_v33  ;;  %v2162_v38 = vrot.slane %v2107_v30, 4 }
 0x21a   :  { %2126 = vrot.lane.b32.xlu1 %v2118_v18, %s4595_s6  ;;  %2128 = vrot.lane.b32.xlu0 %v2117_v20, %s4595_s6  ;;  %v2105_v20 = vmul.f32 %v5307_v7, %v2101_v22 }
 0x21c   :  { %v5628_v48 = vpop.permute.xlu1 %1674  ;;  %v5630_v44 = vpop.permute.xlu0 %1676 }
 0x21d   :  { %7911 = vst [vmem:[#allocation130_spill] sm:$0xff] %v5628_v48  ;;  %7912 = vst [vmem:[#allocation131_spill] sm:$0xff] %v5630_v44  ;;  %v2106_v44 = vmul.f32 %v5310_v4, %v2101_v22 }
 0x21e   :  { %2130 = vrot.lane.b32.xlu1 %v2121_v23, %s4595_s6  ;;  %2132 = vrot.lane.b32.xlu0 %v2123_v59, %s4595_s6  ;;  %v2159_v23 = vrot.slane %v2105_v20, 4  ;;  %v2188_v59 = vstv %s4384_s17  ;;  %s4386_s17 = sld [smem:[#allocation4 + $0x2f]] }
 0x21f   :  { %v2190_v49 = vmul.f32 %v5247_v5, %v2188_v59  ;;  %v2192_v20 = vmul.f32 %v5268_v3, %v2188_v59  ;;  %v2194_v56 = vmul.f32 %v5345_v35, %v2188_v59 }
 0x220   :  { %v5637_v18 = vpop.permute.xlu1 %1678  ;;  %v5639_v60 = vpop.permute.xlu0 %1704 }
 0x221   :  { %7913 = vst [vmem:[#allocation132_spill] sm:$0xff] %v5637_v18  ;;  %7914 = vst [vmem:[#allocation133_spill] sm:$0xff] %v5639_v60  ;;  %v2158_v60 = vsel %vm452_vm5, %v2155_v21, %v2157_v62  ;;  %v2160_v18 = vrot.slane %v2106_v44, 4  ;;  %v2193_v21 = vmul.f32 %v5273_v46, %v2188_v59  ;;  %v2209_v48 = vrot.slane %v2190_v49, 6 }
 0x222   :  { %2134 = vrot.lane.b32.xlu1 %v2122_v42, %s4595_s6  ;;  %2164 = vrot.lane.b32.xlu0 %v2156_v57, %s4595_s6  ;;  %v2189_v42 = vmul.f32 %v5252_v39, %v2188_v59  ;;  %v2213_v28 = vrot.slane %v2192_v20, 6 }
 0x223   :  { %v2161_v44 = vsel %vm452_vm5, %v2159_v23, %v2160_v18  ;;  %v2163_v30 = vsel %vm452_vm5, %v2160_v18, %v2162_v38 }
 0x224   :  { %v5647_v24 = vpop.permute.xlu1 %1706  ;;  %v5649_v54 = vpop.permute.xlu0 %1708 }
 0x225   :  { %7915 = vst [vmem:[#allocation134_spill] sm:$0xff] %v5647_v24  ;;  %7916 = vst [vmem:[#allocation135_spill] sm:$0xff] %v5649_v54  ;;  %v2191_v24 = vmul.f32 %v5333_v15, %v2188_v59 }
 0x226   :  { %2166 = vrot.lane.b32.xlu1 %v2158_v60, %s4595_s6  ;;  %2168 = vrot.lane.b32.xlu0 %v2157_v62, %s4595_s6  ;;  %v2195_v60 = vstv %s4433_s18  ;;  %v2208_v62 = vrot.slane %v2189_v42, 6  ;;  %s4435_s18 = sld [smem:[#allocation4 + $0x60]] }
 0x227   :  { %v2211_v52 = vrot.slane %v2191_v24, 6  ;;  %v2196_v18 = vmul.f32 %v5284_v10, %v2195_v60  ;;  %v2197_v49 = vmul.f32 %v5287_v9, %v2195_v60  ;;  %v2198_v59 = vmul.f32 %v5296_v26, %v2195_v60 }
 0x228   :  { %v5656_v22 = vpop.permute.xlu1 %1710  ;;  %v5658_v57 = vpop.permute.xlu0 %1734  ;;  %v2210_v23 = vsel %vm585_vm6, %v2208_v62, %v2209_v48 }
 0x229   :  { %7917 = vst [vmem:[#allocation136_spill] sm:$0xff] %v5656_v22  ;;  %7918 = vst [vmem:[#allocation137_spill] sm:$0xff] %v5658_v57  ;;  %v2214_v22 = vrot.slane %v2193_v21, 6  ;;  %v2212_v24 = vsel %vm585_vm6, %v2209_v48, %v2211_v52  ;;  %v2216_v21 = vrot.slane %v2194_v56, 6  ;;  %v2241_v62 = vrot.slane %v2197_v49, 6 }
 0x22a   :  { %2170 = vrot.lane.b32.xlu1 %v2161_v44, %s4595_s6  ;;  %2172 = vrot.lane.b32.xlu0 %v2163_v30, %s4595_s6  ;;  %v2240_v30 = vrot.slane %v2196_v18, 6  ;;  %v2243_v56 = vrot.slane %v2198_v59, 6  ;;  %v2201_v49 = vmul.f32 %v5314_v43, %v2195_v60 }
 0x22b   :  { %v2215_v20 = vsel %vm585_vm6, %v2213_v28, %v2214_v22  ;;  %v2217_v28 = vsel %vm585_vm6, %v2214_v22, %v2216_v21  ;;  %v2266_v21 = vstv %s4343_s19  ;;  %s4345_s19 = sld [smem:[#allocation4 + $0x6]] }
 0x22c   :  { %v5667_v33 = vpop.permute.xlu1 %1736  ;;  %v5669_v57 = vpop.permute.xlu0 %1738  ;;  %v2242_v52 = vsel %vm585_vm6, %v2240_v30, %v2241_v62  ;;  %v2248_v22 = vrot.slane %v2201_v49, 6 }
 0x22d   :  { %7919 = vst [vmem:[#allocation138_spill] sm:$0xff] %v5667_v33  ;;  %7920 = vst [vmem:[#allocation139_spill] sm:$0xff] %v5669_v57  ;;  %v2199_v57 = vmul.f32 %v5307_v7, %v2195_v60  ;;  %v2200_v33 = vmul.f32 %v5310_v4, %v2195_v60  ;;  %v2267_v60 = vmul.f32 %v5252_v39, %v2266_v21 }
 0x22e   :  { %2174 = vrot.lane.b32.xlu1 %v2162_v38, %s4595_s6  ;;  %2218 = vrot.lane.b32.xlu0 %v2210_v23, %s4595_s6 }
 0x22f   :  { %v2245_v48 = vrot.slane %v2199_v57, 6  ;;  %v2246_v18 = vrot.slane %v2200_v33, 6 }
 0x230   :  { %v5677_v42 = vpop.permute.xlu1 %1740  ;;  %v5679_v44 = vpop.permute.xlu0 %1754 }
 0x231   :  { %7921 = vst [vmem:[#allocation140_spill] sm:$0xff] %v5677_v42  ;;  %7922 = vst [vmem:[#allocation141_spill] sm:$0xff] %v5679_v44  ;;  %v2247_v44 = vsel %vm585_vm6, %v2245_v48, %v2246_v18  ;;  %v2249_v59 = vsel %vm585_vm6, %v2246_v18, %v2248_v22  ;;  %v2270_v48 = vmul.f32 %v5273_v46, %v2266_v21 }
 0x232   :  { %2220 = vrot.lane.b32.xlu1 %v2212_v24, %s4595_s6  ;;  %2222 = vrot.lane.b32.xlu0 %v2215_v20, %s4595_s6 }
 0x234   :  { %v5688_v38 = vpop.permute.xlu1 %1756  ;;  %v5690_v23 = vpop.permute.xlu0 %1758 }
 0x235   :  { %7923 = vst [vmem:[#allocation142_spill] sm:$0xff] %v5688_v38  ;;  %7924 = vst [vmem:[#allocation143_spill] sm:$0xff] %v5690_v23  ;;  %v2244_v38 = vsel %vm585_vm6, %v2241_v62, %v2243_v56 }
 0x236   :  { %2224 = vrot.lane.b32.xlu1 %v2217_v28, %s4595_s6  ;;  %2250 = vrot.lane.b32.xlu0 %v2242_v52, %s4595_s6  ;;  %v2271_v28 = vstv %s4392_s20  ;;  %s4394_s20 = sld [smem:[#allocation4 + $0x37]] }
 0x237   :  { %v2272_v18 = vmul.f32 %v5284_v10, %v2271_v28 }
 0x238   :  { %v5697_v24 = vpop.permute.xlu1 %1760  ;;  %v5699_v20 = vpop.permute.xlu0 %1790 }
 0x239   :  { %7925 = vst [vmem:[#allocation144_spill] sm:$0xff] %v5697_v24  ;;  %7926 = vst [vmem:[#allocation145_spill] sm:$0xff] %v5699_v20 }
 0x23a   :  { %2252 = vrot.lane.b32.xlu1 %v2244_v38, %s4595_s6  ;;  %2254 = vrot.lane.b32.xlu0 %v2247_v44, %s4595_s6  ;;  %v2268_v38 = vmul.f32 %v5247_v5, %v2266_v21  ;;  %v2269_v44 = vmul.f32 %v5268_v3, %v2266_v21 }
 0x23c   :  { %v5705_v33 = vpop.permute.xlu1 %1792  ;;  %v5707_v57 = vpop.permute.xlu0 %1794 }
 0x23d   :  { %7927 = vst [vmem:[#allocation146_spill] sm:$0xff] %v5705_v33  ;;  %7928 = vst [vmem:[#allocation147_spill] sm:$0xff] %v5707_v57  ;;  %v5805_v33 = vld [vmem:[#allocation3] sm:$0xff] }
 0x23e   :  { %2256 = vrot.lane.b32.xlu1 %v2249_v59, %s4595_s6  ;;  %2280 = vrot.lane.b32.xlu0 %v2267_v60, %s4596_s21  ;;  %v2273_v60 = vmul.f32 %v5287_v9, %v2271_v28  ;;  %v2274_v59 = vmul.f32 %v5307_v7, %v2271_v28  ;;  %s4597_s6 = smov 123  }
 0x240   :  { %v5713_v30 = vpop.permute.xlu1 %1796  ;;  %v5715_v62 = vpop.permute.xlu0 %1798 }
 0x241   :  { %7929 = vst [vmem:[#allocation148_spill] sm:$0xff] %v5713_v30  ;;  %7930 = vst [vmem:[#allocation149_spill] sm:$0xff] %v5715_v62 }
 0x242   :  { %2282 = vrot.lane.b32.xlu1 %v2268_v38, %s4596_s21  ;;  %2284 = vrot.lane.b32.xlu0 %v2269_v44, %s4596_s21  ;;  %v2316_v38 = vstv %s4350_s22  ;;  %s4352_s22 = sld [smem:[#allocation4 + $0xd]] }
 0x244   :  { %v5721_v56 = vpop.permute.xlu1 %1800  ;;  %v5723_v52 = vpop.permute.xlu0 %1820 }
 0x245   :  { %7931 = vst [vmem:[#allocation150_spill] sm:$0xff] %v5721_v56  ;;  %7932 = vst [vmem:[#allocation151_spill] sm:$0xff] %v5723_v52 }
 0x246   :  { %2286 = vrot.lane.b32.xlu1 %v2270_v48, %s4596_s21  ;;  %2300 = vrot.lane.b32.xlu0 %v2272_v18, %s4596_s21  ;;  %v2275_v48 = vmul.f32 %v5310_v4, %v2271_v28  ;;  %v2317_v18 = vmul.f32 %v5252_v39, %v2316_v38 }
 0x248   :  { %v5729_v49 = vpop.permute.xlu1 %1822  ;;  %v5731_v22 = vpop.permute.xlu0 %1824 }
 0x249   :  { %7933 = vst [vmem:[#allocation152_spill] sm:$0xff] %v5729_v49  ;;  %7934 = vst [vmem:[#allocation153_spill] sm:$0xff] %v5731_v22 }
 0x24a   :  { %2302 = vrot.lane.b32.xlu1 %v2273_v60, %s4596_s21  ;;  %2304 = vrot.lane.b32.xlu0 %v2274_v59, %s4596_s21  ;;  %v2318_v60 = vmul.f32 %v5247_v5, %v2316_v38  ;;  %v2319_v59 = vmul.f32 %v5333_v15, %v2316_v38 }
 0x24c   :  { %v5737_v21 = vpop.permute.xlu1 %1826  ;;  %v5739_v44 = vpop.permute.xlu0 %1828 }
 0x24d   :  { %7935 = vst [vmem:[#allocation154_spill] sm:$0xff] %v5737_v21  ;;  %7936 = vst [vmem:[#allocation155_spill] sm:$0xff] %v5739_v44  ;;  %v5793_v44 = vld [vmem:[#allocation2 + $0x20] sm:$0xff]  ;;  %v2397_v21 = vstv %s4406_s25  ;;  %s4367_s25 = sld [smem:[#allocation4 + $0x1c]] }
 0x24e   :  { %2306 = vrot.lane.b32.xlu1 %v2275_v48, %s4596_s21  ;;  %2336 = vrot.lane.b32.xlu0 %v2317_v18, %s4596_s21  ;;  %v2320_v48 = vmul.f32 %v5268_v3, %v2316_v38  ;;  %v2321_v18 = vmul.f32 %v5273_v46, %v2316_v38 }
 0x250   :  { %v5745_v42 = vpop.permute.xlu1 %1830  ;;  %v5747_v22 = vpop.permute.xlu0 %1874 }
 0x251   :  { %7937 = vst [vmem:[#allocation156_spill] sm:$0xff] %v5745_v42  ;;  %7938 = vst [vmem:[#allocation157_spill] sm:$0xff] %v5747_v22  ;;  %v2323_v42 = vstv %s4399_s23  ;;  %s4353_s23 = sld [smem:[#allocation4 + $0xe]] }
 0x252   :  { %2338 = vrot.lane.b32.xlu1 %v2318_v60, %s4596_s21  ;;  %2340 = vrot.lane.b32.xlu0 %v2319_v59, %s4596_s21  ;;  %v2322_v60 = vmul.f32 %v5345_v35, %v2316_v38  ;;  %v2324_v59 = vmul.f32 %v5284_v10, %v2323_v42  ;;  %v2327_v10 = vmul.f32 %v5307_v7, %v2323_v42 }
 0x253   :  { %v2329_v49 = vmul.f32 %v5314_v43, %v2323_v42 }
 0x254   :  { %v5753_v28 = vpop.permute.xlu1 %1876  ;;  %v5755_v39 = vpop.permute.xlu0 %1878 }
 0x255   :  { %7939 = vst [vmem:[#allocation158_spill] sm:$0xff] %v5753_v28  ;;  %7940 = vst [vmem:[#allocation159_spill] sm:$0xff] %v5755_v39  ;;  %v5775_v39 = vld [vmem:[#allocation2 + $0x8] sm:$0xff]  ;;  %v5790_v28 = vld [vmem:[#allocation2 + $0x18] sm:$0xff] }
 0x256   :  { %2342 = vrot.lane.b32.xlu1 %v2320_v48, %s4596_s21  ;;  %2344 = vrot.lane.b32.xlu0 %v2321_v18, %s4596_s21  ;;  %v2325_v48 = vmul.f32 %v5287_v9, %v2323_v42  ;;  %v2326_v18 = vmul.f32 %v5296_v26, %v2323_v42  ;;  %v2328_v26 = vmul.f32 %v5310_v4, %v2323_v42 }
 0x258   :  { %v5761_v5 = vpop.permute.xlu1 %1880  ;;  %v5763_v22 = vpop.permute.xlu0 %1906 }
 0x259   :  { %7941 = vst [vmem:[#allocation160_spill] sm:$0xff] %v5761_v5  ;;  %7942 = vst [vmem:[#allocation161_spill] sm:$0xff] %v5763_v22  ;;  %v2390_v5 = vstv %s4357_s24  ;;  %s177_s24 = sld [smem:[#allocation4]] }
 0x25a   :  { %2346 = vrot.lane.b32.xlu1 %v2322_v60, %s4596_s21  ;;  %2366 = vrot.lane.b32.xlu0 %v2324_v59, %s4596_s21  ;;  %v2392_v38 = vmul.f32 %v5775_v39, %v2390_v5  ;;  %v5781_v60 = vld [vmem:[#allocation2] sm:$0xff]  ;;  %v2393_v22 = vmul.f32 %v5333_v15, %v2390_v5  ;;  %v2395_v7 = vmul.f32 %v5793_v44, %v2390_v5 }
 0x25b   :  { %v2391_v59 = vmul.f32 %v5781_v60, %v2390_v5  ;;  %v2396_v57 = vmul.f32 %v5345_v35, %v2390_v5 }
 0x25c   :  { %v5769_v3 = vpop.permute.xlu1 %1908  ;;  %v5771_v46 = vpop.permute.xlu0 %1910  ;;  %v2413_v56 = vrot.slane %v2393_v22, 2  ;;  %v2416_v30 = vrot.slane %v2395_v7, 2 }
 0x25d   :  { %7943 = vst [vmem:[#allocation162_spill] sm:$0xff] %v5769_v3  ;;  %7944 = vst [vmem:[#allocation163_spill] sm:$0xff] %v5771_v46  ;;  %v2410_v52 = vrot.slane %v2391_v59, 2  ;;  %v5819_v59 = vld [vmem:[#allocation3 + $0x10] sm:$0x3f] }
 0x25e   :  { %2368 = vrot.lane.b32.xlu1 %v2325_v48, %s4596_s21  ;;  %2370 = vrot.lane.b32.xlu0 %v2326_v18, %s4596_s21  ;;  %v2394_v48 = vmul.f32 %v5790_v28, %v2390_v5  ;;  %v2411_v18 = vrot.slane %v2392_v38, 2  ;;  %v2418_v5 = vrot.slane %v2396_v57, 2 }
 0x260   :  { %v5784_v3 = vpop.permute.xlu1 %1912  ;;  %v5786_v9 = vpop.permute.xlu0 %1952  ;;  %v2415_v62 = vrot.slane %v2394_v48, 2  ;;  %v2412_v38 = vsel %vm319_vm4, %v2410_v52, %v2411_v18  ;;  %v2414_v35 = vsel %vm319_vm4, %v2411_v18, %v2413_v56  ;;  %v2400_v48 = vmul.f32 %v5819_v59, %v2397_v21 }
 0x261   :  { %7945 = vst [vmem:[#allocation164_spill] sm:$0xff] %v5784_v3  ;;  %7946 = vst [vmem:[#allocation165_spill] sm:$0xff] %v5786_v9  ;;  %v2419_v56 = vsel %vm319_vm4, %v2416_v30, %v2418_v5 }
 0x262   :  { %2372 = vrot.lane.b32.xlu1 %v2327_v10, %s4596_s21  ;;  %2374 = vrot.lane.b32.xlu0 %v2328_v26, %s4596_s21  ;;  %v2398_v10 = vmul.f32 %v5805_v33, %v2397_v21  ;;  %v5808_v26 = vld [vmem:[#allocation3 + $0x8] sm:$0xff]  ;;  %v2417_v52 = vsel %vm319_vm4, %v2415_v62, %v2416_v30  ;;  %v2445_v18 = vrot.slane %v2400_v48, 2  ;;  %v5847_v48 = vld [vmem:[#allocation2 + $0x10] sm:$0x3f] }
 0x263   :  { %v2399_v43 = vmul.f32 %v5808_v26, %v2397_v21 }
 0x264   :  { %v5799_v4 = vpop.permute.xlu1 %1954  ;;  %v5801_v15 = vpop.permute.xlu0 %1956  ;;  %v2442_v7 = vrot.slane %v2398_v10, 2  ;;  %v5835_v10 = vld [vmem:[#allocation3 + $0x28] sm:$0x3f] }
 0x265   :  { %7947 = vst [vmem:[#allocation166_spill] sm:$0xff] %v5799_v4  ;;  %7948 = vst [vmem:[#allocation167_spill] sm:$0xff] %v5801_v15  ;;  %v2443_v15 = vrot.slane %v2399_v43, 2  ;;  %v5822_v4 = vld [vmem:[#allocation3 + $0x18] sm:$0xff]  ;;  %v2403_v43 = vmul.f32 %v5835_v10, %v2397_v21 }
 0x266   :  { %2376 = vrot.lane.b32.xlu1 %v2329_v49, %s4596_s21  ;;  %2420 = vrot.lane.b32.xlu0 %v2412_v38, %s4596_s21  ;;  %v2401_v49 = vmul.f32 %v5822_v4, %v2397_v21  ;;  %v5825_v38 = vld [vmem:[#allocation3 + $0x20] sm:$0xff] }
 0x267   :  { %v2444_v9 = vsel %vm319_vm4, %v2442_v7, %v2443_v15  ;;  %v2446_v7 = vsel %vm319_vm4, %v2443_v15, %v2445_v18  ;;  %v5862_v18 = vld [vmem:[#allocation2 + $0x28] sm:$0x3f] }
 0x268   :  { %v5813_v42 = vpop.permute.xlu1 %1958  ;;  %v5815_v22 = vpop.permute.xlu0 %1960  ;;  %v2447_v20 = vrot.slane %v2401_v49, 2  ;;  %v2450_v49 = vrot.slane %v2403_v43, 2 }
 0x269   :  { %7949 = vst [vmem:[#allocation168_spill] sm:$0xff] %v5813_v42  ;;  %7950 = vst [vmem:[#allocation169_spill] sm:$0xff] %v5815_v22  ;;  %v2402_v42 = vmul.f32 %v5825_v38, %v2397_v21  ;;  %v2468_v22 = vstv %s4364_s26  ;;  %s4381_s26 = sld [smem:[#allocation4 + $0x2a]] }
 0x26a   :  { %2422 = vrot.lane.b32.xlu1 %v2414_v35, %s4596_s21  ;;  %2424 = vrot.lane.b32.xlu0 %v2417_v52, %s4596_s21  ;;  %v2470_v35 = vmul.f32 %v5775_v39, %v2468_v22  ;;  %v2469_v52 = vmul.f32 %v5781_v60, %v2468_v22  ;;  %v2471_v21 = vmul.f32 %v5847_v48, %v2468_v22 }
 0x26b   :  { %v2448_v3 = vrot.slane %v2402_v42, 2  ;;  %v2474_v43 = vmul.f32 %v5862_v18, %v2468_v22 }
 0x26c   :  { %v5830_v62 = vpop.permute.xlu1 %1962  ;;  %v5832_v57 = vpop.permute.xlu0 %1992 }
 0x26d   :  { %7951 = vst [vmem:[#allocation170_spill] sm:$0xff] %v5830_v62  ;;  %7952 = vst [vmem:[#allocation171_spill] sm:$0xff] %v5832_v57  ;;  %v2449_v42 = vsel %vm319_vm4, %v2447_v20, %v2448_v3  ;;  %v2489_v57 = vrot.slane %v2470_v35, 2  ;;  %v2472_v62 = vmul.f32 %v5790_v28, %v2468_v22  ;;  %v2451_v24 = vsel %vm319_vm4, %v2448_v3, %v2450_v49 }
 0x26e   :  { %2426 = vrot.lane.b32.xlu1 %v2419_v56, %s4596_s21  ;;  %2452 = vrot.lane.b32.xlu0 %v2444_v9, %s4596_s21  ;;  %v2488_v9 = vrot.slane %v2469_v52, 2  ;;  %v2473_v20 = vmul.f32 %v5793_v44, %v2468_v22  ;;  %v2475_v35 = vstv %s4413_s27  ;;  %v2496_v49 = vrot.slane %v2474_v43, 2  ;;  %s4402_s27 = sld [smem:[#allocation4 + $0x3f]] }
 0x26f   :  { %v2493_v3 = vrot.slane %v2472_v62, 2 }
 0x270   :  { %v5843_v30 = vpop.permute.xlu1 %1994  ;;  %v5845_v5 = vpop.permute.xlu0 %1996  ;;  %v2490_v15 = vsel %vm319_vm4, %v2488_v9, %v2489_v57  ;;  %v2476_v9 = vmul.f32 %v5805_v33, %v2475_v35 }
 0x271   :  { %7953 = vst [vmem:[#allocation172_spill] sm:$0xff] %v5843_v30  ;;  %7954 = vst [vmem:[#allocation173_spill] sm:$0xff] %v5845_v5  ;;  %v2491_v5 = vrot.slane %v2471_v21, 2 }
 0x272   :  { %2454 = vrot.lane.b32.xlu1 %v2446_v7, %s4596_s21  ;;  %2456 = vrot.lane.b32.xlu0 %v2449_v42, %s4596_s21  ;;  %v2494_v42 = vrot.slane %v2473_v20, 2  ;;  %v2528_v20 = vrot.slane %v2476_v9, 2 }
 0x273   :  { %v2492_v7 = vsel %vm319_vm4, %v2489_v57, %v2491_v5 }
 0x274   :  { %v5854_v56 = vpop.permute.xlu1 %1998  ;;  %v5856_v30 = vpop.permute.xlu0 %2000  ;;  %v2495_v57 = vsel %vm319_vm4, %v2493_v3, %v2494_v42  ;;  %v2497_v62 = vsel %vm319_vm4, %v2494_v42, %v2496_v49  ;;  %v2481_v3 = vmul.f32 %v5835_v10, %v2475_v35 }
 0x275   :  { %7955 = vst [vmem:[#allocation174_spill] sm:$0xff] %v5854_v56  ;;  %7956 = vst [vmem:[#allocation175_spill] sm:$0xff] %v5856_v30  ;;  %v2477_v30 = vmul.f32 %v5808_v26, %v2475_v35 }
 0x276   :  { %2458 = vrot.lane.b32.xlu1 %v2451_v24, %s4596_s21  ;;  %2498 = vrot.lane.b32.xlu0 %v2490_v15, %s4596_s21  ;;  %v2478_v15 = vmul.f32 %v5819_v59, %v2475_v35 }
 0x277   :  { %v2529_v43 = vrot.slane %v2477_v30, 2 }
 0x278   :  { %v5867_v52 = vpop.permute.xlu1 %2002  ;;  %v5869_v21 = vpop.permute.xlu0 %2046 }
 0x279   :  { %7957 = vst [vmem:[#allocation176_spill] sm:$0xff] %v5867_v52  ;;  %7958 = vst [vmem:[#allocation177_spill] sm:$0xff] %v5869_v21  ;;  %v2531_v21 = vrot.slane %v2478_v15, 2  ;;  %v2480_v52 = vmul.f32 %v5825_v38, %v2475_v35 }
 0x27a   :  { %2500 = vrot.lane.b32.xlu1 %v2492_v7, %s4596_s21  ;;  %2502 = vrot.lane.b32.xlu0 %v2491_v5, %s4596_s21 }
 0x27c   :  { %v5876_v24 = vpop.permute.xlu1 %2048  ;;  %v5878_v22 = vpop.permute.xlu0 %2050 }
 0x27d   :  { %7959 = vst [vmem:[#allocation178_spill] sm:$0xff] %v5876_v24  ;;  %7960 = vst [vmem:[#allocation179_spill] sm:$0xff] %v5878_v22  ;;  %v2479_v24 = vmul.f32 %v5822_v4, %v2475_v35  ;;  %v2530_v22 = vsel %vm319_vm4, %v2528_v20, %v2529_v43  ;;  %v2536_v20 = vrot.slane %v2481_v3, 2 }
 0x27e   :  { %2504 = vrot.lane.b32.xlu1 %v2495_v57, %s4596_s21  ;;  %2506 = vrot.lane.b32.xlu0 %v2497_v62, %s4596_s21  ;;  %v2562_v57 = vstv %s4371_s28  ;;  %v2532_v62 = vsel %vm319_vm4, %v2529_v43, %v2531_v21  ;;  %s6433_s28 = sld [smem:[#allocation4 + $0x31]] }
 0x27f   :  { %v2533_v9 = vrot.slane %v2479_v24, 2  ;;  %v2564_v15 = vmul.f32 %v5775_v39, %v2562_v57  ;;  %v2563_v35 = vmul.f32 %v5781_v60, %v2562_v57  ;;  %v2566_v24 = vmul.f32 %v5790_v28, %v2562_v57 }
 0x280   :  { %v5885_v7 = vpop.permute.xlu1 %2052  ;;  %v5887_v5 = vpop.permute.xlu0 %2078  ;;  %v2567_v43 = vmul.f32 %v5793_v44, %v2562_v57  ;;  %v2568_v23 = vmul.f32 %v5862_v18, %v2562_v57 }
 0x281   :  { %7961 = vst [vmem:[#allocation180_spill] sm:$0xff] %v5885_v7  ;;  %7962 = vst [vmem:[#allocation181_spill] sm:$0xff] %v5887_v5  ;;  %v2534_v5 = vrot.slane %v2480_v52, 2  ;;  %v2583_v7 = vrot.slane %v2564_v15, 4 }
 0x282   :  { %2508 = vrot.lane.b32.xlu1 %v2496_v49, %s4596_s21  ;;  %2538 = vrot.lane.b32.xlu0 %v2530_v22, %s4596_s21  ;;  %v2588_v46 = vrot.slane %v2567_v43, 4 }
 0x283   :  { %v2535_v52 = vsel %vm319_vm4, %v2533_v9, %v2534_v5  ;;  %v2537_v3 = vsel %vm319_vm4, %v2534_v5, %v2536_v20 }
 0x284   :  { %v5895_v30 = vpop.permute.xlu1 %2080  ;;  %v5897_v42 = vpop.permute.xlu0 %2082 }
 0x285   :  { %7963 = vst [vmem:[#allocation182_spill] sm:$0xff] %v5895_v30  ;;  %7964 = vst [vmem:[#allocation183_spill] sm:$0xff] %v5897_v42  ;;  %v2565_v30 = vmul.f32 %v5847_v48, %v2562_v57  ;;  %v2587_v42 = vrot.slane %v2566_v24, 4  ;;  %v2590_v57 = vrot.slane %v2568_v23, 4 }
 0x286   :  { %2540 = vrot.lane.b32.xlu1 %v2532_v62, %s4596_s21  ;;  %2542 = vrot.lane.b32.xlu0 %v2531_v21, %s4596_s21  ;;  %v2569_v21 = vstv %s4420_s0  ;;  %v2582_v62 = vrot.slane %v2563_v35, 4  ;;  %s6441_s0 = sld [smem:[#allocation4 + $0x4d]] }
 0x287   :  { %v2570_v5 = vmul.f32 %v5805_v33, %v2569_v21  ;;  %v2571_v15 = vmul.f32 %v5808_v26, %v2569_v21  ;;  %v2589_v24 = vsel %vm452_vm5, %v2587_v42, %v2588_v46  ;;  %v2572_v43 = vmul.f32 %v5819_v59, %v2569_v21 }
 0x288   :  { %v5904_v49 = vpop.permute.xlu1 %2084  ;;  %v5906_v22 = vpop.permute.xlu0 %2124  ;;  %v2584_v9 = vsel %vm452_vm5, %v2582_v62, %v2583_v7  ;;  %v2575_v23 = vmul.f32 %v5835_v10, %v2569_v21 }
 0x289   :  { %7965 = vst [vmem:[#allocation184_spill] sm:$0xff] %v5904_v49  ;;  %7966 = vst [vmem:[#allocation185_spill] sm:$0xff] %v5906_v22  ;;  %v2585_v49 = vrot.slane %v2565_v30, 4  ;;  %v2615_v62 = vrot.slane %v2571_v15, 4  ;;  %v2617_v42 = vrot.slane %v2572_v43, 4 }
 0x28a   :  { %2544 = vrot.lane.b32.xlu1 %v2535_v52, %s4596_s21  ;;  %2546 = vrot.lane.b32.xlu0 %v2537_v3, %s4596_s21  ;;  %v2614_v3 = vrot.slane %v2570_v5, 4 }
 0x28b   :  { %v2586_v30 = vsel %vm452_vm5, %v2583_v7, %v2585_v49  ;;  %v2591_v7 = vsel %vm452_vm5, %v2588_v46, %v2590_v57  ;;  %v2640_v49 = vstv %s4378_s29  ;;  %v2618_v57 = vsel %vm452_vm5, %v2615_v62, %v2617_v42  ;;  %s6443_s29 = sld [smem:[#allocation4 + $0x3e]] }
 0x28c   :  { %v5915_v56 = vpop.permute.xlu1 %2126  ;;  %v5917_v22 = vpop.permute.xlu0 %2128  ;;  %v2616_v5 = vsel %vm452_vm5, %v2614_v3, %v2615_v62  ;;  %v2645_v42 = vmul.f32 %v5793_v44, %v2640_v49 }
 0x28d   :  { %7967 = vst [vmem:[#allocation186_spill] sm:$0xff] %v5915_v56  ;;  %7968 = vst [vmem:[#allocation187_spill] sm:$0xff] %v5917_v22  ;;  %v2573_v22 = vmul.f32 %v5822_v4, %v2569_v21  ;;  %v2574_v56 = vmul.f32 %v5825_v38, %v2569_v21  ;;  %v2643_v21 = vmul.f32 %v5847_v48, %v2640_v49 }
 0x28e   :  { %2548 = vrot.lane.b32.xlu1 %v2536_v20, %s4596_s21  ;;  %2592 = vrot.lane.b32.xlu0 %v2584_v9, %s4596_s21 }
 0x28f   :  { %v2619_v15 = vrot.slane %v2573_v22, 4  ;;  %v2622_v22 = vrot.slane %v2575_v23, 4 }
 0x290   :  { %v5925_v35 = vpop.permute.xlu1 %2130  ;;  %v5927_v52 = vpop.permute.xlu0 %2132 }
 0x291   :  { %7969 = vst [vmem:[#allocation188_spill] sm:$0xff] %v5925_v35  ;;  %7970 = vst [vmem:[#allocation189_spill] sm:$0xff] %v5927_v52  ;;  %v2620_v52 = vrot.slane %v2574_v56, 4  ;;  %v2642_v35 = vmul.f32 %v5775_v39, %v2640_v49 }
 0x292   :  { %2594 = vrot.lane.b32.xlu1 %v2586_v30, %s4596_s21  ;;  %2596 = vrot.lane.b32.xlu0 %v2589_v24, %s4596_s21  ;;  %v2641_v30 = vmul.f32 %v5781_v60, %v2640_v49 }
 0x293   :  { %v2621_v43 = vsel %vm452_vm5, %v2619_v15, %v2620_v52  ;;  %v2661_v56 = vrot.slane %v2642_v35, 4  ;;  %v2646_v35 = vmul.f32 %v5862_v18, %v2640_v49 }
 0x294   :  { %v5936_v20 = vpop.permute.xlu1 %2134  ;;  %v5938_v9 = vpop.permute.xlu0 %2164  ;;  %v2660_v3 = vrot.slane %v2641_v30, 4 }
 0x295   :  { %7971 = vst [vmem:[#allocation190_spill] sm:$0xff] %v5936_v20  ;;  %7972 = vst [vmem:[#allocation191_spill] sm:$0xff] %v5938_v9  ;;  %v2647_v9 = vstv %s4427_s30  ;;  %v2623_v20 = vsel %vm452_vm5, %v2620_v52, %v2622_v22  ;;  %v2666_v52 = vrot.slane %v2645_v42, 4  ;;  %s6447_s30 = sld [smem:[#allocation4 + $0x5b]] }
 0x296   :  { %2598 = vrot.lane.b32.xlu1 %v2591_v7, %s4596_s21  ;;  %2624 = vrot.lane.b32.xlu0 %v2616_v5, %s4596_s21  ;;  %v2662_v62 = vsel %vm452_vm5, %v2660_v3, %v2661_v56  ;;  %v2649_v22 = vmul.f32 %v5808_v26, %v2647_v9 }
 0x298   :  { %v5947_v24 = vpop.permute.xlu1 %2166  ;;  %v5949_v46 = vpop.permute.xlu0 %2168 }
 0x299   :  { %7973 = vst [vmem:[#allocation192_spill] sm:$0xff] %v5947_v24  ;;  %7974 = vst [vmem:[#allocation193_spill] sm:$0xff] %v5949_v46  ;;  %v2663_v24 = vrot.slane %v2643_v21, 4  ;;  %v2644_v46 = vmul.f32 %v5790_v28, %v2640_v49  ;;  %v2648_v21 = vmul.f32 %v5805_v33, %v2647_v9 }
 0x29a   :  { %2626 = vrot.lane.b32.xlu1 %v2618_v57, %s4596_s21  ;;  %2628 = vrot.lane.b32.xlu0 %v2621_v43, %s4596_s21  ;;  %v2668_v43 = vrot.slane %v2646_v35, 4  ;;  %v2651_v35 = vmul.f32 %v5822_v4, %v2647_v9 }
 0x29b   :  { %v2664_v30 = vsel %vm452_vm5, %v2661_v56, %v2663_v24  ;;  %v2665_v57 = vrot.slane %v2644_v46, 4  ;;  %v2700_v3 = vrot.slane %v2648_v21, 4  ;;  %v2650_v46 = vmul.f32 %v5819_v59, %v2647_v9 }
 0x29c   :  { %v5956_v7 = vpop.permute.xlu1 %2170  ;;  %v5958_v5 = vpop.permute.xlu0 %2172  ;;  %v2669_v56 = vsel %vm452_vm5, %v2666_v52, %v2668_v43 }
 0x29d   :  { %7975 = vst [vmem:[#allocation194_spill] sm:$0xff] %v5956_v7  ;;  %7976 = vst [vmem:[#allocation195_spill] sm:$0xff] %v5958_v5  ;;  %v2703_v21 = vrot.slane %v2650_v46, 4 }
 0x29e   :  { %2630 = vrot.lane.b32.xlu1 %v2623_v20, %s4596_s21  ;;  %2670 = vrot.lane.b32.xlu0 %v2662_v62, %s4596_s21  ;;  %v2667_v62 = vsel %vm452_vm5, %v2665_v57, %v2666_v52  ;;  %v2652_v57 = vmul.f32 %v5825_v38, %v2647_v9  ;;  %v2653_v52 = vmul.f32 %v5835_v10, %v2647_v9 }
 0x2a0   :  { %v5967_v23 = vpop.permute.xlu1 %2174  ;;  %v5969_v15 = vpop.permute.xlu0 %2218 }
 0x2a1   :  { %7977 = vst [vmem:[#allocation196_spill] sm:$0xff] %v5967_v23  ;;  %7978 = vst [vmem:[#allocation197_spill] sm:$0xff] %v5969_v15  ;;  %v2701_v15 = vrot.slane %v2649_v22, 4 }
 0x2a2   :  { %2672 = vrot.lane.b32.xlu1 %v2664_v30, %s4596_s21  ;;  %2674 = vrot.lane.b32.xlu0 %v2663_v24, %s4596_s21 }
 0x2a3   :  { %v2702_v30 = vsel %vm452_vm5, %v2700_v3, %v2701_v15  ;;  %v2708_v3 = vrot.slane %v2653_v52, 4 }
 0x2a4   :  { %v5976_v20 = vpop.permute.xlu1 %2220  ;;  %v5978_v49 = vpop.permute.xlu0 %2222 }
 0x2a5   :  { %7979 = vst [vmem:[#allocation198_spill] sm:$0xff] %v5976_v20  ;;  %7980 = vst [vmem:[#allocation199_spill] sm:$0xff] %v5978_v49  ;;  %v2706_v49 = vrot.slane %v2652_v57, 4 }
 0x2a6   :  { %2676 = vrot.lane.b32.xlu1 %v2667_v62, %s4596_s21  ;;  %2678 = vrot.lane.b32.xlu0 %v2669_v56, %s4596_s21  ;;  %v2705_v56 = vrot.slane %v2651_v35, 4 }
 0x2a7   :  { %v2709_v52 = vsel %vm452_vm5, %v2706_v49, %v2708_v3 }
 0x2a8   :  { %v5985_v42 = vpop.permute.xlu1 %2224  ;;  %v5987_v24 = vpop.permute.xlu0 %2250  ;;  %v2707_v57 = vsel %vm452_vm5, %v2705_v56, %v2706_v49 }
 0x2a9   :  { %7981 = vst [vmem:[#allocation200_spill] sm:$0xff] %v5985_v42  ;;  %7982 = vst [vmem:[#allocation201_spill] sm:$0xff] %v5987_v24  ;;  %v2734_v24 = vstv %s4385_s3  ;;  %v2704_v42 = vsel %vm452_vm5, %v2701_v15, %v2703_v21  ;;  %s6449_s3 = sld [smem:[#allocation4 + $0x7]] }
 0x2aa   :  { %2680 = vrot.lane.b32.xlu1 %v2668_v43, %s4596_s21  ;;  %2710 = vrot.lane.b32.xlu0 %v2702_v30, %s4596_s21  ;;  %v2736_v46 = vmul.f32 %v5775_v39, %v2734_v24  ;;  %v2735_v9 = vmul.f32 %v5781_v60, %v2734_v24  ;;  %v2738_v35 = vmul.f32 %v5790_v28, %v2734_v24 }
 0x2ab   :  { %v2739_v15 = vmul.f32 %v5793_v44, %v2734_v24 }
 0x2ac   :  { %v5995_v22 = vpop.permute.xlu1 %2252  ;;  %v5997_v62 = vpop.permute.xlu0 %2254  ;;  %v2755_v20 = vrot.slane %v2736_v46, 6  ;;  %v2759_v7 = vrot.slane %v2738_v35, 6 }
 0x2ad   :  { %7983 = vst [vmem:[#allocation202_spill] sm:$0xff] %v5995_v22  ;;  %7984 = vst [vmem:[#allocation203_spill] sm:$0xff] %v5997_v62  ;;  %v2737_v22 = vmul.f32 %v5847_v48, %v2734_v24  ;;  %v2740_v62 = vmul.f32 %v5862_v18, %v2734_v24 }
 0x2ae   :  { %2712 = vrot.lane.b32.xlu1 %v2704_v42, %s4596_s21  ;;  %2714 = vrot.lane.b32.xlu0 %v2703_v21, %s4596_s21  ;;  %v2741_v42 = vstv %s4434_s1  ;;  %v2754_v21 = vrot.slane %v2735_v9, 6  ;;  %s6465_s1 = sld [smem:[#allocation4 + $0x15]] }
 0x2af   :  { %v2757_v5 = vrot.slane %v2737_v22, 6  ;;  %v2742_v49 = vmul.f32 %v5805_v33, %v2741_v42  ;;  %v2743_v46 = vmul.f32 %v5808_v26, %v2741_v42  ;;  %v2744_v24 = vmul.f32 %v5819_v59, %v2741_v42 }
 0x2b0   :  { %v6004_v43 = vpop.permute.xlu1 %2256  ;;  %v6006_v30 = vpop.permute.xlu0 %2280  ;;  %v2756_v56 = vsel %vm585_vm6, %v2754_v21, %v2755_v20 }
 0x2b1   :  { %7985 = vst [vmem:[#allocation204_spill] sm:$0xff] %v6004_v43  ;;  %7986 = vst [vmem:[#allocation205_spill] sm:$0xff] %v6006_v30  ;;  %v2760_v43 = vrot.slane %v2739_v15, 6  ;;  %v2758_v22 = vsel %vm585_vm6, %v2755_v20, %v2757_v5  ;;  %v2762_v15 = vrot.slane %v2740_v62, 6  ;;  %v2787_v21 = vrot.slane %v2743_v46, 6 }
 0x2b2   :  { %2716 = vrot.lane.b32.xlu1 %v2707_v57, %s4596_s21  ;;  %2718 = vrot.lane.b32.xlu0 %v2709_v52, %s4596_s21  ;;  %v2786_v52 = vrot.slane %v2742_v49, 6  ;;  %v2789_v5 = vrot.slane %v2744_v24, 6  ;;  %v2747_v46 = vmul.f32 %v5835_v10, %v2741_v42 }
 0x2b3   :  { %v2761_v35 = vsel %vm585_vm6, %v2759_v7, %v2760_v43  ;;  %v2763_v7 = vsel %vm585_vm6, %v2760_v43, %v2762_v15  ;;  %v2812_v15 = vstv %s4344_s4  ;;  %s6467_s4 = sld [smem:[#allocation4 + $0x23]] }
 0x2b4   :  { %v6015_v23 = vpop.permute.xlu1 %2282  ;;  %v6017_v30 = vpop.permute.xlu0 %2284  ;;  %v2788_v20 = vsel %vm585_vm6, %v2786_v52, %v2787_v21  ;;  %v2794_v43 = vrot.slane %v2747_v46, 6  ;;  %v6541_v25 = vstv %s6465_s1 }
 0x2b5   :  { %7987 = vst [vmem:[#allocation206_spill] sm:$0xff] %v6015_v23  ;;  %7988 = vst [vmem:[#allocation207_spill] sm:$0xff] %v6017_v30  ;;  %v2745_v30 = vmul.f32 %v5822_v4, %v2741_v42  ;;  %v2746_v23 = vmul.f32 %v5825_v38, %v2741_v42  ;;  %v2813_v42 = vmul.f32 %v5781_v60, %v2812_v15 }
 0x2b6   :  { %2720 = vrot.lane.b32.xlu1 %v2708_v3, %s4596_s21  ;;  %2764 = vrot.lane.b32.xlu0 %v2756_v56, %s4596_s21 }
 0x2b7   :  { %v2791_v62 = vrot.slane %v2745_v30, 6  ;;  %v2792_v49 = vrot.slane %v2746_v23, 6 }
 0x2b8   :  { %v6025_v9 = vpop.permute.xlu1 %2286  ;;  %v6027_v57 = vpop.permute.xlu0 %2300 }
 0x2b9   :  { %7989 = vst [vmem:[#allocation208_spill] sm:$0xff] %v6025_v9  ;;  %7990 = vst [vmem:[#allocation209_spill] sm:$0xff] %v6027_v57  ;;  %v2793_v57 = vsel %vm585_vm6, %v2791_v62, %v2792_v49  ;;  %v2795_v24 = vsel %vm585_vm6, %v2792_v49, %v2794_v43  ;;  %v2816_v62 = vmul.f32 %v5793_v44, %v2812_v15 }
 0x2ba   :  { %2766 = vrot.lane.b32.xlu1 %v2758_v22, %s4596_s21  ;;  %2768 = vrot.lane.b32.xlu0 %v2761_v35, %s4596_s21 }
 0x2bc   :  { %v6036_v3 = vpop.permute.xlu1 %2302  ;;  %v6038_v56 = vpop.permute.xlu0 %2304 }
 0x2bd   :  { %7991 = vst [vmem:[#allocation210_spill] sm:$0xff] %v6036_v3  ;;  %7992 = vst [vmem:[#allocation211_spill] sm:$0xff] %v6038_v56  ;;  %v2790_v3 = vsel %vm585_vm6, %v2787_v21, %v2789_v5 }
 0x2be   :  { %2770 = vrot.lane.b32.xlu1 %v2763_v7, %s4596_s21  ;;  %2796 = vrot.lane.b32.xlu0 %v2788_v20, %s4596_s21  ;;  %v2817_v7 = vstv %s4393_s5  ;;  %s6492_s5 = sld [smem:[#allocation4 + $0x1b]] }
 0x2bf   :  { %v2818_v49 = vmul.f32 %v5805_v33, %v2817_v7 }
 0x2c0   :  { %v6045_v22 = vpop.permute.xlu1 %2306  ;;  %v6047_v35 = vpop.permute.xlu0 %2336 }
 0x2c1   :  { %7993 = vst [vmem:[#allocation212_spill] sm:$0xff] %v6045_v22  ;;  %7994 = vst [vmem:[#allocation213_spill] sm:$0xff] %v6047_v35 }
 0x2c2   :  { %2798 = vrot.lane.b32.xlu1 %v2790_v3, %s4596_s21  ;;  %2800 = vrot.lane.b32.xlu0 %v2793_v57, %s4596_s21  ;;  %v2814_v3 = vmul.f32 %v5775_v39, %v2812_v15  ;;  %v2815_v57 = vmul.f32 %v5790_v28, %v2812_v15 }
 0x2c4   :  { %v6053_v23 = vpop.permute.xlu1 %2338  ;;  %v6055_v30 = vpop.permute.xlu0 %2340 }
 0x2c5   :  { %7995 = vst [vmem:[#allocation214_spill] sm:$0xff] %v6053_v23  ;;  %7996 = vst [vmem:[#allocation215_spill] sm:$0xff] %v6055_v30 }
 0x2c6   :  { %2802 = vrot.lane.b32.xlu1 %v2795_v24, %s4596_s21  ;;  %2826 = vrot.lane.b32.xlu0 %v2813_v42, %s4597_s6  ;;  %v2819_v42 = vmul.f32 %v5808_v26, %v2817_v7  ;;  %v2820_v24 = vmul.f32 %v5822_v4, %v2817_v7  ;;  %s4598_s21 = smov 122  }
 0x2c8   :  { %v6061_v52 = vpop.permute.xlu1 %2342  ;;  %v6063_v21 = vpop.permute.xlu0 %2344 }
 0x2c9   :  { %7997 = vst [vmem:[#allocation216_spill] sm:$0xff] %v6061_v52  ;;  %7998 = vst [vmem:[#allocation217_spill] sm:$0xff] %v6063_v21 }
 0x2ca   :  { %2828 = vrot.lane.b32.xlu1 %v2814_v3, %s4597_s6  ;;  %2830 = vrot.lane.b32.xlu0 %v2815_v57, %s4597_s6  ;;  %v2862_v3 = vstv %s4351_s7  ;;  %s6593_s7 = sld [smem:[#allocation4 + $0x4c]] }
 0x2cc   :  { %v6069_v5 = vpop.permute.xlu1 %2346  ;;  %v6071_v20 = vpop.permute.xlu0 %2366 }
 0x2cd   :  { %7999 = vst [vmem:[#allocation218_spill] sm:$0xff] %v6069_v5  ;;  %8000 = vst [vmem:[#allocation219_spill] sm:$0xff] %v6071_v20 }
 0x2ce   :  { %2832 = vrot.lane.b32.xlu1 %v2816_v62, %s4597_s6  ;;  %2846 = vrot.lane.b32.xlu0 %v2818_v49, %s4597_s6  ;;  %v2821_v62 = vmul.f32 %v5825_v38, %v2817_v7  ;;  %v2863_v49 = vmul.f32 %v5781_v60, %v2862_v3 }
 0x2d0   :  { %v6077_v46 = vpop.permute.xlu1 %2368  ;;  %v6079_v43 = vpop.permute.xlu0 %2370 }
 0x2d1   :  { %8001 = vst [vmem:[#allocation220_spill] sm:$0xff] %v6077_v46  ;;  %8002 = vst [vmem:[#allocation221_spill] sm:$0xff] %v6079_v43 }
 0x2d2   :  { %2848 = vrot.lane.b32.xlu1 %v2819_v42, %s4597_s6  ;;  %2850 = vrot.lane.b32.xlu0 %v2820_v24, %s4597_s6  ;;  %v2864_v42 = vmul.f32 %v5775_v39, %v2862_v3  ;;  %v2865_v24 = vmul.f32 %v5847_v48, %v2862_v3 }
 0x2d4   :  { %v6085_v15 = vpop.permute.xlu1 %2372  ;;  %v6087_v57 = vpop.permute.xlu0 %2374 }
 0x2d5   :  { %8003 = vst [vmem:[#allocation222_spill] sm:$0xff] %v6085_v15  ;;  %8004 = vst [vmem:[#allocation223_spill] sm:$0xff] %v6087_v57 }
 0x2d6   :  { %2852 = vrot.lane.b32.xlu1 %v2821_v62, %s4597_s6  ;;  %2882 = vrot.lane.b32.xlu0 %v2863_v49, %s4597_s6  ;;  %v2866_v62 = vmul.f32 %v5790_v28, %v2862_v3  ;;  %v2867_v49 = vmul.f32 %v5793_v44, %v2862_v3 }
 0x2d8   :  { %v6093_v9 = vpop.permute.xlu1 %2376  ;;  %v6095_v43 = vpop.permute.xlu0 %2420 }
 0x2d9   :  { %8005 = vst [vmem:[#allocation224_spill] sm:$0xff] %v6093_v9  ;;  %8006 = vst [vmem:[#allocation225_spill] sm:$0xff] %v6095_v43  ;;  %v2869_v9 = vstv %s4400_s8  ;;  %s6658_s8 = sld [smem:[#allocation4 + $0x46]] }
 0x2da   :  { %2884 = vrot.lane.b32.xlu1 %v2864_v42, %s4597_s6  ;;  %2886 = vrot.lane.b32.xlu0 %v2865_v24, %s4597_s6  ;;  %v2868_v42 = vmul.f32 %v5862_v18, %v2862_v3  ;;  %v2870_v24 = vmul.f32 %v5805_v33, %v2869_v9  ;;  %v2873_v3 = vmul.f32 %v5822_v4, %v2869_v9 }
 0x2db   :  { %v2874_v46 = vmul.f32 %v5825_v38, %v2869_v9 }
 0x2dc   :  { %v6101_v7 = vpop.permute.xlu1 %2422  ;;  %v6103_v57 = vpop.permute.xlu0 %2424 }
 0x2dd   :  { %8007 = vst [vmem:[#allocation226_spill] sm:$0xff] %v6101_v7  ;;  %8008 = vst [vmem:[#allocation227_spill] sm:$0xff] %v6103_v57 }
 0x2de   :  { %2888 = vrot.lane.b32.xlu1 %v2866_v62, %s4597_s6  ;;  %2890 = vrot.lane.b32.xlu0 %v2867_v49, %s4597_s6  ;;  %v2871_v62 = vmul.f32 %v5808_v26, %v2869_v9  ;;  %v2872_v49 = vmul.f32 %v5819_v59, %v2869_v9 }
 0x2e0   :  { %v6109_v43 = vpop.permute.xlu1 %2426  ;;  %v6111_v15 = vpop.permute.xlu0 %2452 }
 0x2e1   :  { %8009 = vst [vmem:[#allocation228_spill] sm:$0xff] %v6109_v43  ;;  %8010 = vst [vmem:[#allocation229_spill] sm:$0xff] %v6111_v15  ;;  %v2936_v43 = vstv %s4358_s9  ;;  %s6694_s9 = sld [smem:[#allocation4 + $0x14]] }
 0x2e2   :  { %2892 = vrot.lane.b32.xlu1 %v2868_v42, %s4597_s6  ;;  %2912 = vrot.lane.b32.xlu0 %v2870_v24, %s4597_s6  ;;  %v2938_v15 = vmul.f32 %v5775_v39, %v2936_v43  ;;  %v2937_v42 = vmul.f32 %v5781_v60, %v2936_v43  ;;  %v2939_v20 = vmul.f32 %v5847_v48, %v2936_v43 }
 0x2e3   :  { %v2940_v5 = vmul.f32 %v5790_v28, %v2936_v43  ;;  %v2941_v21 = vmul.f32 %v5793_v44, %v2936_v43 }
 0x2e4   :  { %v6117_v57 = vpop.permute.xlu1 %2454  ;;  %v6119_v7 = vpop.permute.xlu0 %2456  ;;  %v2957_v52 = vrot.slane %v2938_v15, 2  ;;  %v2956_v30 = vrot.slane %v2937_v42, 2  ;;  %v2959_v35 = vrot.slane %v2939_v20, 2 }
 0x2e5   :  { %8011 = vst [vmem:[#allocation230_spill] sm:$0xff] %v6117_v57  ;;  %8012 = vst [vmem:[#allocation231_spill] sm:$0xff] %v6119_v7  ;;  %v2962_v22 = vrot.slane %v2941_v21, 2  ;;  %v2942_v7 = vmul.f32 %v5862_v18, %v2936_v43 }
 0x2e6   :  { %2914 = vrot.lane.b32.xlu1 %v2871_v62, %s4597_s6  ;;  %2916 = vrot.lane.b32.xlu0 %v2872_v49, %s4597_s6  ;;  %v2943_v62 = vstv %s4407_s10  ;;  %v2875_v49 = vmul.f32 %v5835_v10, %v2869_v9  ;;  %v2958_v15 = vsel %vm319_vm4, %v2956_v30, %v2957_v52  ;;  %s6711_s10 = sld [smem:[#allocation4 + $0x54]] }
 0x2e7   :  { %v2964_v20 = vrot.slane %v2942_v7, 2  ;;  %v2946_v43 = vmul.f32 %v5819_v59, %v2943_v62  ;;  %v2948_v56 = vmul.f32 %v5825_v38, %v2943_v62  ;;  %v2949_v7 = vmul.f32 %v5835_v10, %v2943_v62 }
 0x2e8   :  { %v6128_v24 = vpop.permute.xlu1 %2458  ;;  %v6130_v57 = vpop.permute.xlu0 %2498 }
 0x2e9   :  { %8013 = vst [vmem:[#allocation232_spill] sm:$0xff] %v6128_v24  ;;  %8014 = vst [vmem:[#allocation233_spill] sm:$0xff] %v6130_v57  ;;  %v2961_v24 = vrot.slane %v2940_v5, 2  ;;  %v2960_v5 = vsel %vm319_vm4, %v2957_v52, %v2959_v35  ;;  %v2965_v35 = vsel %vm319_vm4, %v2962_v22, %v2964_v20  ;;  %v2991_v52 = vrot.slane %v2946_v43, 2 }
 0x2ea   :  { %2918 = vrot.lane.b32.xlu1 %v2873_v3, %s4597_s6  ;;  %2920 = vrot.lane.b32.xlu0 %v2874_v46, %s4597_s6  ;;  %v2944_v3 = vmul.f32 %v5805_v33, %v2943_v62  ;;  %v2945_v46 = vmul.f32 %v5808_v26, %v2943_v62 }
 0x2eb   :  { %v2963_v21 = vsel %vm319_vm4, %v2961_v24, %v2962_v22  ;;  %v3014_v24 = vstv %s4365_s11  ;;  %s6744_s11 = sld [smem:[#allocation4 + $0x45]] }
 0x2ec   :  { %v6139_v23 = vpop.permute.xlu1 %2500  ;;  %v6141_v57 = vpop.permute.xlu0 %2502  ;;  %v2988_v30 = vrot.slane %v2944_v3, 2 }
 0x2ed   :  { %8015 = vst [vmem:[#allocation234_spill] sm:$0xff] %v6139_v23  ;;  %8016 = vst [vmem:[#allocation235_spill] sm:$0xff] %v6141_v57  ;;  %v2989_v57 = vrot.slane %v2945_v46, 2  ;;  %v2947_v23 = vmul.f32 %v5822_v4, %v2943_v62  ;;  %v3017_v62 = vmul.f32 %v5847_v48, %v3014_v24 }
 0x2ee   :  { %2922 = vrot.lane.b32.xlu1 %v2875_v49, %s4597_s6  ;;  %2966 = vrot.lane.b32.xlu0 %v2958_v15, %s4597_s6 }
 0x2ef   :  { %v2990_v3 = vsel %vm319_vm4, %v2988_v30, %v2989_v57  ;;  %v2993_v46 = vrot.slane %v2947_v23, 2  ;;  %v2992_v20 = vsel %vm319_vm4, %v2989_v57, %v2991_v52  ;;  %v3019_v52 = vmul.f32 %v5793_v44, %v3014_v24 }
 0x2f0   :  { %v6149_v9 = vpop.permute.xlu1 %2504  ;;  %v6151_v42 = vpop.permute.xlu0 %2506 }
 0x2f1   :  { %8017 = vst [vmem:[#allocation236_spill] sm:$0xff] %v6149_v9  ;;  %8018 = vst [vmem:[#allocation237_spill] sm:$0xff] %v6151_v42  ;;  %v2994_v42 = vrot.slane %v2948_v56, 2  ;;  %v3016_v9 = vmul.f32 %v5775_v39, %v3014_v24  ;;  %v2996_v56 = vrot.slane %v2949_v7, 2  ;;  %v3021_v7 = vstv %s4414_s12  ;;  %s6811_s12 = sld [smem:[#allocation4 + $0x29]] }
 0x2f2   :  { %2968 = vrot.lane.b32.xlu1 %v2960_v5, %s4597_s6  ;;  %2970 = vrot.lane.b32.xlu0 %v2963_v21, %s4597_s6  ;;  %v3015_v5 = vmul.f32 %v5781_v60, %v3014_v24 }
 0x2f3   :  { %v2995_v23 = vsel %vm319_vm4, %v2993_v46, %v2994_v42  ;;  %v3035_v43 = vrot.slane %v3016_v9, 2  ;;  %v3020_v9 = vmul.f32 %v5862_v18, %v3014_v24 }
 0x2f4   :  { %v6160_v49 = vpop.permute.xlu1 %2508  ;;  %v6162_v15 = vpop.permute.xlu0 %2538  ;;  %v3034_v30 = vrot.slane %v3015_v5, 2 }
 0x2f5   :  { %8019 = vst [vmem:[#allocation238_spill] sm:$0xff] %v6160_v49  ;;  %8020 = vst [vmem:[#allocation239_spill] sm:$0xff] %v6162_v15  ;;  %v2997_v15 = vsel %vm319_vm4, %v2994_v42, %v2996_v56  ;;  %v3042_v42 = vrot.slane %v3020_v9, 2  ;;  %v3022_v56 = vmul.f32 %v5805_v33, %v3021_v7 }
 0x2f6   :  { %2972 = vrot.lane.b32.xlu1 %v2965_v35, %s4597_s6  ;;  %2998 = vrot.lane.b32.xlu0 %v2990_v3, %s4597_s6  ;;  %v3036_v57 = vsel %vm319_vm4, %v3034_v30, %v3035_v43  ;;  %v3023_v30 = vmul.f32 %v5808_v26, %v3021_v7 }
 0x2f8   :  { %v6171_v21 = vpop.permute.xlu1 %2540  ;;  %v6173_v22 = vpop.permute.xlu0 %2542  ;;  %v3075_v9 = vrot.slane %v3023_v30, 2 }
 0x2f9   :  { %8021 = vst [vmem:[#allocation240_spill] sm:$0xff] %v6171_v21  ;;  %8022 = vst [vmem:[#allocation241_spill] sm:$0xff] %v6173_v22  ;;  %v3037_v21 = vrot.slane %v3017_v62, 2  ;;  %v3018_v22 = vmul.f32 %v5790_v28, %v3014_v24 }
 0x2fa   :  { %3000 = vrot.lane.b32.xlu1 %v2992_v20, %s4597_s6  ;;  %3002 = vrot.lane.b32.xlu0 %v2995_v23, %s4597_s6  ;;  %v3040_v23 = vrot.slane %v3019_v52, 2  ;;  %v3074_v52 = vrot.slane %v3022_v56, 2 }
 0x2fb   :  { %v3038_v62 = vsel %vm319_vm4, %v3035_v43, %v3037_v21  ;;  %v3039_v20 = vrot.slane %v3018_v22, 2 }
 0x2fc   :  { %v6180_v35 = vpop.permute.xlu1 %2544  ;;  %v6182_v3 = vpop.permute.xlu0 %2546  ;;  %v3043_v22 = vsel %vm319_vm4, %v3040_v23, %v3042_v42 }
 0x2fd   :  { %8023 = vst [vmem:[#allocation242_spill] sm:$0xff] %v6180_v35  ;;  %8024 = vst [vmem:[#allocation243_spill] sm:$0xff] %v6182_v3  ;;  %v3041_v43 = vsel %vm319_vm4, %v3039_v20, %v3040_v23  ;;  %v3027_v20 = vmul.f32 %v5835_v10, %v3021_v7 }
 0x2fe   :  { %3004 = vrot.lane.b32.xlu1 %v2997_v15, %s4597_s6  ;;  %3044 = vrot.lane.b32.xlu0 %v3036_v57, %s4597_s6  ;;  %v3024_v57 = vmul.f32 %v5819_v59, %v3021_v7 }
 0x300   :  { %v6191_v46 = vpop.permute.xlu1 %2548  ;;  %v6193_v5 = vpop.permute.xlu0 %2592 }
 0x301   :  { %8025 = vst [vmem:[#allocation244_spill] sm:$0xff] %v6191_v46  ;;  %8026 = vst [vmem:[#allocation245_spill] sm:$0xff] %v6193_v5  ;;  %v3077_v5 = vrot.slane %v3024_v57, 2  ;;  %v3026_v46 = vmul.f32 %v5825_v38, %v3021_v7 }
 0x302   :  { %3046 = vrot.lane.b32.xlu1 %v3038_v62, %s4597_s6  ;;  %3048 = vrot.lane.b32.xlu0 %v3037_v21, %s4597_s6 }
 0x304   :  { %v6200_v15 = vpop.permute.xlu1 %2594  ;;  %v6202_v24 = vpop.permute.xlu0 %2596 }
 0x305   :  { %8027 = vst [vmem:[#allocation246_spill] sm:$0xff] %v6200_v15  ;;  %8028 = vst [vmem:[#allocation247_spill] sm:$0xff] %v6202_v24  ;;  %v3025_v15 = vmul.f32 %v5822_v4, %v3021_v7  ;;  %v3076_v24 = vsel %vm319_vm4, %v3074_v52, %v3075_v9  ;;  %v3082_v52 = vrot.slane %v3027_v20, 2 }
 0x306   :  { %3050 = vrot.lane.b32.xlu1 %v3041_v43, %s4597_s6  ;;  %3052 = vrot.lane.b32.xlu0 %v3043_v22, %s4597_s6  ;;  %v3108_v43 = vstv %s4372_s13  ;;  %v3078_v22 = vsel %vm319_vm4, %v3075_v9, %v3077_v5  ;;  %s6869_s13 = sld [smem:[#allocation4 + $0x5a]] }
 0x307   :  { %v3079_v30 = vrot.slane %v3025_v15, 2  ;;  %v3110_v57 = vmul.f32 %v5775_v39, %v3108_v43  ;;  %v3109_v7 = vmul.f32 %v5781_v60, %v3108_v43  ;;  %v3112_v15 = vmul.f32 %v5790_v28, %v3108_v43 }
 0x308   :  { %v6209_v62 = vpop.permute.xlu1 %2598  ;;  %v6211_v21 = vpop.permute.xlu0 %2624  ;;  %v3113_v9 = vmul.f32 %v5793_v44, %v3108_v43  ;;  %v3114_v44 = vmul.f32 %v5862_v18, %v3108_v43 }
 0x309   :  { %8029 = vst [vmem:[#allocation248_spill] sm:$0xff] %v6209_v62  ;;  %8030 = vst [vmem:[#allocation249_spill] sm:$0xff] %v6211_v21  ;;  %v3080_v21 = vrot.slane %v3026_v46, 2  ;;  %v3129_v62 = vrot.slane %v3110_v57, 4 }
 0x30a   :  { %3054 = vrot.lane.b32.xlu1 %v3042_v42, %s4597_s6  ;;  %3084 = vrot.lane.b32.xlu0 %v3076_v24, %s4597_s6  ;;  %v3134_v28 = vrot.slane %v3113_v9, 4 }
 0x30b   :  { %v3081_v46 = vsel %vm319_vm4, %v3079_v30, %v3080_v21  ;;  %v3083_v20 = vsel %vm319_vm4, %v3080_v21, %v3082_v52 }
 0x30c   :  { %v6219_v23 = vpop.permute.xlu1 %2626  ;;  %v6221_v56 = vpop.permute.xlu0 %2628 }
 0x30d   :  { %8031 = vst [vmem:[#allocation250_spill] sm:$0xff] %v6219_v23  ;;  %8032 = vst [vmem:[#allocation251_spill] sm:$0xff] %v6221_v56  ;;  %v3111_v23 = vmul.f32 %v5847_v48, %v3108_v43  ;;  %v3136_v43 = vrot.slane %v3114_v44, 4 }
 0x30e   :  { %3086 = vrot.lane.b32.xlu1 %v3078_v22, %s4597_s6  ;;  %3088 = vrot.lane.b32.xlu0 %v3077_v5, %s4597_s6  ;;  %v3115_v5 = vstv %s4421_s14  ;;  %v3128_v22 = vrot.slane %v3109_v7, 4  ;;  %s6933_s14 = sld [smem:[#allocation4 + $0x22]] }
 0x30f   :  { %v3131_v49 = vrot.slane %v3111_v23, 4  ;;  %v3116_v21 = vmul.f32 %v5805_v33, %v3115_v5  ;;  %v3117_v57 = vmul.f32 %v5808_v26, %v3115_v5  ;;  %v3118_v9 = vmul.f32 %v5819_v59, %v3115_v5 }
 0x310   :  { %v6228_v42 = vpop.permute.xlu1 %2630  ;;  %v6230_v24 = vpop.permute.xlu0 %2670  ;;  %v3130_v30 = vsel %vm452_vm5, %v3128_v22, %v3129_v62  ;;  %v3120_v26 = vmul.f32 %v5825_v38, %v3115_v5  ;;  %v3186_v59 = vstv %s4379_s15  ;;  %s6974_s15 = sld [smem:[#allocation4 + $0x53]] }
 0x311   :  { %8033 = vst [vmem:[#allocation252_spill] sm:$0xff] %v6228_v42  ;;  %8034 = vst [vmem:[#allocation253_spill] sm:$0xff] %v6230_v24  ;;  %v3133_v24 = vrot.slane %v3112_v15, 4  ;;  %v3132_v23 = vsel %vm452_vm5, %v3129_v62, %v3131_v49  ;;  %v3161_v22 = vrot.slane %v3117_v57, 4  ;;  %v3137_v49 = vsel %vm452_vm5, %v3134_v28, %v3136_v43  ;;  %v6363_v42 = vld [vmem:[#allocation2 + $0x28] sm:$0x3f] }
 0x312   :  { %3090 = vrot.lane.b32.xlu1 %v3081_v46, %s4597_s6  ;;  %3092 = vrot.lane.b32.xlu0 %v3083_v20, %s4597_s6  ;;  %v3160_v20 = vrot.slane %v3116_v21, 4  ;;  %v3163_v62 = vrot.slane %v3118_v9, 4  ;;  %v3166_v21 = vrot.slane %v3120_v26, 4  ;;  %v3188_v38 = vmul.f32 %v5775_v39, %v3186_v59  ;;  %v6284_v26 = vld [vmem:[#allocation2 + $0x18] sm:$0xff] }
 0x313   :  { %v3135_v15 = vsel %vm452_vm5, %v3133_v24, %v3134_v28  ;;  %v3121_v24 = vmul.f32 %v5835_v10, %v3115_v5  ;;  %v3187_v57 = vmul.f32 %v5781_v60, %v3186_v59  ;;  %v3189_v10 = vmul.f32 %v5847_v48, %v3186_v59 }
 0x314   :  { %v6239_v3 = vpop.permute.xlu1 %2672  ;;  %v6241_v35 = vpop.permute.xlu0 %2674  ;;  %v3162_v44 = vsel %vm452_vm5, %v3160_v20, %v3161_v22  ;;  %v3207_v43 = vrot.slane %v3188_v38, 4  ;;  %v3190_v48 = vmul.f32 %v6284_v26, %v3186_v59 }
 0x315   :  { %8035 = vst [vmem:[#allocation254_spill] sm:$0xff] %v6239_v3  ;;  %8036 = vst [vmem:[#allocation255_spill] sm:$0xff] %v6241_v35  ;;  %v3119_v35 = vmul.f32 %v5822_v4, %v3115_v5  ;;  %v3164_v5 = vsel %vm452_vm5, %v3161_v22, %v3163_v62  ;;  %v3206_v39 = vrot.slane %v3187_v57, 4  ;;  %v3209_v20 = vrot.slane %v3189_v10, 4 }
 0x316   :  { %3094 = vrot.lane.b32.xlu1 %v3082_v52, %s4597_s6  ;;  %3138 = vrot.lane.b32.xlu0 %v3130_v30, %s4597_s6 }
 0x317   :  { %v3165_v4 = vrot.slane %v3119_v35, 4  ;;  %v3168_v35 = vrot.slane %v3121_v24, 4  ;;  %v3208_v62 = vsel %vm452_vm5, %v3206_v39, %v3207_v43  ;;  %v6289_v24 = vld [vmem:[#allocation2 + $0x20] sm:$0xff]  ;;  %v3210_v10 = vsel %vm452_vm5, %v3207_v43, %v3209_v20  ;;  %v6301_v39 = vld [vmem:[#allocation3 + $0x8] sm:$0xff] }
 0x318   :  { %v6249_v7 = vpop.permute.xlu1 %2676  ;;  %v6251_v46 = vpop.permute.xlu0 %2678 }
 0x319   :  { %8037 = vst [vmem:[#allocation256_spill] sm:$0xff] %v6249_v7  ;;  %8038 = vst [vmem:[#allocation257_spill] sm:$0xff] %v6251_v46  ;;  %v3169_v22 = vsel %vm452_vm5, %v3166_v21, %v3168_v35 }
 0x31a   :  { %3140 = vrot.lane.b32.xlu1 %v3132_v23, %s4597_s6  ;;  %3142 = vrot.lane.b32.xlu0 %v3135_v15, %s4597_s6  ;;  %v3167_v15 = vsel %vm452_vm5, %v3165_v4, %v3166_v21  ;;  %v3192_v4 = vmul.f32 %v5862_v18, %v3186_v59 }
 0x31c   :  { %v6260_v52 = vpop.permute.xlu1 %2680  ;;  %v6262_v30 = vpop.permute.xlu0 %2710  ;;  %v3214_v35 = vrot.slane %v3192_v4, 4 }
 0x31d   :  { %8039 = vst [vmem:[#allocation258_spill] sm:$0xff] %v6260_v52  ;;  %8040 = vst [vmem:[#allocation259_spill] sm:$0xff] %v6262_v30  ;;  %v3287_v30 = vstv %s4435_s18  ;;  %s4600_s18 = smov 16  }
 0x31e   :  { %3144 = vrot.lane.b32.xlu1 %v3137_v49, %s4597_s6  ;;  %3170 = vrot.lane.b32.xlu0 %v3162_v44, %s4597_s6  ;;  %v3193_v49 = vstv %s4428_s16  ;;  %v3191_v44 = vmul.f32 %v6289_v24, %v3186_v59  ;;  %s7041_s16 = sld [smem:[#allocation4 + $0x30]] }
 0x31f   :  { %v3194_v21 = vmul.f32 %v5805_v33, %v3193_v49 }
 0x320   :  { %v6271_v23 = vpop.permute.xlu1 %2712  ;;  %v6273_v28 = vpop.permute.xlu0 %2714 }
 0x321   :  { %8041 = vst [vmem:[#allocation260_spill] sm:$0xff] %v6271_v23  ;;  %8042 = vst [vmem:[#allocation261_spill] sm:$0xff] %v6273_v28 }
 0x322   :  { %3172 = vrot.lane.b32.xlu1 %v3164_v5, %s4597_s6  ;;  %3174 = vrot.lane.b32.xlu0 %v3167_v15, %s4597_s6  ;;  %v3211_v5 = vrot.slane %v3190_v48, 4  ;;  %v3212_v15 = vrot.slane %v3191_v44, 4 }
 0x324   :  { %v6280_v9 = vpop.permute.xlu1 %2716  ;;  %v6282_v60 = vpop.permute.xlu0 %2718  ;;  %v3213_v43 = vsel %vm452_vm5, %v3211_v5, %v3212_v15  ;;  %v3215_v33 = vsel %vm452_vm5, %v3212_v15, %v3214_v35 }
 0x325   :  { %8043 = vst [vmem:[#allocation262_spill] sm:$0xff] %v6280_v9  ;;  %8044 = vst [vmem:[#allocation263_spill] sm:$0xff] %v6282_v60  ;;  %v3195_v60 = vmul.f32 %v6301_v39, %v3193_v49  ;;  %v6338_v9 = vld [vmem:[#allocation2 + $0x8] sm:$0xff] }
 0x326   :  { %3176 = vrot.lane.b32.xlu1 %v3169_v22, %s4597_s6  ;;  %3216 = vrot.lane.b32.xlu0 %v3208_v62, %s4597_s6  ;;  %v3246_v22 = vrot.slane %v3194_v21, 4  ;;  %v6312_v62 = vld [vmem:[#allocation3 + $0x10] sm:$0x3f] }
 0x327   :  { %v3247_v48 = vrot.slane %v3195_v60, 4  ;;  %v3196_v44 = vmul.f32 %v6312_v62, %v3193_v49  ;;  %v6325_v60 = vld [vmem:[#allocation3 + $0x20] sm:$0xff] }
 0x328   :  { %v6295_v38 = vpop.permute.xlu1 %2720  ;;  %v6297_v57 = vpop.permute.xlu0 %2764  ;;  %v3292_v56 = vmul.f32 %v6325_v60, %v3287_v30 }
 0x329   :  { %8045 = vst [vmem:[#allocation264_spill] sm:$0xff] %v6295_v38  ;;  %8046 = vst [vmem:[#allocation265_spill] sm:$0xff] %v6297_v57  ;;  %v3248_v5 = vsel %vm452_vm5, %v3246_v22, %v3247_v48  ;;  %v3249_v15 = vrot.slane %v3196_v44, 4  ;;  %v3280_v22 = vstv %s4386_s17  ;;  %s7089_s17 = sld [smem:[#allocation4 + $0x61]] }
 0x32a   :  { %3218 = vrot.lane.b32.xlu1 %v3210_v10, %s4597_s6  ;;  %3220 = vrot.lane.b32.xlu0 %v3209_v20, %s4597_s6  ;;  %v6321_v10 = vld [vmem:[#allocation3 + $0x18] sm:$0xff]  ;;  %v3282_v28 = vmul.f32 %v6338_v9, %v3280_v22 }
 0x32b   :  { %v3197_v21 = vmul.f32 %v6321_v10, %v3193_v49  ;;  %v3250_v44 = vsel %vm452_vm5, %v3247_v48, %v3249_v15  ;;  %v3284_v48 = vmul.f32 %v6284_v26, %v3280_v22 }
 0x32c   :  { %v6306_v18 = vpop.permute.xlu1 %2766  ;;  %v6308_v59 = vpop.permute.xlu0 %2768  ;;  %v3301_v23 = vrot.slane %v3282_v28, 6  ;;  %v6367_v28 = vld [vmem:[#allocation3] sm:$0xff] }
 0x32d   :  { %8047 = vst [vmem:[#allocation266_spill] sm:$0xff] %v6306_v18  ;;  %8048 = vst [vmem:[#allocation267_spill] sm:$0xff] %v6308_v59  ;;  %v3198_v59 = vmul.f32 %v6325_v60, %v3193_v49  ;;  %v6328_v18 = vld [vmem:[#allocation3 + $0x28] sm:$0x3f]  ;;  %v3305_v3 = vrot.slane %v3284_v48, 6 }
 0x32e   :  { %3222 = vrot.lane.b32.xlu1 %v3213_v43, %s4597_s6  ;;  %3224 = vrot.lane.b32.xlu0 %v3215_v33, %s4597_s6  ;;  %v3199_v43 = vmul.f32 %v6328_v18, %v3193_v49  ;;  %v6343_v49 = vld [vmem:[#allocation2] sm:$0xff] }
 0x32f   :  { %v3252_v57 = vrot.slane %v3198_v59, 4 }
 0x330   :  { %v6317_v20 = vpop.permute.xlu1 %2770  ;;  %v6319_v4 = vpop.permute.xlu0 %2796  ;;  %v3254_v38 = vrot.slane %v3199_v43, 4  ;;  %v3285_v43 = vmul.f32 %v6289_v24, %v3280_v22 }
 0x331   :  { %8049 = vst [vmem:[#allocation268_spill] sm:$0xff] %v6317_v20  ;;  %8050 = vst [vmem:[#allocation269_spill] sm:$0xff] %v6319_v4  ;;  %v3251_v20 = vrot.slane %v3197_v21, 4 }
 0x332   :  { %3226 = vrot.lane.b32.xlu1 %v3214_v35, %s4597_s6  ;;  %3256 = vrot.lane.b32.xlu0 %v3248_v5, %s4597_s6  ;;  %v3281_v35 = vmul.f32 %v6343_v49, %v3280_v22 }
 0x334   :  { %v6333_v33 = vpop.permute.xlu1 %2798  ;;  %v6335_v4 = vpop.permute.xlu0 %2800  ;;  %v3300_v52 = vrot.slane %v3281_v35, 6 }
 0x335   :  { %8051 = vst [vmem:[#allocation270_spill] sm:$0xff] %v6333_v33  ;;  %8052 = vst [vmem:[#allocation271_spill] sm:$0xff] %v6335_v4  ;;  %v6350_v33 = vld [vmem:[#allocation2 + $0x10] sm:$0x3f]  ;;  %v3291_v4 = vmul.f32 %v6321_v10, %v3287_v30 }
 0x336   :  { %3258 = vrot.lane.b32.xlu1 %v3250_v44, %s4597_s6  ;;  %3260 = vrot.lane.b32.xlu0 %v3249_v15, %s4597_s6  ;;  %8055 = vst [vmem:[#allocation274_spill] sm:$0xff] %v6350_v33  ;;  %v3283_v59 = vmul.f32 %v6350_v33, %v3280_v22  ;;  %v3253_v44 = vsel %vm452_vm5, %v3251_v20, %v3252_v57 }
 0x337   :  { %v3255_v15 = vsel %vm452_vm5, %v3252_v57, %v3254_v38  ;;  %v3286_v20 = vmul.f32 %v6363_v42, %v3280_v22  ;;  %v3302_v57 = vsel %vm585_vm6, %v3300_v52, %v3301_v23  ;;  %v3290_v52 = vmul.f32 %v6312_v62, %v3287_v30 }
 0x338   :  { %v6346_v5 = vpop.permute.xlu1 %2802  ;;  %v6348_v21 = vpop.permute.xlu0 %2826  ;;  %v3303_v7 = vrot.slane %v3283_v59, 6 }
 0x339   :  { %8053 = vst [vmem:[#allocation272_spill] sm:$0xff] %v6346_v5  ;;  %8054 = vst [vmem:[#allocation273_spill] sm:$0xff] %v6348_v21  ;;  %v3306_v5 = vrot.slane %v3285_v43, 6  ;;  %v3308_v43 = vrot.slane %v3286_v20, 6  ;;  %v3337_v20 = vrot.slane %v3291_v4, 6 }
 0x33a   :  { %3262 = vrot.lane.b32.xlu1 %v3253_v44, %s4597_s6  ;;  %3264 = vrot.lane.b32.xlu0 %v3255_v15, %s4597_s6  ;;  %v3288_v44 = vmul.f32 %v6367_v28, %v3287_v30  ;;  %v3289_v15 = vmul.f32 %v6301_v39, %v3287_v30  ;;  %v3304_v48 = vsel %vm585_vm6, %v3301_v23, %v3303_v7  ;;  %v3335_v7 = vrot.slane %v3290_v52, 6 }
 0x33b   :  { %v3307_v22 = vsel %vm585_vm6, %v3305_v3, %v3306_v5  ;;  %v3309_v3 = vsel %vm585_vm6, %v3306_v5, %v3308_v43  ;;  %v3358_v43 = vstv %s4345_s19  ;;  %s4601_s19 = smov 32  }
 0x33c   :  { %v6359_v21 = vpop.permute.xlu1 %2828  ;;  %v6361_v46 = vpop.permute.xlu0 %2830 }
 0x33d   :  { %8056 = vst [vmem:[#allocation275_spill] sm:$0xff] %v6359_v21  ;;  %8057 = vst [vmem:[#allocation276_spill] sm:$0xff] %v6361_v46  ;;  %v3332_v46 = vrot.slane %v3288_v44, 6  ;;  %v3333_v21 = vrot.slane %v3289_v15, 6  ;;  %v3338_v44 = vrot.slane %v3292_v56, 6  ;;  %v3293_v15 = vmul.f32 %v6328_v18, %v3287_v30 }
 0x33e   :  { %3266 = vrot.lane.b32.xlu1 %v3254_v38, %s4597_s6  ;;  %3310 = vrot.lane.b32.xlu0 %v3302_v57, %s4597_s6  ;;  %v3359_v30 = vmul.f32 %v6343_v49, %v3358_v43 }
 0x33f   :  { %v3334_v23 = vsel %vm585_vm6, %v3332_v46, %v3333_v21  ;;  %v3340_v5 = vrot.slane %v3293_v15, 6 }
 0x340   :  { %v6373_v35 = vpop.permute.xlu1 %2832  ;;  %v6375_v59 = vpop.permute.xlu0 %2846 }
 0x341   :  { %8058 = vst [vmem:[#allocation277_spill] sm:$0xff] %v6373_v35  ;;  %8059 = vst [vmem:[#allocation278_spill] sm:$0xff] %v6375_v59  ;;  %v3339_v59 = vsel %vm585_vm6, %v3337_v20, %v3338_v44  ;;  %v3341_v4 = vsel %vm585_vm6, %v3338_v44, %v3340_v5  ;;  %v3362_v20 = vmul.f32 %v6289_v24, %v3358_v43  ;;  %v6445_v35 = vstv %s4353_s23  ;;  %s4605_s23 = smov 96  }
 0x342   :  { %3312 = vrot.lane.b32.xlu1 %v3304_v48, %s4597_s6  ;;  %3314 = vrot.lane.b32.xlu0 %v3307_v22, %s4597_s6  ;;  %8074 = vst [vmem:[#allocation293_spill] sm:$0xff] %v6445_v35  ;;  %v6588_v58 = vmul.f32 %v6350_v33, %v6445_v35 }
 0x344   :  { %v6384_v38 = vpop.permute.xlu1 %2848  ;;  %v6386_v57 = vpop.permute.xlu0 %2850  ;;  %8098 = vst [vmem:[#allocation314_spill] sm:$0xff] %v6588_v58 }
 0x345   :  { %8060 = vst [vmem:[#allocation279_spill] sm:$0xff] %v6384_v38  ;;  %8061 = vst [vmem:[#allocation280_spill] sm:$0xff] %v6386_v57  ;;  %v3336_v38 = vsel %vm585_vm6, %v3333_v21, %v3335_v7 }
 0x346   :  { %3316 = vrot.lane.b32.xlu1 %v3309_v3, %s4597_s6  ;;  %3342 = vrot.lane.b32.xlu0 %v3334_v23, %s4597_s6  ;;  %v3363_v3 = vstv %s4394_s20  ;;  %s4602_s20 = smov 48  }
 0x347   :  { %v3364_v44 = vmul.f32 %v6367_v28, %v3363_v3 }
 0x348   :  { %v6393_v48 = vpop.permute.xlu1 %2852  ;;  %v6395_v22 = vpop.permute.xlu0 %2882 }
 0x349   :  { %8062 = vst [vmem:[#allocation281_spill] sm:$0xff] %v6393_v48  ;;  %8063 = vst [vmem:[#allocation282_spill] sm:$0xff] %v6395_v22  ;;  %v6501_v22 = vstv %s6443_s29 }
 0x34a   :  { %3344 = vrot.lane.b32.xlu1 %v3336_v38, %s4597_s6  ;;  %3346 = vrot.lane.b32.xlu0 %v3339_v59, %s4597_s6  ;;  %v3360_v38 = vmul.f32 %v6338_v9, %v3358_v43  ;;  %v3361_v59 = vmul.f32 %v6284_v26, %v3358_v43  ;;  %v3417_v11 = vmul.f32 %v6301_v39, %v6501_v22 }
 0x34c   :  { %v6401_v56 = vpop.permute.xlu1 %2884  ;;  %v6403_v46 = vpop.permute.xlu0 %2886 }
 0x34d   :  { %8064 = vst [vmem:[#allocation283_spill] sm:$0xff] %v6401_v56  ;;  %8065 = vst [vmem:[#allocation284_spill] sm:$0xff] %v6403_v46  ;;  %v6495_v46 = vstv %s6433_s28  ;;  %v6498_v56 = vstv %s6441_s0 }
 0x34e   :  { %3348 = vrot.lane.b32.xlu1 %v3341_v4, %s4597_s6  ;;  %3372 = vrot.lane.b32.xlu0 %v3359_v30, %s4598_s21  ;;  %v3365_v30 = vmul.f32 %v6301_v39, %v3363_v3  ;;  %v3366_v4 = vmul.f32 %v6321_v10, %v3363_v3  ;;  %8084 = vst [vmem:[#allocation303_spill] sm:$0xff] %v6495_v46  ;;  %8085 = vst [vmem:[#allocation304_spill] sm:$0xff] %v6498_v56  ;;  %s6557_s6 = sld [smem:[#allocation4 + $0x38]] }
 0x350   :  { %v6409_v21 = vpop.permute.xlu1 %2888  ;;  %v6411_v52 = vpop.permute.xlu0 %2890 }
 0x351   :  { %8066 = vst [vmem:[#allocation285_spill] sm:$0xff] %v6409_v21  ;;  %8067 = vst [vmem:[#allocation286_spill] sm:$0xff] %v6411_v52 }
 0x352   :  { %3374 = vrot.lane.b32.xlu1 %v3360_v38, %s4598_s21  ;;  %3376 = vrot.lane.b32.xlu0 %v3361_v59, %s4598_s21  ;;  %v3408_v38 = vstv %s4352_s22  ;;  %s4604_s22 = smov 80  }
 0x353   :  { %v3413_v52 = vmul.f32 %v6289_v24, %v3408_v38 }
 0x354   :  { %v6417_v7 = vpop.permute.xlu1 %2892  ;;  %v6419_v23 = vpop.permute.xlu0 %2912 }
 0x355   :  { %8068 = vst [vmem:[#allocation287_spill] sm:$0xff] %v6417_v7  ;;  %8069 = vst [vmem:[#allocation288_spill] sm:$0xff] %v6419_v23 }
 0x356   :  { %3378 = vrot.lane.b32.xlu1 %v3362_v20, %s4598_s21  ;;  %3392 = vrot.lane.b32.xlu0 %v3364_v44, %s4598_s21  ;;  %v3367_v20 = vmul.f32 %v6325_v60, %v3363_v3  ;;  %v3409_v44 = vmul.f32 %v6343_v49, %v3408_v38 }
 0x358   :  { %v6425_v15 = vpop.permute.xlu1 %2914  ;;  %v6427_v5 = vpop.permute.xlu0 %2916 }
 0x359   :  { %8070 = vst [vmem:[#allocation289_spill] sm:$0xff] %v6425_v15  ;;  %8071 = vst [vmem:[#allocation290_spill] sm:$0xff] %v6427_v5  ;;  %v300_v5 = vmul.f32 %v6343_v49, %v6445_v35  ;;  %v6478_v15 = vstv %s4402_s27 }
 0x35a   :  { %3394 = vrot.lane.b32.xlu1 %v3365_v30, %s4598_s21  ;;  %3396 = vrot.lane.b32.xlu0 %v3366_v4, %s4598_s21  ;;  %v6455_v30 = vmul.f32 %v6338_v9, %v6445_v35  ;;  %8081 = vst [vmem:[#allocation300_spill] sm:$0xff] %v6478_v15  ;;  %v310_v23 = vmul.f32 %v6321_v10, %v6478_v15 }
 0x35b   :  { %v6484_v7 = vmul.f32 %v6325_v60, %v6478_v15  ;;  %v320_v21 = vrot.slane %v300_v5, 2 }
 0x35c   :  { %v6435_v43 = vpop.permute.xlu1 %2918  ;;  %v6437_v59 = vpop.permute.xlu0 %2920  ;;  %8075 = vst [vmem:[#allocation294_spill] sm:$0xff] %v6455_v30  ;;  %v8088_v5 = vrot.slane %v6455_v30, 2  ;;  %v349_v32 = vrot.slane %v310_v23, 2  ;;  %v3414_v30 = vmul.f32 %v6363_v42, %v3408_v38  ;;  %v6544_v23 = vstv %s6467_s4 }
 0x35d   :  { %8072 = vst [vmem:[#allocation291_spill] sm:$0xff] %v6435_v43  ;;  %8073 = vst [vmem:[#allocation292_spill] sm:$0xff] %v6437_v59  ;;  %v3410_v59 = vmul.f32 %v6338_v9, %v3408_v38  ;;  %v3411_v43 = vmul.f32 %v6350_v33, %v3408_v38 }
 0x35e   :  { %3398 = vrot.lane.b32.xlu1 %v3367_v20, %s4598_s21  ;;  %3428 = vrot.lane.b32.xlu0 %v3409_v44, %s4598_s21  ;;  %v6469_v20 = vstv %s177_s24  ;;  %v3412_v44 = vmul.f32 %v6284_v26, %v3408_v38  ;;  %v322_v57 = vsel %vm319_vm4, %v320_v21, %v8088_v5  ;;  %v3416_v21 = vmul.f32 %v6367_v28, %v6501_v22  ;;  %s4606_s24 = smov 112  }
 0x35f   :  { %8078 = vst [vmem:[#allocation297_spill] sm:$0xff] %v6469_v20  ;;  %v276_v5 = vmul.f32 %v6343_v49, %v6469_v20  ;;  %v6538_v27 = vmul.f32 %v6284_v26, %v6469_v20  ;;  %v6549_v38 = vmul.f32 %v6284_v26, %v6445_v35 }
 0x360   :  { %v6457_v3 = vpop.permute.xlu1 %2922  ;;  %v6459_v4 = vpop.permute.xlu0 %2966 }
 0x361   :  { %8076 = vst [vmem:[#allocation295_spill] sm:$0xff] %v6457_v3  ;;  %8077 = vst [vmem:[#allocation296_spill] sm:$0xff] %v6459_v4  ;;  %v6474_v4 = vstv %s4367_s25  ;;  %v6476_v3 = vstv %s4381_s26  ;;  %s4607_s25 = smov [#allocation9]  }
 0x362   :  { %3430 = vrot.lane.b32.xlu1 %v3410_v59, %s4598_s21  ;;  %3432 = vrot.lane.b32.xlu0 %v3411_v43, %s4598_s21  ;;  %8079 = vst [vmem:[#allocation298_spill] sm:$0xff] %v6474_v4  ;;  %8080 = vst [vmem:[#allocation299_spill] sm:$0xff] %v6476_v3  ;;  %v6505_v48 = vmul.f32 %v6338_v9, %v6474_v4  ;;  %v433_v19 = vmul.f32 %v6343_v49, %v6474_v4  ;;  %s4327_s26 = sshll.u32 %s4607_s25, 4  ;;  %s4328_s26 = int_to_ptr.vmem [resolvable:$true] %s4327_s26 }
 0x363   :  { %v566_v34 = vmul.f32 %v6343_v49, %v6476_v3  ;;  %v6524_v54 = vmul.f32 %v6338_v9, %v6476_v3  ;;  %8092 = vst [vmem:[#allocation310_spill] sm:$0xff] %v6538_v27  ;;  %8093 = vst [vmem:[#allocation311_spill] sm:$0xff] %v6549_v38  ;;  %v334_v27 = vadd.f32 %v322_v57, %v276_v5  ;;  %v8094_v38 = vrot.slane %v6484_v7, 2  ;;  %s4559_s27 = scalar_lea.vmem %s4328_s26, 64  ;;  %p4564_p12 = scmp.lt.s32.totalorder %s4328_s26, %s4328_s26 }
 0x364   :  { %v6486_v59 = vpop.permute.xlu1 %2968  ;;  %v6488_v43 = vpop.permute.xlu0 %2970  ;;  %8086 = vst [vmem:[#allocation305_spill] sm:$0xff] %v6505_v48  ;;  %v453_v50 = vrot.slane %v433_v19, 4  ;;  %v8097_v5 = vrot.slane %v6505_v48, 4  ;;  %v6597_v2 = vmul.f32 %v6350_v33, %v6474_v4  ;;  %v6635_v4 = vmul.f32 %v6338_v9, %v6541_v25  ;;  %p4560_p11 = scmp.ne.s32.totalorder %s4328_s26, %s4559_s27  ;;  %p4565_p13 = scmp.lt.s32.totalorder %s4559_s27, %s4559_s27 }
 0x365   :  { %8082 = vst [vmem:[#allocation301_spill] sm:$0xff] %v6486_v59  ;;  %8083 = vst [vmem:[#allocation302_spill] sm:$0xff] %v6488_v43  ;;  %v6508_v59 = vstv %s6447_s30  ;;  %v6511_v43 = vstv %s6449_s3  ;;  %v586_v20 = vrot.slane %v566_v34, 6  ;;  %v351_v37 = vsel %vm319_vm4, %v349_v32, %v8094_v38 }
 0x366   :  { %8087 = vst [vmem:[#allocation306_spill] sm:$0xff] %v6508_v59  ;;  %3434 = vrot.lane.b32.xlu1 %v3412_v44, %s4598_s21  ;;  %3436 = vrot.lane.b32.xlu0 %v3413_v52, %s4598_s21  ;;  %8089 = vst [vmem:[#allocation307_spill] sm:$0xff] %v6524_v54  ;;  %v283_v34 = vmul.f32 %v6321_v10, %v6495_v46  ;;  %v576_v19 = vmul.f32 %v6321_v10, %v6508_v59  ;;  %p4566_p0 = por %p4565_p13, %p4564_p12 }
 0x367   :  { %v6580_v32 = vmul.f32 %v6325_v60, %v6508_v59  ;;  %v455_v38 = vsel %vm452_vm5, %v453_v50, %v8097_v5  ;;  %8099 = vst [vmem:[#allocation315_spill] sm:$0xff] %v6597_v2  ;;  %v312_v50 = vmul.f32 %v6328_v18, %v6478_v15  ;;  %v286_v53 = vmul.f32 %v6343_v49, %v6511_v43 }
 0x368   :  { %v6527_v44 = vpop.permute.xlu1 %2972  ;;  %v6529_v52 = vpop.permute.xlu0 %2998  ;;  %v360_v48 = vadd.f32 %v351_v37, %v283_v34  ;;  %v3419_v37 = vmul.f32 %v6321_v10, %v6501_v22  ;;  %v3420_v34 = vmul.f32 %v6325_v60, %v6501_v22  ;;  %v615_v15 = vrot.slane %v576_v19, 6  ;;  %p4567_p1 = pnand %p4566_p0, %p4560_p11 }
 0x369   :  { %8090 = vst [vmem:[#allocation308_spill] sm:$0xff] %v6527_v44  ;;  %8091 = vst [vmem:[#allocation309_spill] sm:$0xff] %v6529_v52  ;;  %v443_v52 = vmul.f32 %v6321_v10, %v6498_v56  ;;  %v6555_v44 = vmul.f32 %v6325_v60, %v6498_v56 }
 0x36a   :  { %3438 = vrot.lane.b32.xlu1 %v3414_v30, %s4598_s21  ;;  %3458 = vrot.lane.b32.xlu0 %v3416_v21, %s4598_s21  ;;  %v3418_v30 = vmul.f32 %v6312_v62, %v6501_v22  ;;  %v3560_v21 = vstv %s6492_s5 }
 0x36b   :  { %v3562_v57 = vmul.f32 %v6338_v9, %v3560_v21  ;;  %v3561_v5 = vmul.f32 %v6343_v49, %v3560_v21  ;;  %v6652_v2 = vmul.f32 %v6363_v42, %v3560_v21 }
 0x36c   :  { %v6565_v17 = vpop.permute.xlu1 %3000  ;;  %v6567_v14 = vpop.permute.xlu0 %3002 }
 0x36d   :  { %8095 = vst [vmem:[#allocation312_spill] sm:$0xff] %v6565_v17  ;;  %8096 = vst [vmem:[#allocation313_spill] sm:$0xff] %v6567_v14  ;;  %v482_v17 = vrot.slane %v443_v52, 4  ;;  %v6602_v52 = vadd.f32 %v455_v38, %v334_v27  ;;  %v8101_v14 = vrot.slane %v6524_v54, 6  ;;  %v3581_v27 = vrot.slane %v3562_v57, 2 }
 0x36e   :  { %3460 = vrot.lane.b32.xlu1 %v3417_v11, %s4598_s21  ;;  %3462 = vrot.lane.b32.xlu0 %v3418_v30, %s4598_s21  ;;  %v3563_v38 = vmul.f32 %v6350_v33, %v3560_v21  ;;  %v352_v57 = vrot.slane %v312_v50, 2 }
 0x36f   :  { %8100 = vst [vmem:[#allocation316_spill] sm:$0xff] %v6602_v52  ;;  %v6607_v11 = vsel %vm585_vm6, %v586_v20, %v8101_v14  ;;  %v6621_v14 = vmul.f32 %v6350_v33, %v6476_v3  ;;  %v8106_v20 = vrot.slane %v6555_v44, 4  ;;  %v6629_v52 = vstv %s6557_s6 }
 0x370   :  { %8102 = vst [vmem:[#allocation317_spill] sm:$0xff] %v6607_v11  ;;  %v6609_v30 = vpop.permute.xlu1 %3004  ;;  %v6611_v35 = vpop.permute.xlu0 %3044  ;;  %v445_v11 = vmul.f32 %v6328_v18, %v6498_v56  ;;  %v363_v3 = vmul.f32 %v6343_v49, %v6541_v25  ;;  %v3583_v56 = vrot.slane %v3563_v38, 2 }
 0x371   :  { %8103 = vst [vmem:[#allocation318_spill] sm:$0xff] %v6609_v30  ;;  %8104 = vst [vmem:[#allocation319_spill] sm:$0xff] %v6611_v35  ;;  %v484_v54 = vsel %vm452_vm5, %v482_v17, %v8106_v20 }
 0x372   :  { %8105 = vst [vmem:[#allocation320_spill] sm:$0xff] %v6621_v14  ;;  %3464 = vrot.lane.b32.xlu1 %v3419_v37, %s4598_s21  ;;  %3466 = vrot.lane.b32.xlu0 %v3420_v34, %s4598_s21  ;;  %v493_v19 = vadd.f32 %v484_v54, %v360_v48  ;;  %v3580_v14 = vrot.slane %v3561_v5, 2  ;;  %v3421_v37 = vmul.f32 %v6328_v18, %v6501_v22  ;;  %v8109_v48 = vrot.slane %v6580_v32, 6 }
 0x373   :  { %v3564_v34 = vmul.f32 %v6284_v26, %v3560_v21  ;;  %v3565_v54 = vmul.f32 %v6289_v24, %v3560_v21  ;;  %v485_v58 = vrot.slane %v445_v11, 4  ;;  %v284_v22 = vmul.f32 %v6325_v60, %v6495_v46 }
 0x374   :  { %v6639_v17 = vpop.permute.xlu1 %3046  ;;  %v6641_v20 = vpop.permute.xlu0 %3048  ;;  %v617_v50 = vsel %vm585_vm6, %v615_v15, %v8109_v48  ;;  %v3582_v5 = vsel %vm319_vm4, %v3580_v14, %v3581_v27  ;;  %v3567_v15 = vstv %s6593_s7  ;;  %v8110_v14 = vrot.slane %v6484_v7, 2 }
 0x375   :  { %8107 = vst [vmem:[#allocation321_spill] sm:$0xff] %v6639_v17  ;;  %8108 = vst [vmem:[#allocation322_spill] sm:$0xff] %v6641_v20  ;;  %v578_v20 = vmul.f32 %v6328_v18, %v6508_v59  ;;  %v383_v21 = vrot.slane %v6635_v4, 2  ;;  %v496_v11 = vmul.f32 %v6343_v49, %v6544_v23  ;;  %v6671_v48 = vmul.f32 %v6338_v9, %v6544_v23 }
 0x376   :  { %3468 = vrot.lane.b32.xlu1 %v3421_v37, %s4598_s21  ;;  %3590 = vrot.lane.b32.xlu0 %v3582_v5, %s4598_s21  ;;  %v353_v38 = vsel %vm319_vm4, %v8110_v14, %v352_v57  ;;  %v382_v59 = vrot.slane %v363_v3, 2  ;;  %v365_v37 = vmul.f32 %v6350_v33, %v6541_v25  ;;  %v3585_v7 = vrot.slane %v3564_v34, 2 }
 0x377   :  { %v3586_v17 = vrot.slane %v3565_v54, 2  ;;  %v3584_v57 = vsel %vm319_vm4, %v3581_v27, %v3583_v56  ;;  %v3588_v4 = vrot.slane %v6652_v2, 2  ;;  %v3568_v14 = vmul.f32 %v6367_v28, %v3567_v15 }
 0x378   :  { %v6675_v46 = vpop.permute.xlu1 %3050  ;;  %v6677_v5 = vpop.permute.xlu0 %3052  ;;  %v3569_v35 = vmul.f32 %v6301_v39, %v3567_v15  ;;  %v6683_v30 = vadd.f32 %v617_v50, %v493_v19  ;;  %v618_v3 = vrot.slane %v578_v20, 6  ;;  %v361_v29 = vadd.f32 %v353_v38, %v284_v22 }
 0x379   :  { %8111 = vst [vmem:[#allocation323_spill] sm:$0xff] %v6675_v46  ;;  %8112 = vst [vmem:[#allocation324_spill] sm:$0xff] %v6677_v5  ;;  %v8113_v34 = vrot.slane %v6555_v44, 4  ;;  %v384_v2 = vsel %vm319_vm4, %v382_v59, %v383_v21  ;;  %v515_v54 = vrot.slane %v496_v11, 4  ;;  %v516_v5 = vrot.slane %v6671_v48, 4 }
 0x37a   :  { %3592 = vrot.lane.b32.xlu1 %v3584_v57, %s4598_s21  ;;  %3594 = vrot.lane.b32.xlu0 %v3583_v56, %s4598_s21  ;;  %v385_v19 = vrot.slane %v365_v37, 2  ;;  %v366_v20 = vmul.f32 %v6284_v26, %v6541_v25  ;;  %v6700_v50 = vmul.f32 %v6289_v24, %v6541_v25  ;;  %v3589_v59 = vsel %vm319_vm4, %v3586_v17, %v3588_v4 }
 0x37b   :  { %v486_v27 = vsel %vm452_vm5, %v8113_v34, %v485_v58  ;;  %v3587_v58 = vsel %vm319_vm4, %v3585_v7, %v3586_v17  ;;  %v3620_v22 = vrot.slane %v3568_v14, 2  ;;  %v3621_v38 = vrot.slane %v3569_v35, 2 }
 0x37c   :  { %v6702_v56 = vpop.permute.xlu1 %3054  ;;  %v6704_v44 = vpop.permute.xlu0 %3084  ;;  %v3570_v11 = vmul.f32 %v6312_v62, %v3567_v15  ;;  %v494_v48 = vadd.f32 %v486_v27, %v361_v29  ;;  %v398_v37 = vadd.f32 %v384_v2, %v286_v53  ;;  %v498_v57 = vmul.f32 %v6350_v33, %v6544_v23 }
 0x37d   :  { %8114 = vst [vmem:[#allocation325_spill] sm:$0xff] %v6702_v56  ;;  %8115 = vst [vmem:[#allocation326_spill] sm:$0xff] %v6704_v44  ;;  %v6714_v34 = vstv %s6658_s8  ;;  %v8116_v7 = vrot.slane %v6580_v32, 6  ;;  %v517_v35 = vsel %vm452_vm5, %v515_v54, %v516_v5  ;;  %v287_v29 = vmul.f32 %v6338_v9, %v6511_v43 }
 0x37e   :  { %3596 = vrot.lane.b32.xlu1 %v3587_v58, %s4598_s21  ;;  %3598 = vrot.lane.b32.xlu0 %v3589_v59, %s4598_s21  ;;  %v288_v53 = vmul.f32 %v6350_v33, %v6511_v43  ;;  %v386_v14 = vsel %vm319_vm4, %v383_v21, %v385_v19  ;;  %v387_v27 = vrot.slane %v366_v20, 2  ;;  %v388_v2 = vrot.slane %v6700_v50, 2 }
 0x37f   :  { %v619_v17 = vsel %vm585_vm6, %v8116_v7, %v618_v3  ;;  %v3571_v32 = vmul.f32 %v6321_v10, %v3567_v15  ;;  %v3622_v3 = vsel %vm319_vm4, %v3620_v22, %v3621_v38  ;;  %v3623_v54 = vrot.slane %v3570_v11, 2 }
 0x380   :  { %v6728_v58 = vpop.permute.xlu1 %3086  ;;  %v6730_v59 = vpop.permute.xlu0 %3088  ;;  %v3572_v7 = vmul.f32 %v6325_v60, %v3567_v15  ;;  %v6736_v44 = vmul.f32 %v6328_v18, %v3567_v15  ;;  %v6738_v56 = vadd.f32 %v619_v17, %v494_v48  ;;  %v6740_v21 = vadd.f32 %v517_v35, %v398_v37 }
 0x381   :  { %8117 = vst [vmem:[#allocation327_spill] sm:$0xff] %v6728_v58  ;;  %8118 = vst [vmem:[#allocation328_spill] sm:$0xff] %v6730_v59  ;;  %v518_v20 = vrot.slane %v498_v57, 4  ;;  %v400_v50 = vadd.f32 %v385_v19, %v288_v53  ;;  %v399_v59 = vadd.f32 %v386_v14, %v287_v29  ;;  %v499_v22 = vmul.f32 %v6284_v26, %v6544_v23 }
 0x382   :  { %3600 = vrot.lane.b32.xlu1 %v3588_v4, %s4598_s21  ;;  %3630 = vrot.lane.b32.xlu0 %v3622_v3, %s4598_s21  ;;  %v6750_v15 = vmul.f32 %v6289_v24, %v6544_v23  ;;  %v3482_v11 = vstv %s6694_s9  ;;  %v289_v48 = vmul.f32 %v6284_v26, %v6511_v43  ;;  %v389_v19 = vsel %vm319_vm4, %v387_v27, %v388_v2 }
 0x383   :  { %v368_v4 = vmul.f32 %v6363_v42, %v6541_v25  ;;  %v3484_v17 = vmul.f32 %v6338_v9, %v3482_v11  ;;  %v3624_v35 = vsel %vm319_vm4, %v3621_v38, %v3623_v54  ;;  %v3625_v29 = vrot.slane %v3571_v32, 2 }
 0x384   :  { %v6758_v37 = vpop.permute.xlu1 %3090  ;;  %v6760_v57 = vpop.permute.xlu0 %3092  ;;  %v3626_v53 = vrot.slane %v3572_v7, 2  ;;  %v3628_v14 = vrot.slane %v6736_v44, 2  ;;  %v519_v3 = vsel %vm452_vm5, %v516_v5, %v518_v20  ;;  %v6766_v58 = vadd.f32 %v518_v20, %v400_v50 }
 0x385   :  { %8119 = vst [vmem:[#allocation329_spill] sm:$0xff] %v6758_v37  ;;  %8120 = vst [vmem:[#allocation330_spill] sm:$0xff] %v6760_v57  ;;  %v6769_v27 = vstv %s6711_s10  ;;  %v3483_v25 = vmul.f32 %v6343_v49, %v3482_v11  ;;  %v6774_v57 = vadd.f32 %v519_v3, %v399_v59  ;;  %v520_v37 = vrot.slane %v499_v22, 4 }
 0x386   :  { %3632 = vrot.lane.b32.xlu1 %v3624_v35, %s4598_s21  ;;  %3634 = vrot.lane.b32.xlu0 %v3623_v54, %s4598_s21  ;;  %v521_v38 = vrot.slane %v6750_v15, 4  ;;  %v290_v44 = vmul.f32 %v6289_v24, %v6511_v43  ;;  %v401_v5 = vadd.f32 %v389_v19, %v289_v48  ;;  %v390_v32 = vrot.slane %v368_v4, 2 }
 0x387   :  { %v3503_v50 = vrot.slane %v3484_v17, 2  ;;  %v3485_v54 = vmul.f32 %v6350_v33, %v3482_v11  ;;  %v3627_v35 = vsel %vm319_vm4, %v3625_v29, %v3626_v53  ;;  %v3629_v59 = vsel %vm319_vm4, %v3626_v53, %v3628_v14 }
 0x388   :  { %v6779_v7 = vpop.permute.xlu1 %3094  ;;  %v6781_v20 = vpop.permute.xlu0 %3138  ;;  %v3486_v22 = vmul.f32 %v6284_v26, %v3482_v11  ;;  %v3487_v15 = vmul.f32 %v6289_v24, %v3482_v11  ;;  %v501_v3 = vmul.f32 %v6363_v42, %v6544_v23  ;;  %v291_v48 = vmul.f32 %v6363_v42, %v6511_v43 }
 0x389   :  { %8121 = vst [vmem:[#allocation331_spill] sm:$0xff] %v6779_v7  ;;  %8122 = vst [vmem:[#allocation332_spill] sm:$0xff] %v6781_v20  ;;  %v3502_v19 = vrot.slane %v3483_v25, 2  ;;  %v3489_v4 = vstv %s6744_s11  ;;  %v522_v17 = vsel %vm452_vm5, %v520_v37, %v521_v38  ;;  %v293_v29 = vmul.f32 %v6367_v28, %v6629_v52 }
 0x38a   :  { %3636 = vrot.lane.b32.xlu1 %v3627_v35, %s4598_s21  ;;  %3638 = vrot.lane.b32.xlu0 %v3629_v59, %s4598_s21  ;;  %v370_v53 = vmul.f32 %v6367_v28, %v6714_v34  ;;  %v6802_v23 = vmul.f32 %v6301_v39, %v6714_v34  ;;  %v391_v43 = vsel %vm319_vm4, %v388_v2, %v390_v32  ;;  %v3505_v59 = vrot.slane %v3485_v54, 2 }
 0x38b   :  { %v3504_v25 = vsel %vm319_vm4, %v3502_v19, %v3503_v50  ;;  %v3488_v37 = vmul.f32 %v6363_v42, %v3482_v11  ;;  %v3507_v7 = vrot.slane %v3486_v22, 2  ;;  %v3508_v46 = vrot.slane %v3487_v15, 2 }
 0x38c   :  { %v6805_v20 = vpop.permute.xlu1 %3140  ;;  %v6807_v35 = vpop.permute.xlu0 %3142  ;;  %v3490_v12 = vmul.f32 %v6367_v28, %v3489_v4  ;;  %v3491_v8 = vmul.f32 %v6301_v39, %v3489_v4  ;;  %v523_v1 = vrot.slane %v501_v3, 4  ;;  %v403_v55 = vadd.f32 %v390_v32, %v291_v48 }
 0x38d   :  { %8123 = vst [vmem:[#allocation333_spill] sm:$0xff] %v6805_v20  ;;  %8124 = vst [vmem:[#allocation334_spill] sm:$0xff] %v6807_v35  ;;  %v503_v2 = vmul.f32 %v6367_v28, %v6769_v27  ;;  %v6819_v35 = vmul.f32 %v6301_v39, %v6769_v27  ;;  %v6823_v11 = vadd.f32 %v522_v17, %v401_v5  ;;  %v410_v22 = vrot.slane %v370_v53, 2 }
 0x38e   :  { %3640 = vrot.lane.b32.xlu1 %v3628_v14, %s4598_s21  ;;  %3512 = vrot.lane.b32.xlu0 %v3504_v25, %s4598_s21  ;;  %v402_v54 = vadd.f32 %v391_v43, %v290_v44  ;;  %v411_v15 = vrot.slane %v6802_v23, 2  ;;  %v3506_v3 = vsel %vm319_vm4, %v3503_v50, %v3505_v59  ;;  %v3510_v48 = vrot.slane %v3488_v37, 2 }
 0x38f   :  { %v3492_v20 = vmul.f32 %v6312_v62, %v3489_v4  ;;  %v3493_v0 = vmul.f32 %v6321_v10, %v3489_v4  ;;  %v3509_v14 = vsel %vm319_vm4, %v3507_v7, %v3508_v46  ;;  %v3534_v25 = vrot.slane %v3490_v12, 2 }
 0x390   :  { %v6826_v19 = vpop.permute.xlu1 %3144  ;;  %v6828_v32 = vpop.permute.xlu0 %3170  ;;  %v3535_v5 = vrot.slane %v3491_v8, 2  ;;  %v3494_v44 = vmul.f32 %v6325_v60, %v3489_v4  ;;  %v524_v17 = vsel %vm452_vm5, %v521_v38, %v523_v1  ;;  %v6836_v53 = vadd.f32 %v523_v1, %v403_v55 }
 0x391   :  { %8125 = vst [vmem:[#allocation335_spill] sm:$0xff] %v6826_v19  ;;  %8126 = vst [vmem:[#allocation336_spill] sm:$0xff] %v6828_v32  ;;  %v543_v23 = vrot.slane %v503_v2, 4  ;;  %v412_v50 = vsel %vm319_vm4, %v410_v22, %v411_v15  ;;  %v372_v12 = vmul.f32 %v6312_v62, %v6714_v34  ;;  %v6846_v8 = vmul.f32 %v6325_v60, %v6714_v34 }
 0x392   :  { %3514 = vrot.lane.b32.xlu1 %v3506_v3, %s4598_s21  ;;  %3516 = vrot.lane.b32.xlu0 %v3509_v14, %s4598_s21  ;;  %v373_v55 = vmul.f32 %v6321_v10, %v6714_v34  ;;  %v3511_v7 = vsel %vm319_vm4, %v3508_v46, %v3510_v48  ;;  %v3537_v59 = vrot.slane %v3492_v20, 2  ;;  %v3495_v37 = vmul.f32 %v6328_v18, %v3489_v4 }
 0x393   :  { %v3732_v2 = vstv %s6811_s12  ;;  %v3536_v22 = vsel %vm319_vm4, %v3534_v25, %v3535_v5  ;;  %v3539_v3 = vrot.slane %v3493_v0, 2  ;;  %v3540_v14 = vrot.slane %v3494_v44, 2 }
 0x394   :  { %v6850_v1 = vpop.permute.xlu1 %3172  ;;  %v6852_v38 = vpop.permute.xlu0 %3174  ;;  %v3734_v43 = vmul.f32 %v6338_v9, %v3732_v2  ;;  %v6859_v32 = vadd.f32 %v524_v17, %v402_v54  ;;  %v294_v19 = vmul.f32 %v6301_v39, %v6629_v52  ;;  %v426_v46 = vadd.f32 %v412_v50, %v293_v29 }
 0x395   :  { %8127 = vst [vmem:[#allocation337_spill] sm:$0xff] %v6850_v1  ;;  %8128 = vst [vmem:[#allocation338_spill] sm:$0xff] %v6852_v38  ;;  %v6865_v1 = vmul.f32 %v6312_v62, %v6769_v27  ;;  %v413_v0 = vrot.slane %v372_v12, 2  ;;  %v375_v20 = vmul.f32 %v6328_v18, %v6714_v34  ;;  %v3733_v4 = vmul.f32 %v6343_v49, %v3732_v2 }
 0x396   :  { %3518 = vrot.lane.b32.xlu1 %v3511_v7, %s4598_s21  ;;  %3544 = vrot.lane.b32.xlu0 %v3536_v22, %s4598_s21  ;;  %v8129_v54 = vrot.slane %v6819_v35, 4  ;;  %v416_v25 = vrot.slane %v6846_v8, 2  ;;  %v415_v44 = vrot.slane %v373_v55, 2  ;;  %v3735_v22 = vmul.f32 %v6350_v33, %v3732_v2 }
 0x397   :  { %v3538_v29 = vsel %vm319_vm4, %v3535_v5, %v3537_v59  ;;  %v3541_v50 = vsel %vm319_vm4, %v3539_v3, %v3540_v14  ;;  %v3542_v34 = vrot.slane %v3495_v37, 2  ;;  %v3753_v12 = vrot.slane %v3734_v43, 4 }
 0x398   :  { %v545_v48 = vsel %vm452_vm5, %v543_v23, %v8129_v54  ;;  %v6878_v17 = vpop.permute.xlu1 %3176  ;;  %v6880_v7 = vpop.permute.xlu0 %3216  ;;  %v546_v38 = vrot.slane %v6865_v1, 4  ;;  %v295_v23 = vmul.f32 %v6312_v62, %v6629_v52  ;;  %v507_v8 = vmul.f32 %v6325_v60, %v6769_v27 }
 0x399   :  { %8130 = vst [vmem:[#allocation339_spill] sm:$0xff] %v6878_v17  ;;  %8131 = vst [vmem:[#allocation340_spill] sm:$0xff] %v6880_v7  ;;  %v296_v55 = vmul.f32 %v6321_v10, %v6629_v52  ;;  %v414_v5 = vsel %vm319_vm4, %v411_v15, %v413_v0  ;;  %v506_v43 = vmul.f32 %v6321_v10, %v6769_v27  ;;  %v418_v59 = vrot.slane %v375_v20, 2 }
 0x39a   :  { %3546 = vrot.lane.b32.xlu1 %v3538_v29, %s4598_s21  ;;  %3548 = vrot.lane.b32.xlu0 %v3541_v50, %s4598_s21  ;;  %v3752_v1 = vrot.slane %v3733_v4, 4  ;;  %v417_v37 = vsel %vm319_vm4, %v415_v44, %v416_v25  ;;  %v508_v3 = vmul.f32 %v6328_v18, %v6769_v27  ;;  %v3755_v29 = vrot.slane %v3735_v22, 4 }
 0x39b   :  { %v3736_v50 = vmul.f32 %v6284_v26, %v3732_v2  ;;  %v3543_v15 = vsel %vm319_vm4, %v3540_v14, %v3542_v34  ;;  %v3737_v20 = vmul.f32 %v6289_v24, %v3732_v2  ;;  %v6909_v4 = vmul.f32 %v6363_v42, %v3732_v2 }
 0x39c   :  { %v6900_v54 = vpop.permute.xlu1 %3218  ;;  %v6902_v7 = vpop.permute.xlu0 %3220  ;;  %v3754_v17 = vsel %vm452_vm5, %v3752_v1, %v3753_v12  ;;  %v428_v44 = vadd.f32 %v413_v0, %v295_v23  ;;  %v549_v33 = vrot.slane %v507_v8, 4  ;;  %v298_v27 = vmul.f32 %v6328_v18, %v6629_v52 }
 0x39d   :  { %8132 = vst [vmem:[#allocation341_spill] sm:$0xff] %v6902_v7  ;;  %v3739_v22 = vstv %s6869_s13  ;;  %v427_v26 = vadd.f32 %v414_v5, %v294_v19  ;;  %v548_v7 = vrot.slane %v506_v43, 4  ;;  %v297_v14 = vmul.f32 %v6325_v60, %v6629_v52 }
 0x39e   :  { %3550 = vrot.lane.b32.xlu1 %v3543_v15, %s4598_s21  ;;  %3762 = vrot.lane.b32.xlu0 %v3754_v17, %s4598_s21  ;;  %v419_v24 = vsel %vm319_vm4, %v416_v25, %v418_v59  ;;  %v429_v34 = vadd.f32 %v417_v37, %v296_v55  ;;  %v551_v2 = vrot.slane %v508_v3, 4  ;;  %v3756_v23 = vsel %vm452_vm5, %v3753_v12, %v3755_v29 }
 0x39f   :  { %v3757_v8 = vrot.slane %v3736_v50, 4  ;;  %v3758_v15 = vrot.slane %v3737_v20, 4  ;;  %v3760_v17 = vrot.slane %v6909_v4, 4  ;;  %v3740_v19 = vmul.f32 %v6367_v28, %v3739_v22 }
 0x3a0   :  { %v6919_v1 = vpop.permute.xlu1 %3222  ;;  %v6921_v0 = vpop.permute.xlu0 %3224  ;;  %v3741_v5 = vmul.f32 %v6301_v39, %v3739_v22  ;;  %v8133_v52 = vrot.slane %v6819_v35, 4  ;;  %v430_v55 = vadd.f32 %v419_v24, %v297_v14  ;;  %v431_v43 = vadd.f32 %v418_v59, %v298_v27 }
 0x3a1   :  { %v559_v37 = vadd.f32 %v545_v48, %v426_v46  ;;  %v561_v3 = vadd.f32 %v546_v38, %v428_v44  ;;  %v550_v50 = vsel %vm452_vm5, %v548_v7, %v549_v33  ;;  %v676_v39 = vadd.f32 %v5018_v36, %v6683_v30 }
 0x3a2   :  { %v547_v25 = vsel %vm452_vm5, %v8133_v52, %v546_v38  ;;  %3764 = vrot.lane.b32.xlu1 %v3756_v23, %s4598_s21  ;;  %3766 = vrot.lane.b32.xlu0 %v3755_v29, %s4598_s21  ;;  %v562_v20 = vadd.f32 %v550_v50, %v429_v34  ;;  %v552_v35 = vsel %vm452_vm5, %v549_v33, %v551_v2  ;;  %v3792_v48 = vrot.slane %v3740_v19, 4  ;;  %v8137_v34 = vld [vmem:[#allocation22_spill] sm:$0xff] }
 0x3a3   :  { %v560_v12 = vadd.f32 %v547_v25, %v427_v26  ;;  %v3742_v27 = vmul.f32 %v6312_v62, %v3739_v22  ;;  %v3759_v46 = vsel %vm452_vm5, %v3757_v8, %v3758_v15  ;;  %v3761_v38 = vsel %vm452_vm5, %v3758_v15, %v3760_v17  ;;  %v8140_v25 = vld [vmem:[#allocation68_spill] sm:$0xff] }
 0x3a4   :  { %v6938_v4 = vpop.permute.xlu1 %3226  ;;  %v6940_v59 = vpop.permute.xlu0 %3256  ;;  %v3793_v7 = vrot.slane %v3741_v5, 4  ;;  %v563_v29 = vadd.f32 %v552_v35, %v430_v55  ;;  %v564_v44 = vadd.f32 %v551_v2, %v431_v43  ;;  %v828_v26 = vadd.f32 %v5142_v13, %v676_v39  ;;  %v8141_v43 = vld [vmem:[#allocation95_spill] sm:$0xff] }
 0x3a5   :  { %v677_v36 = vadd.f32 %v5025_v40, %v6738_v56  ;;  %v6952_v62 = vadd.f32 %v5027_v41, %v6740_v21  ;;  %v6956_v33 = vadd.f32 %v5033_v45, %v6774_v57  ;;  %v718_v30 = vadd.f32 %v5035_v47, %v6766_v58 }
 0x3a6   :  { %3768 = vrot.lane.b32.xlu1 %v3759_v46, %s4598_s21  ;;  %3770 = vrot.lane.b32.xlu0 %v3761_v38, %s4598_s21  ;;  %v6962_v13 = vadd.f32 %v5041_v51, %v6823_v11  ;;  %v6966_v14 = vadd.f32 %v5043_v63, %v6859_v32  ;;  %v1000_v40 = vadd.f32 %v5221_v31, %v828_v26  ;;  %v3795_v58 = vrot.slane %v3742_v27, 4  ;;  %v8135_v32 = vld [vmem:[#allocation20_spill] sm:$0xff]  ;;  %v8145_v27 = vld [vmem:[#allocation274_spill] sm:$0xff] }
 0x3a7   :  { %v3743_v45 = vmul.f32 %v6321_v10, %v3739_v22  ;;  %v3794_v47 = vsel %vm452_vm5, %v3792_v48, %v3793_v7  ;;  %v3744_v51 = vmul.f32 %v6325_v60, %v3739_v22  ;;  %v6979_v21 = vmul.f32 %v6328_v18, %v3739_v22  ;;  %v8134_v10 = vld [vmem:[#allocation19_spill] sm:$0xff]  ;;  %v8136_v60 = vld [vmem:[#allocation21_spill] sm:$0xff]  ;;  %v8146_v38 = vld [vmem:[#allocation76_spill] sm:$0xff] }
 0x3a8   :  { %v6969_v56 = vpop.permute.xlu1 %3258  ;;  %v6971_v41 = vpop.permute.xlu0 %3260  ;;  %v721_v63 = vadd.f32 %v5049_v61, %v6836_v53  ;;  %v829_v31 = vadd.f32 %v5151_v6, %v677_v36  ;;  %v1172_v57 = vadd.f32 %v5321_v16, %v1000_v40  ;;  %v6988_v11 = vadd.f32 %v8134_v10, %v559_v37  ;;  %v8138_v61 = vld [vmem:[#allocation53_spill] sm:$0xff]  ;;  %v8139_v53 = vld [vmem:[#allocation75_spill] sm:$0xff] }
 0x3a9   :  { %v6991_v24 = vadd.f32 %v8135_v32, %v560_v12  ;;  %v748_v18 = vadd.f32 %v8136_v60, %v561_v3  ;;  %v3654_v22 = vstv %s6933_s14  ;;  %v6996_v2 = vadd.f32 %v8137_v34, %v562_v20  ;;  %v8142_v3 = vld [vmem:[#allocation23_spill] sm:$0xff]  ;;  %v8144_v20 = vld [vmem:[#allocation25_spill] sm:$0xff]  ;;  %v8150_v32 = vld [vmem:[#allocation96_spill] sm:$0xff] }
 0x3aa   :  { %3772 = vrot.lane.b32.xlu1 %v3760_v17, %s4598_s21  ;;  %3802 = vrot.lane.b32.xlu0 %v3794_v47, %s4598_s21  ;;  %v1001_v6 = vadd.f32 %v8138_v61, %v829_v31  ;;  %v1222_v16 = vadd.f32 %v8139_v53, %v1172_v57  ;;  %v3656_v15 = vmul.f32 %v6338_v9, %v3654_v22  ;;  %v3797_v19 = vrot.slane %v3743_v45, 4  ;;  %v8143_v9 = vld [vmem:[#allocation24_spill] sm:$0xff]  ;;  %v8149_v57 = vld [vmem:[#allocation27_spill] sm:$0xff] }
 0x3ab   :  { %v3796_v17 = vsel %vm452_vm5, %v3793_v7, %v3795_v58  ;;  %v3798_v5 = vrot.slane %v3744_v51, 4  ;;  %v3800_v52 = vrot.slane %v6979_v21, 4  ;;  %v3655_v12 = vmul.f32 %v6343_v49, %v3654_v22  ;;  %v8147_v7 = vld [vmem:[#allocation115_spill] sm:$0xff]  ;;  %v8148_v21 = vld [vmem:[#allocation26_spill] sm:$0xff]  ;;  %v8151_v61 = vld [vmem:[#allocation28_spill] sm:$0xff] }
 0x3ac   :  { %v7000_v23 = vpop.permute.xlu1 %3262  ;;  %v7002_v8 = vpop.permute.xlu0 %3264  ;;  %v1173_v55 = vadd.f32 %v8140_v25, %v1001_v6  ;;  %v1374_v37 = vadd.f32 %v8141_v43, %v1222_v16  ;;  %v7013_v50 = vadd.f32 %v8142_v3, %v563_v29  ;;  %v751_v39 = vadd.f32 %v8143_v9, %v564_v44  ;;  %v8152_v53 = vld [vmem:[#allocation135_spill] sm:$0xff] }
 0x3ad   :  { %v880_v35 = vadd.f32 %v8144_v20, %v718_v30  ;;  %v3657_v46 = vmul.f32 %v8145_v27, %v3654_v22  ;;  %v3675_v45 = vrot.slane %v3656_v15, 4  ;;  %v3661_v47 = vstv %s6974_s15  ;;  %v7030_v30 = vld [vmem:[#allocation2 + $0x20] sm:$0xff]  ;;  %v8158_v20 = vld [vmem:[#allocation30_spill] sm:$0xff]  ;;  %v8159_v27 = vld [vmem:[#allocation31_spill] sm:$0xff] }
 0x3ae   :  { %3804 = vrot.lane.b32.xlu1 %v3796_v17, %s4598_s21  ;;  %3806 = vrot.lane.b32.xlu0 %v3795_v58, %s4598_s21  ;;  %v1223_v48 = vadd.f32 %v8146_v38, %v1173_v55  ;;  %v1546_v26 = vadd.f32 %v8147_v7, %v1374_v37  ;;  %v3799_v49 = vsel %vm452_vm5, %v3797_v19, %v3798_v5  ;;  %v7027_v58 = vld [vmem:[#allocation2 + $0x18] sm:$0xff]  ;;  %v3674_v34 = vrot.slane %v3655_v12, 4  ;;  %v8153_v19 = vld [vmem:[#allocation29_spill] sm:$0xff] }
 0x3af   :  { %v3801_v29 = vsel %vm452_vm5, %v3798_v5, %v3800_v52  ;;  %v3658_v44 = vmul.f32 %v7027_v58, %v3654_v22  ;;  %v3659_v51 = vmul.f32 %v7030_v30, %v3654_v22  ;;  %v883_v31 = vadd.f32 %v8148_v21, %v721_v63  ;;  %v8157_v12 = vld [vmem:[#allocation143_spill] sm:$0xff]  ;;  %v8160_v38 = vld [vmem:[#allocation32_spill] sm:$0xff] }
 0x3b0   :  { %v7020_v36 = vpop.permute.xlu1 %3266  ;;  %v7022_v40 = vpop.permute.xlu0 %3310  ;;  %v920_v10 = vadd.f32 %v8149_v57, %v748_v18  ;;  %v1375_v60 = vadd.f32 %v8150_v32, %v1223_v48  ;;  %v923_v6 = vadd.f32 %v8151_v61, %v751_v39  ;;  %v1718_v16 = vadd.f32 %v8152_v53, %v1546_v26  ;;  %v8154_v18 = vld [vmem:[#allocation116_spill] sm:$0xff]  ;;  %v8162_v26 = vld [vmem:[#allocation163_spill] sm:$0xff]  ;;  %v7078_v32 = vld [vmem:[#allocation3 + $0x18] sm:$0xff] }
 0x3b1   :  { %v3677_v15 = vrot.slane %v3657_v46, 4  ;;  %v3660_v17 = vmul.f32 %v6363_v42, %v3654_v22  ;;  %v7044_v63 = vadd.f32 %v8153_v19, %v880_v35  ;;  %v3676_v43 = vsel %vm452_vm5, %v3674_v34, %v3675_v45  ;;  %v7054_v42 = vld [vmem:[#allocation3 + $0x8] sm:$0xff]  ;;  %v7075_v57 = vld [vmem:[#allocation3 + $0x10] sm:$0x3f] }
 0x3b2   :  { %3808 = vrot.lane.b32.xlu1 %v3799_v49, %s4598_s21  ;;  %3810 = vrot.lane.b32.xlu0 %v3801_v29, %s4598_s21  ;;  %v1547_v5 = vadd.f32 %v8154_v18, %v1375_v60  ;;  %v3662_v37 = vmul.f32 %v6367_v28, %v3661_v47  ;;  %v1768_v3 = vadd.f32 %v8157_v12, %v1718_v16  ;;  %v3679_v9 = vrot.slane %v3658_v44, 4  ;;  %v8161_v28 = vld [vmem:[#allocation136_spill] sm:$0xff]  ;;  %v7081_v60 = vld [vmem:[#allocation3 + $0x20] sm:$0xff] }
 0x3b3   :  { %v3680_v39 = vrot.slane %v3659_v51, 4  ;;  %v3663_v22 = vmul.f32 %v7054_v42, %v3661_v47  ;;  %v7058_v35 = vadd.f32 %v8158_v20, %v883_v31  ;;  %v7061_v46 = vadd.f32 %v8159_v27, %v920_v10  ;;  %v8168_v18 = vld [vmem:[#allocation40_spill] sm:$0xff] }
 0x3b4   :  { %v7047_v25 = vpop.permute.xlu1 %3312  ;;  %v7049_v55 = vpop.permute.xlu0 %3314  ;;  %v7064_v48 = vadd.f32 %v8160_v38, %v923_v6  ;;  %v1719_v7 = vadd.f32 %v8161_v28, %v1547_v5  ;;  %v1920_v49 = vadd.f32 %v8162_v26, %v1768_v3  ;;  %v3678_v29 = vsel %vm452_vm5, %v3675_v45, %v3677_v15  ;;  %v8165_v45 = vld [vmem:[#allocation144_spill] sm:$0xff]  ;;  %v8166_v6 = vld [vmem:[#allocation183_spill] sm:$0xff] }
 0x3b5   :  { %8155 = vst [vmem:[#allocation19_spill] sm:$0xff] %v7047_v25  ;;  %8156 = vst [vmem:[#allocation20_spill] sm:$0xff] %v7049_v55  ;;  %v3682_v44 = vrot.slane %v3660_v17, 4  ;;  %v3706_v31 = vrot.slane %v3662_v37, 4  ;;  %v3664_v10 = vmul.f32 %v7075_v57, %v3661_v47  ;;  %v7084_v34 = vmul.f32 %v7081_v60, %v3661_v47  ;;  %v8167_v17 = vld [vmem:[#allocation39_spill] sm:$0xff]  ;;  %v8170_v12 = vld [vmem:[#allocation164_spill] sm:$0xff] }
 0x3b6   :  { %3812 = vrot.lane.b32.xlu1 %v3800_v52, %s4598_s21  ;;  %3684 = vrot.lane.b32.xlu0 %v3676_v43, %s4598_s21  ;;  %v3665_v52 = vmul.f32 %v7078_v32, %v3661_v47  ;;  %v1769_v61 = vadd.f32 %v8165_v45, %v1719_v7  ;;  %v2092_v53 = vadd.f32 %v8166_v6, %v1920_v49  ;;  %v3707_v15 = vrot.slane %v3663_v22, 4  ;;  %v8169_v43 = vld [vmem:[#allocation41_spill] sm:$0xff]  ;;  %v7107_v20 = vld [vmem:[#allocation3 + $0x28] sm:$0x3f]  ;;  %v8304_v25 = vld [vmem:[#allocation322_spill] sm:$0xff] }
 0x3b7   :  { %v3681_v16 = vsel %vm452_vm5, %v3679_v9, %v3680_v39  ;;  %v7093_v19 = vadd.f32 %v8167_v17, %v6952_v62  ;;  %v7097_v5 = vadd.f32 %v8168_v18, %v6956_v33  ;;  %v7101_v37 = vadd.f32 %v8169_v43, %v6966_v14  ;;  %v8171_v9 = vld [vmem:[#allocation203_spill] sm:$0xff]  ;;  %v8173_v49 = vld [vmem:[#allocation184_spill] sm:$0xff] }
 0x3b8   :  { %v7071_v51 = vpop.permute.xlu1 %3316  ;;  %v7073_v21 = vpop.permute.xlu0 %3342  ;;  %v1921_v3 = vadd.f32 %v8170_v12, %v1769_v61  ;;  %v2264_v22 = vadd.f32 %v8171_v9, %v2092_v53  ;;  %v3667_v62 = vmul.f32 %v7107_v20, %v3661_v47  ;;  %v3826_v27 = vstv %s7041_s16  ;;  %v8174_v45 = vld [vmem:[#allocation211_spill] sm:$0xff]  ;;  %v7120_v53 = vld [vmem:[#allocation2 + $0x8] sm:$0xff] }
 0x3b9   :  { %8163 = vst [vmem:[#allocation21_spill] sm:$0xff] %v7071_v51  ;;  %8164 = vst [vmem:[#allocation22_spill] sm:$0xff] %v7073_v21  ;;  %v3683_v14 = vsel %vm452_vm5, %v3680_v39, %v3682_v44  ;;  %v3709_v28 = vrot.slane %v3664_v10, 4  ;;  %v3711_v7 = vrot.slane %v3665_v52, 4  ;;  %v3712_v26 = vrot.slane %v7084_v34, 4  ;;  %v8176_v18 = vld [vmem:[#allocation43_spill] sm:$0xff] }
 0x3ba   :  { %3686 = vrot.lane.b32.xlu1 %v3678_v29, %s4598_s21  ;;  %3688 = vrot.lane.b32.xlu0 %v3681_v16, %s4598_s21  ;;  %v2093_v29 = vadd.f32 %v8173_v49, %v1921_v3  ;;  %v2314_v61 = vadd.f32 %v8174_v45, %v2264_v22  ;;  %v3708_v6 = vsel %vm452_vm5, %v3706_v31, %v3707_v15  ;;  %v8175_v16 = vld [vmem:[#allocation42_spill] sm:$0xff]  ;;  %v4523_v44 = vld [vmem:[#allocation2] sm:$0xff]  ;;  %v8178_v31 = vld [vmem:[#allocation231_spill] sm:$0xff]  ;;  %v3714_v12 = vrot.slane %v3667_v62, 4 }
 0x3bb   :  { %v3828_v47 = vmul.f32 %v7120_v53, %v3826_v27  ;;  %v881_v17 = vadd.f32 %v8175_v16, %v6962_v13  ;;  %v918_v39 = vadd.f32 %v8176_v18, %v6988_v11  ;;  %v3827_v10 = vmul.f32 %v4523_v44, %v3826_v27  ;;  %v8177_v52 = vld [vmem:[#allocation204_spill] sm:$0xff]  ;;  %v4524_v3 = vld [vmem:[#allocation2 + $0x10] sm:$0x3f] }
 0x3bc   :  { %v7111_v38 = vpop.permute.xlu1 %3344  ;;  %v7113_v33 = vpop.permute.xlu0 %3346  ;;  %v2265_v34 = vadd.f32 %v8177_v52, %v2093_v29  ;;  %v2466_v43 = vadd.f32 %v8178_v31, %v2314_v61  ;;  %v3829_v9 = vmul.f32 %v4524_v3, %v3826_v27  ;;  %v3710_v11 = vsel %vm452_vm5, %v3707_v15, %v3709_v28  ;;  %v8180_v29 = vld [vmem:[#allocation251_spill] sm:$0xff]  ;;  %v8181_v44 = vld [vmem:[#allocation44_spill] sm:$0xff]  ;;  %v8182_v31 = vld [vmem:[#allocation45_spill] sm:$0xff] }
 0x3bd   :  { %8172 = vst [vmem:[#allocation53_spill] sm:$0xff] %v7111_v38  ;;  %v3830_v49 = vmul.f32 %v7027_v58, %v3826_v27  ;;  %v3831_v45 = vmul.f32 %v7030_v30, %v3826_v27  ;;  %v3847_v61 = vrot.slane %v3828_v47, 6  ;;  %v3833_v62 = vstv %s7089_s17  ;;  %v8183_v15 = vld [vmem:[#allocation46_spill] sm:$0xff]  ;;  %v8184_v38 = vld [vmem:[#allocation232_spill] sm:$0xff]  ;;  %v8191_v51 = vld [vmem:[#allocation55_spill] sm:$0xff] }
 0x3be   :  { %3690 = vrot.lane.b32.xlu1 %v3683_v14, %s4598_s21  ;;  %3716 = vrot.lane.b32.xlu0 %v3708_v6, %s4598_s21  ;;  %v3713_v14 = vsel %vm452_vm5, %v3711_v7, %v3712_v26  ;;  %v8179_v6 = vld [vmem:[#allocation212_spill] sm:$0xff]  ;;  %v2638_v18 = vadd.f32 %v8180_v29, %v2466_v43  ;;  %v919_v52 = vadd.f32 %v8181_v44, %v6991_v24  ;;  %v3846_v7 = vrot.slane %v3827_v10, 6  ;;  %v7152_v29 = vld [vmem:[#allocation2 + $0x28] sm:$0x3f] }
 0x3bf   :  { %v2315_v16 = vadd.f32 %v8179_v6, %v2265_v34  ;;  %v922_v3 = vadd.f32 %v8182_v31, %v7013_v50  ;;  %v921_v28 = vadd.f32 %v8183_v15, %v6996_v2  ;;  %v8185_v6 = vld [vmem:[#allocation271_spill] sm:$0xff]  ;;  %v3849_v47 = vrot.slane %v3829_v9, 6  ;;  %v8189_v9 = vld [vmem:[#allocation280_spill] sm:$0xff] }
 0x3c0   :  { %v7131_v22 = vpop.permute.xlu1 %3348  ;;  %v7133_v13 = vpop.permute.xlu0 %3372  ;;  %v2810_v43 = vadd.f32 %v8185_v6, %v2638_v18  ;;  %v3832_v24 = vmul.f32 %v7152_v29, %v3826_v27  ;;  %v3715_v2 = vsel %vm452_vm5, %v3712_v26, %v3714_v12  ;;  %v3851_v31 = vrot.slane %v3830_v49, 6  ;;  %v8190_v6 = vld [vmem:[#allocation54_spill] sm:$0xff]  ;;  %v8192_v12 = vld [vmem:[#allocation56_spill] sm:$0xff] }
 0x3c1   :  { %v2467_v34 = vadd.f32 %v8184_v38, %v2315_v16  ;;  %v3835_v38 = vmul.f32 %v7054_v42, %v3833_v62  ;;  %v3848_v15 = vsel %vm585_vm6, %v3846_v7, %v3847_v61  ;;  %v3852_v27 = vrot.slane %v3831_v45, 6 }
 0x3c2   :  { %3718 = vrot.lane.b32.xlu1 %v3710_v11, %s4598_s21  ;;  %3720 = vrot.lane.b32.xlu0 %v3713_v14, %s4598_s21  ;;  %v7160_v11 = vld [vmem:[#allocation3] sm:$0xff]  ;;  %v8188_v14 = vld [vmem:[#allocation252_spill] sm:$0xff]  ;;  %v2860_v18 = vadd.f32 %v8189_v9, %v2810_v43  ;;  %v1050_v21 = vadd.f32 %v8190_v6, %v7093_v19  ;;  %v1051_v26 = vadd.f32 %v8191_v51, %v7097_v5  ;;  %v3854_v45 = vrot.slane %v3832_v24, 6 }
 0x3c3   :  { %v3834_v10 = vmul.f32 %v7160_v11, %v3833_v62  ;;  %v2639_v16 = vadd.f32 %v8188_v14, %v2467_v34  ;;  %v1054_v49 = vadd.f32 %v8192_v12, %v7101_v37  ;;  %v8194_v14 = vld [vmem:[#allocation313_spill] sm:$0xff]  ;;  %v3850_v7 = vsel %vm585_vm6, %v3847_v61, %v3849_v47  ;;  %v8200_v24 = vld [vmem:[#allocation58_spill] sm:$0xff] }
 0x3c4   :  { %v7155_v44 = vpop.permute.xlu1 %3374  ;;  %v7157_v50 = vpop.permute.xlu0 %3376  ;;  %v3012_v43 = vadd.f32 %v8194_v14, %v2860_v18  ;;  %v3879_v51 = vrot.slane %v3835_v38, 6  ;;  %v3836_v5 = vmul.f32 %v7075_v57, %v3833_v62  ;;  %v3837_v37 = vmul.f32 %v7078_v32, %v3833_v62  ;;  %v8199_v61 = vld [vmem:[#allocation57_spill] sm:$0xff]  ;;  %v8201_v14 = vld [vmem:[#allocation59_spill] sm:$0xff] }
 0x3c5   :  { %8186 = vst [vmem:[#allocation75_spill] sm:$0xff] %v7155_v44  ;;  %8187 = vst [vmem:[#allocation68_spill] sm:$0xff] %v7157_v50  ;;  %v8193_v50 = vld [vmem:[#allocation272_spill] sm:$0xff]  ;;  %v3878_v6 = vrot.slane %v3834_v10, 6  ;;  %v1053_v47 = vadd.f32 %v8199_v61, %v881_v17  ;;  %v1090_v18 = vadd.f32 %v8200_v24, %v918_v39  ;;  %v8203_v38 = vld [vmem:[#allocation61_spill] sm:$0xff]  ;;  %v3855_v17 = vsel %vm585_vm6, %v3852_v27, %v3854_v45 }
 0x3c6   :  { %3722 = vrot.lane.b32.xlu1 %v3715_v2, %s4598_s21  ;;  %3856 = vrot.lane.b32.xlu0 %v3848_v15, %s4598_s21  ;;  %v2811_v34 = vadd.f32 %v8193_v50, %v2639_v16  ;;  %v8197_v2 = vld [vmem:[#allocation281_spill] sm:$0xff]  ;;  %v8198_v15 = vld [vmem:[#allocation338_spill] sm:$0xff]  ;;  %v3853_v50 = vsel %vm585_vm6, %v3851_v31, %v3852_v27  ;;  %v3838_v16 = vmul.f32 %v7081_v60, %v3833_v62  ;;  %v8202_v10 = vld [vmem:[#allocation60_spill] sm:$0xff]  ;;  %v3883_v61 = vrot.slane %v3837_v37, 6 }
 0x3c7   :  { %v3184_v44 = vadd.f32 %v8198_v15, %v3012_v43  ;;  %v1094_v32 = vadd.f32 %v8202_v10, %v922_v3  ;;  %v3880_v39 = vsel %vm585_vm6, %v3878_v6, %v3879_v51  ;;  %v8209_v10 = vld [vmem:[#allocation78_spill] sm:$0xff]  ;;  %v8211_v27 = vld [vmem:[#allocation80_spill] sm:$0xff]  ;;  %v8212_v6 = vld [vmem:[#allocation81_spill] sm:$0xff] }
 0x3c8   :  { %v7178_v9 = vpop.permute.xlu1 %3378  ;;  %v7180_v19 = vpop.permute.xlu0 %3392  ;;  %v2861_v12 = vadd.f32 %v8197_v2, %v2811_v34  ;;  %v1093_v34 = vadd.f32 %v8203_v38, %v921_v28  ;;  %v8204_v2 = vld [vmem:[#allocation318_spill] sm:$0xff]  ;;  %v3884_v3 = vrot.slane %v3838_v16, 6  ;;  %v3839_v28 = vmul.f32 %v7107_v20, %v3833_v62  ;;  %v8214_v62 = vld [vmem:[#allocation83_spill] sm:$0xff] }
 0x3c9   :  { %8195 = vst [vmem:[#allocation95_spill] sm:$0xff] %v7178_v9  ;;  %8196 = vst [vmem:[#allocation23_spill] sm:$0xff] %v7180_v19  ;;  %v1091_v19 = vadd.f32 %v8201_v14, %v919_v52  ;;  %v3356_v31 = vadd.f32 %v7113_v33, %v3184_v44  ;;  %v3881_v52 = vrot.slane %v3836_v5, 6  ;;  %v8208_v14 = vld [vmem:[#allocation77_spill] sm:$0xff]  ;;  %v1263_v33 = vadd.f32 %v8209_v10, %v1051_v26  ;;  %v8210_v44 = vld [vmem:[#allocation79_spill] sm:$0xff] }
 0x3ca   :  { %3858 = vrot.lane.b32.xlu1 %v3850_v7, %s4598_s21  ;;  %3860 = vrot.lane.b32.xlu0 %v3853_v50, %s4598_s21  ;;  %v3013_v43 = vadd.f32 %v8204_v2, %v2861_v12  ;;  %v8206_v7 = vld [vmem:[#allocation339_spill] sm:$0xff]  ;;  %v1262_v12 = vadd.f32 %v8208_v14, %v1050_v21  ;;  %v1264_v38 = vadd.f32 %v8210_v44, %v7044_v63  ;;  %v8213_v37 = vld [vmem:[#allocation82_spill] sm:$0xff]  ;;  %v8215_v2 = vld [vmem:[#allocation84_spill] sm:$0xff] }
 0x3cb   :  { %v1265_v45 = vadd.f32 %v8211_v27, %v1053_v47  ;;  %v1266_v5 = vadd.f32 %v8212_v6, %v1054_v49  ;;  %v1267_v16 = vadd.f32 %v8213_v37, %v7058_v35  ;;  %v1292_v21 = vadd.f32 %v8214_v62, %v1090_v18  ;;  %v8220_v18 = vld [vmem:[#allocation86_spill] sm:$0xff]  ;;  %v8224_v6 = vld [vmem:[#allocation99_spill] sm:$0xff] }
 0x3cc   :  { %v7197_v15 = vpop.permute.xlu1 %3394  ;;  %v3397_v60 = vpop.permute.xlu0 %3396  ;;  %v3185_v24 = vadd.f32 %v8206_v7, %v3013_v43  ;;  %v1293_v26 = vadd.f32 %v8215_v2, %v1091_v19  ;;  %v8216_v43 = vld [vmem:[#allocation85_spill] sm:$0xff]  ;;  %v3882_v49 = vsel %vm585_vm6, %v3879_v51, %v3881_v52  ;;  %v3885_v35 = vsel %vm585_vm6, %v3883_v61, %v3884_v3  ;;  %v8221_v19 = vld [vmem:[#allocation87_spill] sm:$0xff]  ;;  %v8225_v52 = vld [vmem:[#allocation100_spill] sm:$0xff] }
 0x3cd   :  { %8205 = vst [vmem:[#allocation24_spill] sm:$0xff] %v7197_v15  ;;  %v7202_v50 = vadd.f32 %v3397_v60, %v3356_v31  ;;  %v1294_v63 = vadd.f32 %v8216_v43, %v7061_v46  ;;  %v8217_v31 = vld [vmem:[#allocation97_spill] sm:$0xff]  ;;  %v3886_v7 = vrot.slane %v3839_v28, 6  ;;  %v1295_v14 = vadd.f32 %v8220_v18, %v1093_v34  ;;  %v8222_v46 = vld [vmem:[#allocation88_spill] sm:$0xff]  ;;  %v8228_v34 = vld [vmem:[#allocation102_spill] sm:$0xff] }
 0x3ce   :  { %3862 = vrot.lane.b32.xlu1 %v3855_v17, %s4598_s21  ;;  %3888 = vrot.lane.b32.xlu0 %v3880_v39, %s4598_s21  ;;  %v3357_v20 = vadd.f32 %v7131_v22, %v3185_v24  ;;  %v1424_v60 = vadd.f32 %v8217_v31, %v1262_v12  ;;  %v8219_v22 = vld [vmem:[#allocation311_spill] sm:$0xff]  ;;  %v1296_v10 = vadd.f32 %v8221_v19, %v1094_v32  ;;  %v8223_v12 = vld [vmem:[#allocation98_spill] sm:$0xff]  ;;  %v8226_v28 = vld [vmem:[#allocation117_spill] sm:$0xff] }
 0x3cf   :  { %8207 = vst [vmem:[#allocation25_spill] sm:$0xff] %v7202_v50  ;;  %v1297_v44 = vadd.f32 %v8222_v46, %v7064_v48  ;;  %v1425_v27 = vadd.f32 %v8223_v12, %v1263_v33  ;;  %v1426_v51 = vadd.f32 %v8224_v6, %v1264_v38  ;;  %v1427_v61 = vadd.f32 %v8225_v52, %v1265_v45  ;;  %v8229_v32 = vld [vmem:[#allocation103_spill] sm:$0xff]  ;;  %v8230_v31 = vld [vmem:[#allocation104_spill] sm:$0xff]  ;;  %v8232_v18 = vld [vmem:[#allocation106_spill] sm:$0xff] }
 0x3d0   :  { %v3399_v17 = vpop.permute.xlu1 %3398  ;;  %v7221_v39 = vpop.permute.xlu0 %3428  ;;  %v1596_v37 = vadd.f32 %v8226_v28, %v1424_v60  ;;  %v1429_v2 = vadd.f32 %v8228_v34, %v1267_v16  ;;  %v1464_v43 = vadd.f32 %v8229_v32, %v1292_v21  ;;  %v1465_v48 = vadd.f32 %v8230_v31, %v1293_v26  ;;  %v8233_v19 = vld [vmem:[#allocation145_spill] sm:$0xff]  ;;  %v8234_v46 = vld [vmem:[#allocation107_spill] sm:$0xff]  ;;  %v8235_v12 = vld [vmem:[#allocation108_spill] sm:$0xff] }
 0x3d1   :  { %v7223_v47 = vadd.f32 %v3399_v17, %v3357_v20  ;;  %v8227_v20 = vld [vmem:[#allocation101_spill] sm:$0xff]  ;;  %v1467_v38 = vadd.f32 %v8232_v18, %v1295_v14  ;;  %v3887_v60 = vsel %vm585_vm6, %v3884_v3, %v3886_v7  ;;  %v1469_v16 = vadd.f32 %v8235_v12, %v1297_v44  ;;  %v8236_v6 = vld [vmem:[#allocation118_spill] sm:$0xff]  ;;  %v8237_v52 = vld [vmem:[#allocation119_spill] sm:$0xff] }
 0x3d2   :  { %3890 = vrot.lane.b32.xlu1 %v3882_v49, %s4598_s21  ;;  %3892 = vrot.lane.b32.xlu0 %v3885_v35, %s4598_s21  ;;  %v1428_v62 = vadd.f32 %v8227_v20, %v1266_v5  ;;  %v8231_v35 = vld [vmem:[#allocation105_spill] sm:$0xff]  ;;  %v1808_v45 = vadd.f32 %v8233_v19, %v1596_v37  ;;  %v1468_v5 = vadd.f32 %v8234_v46, %v1296_v10  ;;  %v8238_v28 = vld [vmem:[#allocation120_spill] sm:$0xff]  ;;  %v8240_v32 = vld [vmem:[#allocation122_spill] sm:$0xff] }
 0x3d3   :  { %8218 = vst [vmem:[#allocation274_spill] sm:$0xff] %v7223_v47  ;;  %v1466_v33 = vadd.f32 %v8231_v35, %v1294_v63  ;;  %v1597_v21 = vadd.f32 %v8236_v6, %v1425_v27  ;;  %v1598_v26 = vadd.f32 %v8237_v52, %v1426_v51  ;;  %v1599_v20 = vadd.f32 %v8238_v28, %v1427_v61  ;;  %v8239_v34 = vld [vmem:[#allocation121_spill] sm:$0xff]  ;;  %v8242_v35 = vld [vmem:[#allocation123_spill] sm:$0xff]  ;;  %v8243_v7 = vld [vmem:[#allocation124_spill] sm:$0xff] }
 0x3d4   :  { %v7242_v17 = vpop.permute.xlu1 %3430  ;;  %v7244_v49 = vpop.permute.xlu0 %3432  ;;  %v1600_v63 = vadd.f32 %v8239_v34, %v1428_v62  ;;  %v1601_v14 = vadd.f32 %v8240_v32, %v1429_v2  ;;  %v8241_v31 = vld [vmem:[#allocation165_spill] sm:$0xff]  ;;  %v1636_v3 = vadd.f32 %v8242_v35, %v1464_v43  ;;  %v1637_v10 = vadd.f32 %v8243_v7, %v1465_v48  ;;  %v8245_v19 = vld [vmem:[#allocation126_spill] sm:$0xff]  ;;  %v8248_v6 = vld [vmem:[#allocation147_spill] sm:$0xff] }
 0x3d5   :  { %v1970_v37 = vadd.f32 %v8241_v31, %v1808_v45  ;;  %v8244_v18 = vld [vmem:[#allocation125_spill] sm:$0xff]  ;;  %v1639_v27 = vadd.f32 %v8245_v19, %v1467_v38  ;;  %v8247_v12 = vld [vmem:[#allocation146_spill] sm:$0xff]  ;;  %v1810_v2 = vadd.f32 %v8248_v6, %v1598_v26  ;;  %v8250_v28 = vld [vmem:[#allocation128_spill] sm:$0xff] }
 0x3d6   :  { %3894 = vrot.lane.b32.xlu1 %v3887_v60, %s4598_s21  ;;  %v1638_v44 = vadd.f32 %v8244_v18, %v1466_v33  ;;  %v8246_v60 = vld [vmem:[#allocation127_spill] sm:$0xff]  ;;  %v1809_v62 = vadd.f32 %v8247_v12, %v1597_v21  ;;  %v8249_v52 = vld [vmem:[#allocation185_spill] sm:$0xff]  ;;  %v1641_v43 = vadd.f32 %v8250_v28, %v1469_v16  ;;  %v8251_v34 = vld [vmem:[#allocation148_spill] sm:$0xff]  ;;  %s4603_s21 = smov 64  }
 0x3d7   :  { %v1640_v61 = vadd.f32 %v8246_v60, %v1468_v5  ;;  %v2142_v45 = vadd.f32 %v8249_v52, %v1970_v37  ;;  %v1811_v48 = vadd.f32 %v8251_v34, %v1599_v20  ;;  %v8252_v32 = vld [vmem:[#allocation149_spill] sm:$0xff]  ;;  %v8253_v31 = vld [vmem:[#allocation150_spill] sm:$0xff]  ;;  %v8254_v35 = vld [vmem:[#allocation151_spill] sm:$0xff] }
 0x3d8   :  { %v7263_v46 = vpop.permute.xlu1 %3434  ;;  %v7265_v51 = vpop.permute.xlu0 %3436  ;;  %v1812_v33 = vadd.f32 %v8252_v32, %v1600_v63  ;;  %v1813_v38 = vadd.f32 %v8253_v31, %v1601_v14  ;;  %v1838_v7 = vadd.f32 %v8254_v35, %v1636_v3  ;;  %v8255_v18 = vld [vmem:[#allocation166_spill] sm:$0xff]  ;;  %v8256_v24 = vld [vmem:[#allocation167_spill] sm:$0xff]  ;;  %v8257_v60 = vld [vmem:[#allocation213_spill] sm:$0xff] }
 0x3d9   :  { %v1971_v19 = vadd.f32 %v8255_v18, %v1809_v62  ;;  %v1972_v5 = vadd.f32 %v8256_v24, %v1810_v2  ;;  %v2354_v21 = vadd.f32 %v8257_v60, %v2142_v45  ;;  %v8258_v12 = vld [vmem:[#allocation152_spill] sm:$0xff]  ;;  %v8259_v6 = vld [vmem:[#allocation153_spill] sm:$0xff]  ;;  %v8260_v52 = vld [vmem:[#allocation154_spill] sm:$0xff] }
 0x3da   :  { %v1839_v26 = vadd.f32 %v8258_v12, %v1637_v10  ;;  %v1840_v37 = vadd.f32 %v8259_v6, %v1638_v44  ;;  %v1841_v16 = vadd.f32 %v8260_v52, %v1639_v27  ;;  %v8261_v28 = vld [vmem:[#allocation155_spill] sm:$0xff]  ;;  %v8262_v14 = vld [vmem:[#allocation156_spill] sm:$0xff]  ;;  %v8263_v32 = vld [vmem:[#allocation186_spill] sm:$0xff] }
 0x3db   :  { %v1842_v20 = vadd.f32 %v8261_v28, %v1640_v61  ;;  %v1843_v3 = vadd.f32 %v8262_v14, %v1641_v43  ;;  %v2143_v62 = vadd.f32 %v8263_v32, %v1971_v19  ;;  %v8264_v31 = vld [vmem:[#allocation187_spill] sm:$0xff]  ;;  %v8265_v2 = vld [vmem:[#allocation233_spill] sm:$0xff]  ;;  %v8266_v35 = vld [vmem:[#allocation168_spill] sm:$0xff] }
 0x3dc   :  { %v7283_v34 = vpop.permute.xlu1 %3438  ;;  %v7285_v63 = vpop.permute.xlu0 %3458  ;;  %v2144_v24 = vadd.f32 %v8264_v31, %v1972_v5  ;;  %v2516_v45 = vadd.f32 %v8265_v2, %v2354_v21  ;;  %v1973_v10 = vadd.f32 %v8266_v35, %v1811_v48  ;;  %v8267_v18 = vld [vmem:[#allocation169_spill] sm:$0xff]  ;;  %v8268_v60 = vld [vmem:[#allocation170_spill] sm:$0xff]  ;;  %v8269_v12 = vld [vmem:[#allocation171_spill] sm:$0xff] }
 0x3dd   :  { %v1974_v44 = vadd.f32 %v8267_v18, %v1812_v33  ;;  %v1975_v27 = vadd.f32 %v8268_v60, %v1813_v38  ;;  %v2010_v61 = vadd.f32 %v8269_v12, %v1838_v7  ;;  %v8270_v6 = vld [vmem:[#allocation172_spill] sm:$0xff]  ;;  %v8271_v28 = vld [vmem:[#allocation214_spill] sm:$0xff]  ;;  %v8272_v50 = vld [vmem:[#allocation215_spill] sm:$0xff] }
 0x3de   :  { %v2011_v52 = vadd.f32 %v8270_v6, %v1839_v26  ;;  %v2355_v47 = vadd.f32 %v8271_v28, %v2143_v62  ;;  %v2356_v43 = vadd.f32 %v8272_v50, %v2144_v24  ;;  %v8273_v14 = vld [vmem:[#allocation253_spill] sm:$0xff]  ;;  %v8275_v31 = vld [vmem:[#allocation174_spill] sm:$0xff]  ;;  %v8276_v2 = vld [vmem:[#allocation175_spill] sm:$0xff] }
 0x3df   :  { %v2688_v19 = vadd.f32 %v8273_v14, %v2516_v45  ;;  %v8274_v32 = vld [vmem:[#allocation173_spill] sm:$0xff]  ;;  %v2013_v21 = vadd.f32 %v8275_v31, %v1841_v16  ;;  %v2014_v48 = vadd.f32 %v8276_v2, %v1842_v20  ;;  %v8277_v35 = vld [vmem:[#allocation188_spill] sm:$0xff]  ;;  %v8279_v60 = vld [vmem:[#allocation234_spill] sm:$0xff] }
 0x3e0   :  { %v2012_v5 = vadd.f32 %v8274_v32, %v1840_v37  ;;  %v2145_v33 = vadd.f32 %v8277_v35, %v1973_v10  ;;  %v7303_v18 = vpop.permute.xlu1 %3460  ;;  %v7305_v38 = vpop.permute.xlu0 %3462  ;;  %v8278_v7 = vld [vmem:[#allocation189_spill] sm:$0xff]  ;;  %v2517_v62 = vadd.f32 %v8279_v60, %v2355_v47  ;;  %v8280_v12 = vld [vmem:[#allocation235_spill] sm:$0xff]  ;;  %v8281_v24 = vld [vmem:[#allocation282_spill] sm:$0xff] }
 0x3e1   :  { %v2146_v26 = vadd.f32 %v8278_v7, %v1974_v44  ;;  %v2518_v50 = vadd.f32 %v8280_v12, %v2356_v43  ;;  %v2900_v45 = vadd.f32 %v8281_v24, %v2688_v19  ;;  %v8282_v6 = vld [vmem:[#allocation176_spill] sm:$0xff]  ;;  %v8283_v28 = vld [vmem:[#allocation190_spill] sm:$0xff]  ;;  %v8284_v14 = vld [vmem:[#allocation191_spill] sm:$0xff] }
 0x3e2   :  { %v2015_v37 = vadd.f32 %v8282_v6, %v1843_v3  ;;  %v2147_v16 = vadd.f32 %v8283_v28, %v1975_v27  ;;  %v2182_v20 = vadd.f32 %v8284_v14, %v2010_v61  ;;  %v8285_v32 = vld [vmem:[#allocation216_spill] sm:$0xff]  ;;  %v8286_v31 = vld [vmem:[#allocation217_spill] sm:$0xff]  ;;  %v8287_v35 = vld [vmem:[#allocation254_spill] sm:$0xff] }
 0x3e3   :  { %v2357_v10 = vadd.f32 %v8285_v32, %v2145_v33  ;;  %v2358_v2 = vadd.f32 %v8286_v31, %v2146_v26  ;;  %v2689_v15 = vadd.f32 %v8287_v35, %v2517_v62  ;;  %v8288_v9 = vld [vmem:[#allocation255_spill] sm:$0xff]  ;;  %v8290_v60 = vld [vmem:[#allocation192_spill] sm:$0xff]  ;;  %v8291_v12 = vld [vmem:[#allocation193_spill] sm:$0xff] }
 0x3e4   :  { %v2690_v44 = vadd.f32 %v8288_v9, %v2518_v50  ;;  %v8289_v7 = vld [vmem:[#allocation319_spill] sm:$0xff]  ;;  %v2183_v43 = vadd.f32 %v8290_v60, %v2011_v52  ;;  %v2184_v19 = vadd.f32 %v8291_v12, %v2012_v5  ;;  %v8292_v24 = vld [vmem:[#allocation194_spill] sm:$0xff]  ;;  %v8293_v6 = vld [vmem:[#allocation236_spill] sm:$0xff]  ;;  %v7323_v28 = vpop.permute.xlu1 %3464  ;;  %v7325_v61 = vpop.permute.xlu0 %3466 }
 0x3e5   :  { %v3062_v47 = vadd.f32 %v8289_v7, %v2900_v45  ;;  %v2185_v3 = vadd.f32 %v8292_v24, %v2013_v21  ;;  %v2519_v27 = vadd.f32 %v8293_v6, %v2357_v10  ;;  %v8294_v33 = vld [vmem:[#allocation237_spill] sm:$0xff]  ;;  %v8295_v14 = vld [vmem:[#allocation283_spill] sm:$0xff]  ;;  %v8296_v32 = vld [vmem:[#allocation284_spill] sm:$0xff] }
 0x3e6   :  { %v2520_v26 = vadd.f32 %v8294_v33, %v2358_v2  ;;  %v2901_v62 = vadd.f32 %v8295_v14, %v2689_v15  ;;  %v2902_v9 = vadd.f32 %v8296_v32, %v2690_v44  ;;  %v8297_v50 = vld [vmem:[#allocation340_spill] sm:$0xff]  ;;  %v8298_v31 = vld [vmem:[#allocation195_spill] sm:$0xff]  ;;  %v8299_v35 = vld [vmem:[#allocation218_spill] sm:$0xff] }
 0x3e7   :  { %v3234_v45 = vadd.f32 %v8297_v50, %v3062_v47  ;;  %v2186_v52 = vadd.f32 %v8298_v31, %v2014_v48  ;;  %v2359_v5 = vadd.f32 %v8299_v35, %v2147_v16  ;;  %v8300_v7 = vld [vmem:[#allocation219_spill] sm:$0xff]  ;;  %v8301_v60 = vld [vmem:[#allocation256_spill] sm:$0xff]  ;;  %v8302_v12 = vld [vmem:[#allocation257_spill] sm:$0xff] }
 0x3e8   :  { %v2384_v21 = vadd.f32 %v8300_v7, %v2182_v20  ;;  %v2691_v10 = vadd.f32 %v8301_v60, %v2519_v27  ;;  %v2692_v24 = vadd.f32 %v8302_v12, %v2520_v26  ;;  %v8303_v6 = vld [vmem:[#allocation321_spill] sm:$0xff]  ;;  %v3064_v2 = vadd.f32 %v8304_v25, %v2902_v9  ;;  %v8305_v33 = vld [vmem:[#allocation196_spill] sm:$0xff]  ;;  %v8306_v14 = vld [vmem:[#allocation238_spill] sm:$0xff]  ;;  %v7343_v31 = vpop.permute.xlu1 %3468  ;;  %v3591_v20 = vpop.permute.xlu0 %3590 }
 0x3e9   :  { %v3063_v55 = vadd.f32 %v8303_v6, %v2901_v62  ;;  %v3446_v15 = vadd.f32 %v7221_v39, %v3234_v45  ;;  %v2187_v44 = vadd.f32 %v8305_v33, %v2015_v37  ;;  %v2521_v47 = vadd.f32 %v8306_v14, %v2359_v5  ;;  %v8307_v32 = vld [vmem:[#allocation239_spill] sm:$0xff]  ;;  %v8308_v50 = vld [vmem:[#allocation285_spill] sm:$0xff]  ;;  %v8309_v27 = vld [vmem:[#allocation286_spill] sm:$0xff] }
 0x3ea   :  { %v2556_v48 = vadd.f32 %v8307_v32, %v2384_v21  ;;  %v2903_v16 = vadd.f32 %v8308_v50, %v2691_v10  ;;  %v2904_v35 = vadd.f32 %v8309_v27, %v2692_v24  ;;  %v8310_v62 = vld [vmem:[#allocation341_spill] sm:$0xff]  ;;  %v8311_v39 = vld [vmem:[#allocation220_spill] sm:$0xff]  ;;  %v8313_v5 = vld [vmem:[#allocation258_spill] sm:$0xff] }
 0x3eb   :  { %v3235_v26 = vadd.f32 %v6900_v54, %v3063_v55  ;;  %v3236_v7 = vadd.f32 %v8310_v62, %v3064_v2  ;;  %v7348_v25 = vadd.f32 %v3591_v20, %v3446_v15  ;;  %v2385_v9 = vadd.f32 %v8311_v39, %v2183_v43  ;;  %v8312_v37 = vld [vmem:[#allocation221_spill] sm:$0xff]  ;;  %v8314_v21 = vld [vmem:[#allocation259_spill] sm:$0xff]  ;;  %v8316_v33 = vld [vmem:[#allocation324_spill] sm:$0xff] }
 0x3ec   :  { %v2386_v45 = vadd.f32 %v8312_v37, %v2184_v19  ;;  %v2693_v60 = vadd.f32 %v8313_v5, %v2521_v47  ;;  %v2728_v12 = vadd.f32 %v8314_v21, %v2556_v48  ;;  %v8315_v10 = vld [vmem:[#allocation323_spill] sm:$0xff]  ;;  %v3066_v14 = vadd.f32 %v8316_v33, %v2904_v35  ;;  %v8317_v55 = vld [vmem:[#allocation240_spill] sm:$0xff]  ;;  %v8318_v15 = vld [vmem:[#allocation241_spill] sm:$0xff]  ;;  %v3593_v27 = vpop.permute.xlu1 %3592  ;;  %v3595_v47 = vpop.permute.xlu0 %3594 }
 0x3ed   :  { %v3065_v6 = vadd.f32 %v8315_v10, %v2903_v16  ;;  %v3447_v24 = vadd.f32 %v7242_v17, %v3235_v26  ;;  %v3448_v54 = vadd.f32 %v7244_v49, %v3236_v7  ;;  %v2557_v2 = vadd.f32 %v8317_v55, %v2385_v9  ;;  %v8319_v50 = vld [vmem:[#allocation287_spill] sm:$0xff]  ;;  %v8320_v20 = vld [vmem:[#allocation288_spill] sm:$0xff]  ;;  %v8321_v17 = vld [vmem:[#allocation222_spill] sm:$0xff] }
 0x3ee   :  { %v2558_v32 = vadd.f32 %v8318_v15, %v2386_v45  ;;  %v2905_v43 = vadd.f32 %v8319_v50, %v2693_v60  ;;  %v2930_v19 = vadd.f32 %v8320_v20, %v2728_v12  ;;  %v3238_v16 = vadd.f32 %v6921_v0, %v3066_v14  ;;  %v8322_v26 = vld [vmem:[#allocation223_spill] sm:$0xff]  ;;  %v8323_v39 = vld [vmem:[#allocation260_spill] sm:$0xff]  ;;  %v8324_v37 = vld [vmem:[#allocation261_spill] sm:$0xff] }
 0x3ef   :  { %v3237_v48 = vadd.f32 %v6919_v1, %v3065_v6  ;;  %v7364_v62 = vadd.f32 %v3593_v27, %v3447_v24  ;;  %v7366_v35 = vadd.f32 %v3595_v47, %v3448_v54  ;;  %v2387_v49 = vadd.f32 %v8321_v17, %v2185_v3  ;;  %v8325_v5 = vld [vmem:[#allocation325_spill] sm:$0xff]  ;;  %v8326_v21 = vld [vmem:[#allocation326_spill] sm:$0xff]  ;;  %v8328_v33 = vld [vmem:[#allocation243_spill] sm:$0xff] }
 0x3f0   :  { %v2388_v7 = vadd.f32 %v8322_v26, %v2186_v52  ;;  %v2729_v9 = vadd.f32 %v8323_v39, %v2557_v2  ;;  %v2730_v45 = vadd.f32 %v8324_v37, %v2558_v32  ;;  %v3067_v60 = vadd.f32 %v8325_v5, %v2905_v43  ;;  %v8327_v10 = vld [vmem:[#allocation242_spill] sm:$0xff]  ;;  %v8329_v24 = vld [vmem:[#allocation289_spill] sm:$0xff]  ;;  %v3597_v55 = vpop.permute.xlu1 %3596  ;;  %v3599_v2 = vpop.permute.xlu0 %3598  ;;  %v8332_v20 = vld [vmem:[#allocation224_spill] sm:$0xff] }
 0x3f1   :  { %v3102_v12 = vadd.f32 %v8326_v21, %v2930_v19  ;;  %v3449_v1 = vadd.f32 %v7263_v46, %v3237_v48  ;;  %v3450_v0 = vadd.f32 %v7265_v51, %v3238_v16  ;;  %v2559_v6 = vadd.f32 %v8327_v10, %v2387_v49  ;;  %v8330_v54 = vld [vmem:[#allocation290_spill] sm:$0xff]  ;;  %v8334_v48 = vld [vmem:[#allocation263_spill] sm:$0xff]  ;;  %v8336_v26 = vld [vmem:[#allocation328_spill] sm:$0xff] }
 0x3f2   :  { %v2560_v14 = vadd.f32 %v8328_v33, %v2388_v7  ;;  %v2931_v3 = vadd.f32 %v8329_v24, %v2729_v9  ;;  %v2932_v52 = vadd.f32 %v8330_v54, %v2730_v45  ;;  %v3239_v15 = vadd.f32 %v6938_v4, %v3067_v60  ;;  %v8331_v46 = vld [vmem:[#allocation314_spill] sm:$0xff]  ;;  %v8335_v17 = vld [vmem:[#allocation327_spill] sm:$0xff]  ;;  %v8337_v39 = vld [vmem:[#allocation293_spill] sm:$0xff] }
 0x3f3   :  { %v3274_v32 = vadd.f32 %v6940_v59, %v3102_v12  ;;  %v7382_v50 = vadd.f32 %v3597_v55, %v3449_v1  ;;  %v7384_v43 = vadd.f32 %v3599_v2, %v3450_v0  ;;  %v323_v51 = vrot.slane %v8331_v46, 2  ;;  %v8333_v27 = vld [vmem:[#allocation262_spill] sm:$0xff]  ;;  %v8338_v37 = vld [vmem:[#allocation244_spill] sm:$0xff]  ;;  %v8339_v5 = vld [vmem:[#allocation291_spill] sm:$0xff] }
 0x3f4   :  { %v2389_v19 = vadd.f32 %v8332_v20, %v2187_v44  ;;  %v2731_v47 = vadd.f32 %v8333_v27, %v2559_v6  ;;  %v2732_v16 = vadd.f32 %v8334_v48, %v2560_v14  ;;  %v3103_v49 = vadd.f32 %v8335_v17, %v2931_v3  ;;  %v8340_v44 = vld [vmem:[#allocation292_spill] sm:$0xff]  ;;  %v3601_v12 = vpop.permute.xlu1 %3600  ;;  %v3631_v1 = vpop.permute.xlu0 %3630  ;;  %v8342_v14 = vld [vmem:[#allocation297_spill] sm:$0xff]  ;;  %v8343_v3 = vld [vmem:[#allocation298_spill] sm:$0xff] }
 0x3f5   :  { %v3104_v7 = vadd.f32 %v8336_v26, %v2932_v52  ;;  %v3451_v4 = vadd.f32 %v7283_v34, %v3239_v15  ;;  %v3476_v59 = vadd.f32 %v7285_v63, %v3274_v32  ;;  %v304_v9 = vmul.f32 %v7030_v30, %v8337_v39  ;;  %v8341_v63 = vld [vmem:[#allocation315_spill] sm:$0xff]  ;;  %v8344_v52 = vld [vmem:[#allocation264_spill] sm:$0xff]  ;;  %v8345_v2 = vld [vmem:[#allocation329_spill] sm:$0xff] }
 0x3f6   :  { %v2561_v45 = vadd.f32 %v8338_v37, %v2389_v19  ;;  %v2933_v60 = vadd.f32 %v8339_v5, %v2731_v47  ;;  %v2934_v21 = vadd.f32 %v8340_v44, %v2732_v16  ;;  %v3275_v0 = vadd.f32 %v6969_v56, %v3103_v49  ;;  %v8346_v56 = vld [vmem:[#allocation330_spill] sm:$0xff]  ;;  %v8349_v48 = vld [vmem:[#allocation295_spill] sm:$0xff] }
 0x3f7   :  { %v3276_v10 = vadd.f32 %v6971_v41, %v3104_v7  ;;  %v7401_v6 = vadd.f32 %v3601_v12, %v3451_v4  ;;  %v7403_v34 = vadd.f32 %v3631_v1, %v3476_v59  ;;  %v456_v33 = vrot.slane %v8341_v63, 4  ;;  %v8347_v20 = vld [vmem:[#allocation294_spill] sm:$0xff]  ;;  %v8351_v59 = vld [vmem:[#allocation317_spill] sm:$0xff] }
 0x3f8   :  { %v277_v24 = vmul.f32 %v7120_v53, %v8342_v14  ;;  %v7410_v54 = vmul.f32 %v7027_v58, %v8343_v3  ;;  %v2733_v55 = vadd.f32 %v8344_v52, %v2561_v45  ;;  %v3105_v15 = vadd.f32 %v8345_v2, %v2933_v60  ;;  %v3633_v17 = vpop.permute.xlu1 %3632  ;;  %v3635_v49 = vpop.permute.xlu0 %3634  ;;  %v8354_v12 = vld [vmem:[#allocation305_spill] sm:$0xff] }
 0x3f9   :  { %v3106_v32 = vadd.f32 %v8346_v56, %v2934_v21  ;;  %v3477_v41 = vadd.f32 %v7303_v18, %v3275_v0  ;;  %v3478_v46 = vadd.f32 %v7305_v38, %v3276_v10  ;;  %v8348_v19 = vrot.slane %v8347_v20, 2  ;;  %v8350_v38 = vld [vmem:[#allocation316_spill] sm:$0xff] }
 0x3fa   :  { %v326_v47 = vrot.slane %v304_v9, 2  ;;  %v305_v53 = vmul.f32 %v7152_v29, %v8337_v39  ;;  %v2935_v16 = vadd.f32 %v8349_v48, %v2733_v55  ;;  %v3277_v26 = vadd.f32 %v7000_v23, %v3105_v15 }
 0x3fb   :  { %v324_v27 = vsel %vm319_vm4, %v8348_v19, %v323_v51  ;;  %v3278_v7 = vadd.f32 %v7002_v8, %v3106_v32  ;;  %v7425_v4 = vadd.f32 %v3633_v17, %v3477_v41  ;;  %v7427_v18 = vadd.f32 %v3635_v49, %v3478_v46  ;;  %v8352_v51 = vld [vmem:[#allocation300_spill] sm:$0xff]  ;;  %v8353_v8 = vld [vmem:[#allocation331_spill] sm:$0xff] }
 0x3fc   :  { %v7431_v37 = vadd.f32 %v8351_v59, %v8350_v38  ;;  %v307_v9 = vmul.f32 %v7160_v11, %v8352_v51  ;;  %v308_v39 = vmul.f32 %v7054_v42, %v8352_v51  ;;  %v309_v45 = vmul.f32 %v7075_v57, %v8352_v51  ;;  %v3637_v52 = vpop.permute.xlu1 %3636  ;;  %v3639_v55 = vpop.permute.xlu0 %3638  ;;  %v8357_v46 = vld [vmem:[#allocation299_spill] sm:$0xff]  ;;  %v8358_v19 = vld [vmem:[#allocation304_spill] sm:$0xff] }
 0x3fd   :  { %v437_v23 = vmul.f32 %v7030_v30, %v8343_v3  ;;  %v3107_v5 = vadd.f32 %v8353_v8, %v2935_v16  ;;  %v3479_v60 = vadd.f32 %v7323_v28, %v3277_v26  ;;  %v3480_v44 = vadd.f32 %v7325_v61, %v3278_v7  ;;  %v8360_v38 = vld [vmem:[#allocation303_spill] sm:$0xff] }
 0x3fe   :  { %v335_v21 = vadd.f32 %v324_v27, %v277_v24  ;;  %v8355_v1 = vrot.slane %v8354_v12, 4  ;;  %v458_v10 = vrot.slane %v7410_v54, 4  ;;  %v328_v63 = vrot.slane %v305_v53, 2 }
 0x3ff   :  { %v8356_v2 = vrot.slane %v8219_v22, 2  ;;  %v3279_v56 = vadd.f32 %v7020_v36, %v3107_v5  ;;  %v7452_v32 = vadd.f32 %v3637_v52, %v3479_v60  ;;  %v7454_v28 = vadd.f32 %v3639_v55, %v3480_v44 }
 0x400   :  { %v457_v0 = vsel %vm452_vm5, %v8355_v1, %v456_v33  ;;  %v438_v61 = vmul.f32 %v7152_v29, %v8343_v3  ;;  %v344_v24 = vrot.slane %v307_v9, 2  ;;  %v345_v33 = vrot.slane %v308_v39, 2  ;;  %v3641_v16 = vpop.permute.xlu1 %3640  ;;  %v7470_v17 = vpop.permute.xlu0 %3512  ;;  %v8362_v1 = vld [vmem:[#allocation320_spill] sm:$0xff] }
 0x401   :  { %v327_v15 = vsel %vm319_vm4, %v8356_v2, %v326_v47  ;;  %v347_v41 = vrot.slane %v309_v45, 2  ;;  %v459_v54 = vrot.slane %v437_v23, 4  ;;  %v569_v20 = vmul.f32 %v7027_v58, %v8357_v46  ;;  %v8359_v58 = vld [vmem:[#allocation310_spill] sm:$0xff] }
 0x402   :  { %v440_v22 = vmul.f32 %v7160_v11, %v8358_v19  ;;  %v3481_v27 = vadd.f32 %v7343_v31, %v3279_v56  ;;  %v570_v36 = vmul.f32 %v7030_v30, %v8357_v46  ;;  %v329_v53 = vsel %vm319_vm4, %v326_v47, %v328_v63  ;;  %v8361_v23 = vld [vmem:[#allocation306_spill] sm:$0xff] }
 0x403   :  { %v441_v3 = vmul.f32 %v7054_v42, %v8358_v19  ;;  %v442_v48 = vmul.f32 %v7075_v57, %v8358_v19  ;;  %v336_v49 = vadd.f32 %v327_v15, %v8359_v58  ;;  %v279_v26 = vmul.f32 %v7030_v30, %v8342_v14 }
 0x404   :  { %v571_v31 = vmul.f32 %v7152_v29, %v8357_v46  ;;  %v7477_v7 = vadd.f32 %v3641_v16, %v3481_v27  ;;  %v461_v47 = vrot.slane %v438_v61, 4  ;;  %v281_v59 = vmul.f32 %v7160_v11, %v8360_v38  ;;  %v7491_v44 = vpop.permute.xlu1 %3514  ;;  %v7493_v12 = vpop.permute.xlu0 %3516 }
 0x405   :  { %v346_v51 = vsel %vm319_vm4, %v344_v24, %v345_v33  ;;  %v348_v9 = vsel %vm319_vm4, %v345_v33, %v347_v41  ;;  %v337_v39 = vadd.f32 %v329_v53, %v279_v26  ;;  %v477_v45 = vrot.slane %v440_v22, 4 }
 0x406   :  { %v573_v8 = vmul.f32 %v7160_v11, %v8361_v23  ;;  %v282_v30 = vmul.f32 %v7054_v42, %v8360_v38  ;;  %v478_v14 = vrot.slane %v441_v3, 4  ;;  %v574_v29 = vmul.f32 %v7054_v42, %v8361_v23  ;;  %v8366_v38 = vld [vmem:[#allocation33_spill] sm:$0xff] }
 0x407   :  { %v480_v5 = vrot.slane %v442_v48, 4  ;;  %v575_v60 = vmul.f32 %v7075_v57, %v8361_v23  ;;  %v589_v63 = vrot.slane %v8362_v1, 6  ;;  %v468_v52 = vadd.f32 %v457_v0, %v335_v21  ;;  %v8371_v1 = vld [vmem:[#allocation17_spill] sm:$0xff] }
 0x408   :  { %v358_v55 = vadd.f32 %v346_v51, %v281_v59  ;;  %v359_v11 = vadd.f32 %v348_v9, %v282_v30  ;;  %v460_v2 = vsel %vm452_vm5, %v458_v10, %v459_v54  ;;  %v591_v15 = vrot.slane %v569_v20, 6  ;;  %v7500_v27 = vpop.permute.xlu1 %3518  ;;  %v7502_v21 = vpop.permute.xlu0 %3544  ;;  %v8363_v20 = vld [vmem:[#allocation13_spill] sm:$0xff] }
 0x409   :  { %v592_v56 = vrot.slane %v570_v36, 6  ;;  %v462_v61 = vsel %vm452_vm5, %v459_v54, %v461_v47  ;;  %v469_v42 = vadd.f32 %v460_v2, %v336_v49  ;;  %v594_v33 = vrot.slane %v571_v31, 6  ;;  %v8364_v54 = vld [vmem:[#allocation307_spill] sm:$0xff] }
 0x40a   :  { %v470_v24 = vadd.f32 %v462_v61, %v337_v39  ;;  %v610_v41 = vrot.slane %v573_v8, 6  ;;  %v479_v57 = vsel %vm452_vm5, %v477_v45, %v478_v14  ;;  %v611_v46 = vrot.slane %v574_v29, 6  ;;  %v8367_v45 = vld [vmem:[#allocation14_spill] sm:$0xff]  ;;  %v8368_v8 = vld [vmem:[#allocation15_spill] sm:$0xff]  ;;  %v8375_v61 = vld [vmem:[#allocation36_spill] sm:$0xff] }
 0x40b   :  { %v613_v19 = vrot.slane %v575_v60, 6  ;;  %v481_v22 = vsel %vm452_vm5, %v478_v14, %v480_v5  ;;  %v491_v0 = vadd.f32 %v479_v57, %v358_v55  ;;  %v654_v36 = vadd.f32 %v8363_v20, %v7431_v37  ;;  %v8369_v14 = vld [vmem:[#allocation16_spill] sm:$0xff]  ;;  %v8370_v5 = vld [vmem:[#allocation47_spill] sm:$0xff] }
 0x40c   :  { %v492_v10 = vadd.f32 %v481_v22, %v359_v11  ;;  %v8365_v53 = vrot.slane %v8364_v54, 6  ;;  %v593_v48 = vsel %vm585_vm6, %v591_v15, %v592_v56  ;;  %v595_v49 = vsel %vm585_vm6, %v592_v56, %v594_v33  ;;  %v7514_v51 = vpop.permute.xlu1 %3546  ;;  %v7516_v37 = vpop.permute.xlu0 %3548  ;;  %v8373_v11 = vld [vmem:[#allocation34_spill] sm:$0xff]  ;;  %v8374_v15 = vld [vmem:[#allocation35_spill] sm:$0xff] }
 0x40d   :  { %v602_v58 = vadd.f32 %v593_v48, %v469_v42  ;;  %v603_v26 = vadd.f32 %v595_v49, %v470_v24  ;;  %v612_v31 = vsel %vm585_vm6, %v610_v41, %v611_v46  ;;  %v614_v47 = vsel %vm585_vm6, %v611_v46, %v613_v19  ;;  %v8376_v24 = vld [vmem:[#allocation62_spill] sm:$0xff]  ;;  %v8377_v46 = vld [vmem:[#allocation37_spill] sm:$0xff] }
 0x40e   :  { %v590_v3 = vsel %vm585_vm6, %v8365_v53, %v589_v63  ;;  %v794_v59 = vadd.f32 %v8366_v38, %v654_v36  ;;  %v624_v9 = vadd.f32 %v612_v31, %v491_v0  ;;  %v625_v39 = vadd.f32 %v614_v47, %v492_v10  ;;  %v8378_v22 = vld [vmem:[#allocation38_spill] sm:$0xff]  ;;  %v8379_v10 = vld [vmem:[#allocation48_spill] sm:$0xff]  ;;  %v8380_v36 = vld [vmem:[#allocation49_spill] sm:$0xff] }
 0x40f   :  { %v601_v16 = vadd.f32 %v590_v3, %v468_v52  ;;  %v656_v30 = vadd.f32 %v8368_v8, %v602_v58  ;;  %v657_v29 = vadd.f32 %v8369_v14, %v603_v26  ;;  %v8372_v52 = vld [vmem:[#allocation18_spill] sm:$0xff]  ;;  %v8382_v48 = vld [vmem:[#allocation69_spill] sm:$0xff]  ;;  %v8383_v58 = vld [vmem:[#allocation51_spill] sm:$0xff] }
 0x410   :  { %v966_v60 = vadd.f32 %v8370_v5, %v794_v59  ;;  %v674_v63 = vadd.f32 %v8371_v1, %v624_v9  ;;  %v675_v55 = vadd.f32 %v8372_v52, %v625_v39  ;;  %v7528_v41 = vpop.permute.xlu1 %3550  ;;  %v3763_v57 = vpop.permute.xlu0 %3762  ;;  %v8381_v53 = vld [vmem:[#allocation50_spill] sm:$0xff]  ;;  %v8384_v26 = vld [vmem:[#allocation52_spill] sm:$0xff]  ;;  %v8385_v38 = vld [vmem:[#allocation63_spill] sm:$0xff] }
 0x411   :  { %v655_v23 = vadd.f32 %v8367_v45, %v601_v16  ;;  %v796_v56 = vadd.f32 %v8374_v15, %v656_v30  ;;  %v797_v42 = vadd.f32 %v8375_v61, %v657_v29  ;;  %v3780_v47 = vadd.f32 %v3763_v57, %v7348_v25  ;;  %v8386_v9 = vld [vmem:[#allocation64_spill] sm:$0xff]  ;;  %v8387_v45 = vld [vmem:[#allocation65_spill] sm:$0xff]  ;;  %v8389_v5 = vld [vmem:[#allocation66_spill] sm:$0xff] }
 0x412   :  { %v1138_v33 = vadd.f32 %v8376_v24, %v966_v60  ;;  %v826_v19 = vadd.f32 %v8377_v46, %v674_v63  ;;  %v827_v0 = vadd.f32 %v8378_v22, %v675_v55  ;;  %v8388_v8 = vld [vmem:[#allocation89_spill] sm:$0xff]  ;;  %v8390_v1 = vld [vmem:[#allocation67_spill] sm:$0xff] }
 0x413   :  { %v795_v2 = vadd.f32 %v8373_v11, %v655_v23  ;;  %v968_v54 = vadd.f32 %v8380_v36, %v796_v56  ;;  %v969_v3 = vadd.f32 %v8381_v53, %v797_v42  ;;  %v8391_v11 = vld [vmem:[#allocation70_spill] sm:$0xff]  ;;  %v8393_v56 = vld [vmem:[#allocation109_spill] sm:$0xff]  ;;  %v8394_v42 = vld [vmem:[#allocation72_spill] sm:$0xff] }
 0x414   :  { %v1200_v16 = vadd.f32 %v8382_v48, %v1138_v33  ;;  %v998_v49 = vadd.f32 %v8383_v58, %v826_v19  ;;  %v999_v31 = vadd.f32 %v8384_v26, %v827_v0  ;;  %v3765_v14 = vpop.permute.xlu1 %3764  ;;  %v3767_v29 = vpop.permute.xlu0 %3766  ;;  %v3911_v33 = vrot.slane %v3780_v47, 1  ;;  %v8395_v19 = vld [vmem:[#allocation73_spill] sm:$0xff]  ;;  %v8396_v0 = vld [vmem:[#allocation90_spill] sm:$0xff] }
 0x415   :  { %v967_v20 = vadd.f32 %v8379_v10, %v795_v2  ;;  %v1140_v39 = vadd.f32 %v8386_v9, %v968_v54  ;;  %v1141_v23 = vadd.f32 %v8387_v45, %v969_v3  ;;  %v3781_v52 = vadd.f32 %v3765_v14, %v7364_v62  ;;  %v8392_v2 = vld [vmem:[#allocation71_spill] sm:$0xff]  ;;  %v8398_v36 = vld [vmem:[#allocation129_spill] sm:$0xff]  ;;  %v8403_v45 = vld [vmem:[#allocation92_spill] sm:$0xff] }
 0x416   :  { %v1340_v30 = vadd.f32 %v8388_v8, %v1200_v16  ;;  %v1170_v60 = vadd.f32 %v8389_v5, %v998_v49  ;;  %v1171_v63 = vadd.f32 %v8390_v1, %v999_v31  ;;  %v3782_v55 = vadd.f32 %v3767_v29, %v7366_v35  ;;  %v8399_v49 = vld [vmem:[#allocation74_spill] sm:$0xff]  ;;  %v8402_v9 = vld [vmem:[#allocation137_spill] sm:$0xff]  ;;  %v8407_v1 = vld [vmem:[#allocation131_spill] sm:$0xff] }
 0x417   :  { %v1139_v59 = vadd.f32 %v8385_v38, %v967_v20  ;;  %v1202_v15 = vadd.f32 %v8392_v2, %v1140_v39  ;;  %v1203_v24 = vadd.f32 %v8394_v42, %v1141_v23  ;;  %v3912_v57 = vrot.slane %v3781_v52, 1  ;;  %v8397_v20 = vld [vmem:[#allocation91_spill] sm:$0xff]  ;;  %v8400_v31 = vld [vmem:[#allocation110_spill] sm:$0xff]  ;;  %v8404_v8 = vld [vmem:[#allocation93_spill] sm:$0xff] }
 0x418   :  { %v1512_v61 = vadd.f32 %v8393_v56, %v1340_v30  ;;  %v3914_v46 = vrot.slane %v3782_v55, 1  ;;  %v1220_v22 = vadd.f32 %v8395_v19, %v1170_v60  ;;  %v3769_v54 = vpop.permute.xlu1 %3768  ;;  %v3771_v53 = vpop.permute.xlu0 %3770  ;;  %v1221_v26 = vadd.f32 %v8399_v49, %v1171_v63  ;;  %v8401_v38 = vld [vmem:[#allocation111_spill] sm:$0xff]  ;;  %v8405_v14 = vld [vmem:[#allocation94_spill] sm:$0xff]  ;;  %v8408_v55 = vld [vmem:[#allocation157_spill] sm:$0xff] }
 0x419   :  { %v1201_v25 = vadd.f32 %v8391_v11, %v1139_v59  ;;  %v1342_v62 = vadd.f32 %v8397_v20, %v1202_v15  ;;  %v3783_v3 = vadd.f32 %v3769_v54, %v7382_v50  ;;  %v3784_v48 = vadd.f32 %v3771_v53, %v7384_v43  ;;  %v8406_v5 = vld [vmem:[#allocation130_spill] sm:$0xff]  ;;  %v8409_v2 = vld [vmem:[#allocation112_spill] sm:$0xff]  ;;  %v8410_v56 = vld [vmem:[#allocation113_spill] sm:$0xff] }
 0x41a   :  { %v1684_v35 = vadd.f32 %v8398_v36, %v1512_v61  ;;  %v7558_v16 = vsel %vm3910_vm7, %v3911_v33, %v3912_v57  ;;  %v7561_v58 = vsel %vm3910_vm7, %v3912_v57, %v3914_v46  ;;  %v1343_v23 = vadd.f32 %v8403_v45, %v1203_v24  ;;  %v8411_v33 = vld [vmem:[#allocation114_spill] sm:$0xff]  ;;  %v8421_v45 = vld [vmem:[#allocation140_spill] sm:$0xff] }
 0x41b   :  { %v1341_v10 = vadd.f32 %v8396_v0, %v1201_v25  ;;  %v1514_v59 = vadd.f32 %v8401_v38, %v1342_v62  ;;  %v1372_v50 = vadd.f32 %v8404_v8, %v1220_v22  ;;  %v3916_v30 = vrot.slane %v3783_v3, 1  ;;  %v8412_v46 = vld [vmem:[#allocation138_spill] sm:$0xff]  ;;  %v8413_v22 = vld [vmem:[#allocation139_spill] sm:$0xff]  ;;  %v8415_v62 = vld [vmem:[#allocation132_spill] sm:$0xff] }
 0x41c   :  { %v1746_v39 = vadd.f32 %v8402_v9, %v1684_v35  ;;  %v3917_v43 = vrot.slane %v3784_v48, 1  ;;  %v1373_v29 = vadd.f32 %v8405_v14, %v1221_v26  ;;  %v3773_v11 = vpop.permute.xlu1 %3772  ;;  %v3803_v25 = vpop.permute.xlu0 %3802  ;;  %v1515_v15 = vadd.f32 %v8409_v2, %v1343_v23  ;;  %v8416_v35 = vld [vmem:[#allocation133_spill] sm:$0xff]  ;;  %v8417_v48 = vld [vmem:[#allocation134_spill] sm:$0xff] }
 0x41d   :  { %v1513_v47 = vadd.f32 %v8400_v31, %v1341_v10  ;;  %v1686_v52 = vadd.f32 %v8407_v1, %v1514_v59  ;;  %v1544_v61 = vadd.f32 %v8410_v56, %v1372_v50  ;;  %v3785_v42 = vadd.f32 %v3773_v11, %v7401_v6  ;;  %v8414_v10 = vld [vmem:[#allocation177_spill] sm:$0xff]  ;;  %v8418_v49 = vld [vmem:[#allocation158_spill] sm:$0xff]  ;;  %v8419_v31 = vld [vmem:[#allocation159_spill] sm:$0xff] }
 0x41e   :  { %v1886_v63 = vadd.f32 %v8408_v55, %v1746_v39  ;;  %v7577_v24 = vsel %vm3910_vm7, %v3916_v30, %v3917_v43  ;;  %v1545_v57 = vadd.f32 %v8411_v33, %v1373_v29  ;;  %v1687_v36 = vadd.f32 %v8415_v62, %v1515_v15  ;;  %v8420_v38 = vld [vmem:[#allocation197_spill] sm:$0xff]  ;;  %v8423_v29 = vld [vmem:[#allocation178_spill] sm:$0xff] }
 0x41f   :  { %v1685_v60 = vadd.f32 %v8406_v5, %v1513_v47  ;;  %v1748_v0 = vadd.f32 %v8413_v22, %v1686_v52  ;;  %v1716_v54 = vadd.f32 %v8416_v35, %v1544_v61  ;;  %v3919_v53 = vrot.slane %v3785_v42, 1  ;;  %v8425_v52 = vld [vmem:[#allocation205_spill] sm:$0xff]  ;;  %v8428_v61 = vld [vmem:[#allocation198_spill] sm:$0xff]  ;;  %v8429_v42 = vld [vmem:[#allocation199_spill] sm:$0xff] }
 0x420   :  { %v2058_v20 = vadd.f32 %v8414_v10, %v1886_v63  ;;  %v3820_v3 = vadd.f32 %v3803_v25, %v7403_v34  ;;  %v1717_v6 = vadd.f32 %v8417_v48, %v1545_v57  ;;  %v3805_v9 = vpop.permute.xlu1 %3804  ;;  %v3807_v39 = vpop.permute.xlu0 %3806  ;;  %v1749_v23 = vadd.f32 %v8421_v45, %v1687_v36  ;;  %v8422_v34 = vld [vmem:[#allocation141_spill] sm:$0xff]  ;;  %v8426_v63 = vld [vmem:[#allocation160_spill] sm:$0xff]  ;;  %v8431_v62 = vld [vmem:[#allocation142_spill] sm:$0xff] }
 0x421   :  { %v1747_v19 = vadd.f32 %v8412_v46, %v1685_v60  ;;  %v1888_v47 = vadd.f32 %v8419_v31, %v1748_v0  ;;  %v3821_v8 = vadd.f32 %v3805_v9, %v7425_v4  ;;  %v3822_v50 = vadd.f32 %v3807_v39, %v7427_v18  ;;  %v8424_v60 = vld [vmem:[#allocation179_spill] sm:$0xff]  ;;  %v8427_v56 = vld [vmem:[#allocation161_spill] sm:$0xff]  ;;  %v8432_v35 = vld [vmem:[#allocation180_spill] sm:$0xff] }
 0x422   :  { %v2230_v59 = vadd.f32 %v8420_v38, %v2058_v20  ;;  %v7594_v30 = vsel %vm3910_vm7, %v3917_v43, %v3919_v53  ;;  %v1766_v14 = vadd.f32 %v8422_v34, %v1716_v54  ;;  %v1889_v11 = vadd.f32 %v8426_v63, %v1749_v23  ;;  %v8430_v33 = vld [vmem:[#allocation225_spill] sm:$0xff]  ;;  %v8434_v48 = vld [vmem:[#allocation206_spill] sm:$0xff]  ;;  %v8438_v39 = vld [vmem:[#allocation200_spill] sm:$0xff] }
 0x423   :  { %v1887_v26 = vadd.f32 %v8418_v49, %v1747_v19  ;;  %v2060_v1 = vadd.f32 %v8424_v60, %v1888_v47  ;;  %v3935_v25 = vrot.slane %v3820_v3, 1  ;;  %v3936_v2 = vrot.slane %v3821_v8, 1  ;;  %v8433_v53 = vld [vmem:[#allocation181_spill] sm:$0xff]  ;;  %v8443_v63 = vld [vmem:[#allocation182_spill] sm:$0xff] }
 0x424   :  { %v2292_v55 = vadd.f32 %v8425_v52, %v2230_v59  ;;  %v3938_v15 = vrot.slane %v3822_v50, 1  ;;  %v1918_v4 = vadd.f32 %v8427_v56, %v1766_v14  ;;  %v3809_v46 = vpop.permute.xlu1 %3808  ;;  %v3811_v19 = vpop.permute.xlu0 %3810  ;;  %v1767_v36 = vadd.f32 %v8431_v62, %v1717_v6  ;;  %v8436_v47 = vld [vmem:[#allocation245_spill] sm:$0xff]  ;;  %v8437_v59 = vld [vmem:[#allocation162_spill] sm:$0xff] }
 0x425   :  { %v2059_v5 = vadd.f32 %v8423_v29, %v1887_v26  ;;  %v2232_v43 = vadd.f32 %v8429_v42, %v2060_v1  ;;  %v3823_v22 = vadd.f32 %v3809_v46, %v7452_v32  ;;  %v3824_v0 = vadd.f32 %v3811_v19, %v7454_v28  ;;  %v8435_v26 = vld [vmem:[#allocation207_spill] sm:$0xff]  ;;  %v8439_v23 = vld [vmem:[#allocation201_spill] sm:$0xff]  ;;  %v8440_v50 = vld [vmem:[#allocation226_spill] sm:$0xff] }
 0x426   :  { %v2432_v57 = vadd.f32 %v8430_v33, %v2292_v55  ;;  %v7608_v10 = vsel %vm3910_vm7, %v3935_v25, %v3936_v2  ;;  %v7611_v20 = vsel %vm3910_vm7, %v3936_v2, %v3938_v15  ;;  %v2061_v54 = vadd.f32 %v8432_v35, %v1889_v11  ;;  %v8441_v29 = vld [vmem:[#allocation227_spill] sm:$0xff]  ;;  %v8442_v60 = vld [vmem:[#allocation265_spill] sm:$0xff]  ;;  %v8444_v25 = vld [vmem:[#allocation208_spill] sm:$0xff] }
 0x427   :  { %v2231_v18 = vadd.f32 %v8428_v61, %v2059_v5  ;;  %v2090_v3 = vadd.f32 %v8433_v53, %v1918_v4  ;;  %v2294_v31 = vadd.f32 %v8435_v26, %v2232_v43  ;;  %v3940_v38 = vrot.slane %v3823_v22, 1  ;;  %v8445_v15 = vld [vmem:[#allocation209_spill] sm:$0xff]  ;;  %v8446_v4 = vld [vmem:[#allocation246_spill] sm:$0xff]  ;;  %v8450_v22 = vld [vmem:[#allocation228_spill] sm:$0xff] }
 0x428   :  { %v2604_v32 = vadd.f32 %v8436_v47, %v2432_v57  ;;  %v3941_v28 = vrot.slane %v3824_v0, 1  ;;  %v1919_v9 = vadd.f32 %v8437_v59, %v1767_v36  ;;  %v2233_v45 = vadd.f32 %v8438_v39, %v2061_v54  ;;  %v3813_v34 = vpop.permute.xlu1 %3812  ;;  %v3685_v14 = vpop.permute.xlu0 %3684  ;;  %v8448_v43 = vld [vmem:[#allocation273_spill] sm:$0xff]  ;;  %v8449_v46 = vld [vmem:[#allocation202_spill] sm:$0xff] }
 0x429   :  { %v2293_v49 = vadd.f32 %v8434_v48, %v2231_v18  ;;  %v2262_v8 = vadd.f32 %v8439_v23, %v2090_v3  ;;  %v2434_v5 = vadd.f32 %v8441_v29, %v2294_v31  ;;  %v3825_v52 = vadd.f32 %v3813_v34, %v7477_v7  ;;  %v8447_v18 = vld [vmem:[#allocation247_spill] sm:$0xff]  ;;  %v8451_v0 = vld [vmem:[#allocation229_spill] sm:$0xff]  ;;  %v8452_v54 = vld [vmem:[#allocation266_spill] sm:$0xff] }
 0x42a   :  { %v2776_v1 = vadd.f32 %v8442_v60, %v2604_v32  ;;  %v7627_v55 = vsel %vm3910_vm7, %v3940_v38, %v3941_v28  ;;  %v2091_v11 = vadd.f32 %v8443_v63, %v1919_v9  ;;  %v2295_v2 = vadd.f32 %v8444_v25, %v2233_v45  ;;  %v8453_v3 = vld [vmem:[#allocation267_spill] sm:$0xff]  ;;  %v8455_v47 = vld [vmem:[#allocation210_spill] sm:$0xff]  ;;  %v8456_v38 = vld [vmem:[#allocation248_spill] sm:$0xff] }
 0x42b   :  { %v2433_v6 = vadd.f32 %v8440_v50, %v2293_v49  ;;  %v2312_v56 = vadd.f32 %v8445_v15, %v2262_v8  ;;  %v2606_v42 = vadd.f32 %v8447_v18, %v2434_v5  ;;  %v3943_v57 = vrot.slane %v3825_v52, 1  ;;  %v8454_v49 = vld [vmem:[#allocation296_spill] sm:$0xff]  ;;  %v8457_v9 = vld [vmem:[#allocation249_spill] sm:$0xff]  ;;  %v8458_v45 = vld [vmem:[#allocation275_spill] sm:$0xff] }
 0x42c   :  { %v2838_v33 = vadd.f32 %v8448_v43, %v2776_v1  ;;  %v2263_v19 = vadd.f32 %v8449_v46, %v2091_v11  ;;  %v2435_v7 = vadd.f32 %v8450_v22, %v2295_v2  ;;  %v3687_v36 = vpop.permute.xlu1 %3686  ;;  %v3689_v35 = vpop.permute.xlu0 %3688  ;;  %v8459_v8 = vld [vmem:[#allocation276_spill] sm:$0xff]  ;;  %v8461_v29 = vld [vmem:[#allocation230_spill] sm:$0xff]  ;;  %v8464_v25 = vld [vmem:[#allocation301_spill] sm:$0xff] }
 0x42d   :  { %v2605_v61 = vadd.f32 %v8446_v4, %v2433_v6  ;;  %v2464_v62 = vadd.f32 %v8451_v0, %v2312_v56  ;;  %v2778_v48 = vadd.f32 %v8453_v3, %v2606_v42  ;;  %v7642_v31 = vsel %vm3910_vm7, %v3941_v28, %v3943_v57  ;;  %v8460_v6 = vld [vmem:[#allocation332_spill] sm:$0xff]  ;;  %v8463_v28 = vld [vmem:[#allocation269_spill] sm:$0xff]  ;;  %v8465_v15 = vld [vmem:[#allocation302_spill] sm:$0xff] }
 0x42e   :  { %v2978_v26 = vadd.f32 %v8454_v49, %v2838_v33  ;;  %v2313_v32 = vadd.f32 %v8455_v47, %v2263_v19  ;;  %v2607_v59 = vadd.f32 %v8456_v38, %v2435_v7  ;;  %v8462_v60 = vld [vmem:[#allocation268_spill] sm:$0xff]  ;;  %v8467_v42 = vld [vmem:[#allocation277_spill] sm:$0xff]  ;;  %v8468_v33 = vld [vmem:[#allocation278_spill] sm:$0xff] }
 0x42f   :  { %v2777_v53 = vadd.f32 %v8452_v54, %v2605_v61  ;;  %v2636_v39 = vadd.f32 %v8457_v9, %v2464_v62  ;;  %v2840_v50 = vadd.f32 %v8459_v8, %v2778_v48  ;;  %v8466_v61 = vld [vmem:[#allocation250_spill] sm:$0xff]  ;;  %v8469_v46 = vld [vmem:[#allocation333_spill] sm:$0xff]  ;;  %v8474_v47 = vld [vmem:[#allocation19_spill] sm:$0xff] }
 0x430   :  { %v3150_v34 = vadd.f32 %v8460_v6, %v2978_v26  ;;  %v2465_v5 = vadd.f32 %v8461_v29, %v2313_v32  ;;  %v2779_v1 = vadd.f32 %v8462_v60, %v2607_v59  ;;  %v3691_v52 = vpop.permute.xlu1 %3690  ;;  %v3717_v63 = vpop.permute.xlu0 %3716  ;;  %v8470_v22 = vld [vmem:[#allocation334_spill] sm:$0xff]  ;;  %v8473_v26 = vld [vmem:[#allocation309_spill] sm:$0xff]  ;;  %v8475_v38 = vld [vmem:[#allocation20_spill] sm:$0xff] }
 0x431   :  { %v2839_v23 = vadd.f32 %v8458_v45, %v2777_v53  ;;  %v2808_v11 = vadd.f32 %v8463_v28, %v2636_v39  ;;  %v2980_v56 = vadd.f32 %v8465_v15, %v2840_v50  ;;  %v8471_v62 = vld [vmem:[#allocation270_spill] sm:$0xff]  ;;  %v8472_v53 = vld [vmem:[#allocation308_spill] sm:$0xff]  ;;  %v8476_v39 = vld [vmem:[#allocation279_spill] sm:$0xff] }
 0x432   :  { %v3322_v4 = vadd.f32 %v7022_v40, %v3150_v34  ;;  %v2637_v18 = vadd.f32 %v8466_v61, %v2465_v5  ;;  %v2841_v43 = vadd.f32 %v8467_v42, %v2779_v1  ;;  %v8478_v50 = vld [vmem:[#allocation336_spill] sm:$0xff]  ;;  %v8479_v6 = vld [vmem:[#allocation75_spill] sm:$0xff]  ;;  %v8484_v42 = vld [vmem:[#allocation337_spill] sm:$0xff] }
 0x433   :  { %v2979_v2 = vadd.f32 %v8464_v25, %v2839_v23  ;;  %v2858_v57 = vadd.f32 %v8468_v33, %v2808_v11  ;;  %v3152_v7 = vadd.f32 %v8470_v22, %v2980_v56  ;;  %v8477_v23 = vld [vmem:[#allocation335_spill] sm:$0xff]  ;;  %v8480_v29 = vld [vmem:[#allocation68_spill] sm:$0xff]  ;;  %v8482_v11 = vld [vmem:[#allocation21_spill] sm:$0xff] }
 0x434   :  { %v3384_v0 = vadd.f32 %v7133_v13, %v3322_v4  ;;  %v2809_v54 = vadd.f32 %v8471_v62, %v2637_v18  ;;  %v2981_v3 = vadd.f32 %v8472_v53, %v2841_v43  ;;  %v3719_v48 = vpop.permute.xlu1 %3718  ;;  %v3721_v49 = vpop.permute.xlu0 %3720  ;;  %v8481_v1 = vld [vmem:[#allocation312_spill] sm:$0xff]  ;;  %v8483_v56 = vld [vmem:[#allocation22_spill] sm:$0xff]  ;;  %v8485_v33 = vld [vmem:[#allocation95_spill] sm:$0xff] }
 0x435   :  { %v3151_v19 = vadd.f32 %v8469_v46, %v2979_v2  ;;  %v3010_v40 = vadd.f32 %v8473_v26, %v2858_v57  ;;  %v3324_v59 = vadd.f32 %v8475_v38, %v3152_v7  ;;  %v8486_v46 = vld [vmem:[#allocation23_spill] sm:$0xff] }
 0x436   :  { %v3524_v9 = vadd.f32 %v7470_v17, %v3384_v0  ;;  %v2859_v45 = vadd.f32 %v8476_v39, %v2809_v54  ;;  %v3153_v8 = vadd.f32 %v8477_v23, %v2981_v3  ;;  %v8487_v0 = vld [vmem:[#allocation53_spill] sm:$0xff] }
 0x437   :  { %v3323_v32 = vadd.f32 %v8474_v47, %v3151_v19  ;;  %v3182_v13 = vadd.f32 %v8478_v50, %v3010_v40  ;;  %v3386_v5 = vadd.f32 %v8480_v29, %v3324_v59  ;;  %v8488_v40 = vld [vmem:[#allocation24_spill] sm:$0xff]  ;;  %v8489_v39 = vld [vmem:[#allocation25_spill] sm:$0xff] }
 0x438   :  { %v3696_v60 = vadd.f32 %v3685_v14, %v3524_v9  ;;  %v3011_v28 = vadd.f32 %v8481_v1, %v2859_v45  ;;  %v3325_v25 = vadd.f32 %v8482_v11, %v3153_v8  ;;  %v3723_v2 = vpop.permute.xlu1 %3722  ;;  %v3857_v15 = vpop.permute.xlu0 %3856  ;;  %v3558_v45 = vadd.f32 %v7516_v37, %v8489_v39 }
 0x439   :  { %v3385_v34 = vadd.f32 %v8479_v6, %v3323_v32  ;;  %v3354_v4 = vadd.f32 %v8483_v56, %v3182_v13  ;;  %v3526_v61 = vadd.f32 %v7493_v12, %v3386_v5  ;;  %v3981_v56 = vlaneseq }
 0x43a   :  { %v3868_v18 = vadd.f32 %v3857_v15, %v3696_v60  ;;  %v3183_v43 = vadd.f32 %v8484_v42, %v3011_v28  ;;  %v3387_v57 = vadd.f32 %v8485_v33, %v3325_v25  ;;  %v3730_v8 = vadd.f32 %v3721_v49, %v3558_v45 }
 0x43b   :  { %v3525_v17 = vadd.f32 %v7491_v44, %v3385_v34  ;;  %v3404_v19 = vadd.f32 %v8486_v46, %v3354_v4  ;;  %v3698_v22 = vadd.f32 %v3689_v35, %v3526_v61  ;;  %vm7702_vm8 = vcmp.lt.s32.totalorder %v3981_v56, 16 }
 0x43c   :  { %v3925_v7 = vadd.f32 %v7558_v16, %v3868_v18  ;;  %v3355_v62 = vadd.f32 %v8487_v0, %v3183_v43  ;;  %v3859_v54 = vpop.permute.xlu1 %3858  ;;  %v3861_v53 = vpop.permute.xlu0 %3860  ;;  %v3527_v3 = vadd.f32 %v7500_v27, %v3387_v57  ;;  %v3993_v43 = vshrl.u32 %v3981_v56, 7 }
 0x43d   :  { %v3697_v14 = vadd.f32 %v3687_v36, %v3525_v17  ;;  %v3556_v44 = vadd.f32 %v7502_v21, %v3404_v19  ;;  %v3870_v26 = vadd.f32 %v3861_v53, %v3698_v22  ;;  %vm4039_vm9 = vcmp.ge.s32.totalorder %v3981_v56, 16 }
 0x43e   :  { %v3405_v47 = vadd.f32 %v8488_v40, %v3355_v62  ;;  %v3699_v32 = vadd.f32 %v3691_v52, %v3527_v3  ;;  %vm4040_vm10 = vcmp.lt.s32.totalorder %v3981_v56, 32  ;;  %vm4052_vm12 = vcmp.ge.s32.totalorder %v3981_v56, 32 }
 0x43f   :  { %v3869_v12 = vadd.f32 %v3859_v54, %v3697_v14  ;;  %v3728_v38 = vadd.f32 %v3717_v63, %v3556_v44  ;;  %v3927_v36 = vadd.f32 %v7577_v24, %v3870_v26  ;;  %vm4041_vm11 = vmand %vm4039_vm9, %vm4040_vm10  ;;  %vm4053_vm13 = vcmp.lt.s32.totalorder %v3981_v56, 48 }
 0x440   :  { %v3863_v35 = vpop.permute.xlu1 %3862  ;;  %v3889_v16 = vpop.permute.xlu0 %3888  ;;  %v3557_v9 = vadd.f32 %v7514_v51, %v3405_v47  ;;  %vm4054_vm14 = vmand %vm4052_vm12, %vm4053_vm13  ;;  %vm4065_vm15 = vcmp.ge.s32.totalorder %v3981_v56, 48  ;;  %vm4066_vm0 = vcmp.lt.s32.totalorder %v3981_v56, 64  ;;  %vm4106_vm2 = vcmp.ge.s32.totalorder %v3981_v56, 64 }
 0x441   :  { %v3926_v59 = vadd.f32 %v7561_v58, %v3869_v12  ;;  %v3871_v27 = vadd.f32 %v3863_v35, %v3699_v32  ;;  %v3900_v23 = vadd.f32 %v3889_v16, %v3728_v38  ;;  %v8490_v58 = vld [vmem:[#allocation274_spill] sm:$0xff]  ;;  %vm4067_vm1 = vmand %vm4065_vm15, %vm4066_vm0  ;;  %vm4107_vm3 = vcmp.lt.s32.totalorder %v3981_v56, 80 }
 0x442   :  { %v3729_v21 = vadd.f32 %v3719_v48, %v3557_v9  ;;  %v3559_v24 = vadd.f32 %v7528_v41, %v8490_v58  ;;  %vm4108_vm4 = vmand %vm4106_vm2, %vm4107_vm3  ;;  %vm4133_vm5 = vcmp.ge.s32.totalorder %v3981_v56, 80  ;;  %vm4134_vm6 = vcmp.lt.s32.totalorder %v3981_v56, 96 }
 0x443   :  { %v3928_v50 = vadd.f32 %v7594_v30, %v3871_v27  ;;  %v3949_v52 = vadd.f32 %v7608_v10, %v3900_v23  ;;  %vm4135_vm7 = vmand %vm4133_vm5, %vm4134_vm6  ;;  %vm4147_vm9 = vcmp.lt.s32.totalorder %v3981_v56, 112  ;;  %vm4160_vm12 = vcmp.lt.s32.totalorder %v3981_v56, 128 }
 0x444   :  { %v3891_v63 = vpop.permute.xlu1 %3890  ;;  %v3893_v13 = vpop.permute.xlu0 %3892  ;;  %v3731_v51 = vadd.f32 %v3723_v2, %v3559_v24 }
 0x445   :  { %v3953_v6 = vadd.f32 %v3949_v52, %v3925_v7  ;;  %v3901_v34 = vadd.f32 %v3891_v63, %v3729_v21  ;;  %v3902_v29 = vadd.f32 %v3893_v13, %v3730_v8 }
 0x447   :  { %v4437_v5 = vmul.f32 -1.442695, %v3953_v6  ;;  %v3950_v37 = vadd.f32 %v7611_v20, %v3901_v34  ;;  %v3951_v60 = vadd.f32 %v7627_v55, %v3902_v29  ;;  %v4599_v20 = vmov 1966171168  }
 0x448   :  { %v3895_v48 = vpop.permute.xlu1 %3894  ;;  %v3990_v4 = vunpack.c.l.s4 %v4599_v20 }
 0x449   :  { %4463 = vpow2.f32 %v4437_v5  ;;  %v3954_v49 = vadd.f32 %v3950_v37, %v3926_v59  ;;  %v3955_v30 = vadd.f32 %v3951_v60, %v3927_v36  ;;  %v3903_v1 = vadd.f32 %v3895_v48, %v3731_v51 }
 0x44a   :  { %v3991_v42 = vunpack.c.0.s8 %v3990_v4 }
 0x44b   :  { %v4438_v10 = vmul.f32 -1.442695, %v3954_v49  ;;  %v4439_v28 = vmul.f32 -1.442695, %v3955_v30  ;;  %v3952_v11 = vadd.f32 %v7642_v31, %v3903_v1 }
 0x44c   :  { %v7699_v57 = vsub.s32 %v3991_v42, %v3993_v43 }
 0x44d   :  { %4465 = vpow2.f32 %v4438_v10  ;;  %v3956_v41 = vadd.f32 %v3952_v11, %v3928_v50 }
 0x44e   :  { %4467 = vpow2.f32 %v4439_v28 }
 0x44f   :  { %v4440_v25 = vmul.f32 -1.442695, %v3956_v41 }
 0x451   :  { %4469 = vpow2.f32 %v4440_v25 }
 0x453   :  { %v4464_v2 = vpop.eup %4463 }
 0x454   :  { %v3969_v15 = vadd.f32 1.0, %v4464_v2 }
 0x456   :  { %4471 = vrcp.f32 %v3969_v15 }
 0x457   :  { %v4466_v55 = vpop.eup %4465 }
 0x458   :  { %v4468_v17 = vpop.eup %4467  ;;  %v3970_v61 = vadd.f32 1.0, %v4466_v55 }
 0x459   :  { %v3971_v18 = vadd.f32 1.0, %v4468_v17 }
 0x45a   :  { %4473 = vrcp.f32 %v3970_v61 }
 0x45b   :  { %v4470_v31 = vpop.eup %4469  ;;  %4475 = vrcp.f32 %v3971_v18 }
 0x45c   :  { %v3972_v33 = vadd.f32 1.0, %v4470_v31 }
 0x45e   :  { %4477 = vrcp.f32 %v3972_v33 }
 0x460   :  { %v4472_v19 = vpop.eup %4471 }
 0x461   :  { %v3995_v14 = vrot.slane %v4472_v19, %v7699_v57  ;;  %3985 = vst.msk [vmem:[#allocation9] sm:$0x1] %vm7702_vm8, %v4472_v19  ;;  %v4070_v23 = vcombine.high %v4472_v19, %v4472_v19 }
 0x463   :  { %v3996_v22 = vcombine.high %v3995_v14, %v3995_v14  ;;  %v4003_v40 = vrot.slane %v3995_v14, %v7699_v57  ;;  %v4077_v50 = vrot.slane %v4070_v23, %v7699_v57 }
 0x464   :  { %v4474_v7 = vpop.eup %4473 }
 0x465   :  { %v4476_v0 = vpop.eup %4475  ;;  %v4010_v62 = vrot.slane %v3996_v22, %v7699_v57  ;;  %v4174_v54 = vrot.slane %v4474_v7, %v7699_v57  ;;  %4164 = vst.msk [vmem:[#allocation9 + $0x1] sm:$0x1] %vm7702_vm8, %v4474_v7  ;;  %v4044_v59 = vcombine.high %v4003_v40, %v4003_v40  ;;  %v4240_v52 = vcombine.high %v4474_v7, %v4474_v7 }
 0x466   :  { %v4017_v53 = vrot.slane %v4476_v0, %v7699_v57  ;;  %3986 = vst.msk [vmem:[#allocation9 + $0x2] sm:$0x1] %vm7702_vm8, %v4476_v0  ;;  %v4085_v13 = vcombine.high %v4476_v0, %v4476_v0  ;;  %v4084_v58 = vrot.slane %v4077_v50, %v7699_v57  ;;  %v4111_v5 = vcombine.high %v4077_v50, %v4077_v50 }
 0x467   :  { %4033 = vrot.lane.b32.xlu0 %v4010_v62, %s4600_s18  ;;  %v4175_v3 = vcombine.high %v4174_v54, %v4174_v54  ;;  %v4182_v35 = vrot.slane %v4174_v54, %v7699_v57  ;;  %v4057_v27 = vcombine.high %v4010_v62, %v4010_v62  ;;  %v4247_v24 = vrot.slane %v4240_v52, %v7699_v57 }
 0x468   :  { %v4478_v44 = vpop.eup %4477  ;;  %v4018_v12 = vcombine.high %v4017_v53, %v4017_v53  ;;  %v4025_v16 = vrot.slane %v4017_v53, %v7699_v57  ;;  %v4092_v34 = vrot.slane %v4085_v13, %v7699_v57  ;;  %v4118_v48 = vrot.slane %v4111_v5, %v7699_v57 }
 0x469   :  { %v4189_v26 = vrot.slane %v4175_v3, %v7699_v57  ;;  %v4196_v47 = vrot.slane %v4478_v44, %v7699_v57  ;;  %4165 = vst.msk [vmem:[#allocation9 + $0x3] sm:$0x1] %vm7702_vm8, %v4478_v44  ;;  %v4220_v9 = vcombine.high %v4182_v35, %v4182_v35  ;;  %v4255_v29 = vcombine.high %v4478_v44, %v4478_v44 }
 0x46a   :  { %v4032_v32 = vrot.slane %v4018_v12, %v7699_v57  ;;  %v4045_v39 = vcombine.high %v4025_v16, %v4025_v16  ;;  %v4254_v51 = vrot.slane %v4247_v24, %v7699_v57  ;;  %v4099_v37 = vrot.slane %v4092_v34, %v7699_v57 }
 0x46b   :  { %4212 = vrot.lane.b32.xlu0 %v4189_v26, %s4600_s18  ;;  %v4197_v38 = vcombine.high %v4196_v47, %v4196_v47  ;;  %v4204_v45 = vrot.slane %v4196_v47, %v7699_v57  ;;  %v4230_v8 = vcombine.high %v4189_v26, %v4189_v26  ;;  %v4262_v60 = vrot.slane %v4255_v29, %v7699_v57 }
 0x46c   :  { %4035 = vrot.lane.b32.xlu1 %v4032_v32, %s4600_s18  ;;  %v4058_v63 = vcombine.high %v4032_v32, %v4032_v32  ;;  %v4278_v49 = vcombine.high %v4247_v24, %v4247_v24  ;;  %v4119_v1 = vcombine.high %v4092_v34, %v4092_v34  ;;  %v4138_v41 = vcombine.high %v4084_v58, %v4084_v58 }
 0x46d   :  { %v4211_v36 = vrot.slane %v4197_v38, %v7699_v57  ;;  %v4221_v21 = vcombine.high %v4204_v45, %v4204_v45  ;;  %v4269_v30 = vrot.slane %v4262_v60, %v7699_v57  ;;  %v4286_v11 = vcombine.high %v4262_v60, %v4262_v60 }
 0x46e   :  { %v4285_v10 = vrot.slane %v4278_v49, %v7699_v57  ;;  %v4126_v28 = vrot.slane %v4119_v1, %v7699_v57  ;;  %v4302_v2 = vcombine.high %v4254_v51, %v4254_v51  ;;  %v4139_v15 = vcombine.high %v4099_v37, %v4099_v37 }
 0x46f   :  { %4046 = vrot.lane.b32.xlu0 %v4044_v59, %s4601_s19  ;;  %v4231_v6 = vcombine.high %v4211_v36, %v4211_v36  ;;  %v4293_v25 = vrot.slane %v4286_v11, %v7699_v57  ;;  %v4151_v20 = vcombine.high %v4118_v48, %v4118_v48  ;;  %v4303_v4 = vcombine.high %v4269_v30, %v4269_v30 }
 0x470   :  { %4214 = vrot.lane.b32.xlu1 %v4211_v36, %s4600_s18  ;;  %v4312_v55 = vcombine.high %v4285_v10, %v4285_v10  ;;  %v4152_v17 = vcombine.high %v4126_v28, %v4126_v28  ;;  %vm4146_vm8 = vcmp.ge.s32.totalorder %v3981_v56, 96 }
 0x471   :  { %v4313_v61 = vcombine.high %v4293_v25, %v4293_v25  ;;  %vm4148_vm10 = vmand %vm4146_vm8, %vm4147_vm9 }
 0x473   :  { %4222 = vrot.lane.b32.xlu0 %v4220_v9, %s4601_s19 }
 0x474   :  { %4048 = vrot.lane.b32.xlu1 %v4045_v39, %s4601_s19 }
 0x477   :  { %4059 = vrot.lane.b32.xlu0 %v4057_v27, %s4602_s20 }
 0x478   :  { %4224 = vrot.lane.b32.xlu1 %v4221_v21, %s4601_s19 }
 0x47b   :  { %4232 = vrot.lane.b32.xlu0 %v4230_v8, %s4602_s20 }
 0x47c   :  { %4061 = vrot.lane.b32.xlu1 %v4058_v63, %s4602_s20 }
 0x47f   :  { %4100 = vrot.lane.b32.xlu0 %v4084_v58, %s4603_s21 }
 0x480   :  { %4234 = vrot.lane.b32.xlu1 %v4231_v6, %s4602_s20 }
 0x483   :  { %4270 = vrot.lane.b32.xlu0 %v4254_v51, %s4603_s21 }
 0x484   :  { %4102 = vrot.lane.b32.xlu1 %v4099_v37, %s4603_s21 }
 0x487   :  { %4127 = vrot.lane.b32.xlu0 %v4118_v48, %s4604_s22 }
 0x488   :  { %4272 = vrot.lane.b32.xlu1 %v4269_v30, %s4603_s21 }
 0x48b   :  { %4294 = vrot.lane.b32.xlu0 %v4285_v10, %s4604_s22 }
 0x48c   :  { %4129 = vrot.lane.b32.xlu1 %v4126_v28, %s4604_s22 }
 0x48f   :  { %4140 = vrot.lane.b32.xlu0 %v4138_v41, %s4605_s23 }
 0x490   :  { %4296 = vrot.lane.b32.xlu1 %v4293_v25, %s4604_s22 }
 0x493   :  { %4304 = vrot.lane.b32.xlu0 %v4302_v2, %s4605_s23 }
 0x494   :  { %4142 = vrot.lane.b32.xlu1 %v4139_v15, %s4605_s23 }
 0x497   :  { %4153 = vrot.lane.b32.xlu0 %v4151_v20, %s4606_s24 }
 0x498   :  { %4306 = vrot.lane.b32.xlu1 %v4303_v4, %s4605_s23 }
 0x49b   :  { %4314 = vrot.lane.b32.xlu0 %v4312_v55, %s4606_s24 }
 0x49c   :  { %4155 = vrot.lane.b32.xlu1 %v4152_v17, %s4606_s24 }
 0x4a0   :  { %4316 = vrot.lane.b32.xlu1 %v4313_v61, %s4606_s24 }
 0x4d9   :  { %v4034_v18 = vpop.permute.xlu0 %4033 }
 0x4da   :  { %4042 = vst.msk [vmem:[#allocation9] sm:$0x1] %vm4041_vm11, %v4034_v18 }
 0x4dd   :  { %v4213_v42 = vpop.permute.xlu0 %4212 }
 0x4de   :  { %v4036_v43 = vpop.permute.xlu1 %4035  ;;  %4218 = vst.msk [vmem:[#allocation9 + $0x1] sm:$0x1] %vm4041_vm11, %v4213_v42 }
 0x4df   :  { %4043 = vst.msk [vmem:[#allocation9 + $0x2] sm:$0x1] %vm4041_vm11, %v4036_v43 }
 0x4e1   :  { %v4047_v31 = vpop.permute.xlu0 %4046 }
 0x4e2   :  { %v4215_v33 = vpop.permute.xlu1 %4214  ;;  %4055 = vst.msk [vmem:[#allocation9] sm:$0x1] %vm4054_vm14, %v4047_v31 }
 0x4e3   :  { %4219 = vst.msk [vmem:[#allocation9 + $0x3] sm:$0x1] %vm4041_vm11, %v4215_v33  ;;  %vm4159_vm11 = vcmp.ge.s32.totalorder %v3981_v56, 112 }
 0x4e4   :  { %vm4161_vm13 = vmand %vm4159_vm11, %vm4160_vm12 }
 0x4e5   :  { %v4223_v57 = vpop.permute.xlu0 %4222 }
 0x4e6   :  { %v4049_v46 = vpop.permute.xlu1 %4048  ;;  %4228 = vst.msk [vmem:[#allocation9 + $0x1] sm:$0x1] %vm4054_vm14, %v4223_v57 }
 0x4e7   :  { %4056 = vst.msk [vmem:[#allocation9 + $0x2] sm:$0x1] %vm4054_vm14, %v4049_v46 }
 0x4e9   :  { %v4060_v19 = vpop.permute.xlu0 %4059 }
 0x4ea   :  { %v4225_v14 = vpop.permute.xlu1 %4224  ;;  %4068 = vst.msk [vmem:[#allocation9] sm:$0x1] %vm4067_vm1, %v4060_v19 }
 0x4eb   :  { %4229 = vst.msk [vmem:[#allocation9 + $0x3] sm:$0x1] %vm4054_vm14, %v4225_v14 }
 0x4ed   :  { %v4233_v22 = vpop.permute.xlu0 %4232 }
 0x4ee   :  { %v4062_v7 = vpop.permute.xlu1 %4061  ;;  %4238 = vst.msk [vmem:[#allocation9 + $0x1] sm:$0x1] %vm4067_vm1, %v4233_v22 }
 0x4ef   :  { %4069 = vst.msk [vmem:[#allocation9 + $0x2] sm:$0x1] %vm4067_vm1, %v4062_v7 }
 0x4f1   :  { %v4101_v0 = vpop.permute.xlu0 %4100 }
 0x4f2   :  { %v4235_v62 = vpop.permute.xlu1 %4234  ;;  %4109 = vst.msk [vmem:[#allocation9] sm:$0x1] %vm4108_vm4, %v4101_v0 }
 0x4f3   :  { %4239 = vst.msk [vmem:[#allocation9 + $0x3] sm:$0x1] %vm4067_vm1, %v4235_v62 }
 0x4f5   :  { %v4271_v54 = vpop.permute.xlu0 %4270 }
 0x4f6   :  { %v4103_v53 = vpop.permute.xlu1 %4102  ;;  %4276 = vst.msk [vmem:[#allocation9 + $0x1] sm:$0x1] %vm4108_vm4, %v4271_v54 }
 0x4f7   :  { %4110 = vst.msk [vmem:[#allocation9 + $0x2] sm:$0x1] %vm4108_vm4, %v4103_v53 }
 0x4f9   :  { %v4128_v3 = vpop.permute.xlu0 %4127 }
 0x4fa   :  { %v4273_v44 = vpop.permute.xlu1 %4272  ;;  %4136 = vst.msk [vmem:[#allocation9] sm:$0x1] %vm4135_vm7, %v4128_v3 }
 0x4fb   :  { %4277 = vst.msk [vmem:[#allocation9 + $0x3] sm:$0x1] %vm4108_vm4, %v4273_v44 }
 0x4fd   :  { %v4295_v12 = vpop.permute.xlu0 %4294 }
 0x4fe   :  { %v4130_v26 = vpop.permute.xlu1 %4129  ;;  %4300 = vst.msk [vmem:[#allocation9 + $0x1] sm:$0x1] %vm4135_vm7, %v4295_v12 }
 0x4ff   :  { %4137 = vst.msk [vmem:[#allocation9 + $0x2] sm:$0x1] %vm4135_vm7, %v4130_v26 }
 0x501   :  { %v4141_v40 = vpop.permute.xlu0 %4140 }
 0x502   :  { %v4297_v47 = vpop.permute.xlu1 %4296  ;;  %4149 = vst.msk [vmem:[#allocation9] sm:$0x1] %vm4148_vm10, %v4141_v40 }
 0x503   :  { %4301 = vst.msk [vmem:[#allocation9 + $0x3] sm:$0x1] %vm4135_vm7, %v4297_v47 }
 0x505   :  { %v4305_v32 = vpop.permute.xlu0 %4304 }
 0x506   :  { %v4143_v38 = vpop.permute.xlu1 %4142  ;;  %4310 = vst.msk [vmem:[#allocation9 + $0x1] sm:$0x1] %vm4148_vm10, %v4305_v32 }
 0x507   :  { %4150 = vst.msk [vmem:[#allocation9 + $0x2] sm:$0x1] %vm4148_vm10, %v4143_v38 }
 0x509   :  { %v4154_v59 = vpop.permute.xlu0 %4153 }
 0x50a   :  { %v4307_v36 = vpop.permute.xlu1 %4306  ;;  %4162 = vst.msk [vmem:[#allocation9] sm:$0x1] %vm4161_vm13, %v4154_v59 }
 0x50b   :  { %4311 = vst.msk [vmem:[#allocation9 + $0x3] sm:$0x1] %vm4148_vm10, %v4307_v36 }
 0x50d   :  { %v4315_v35 = vpop.permute.xlu0 %4314 }
 0x50e   :  { %v4156_v16 = vpop.permute.xlu1 %4155  ;;  %4320 = vst.msk [vmem:[#allocation9 + $0x1] sm:$0x1] %vm4161_vm13, %v4315_v35 }
 0x50f   :  { %4163 = vst.msk [vmem:[#allocation9 + $0x2] sm:$0x1] %vm4161_vm13, %v4156_v16 }
 0x512   :  { %v4317_v9 = vpop.permute.xlu1 %4316 }
 0x513   :  { %4321 = vst.msk [vmem:[#allocation9 + $0x3] sm:$0x1] %vm4161_vm13, %v4317_v9 }
 0x514   :  { %4570 = shalt.err (!%p4567_p1)
}
 0x515   :  { %s4571_s29 = scalar_lea.hbm %s7772_s2, 64 }
 0x516   :  { %p4572_p2 = scmp.ne.s32.totalorder %s7772_s2, %s4571_s29  ;;  %p4575_p3 = scmp.lt.u32.totalorder %s4571_s29, %s7772_s2 }
 0x518   :  { %p4577_p4 = pnand %p4575_p3, %p4572_p2 }
 0x51a   :  { %4580 = shalt.err (!%p4577_p4)
}
 0x51b   :  { %s4608_s5 = smov 2  }
 0x51c   :  { %4333 = dma.vmem_to_hbm [thread:$0]  %s4328_s26, 64, %s7772_s2, [#allocation6], %s4601_s19, %s4601_s19, %s4608_s5  }
 0x51d   :  { %4585 = dma.done.wait [#allocation6], 64  }
 0x51e   :  { %4586 = vsyncadd [#allocation6], 4294967232 }
 0x51f   :  { %4337 = vsyncpa [#allocation5], 1 }
 0x520   :  { %4338 = vsyncpa [#allocation6], 1 }
 0x521   :  { %4339 = vsyncpa [#allocation7], 1 }

</bundles_post_ra>
